<compile_context>
chip_gen: v7x
topology: tpu7x:2x2x1
jax: 0.10.0
libtpu: 0.0.40
codegen_flags: <defaults>
</compile_context>

<pallas_src>
import math
from functools import partial

import jax
import jax.numpy as jnp
from jax import lax
from jax.experimental import pallas as pl
from jax.experimental.pallas import tpu as pltpu

D_EMB = 4
NHEAD = 4
HEAD_DIM = D_EMB // NHEAD          # = 1
NUM_LAYERS = 6
DIM_FF = 2048
PERM_LEN = 7
GEN_PAD = 128                      # lane-dense generator output, sliced to 7 outside
EPS = 1e-5                         # nn.Transformer layer_norm_eps default
SCALE = 1.0 / math.sqrt(HEAD_DIM)  # = 1.0 for head_dim 1

# Fixed operand order shared by the wrapper and the kernel.
_INPUT_NAMES = (
    "src_x", "tgt_x", "src_mask", "tgt_mask",
    # encoder (stacked over layers)
    "e_wqkv", "e_bqkv", "e_wo", "e_bo",
    "e_ln1g", "e_ln1b", "e_w1", "e_b1", "e_w2", "e_b2", "e_ln2g", "e_ln2b",
    # decoder self-attention
    "d_swqkv", "d_sbqkv", "d_swo", "d_sbo",
    # decoder cross-attention
    "d_cwq", "d_cbq", "d_cwkv", "d_cbkv", "d_cwo", "d_cbo",
    # decoder norms + feed-forward
    "d_ln1g", "d_ln1b", "d_ln2g", "d_ln2b", "d_ln3g", "d_ln3b",
    "d_w1", "d_b1", "d_w2", "d_b2",
    # final norms + generator
    "enc_ng", "enc_nb", "dec_ng", "dec_nb", "gen_w", "gen_b",
)


# ----------------------------------------------------------------------------
# In-kernel building blocks (operate on traced values, all 2-D [tokens, feat]).
# ----------------------------------------------------------------------------
def _layernorm(x, g, b):
    mu = jnp.mean(x, axis=-1, keepdims=True)
    var = jnp.mean((x - mu) ** 2, axis=-1, keepdims=True)     # biased, like PyTorch
    return (x - mu) * lax.rsqrt(var + EPS) * g + b


def _ffn(x, w1, b1, w2, b2):
    h = jnp.dot(x, w1, preferred_element_type=jnp.float32) + b1
    h = jnp.maximum(h, 0.0)
    return jnp.dot(h, w2, preferred_element_type=jnp.float32) + b2


def _attention(q, k, v, wo, bo, mask, batch, s_q, s_k):
    """Multi-head attention on flat activations.

    q: (batch*s_q, D); k, v: (batch*s_k, D); mask: (s_q, s_k) additive or None.
    Returns (batch*s_q, D) = concat_heads(softmax(q k^T / sqrt(hd)) v) @ wo + bo.
    """
    outs = []
    for b in range(batch):                       # static loops: batch, heads tiny
        qb = q[b * s_q:(b + 1) * s_q, :]
        kb = k[b * s_k:(b + 1) * s_k, :]
        vb = v[b * s_k:(b + 1) * s_k, :]
        acc = None
        for h in range(NHEAD):
            lo, hi = h * HEAD_DIM, (h + 1) * HEAD_DIM
            qh = qb[:, lo:hi] * SCALE                          # (s_q, hd)
            kh = kb[:, lo:hi]                                  # (s_k, hd)
            vh = vb[:, lo:hi]                                  # (s_k, hd)
            # scores: q @ k^T, keeping s_k on the lane axis
            s = jnp.einsum("qd,kd->qk", qh, kh,
                           preferred_element_type=jnp.float32)  # (s_q, s_k)
            if mask is not None:
                s = s + mask
            s = s - jnp.max(s, axis=-1, keepdims=True)
            e = jnp.exp(s)
            p = e / jnp.sum(e, axis=-1, keepdims=True)
            oh = jnp.dot(p, vh, preferred_element_type=jnp.float32)   # (s_q, hd)
            # concat-over-heads folded into the output projection
            if HEAD_DIM == 1:
                contrib = oh * wo[lo:hi, :]                    # outer product (VPU)
            else:
                contrib = jnp.dot(oh, wo[lo:hi, :],
                                  preferred_element_type=jnp.float32)
            acc = contrib if acc is None else acc + contrib
        outs.append(acc)
    return jnp.concatenate(outs, axis=0) + bo                  # (batch*s_q, D)


# ----------------------------------------------------------------------------
# Fused whole-model kernel
# ----------------------------------------------------------------------------
def _transformer_kernel(*refs, batch, s_src, s_tgt):
    r = dict(zip(_INPUT_NAMES, refs))
    out_ref = refs[len(_INPUT_NAMES)]

    src = r["src_x"][...]                                      # (B*S_src, D)
    tgt = r["tgt_x"][...]                                      # (B*S_tgt, D)
    src_mask = r["src_mask"][...]                              # (S_src, S_src)
    tgt_mask = r["tgt_mask"][...]                              # (S_tgt, S_tgt)

    # ---------------- encoder stack (post-norm, PyTorch default) ------------
    def enc_body(l, x):
        qkv = jnp.dot(x, r["e_wqkv"][l],
                      preferred_element_type=jnp.float32) + r["e_bqkv"][l]
        q = qkv[:, 0:D_EMB]
        k = qkv[:, D_EMB:2 * D_EMB]
        v = qkv[:, 2 * D_EMB:3 * D_EMB]
        sa = _attention(q, k, v, r["e_wo"][l], r["e_bo"][l], src_mask,
                        batch, s_src, s_src)
        x = _layernorm(x + sa, r["e_ln1g"][l], r["e_ln1b"][l])
        ff = _ffn(x, r["e_w1"][l], r["e_b1"][l], r["e_w2"][l], r["e_b2"][l])
        x = _layernorm(x + ff, r["e_ln2g"][l], r["e_ln2b"][l])
        return x

    memory = lax.fori_loop(0, NUM_LAYERS, enc_body, src)
    memory = _layernorm(memory, r["enc_ng"][...], r["enc_nb"][...])

    # ---------------- decoder stack ------------------------------------------
    def dec_body(l, x):
        # self-attention (causal additive mask)
        qkv = jnp.dot(x, r["d_swqkv"][l],
                      preferred_element_type=jnp.float32) + r["d_sbqkv"][l]
        q = qkv[:, 0:D_EMB]
        k = qkv[:, D_EMB:2 * D_EMB]
        v = qkv[:, 2 * D_EMB:3 * D_EMB]
        sa = _attention(q, k, v, r["d_swo"][l], r["d_sbo"][l], tgt_mask,
                        batch, s_tgt, s_tgt)
        x = _layernorm(x + sa, r["d_ln1g"][l], r["d_ln1b"][l])

        # cross-attention (memory_mask=None in nn.Transformer -> no mask)
        q = jnp.dot(x, r["d_cwq"][l],
                    preferred_element_type=jnp.float32) + r["d_cbq"][l]
        kv = jnp.dot(memory, r["d_cwkv"][l],
                     preferred_element_type=jnp.float32) + r["d_cbkv"][l]
        k = kv[:, 0:D_EMB]
        v = kv[:, D_EMB:2 * D_EMB]
        ca = _attention(q, k, v, r["d_cwo"][l], r["d_cbo"][l], None,
                        batch, s_tgt, s_src)
        x = _layernorm(x + ca, r["d_ln2g"][l], r["d_ln2b"][l])

        # feed-forward
        ff = _ffn(x, r["d_w1"][l], r["d_b1"][l], r["d_w2"][l], r["d_b2"][l])
        x = _layernorm(x + ff, r["d_ln3g"][l], r["d_ln3b"][l])
        return x

    x = lax.fori_loop(0, NUM_LAYERS, dec_body, tgt)
    x = _layernorm(x, r["dec_ng"][...], r["dec_nb"][...])

    # ---------------- generator (lane-dense padded output) -------------------
    out_ref[...] = (jnp.dot(x, r["gen_w"][...],
                            preferred_element_type=jnp.float32) + r["gen_b"][...])


# ----------------------------------------------------------------------------
# Wrapper: embedding + PE in plain JAX glue, then one fused pallas_call.
# ----------------------------------------------------------------------------
def _whole_spec(shape):
    return pl.BlockSpec(shape, lambda *_: (0,) * len(shape))


def positional_encoding_table(max_len=5000, d=D_EMB):
    position = jnp.arange(max_len, dtype=jnp.float32)[:, None]
    div_term = jnp.exp(jnp.arange(0, d, 2, dtype=jnp.float32)
                       * (-math.log(10000.0) / d))
    pe = jnp.zeros((max_len, d), jnp.float32)
    pe = pe.at[:, 0::2].set(jnp.sin(position * div_term))
    pe = pe.at[:, 1::2].set(jnp.cos(position * div_term))
    return pe[:, None, :]          # (max_len, 1, d) == pe.unsqueeze(0).transpose(0,1)


def transformer_forward(params, src_tokens, tgt_tokens, src_mask, tgt_mask):
    pe = params["pe"]
    B, s_src = src_tokens.shape
    _, s_tgt = tgt_tokens.shape

    # Embedding lookup (gather) + PE add; reproduces the batch-index PE quirk.
    src_x = (params["src_emb"][src_tokens] + pe[:B]).reshape(B * s_src, D_EMB)
    tgt_x = (params["tgt_emb"][tgt_tokens] + pe[:B]).reshape(B * s_tgt, D_EMB)

    # Pad the generator to a lane-dense (128-wide) output; slice back outside.
    gen_w = jnp.zeros((D_EMB, GEN_PAD), jnp.float32).at[:, :PERM_LEN].set(params["gen_w"])
    gen_b = jnp.zeros((1, GEN_PAD), jnp.float32).at[0, :PERM_LEN].set(params["gen_b"])

    inputs = dict(
        src_x=src_x, tgt_x=tgt_x,
        src_mask=src_mask.astype(jnp.float32),
        tgt_mask=tgt_mask.astype(jnp.float32),
        **params["enc"], **params["dec"],
        enc_ng=params["enc_ng"], enc_nb=params["enc_nb"],
        dec_ng=params["dec_ng"], dec_nb=params["dec_nb"],
        gen_w=gen_w, gen_b=gen_b,
    )
    args = [inputs[name] for name in _INPUT_NAMES]

    out = pl.pallas_call(
        partial(_transformer_kernel, batch=B, s_src=s_src, s_tgt=s_tgt),
        out_shape=jax.ShapeDtypeStruct((B * s_tgt, GEN_PAD), jnp.float32),
        in_specs=[_whole_spec(a.shape) for a in args],
        out_specs=_whole_spec((B * s_tgt, GEN_PAD)),
        compiler_params=pltpu.CompilerParams(vmem_limit_bytes=16 * 1024 * 1024),
    )(*args)

    return out[:, :PERM_LEN].reshape(B, s_tgt, PERM_LEN)


# ----------------------------------------------------------------------------
# Deterministic synthetic parameters (shapes mirror the PyTorch module, stacked
# over layers so the fused kernel can loop over them in-VMEM).
# ----------------------------------------------------------------------------
def init_params(seed=0):
    base = jax.random.PRNGKey(seed)
    counter = [0]

    def nxt():
        counter[0] += 1
        return jax.random.fold_in(base, counter[0])

    def dense(shape, scale=0.1):
        return (scale * jax.random.normal(nxt(), shape)).astype(jnp.float32)

    L = NUM_LAYERS
    ones = lambda *s: jnp.ones(s, jnp.float32)
    zeros = lambda *s: jnp.zeros(s, jnp.float32)

    enc = dict(
        e_wqkv=dense((L, D_EMB, 3 * D_EMB)), e_bqkv=dense((L, 1, 3 * D_EMB)),
        e_wo=dense((L, D_EMB, D_EMB)),       e_bo=dense((L, 1, D_EMB)),
        e_ln1g=ones(L, 1, D_EMB),            e_ln1b=zeros(L, 1, D_EMB),
        e_w1=dense((L, D_EMB, DIM_FF)),      e_b1=dense((L, 1, DIM_FF)),
        e_w2=dense((L, DIM_FF, D_EMB)),      e_b2=dense((L, 1, D_EMB)),
        e_ln2g=ones(L, 1, D_EMB),            e_ln2b=zeros(L, 1, D_EMB),
    )
    dec = dict(
        d_swqkv=dense((L, D_EMB, 3 * D_EMB)), d_sbqkv=dense((L, 1, 3 * D_EMB)),
        d_swo=dense((L, D_EMB, D_EMB)),       d_sbo=dense((L, 1, D_EMB)),
        d_cwq=dense((L, D_EMB, D_EMB)),       d_cbq=dense((L, 1, D_EMB)),
        d_cwkv=dense((L, D_EMB, 2 * D_EMB)),  d_cbkv=dense((L, 1, 2 * D_EMB)),
        d_cwo=dense((L, D_EMB, D_EMB)),       d_cbo=dense((L, 1, D_EMB)),
        d_ln1g=ones(L, 1, D_EMB),             d_ln1b=zeros(L, 1, D_EMB),
        d_ln2g=ones(L, 1, D_EMB),             d_ln2b=zeros(L, 1, D_EMB),
        d_ln3g=ones(L, 1, D_EMB),             d_ln3b=zeros(L, 1, D_EMB),
        d_w1=dense((L, D_EMB, DIM_FF)),       d_b1=dense((L, 1, DIM_FF)),
        d_w2=dense((L, DIM_FF, D_EMB)),       d_b2=dense((L, 1, D_EMB)),
    )
    return dict(
        src_emb=dense((PERM_LEN, D_EMB), 1.0),
        tgt_emb=dense((PERM_LEN, D_EMB), 1.0),
        pe=positional_encoding_table(),
        enc=enc, dec=dec,
        enc_ng=ones(1, D_EMB), enc_nb=zeros(1, D_EMB),
        dec_ng=ones(1, D_EMB), dec_nb=zeros(1, D_EMB),
        gen_w=dense((D_EMB, PERM_LEN)), gen_b=dense((PERM_LEN,)),
    )


# ----------------------------------------------------------------------------
if __name__ == "__main__":
    B, S_SRC, S_TGT = 2, 8, 6
    key = jax.random.PRNGKey(0)
    k_src, k_tgt = jax.random.split(key)
    src = jax.random.randint(k_src, (B, S_SRC), 0, PERM_LEN)
    tgt = jax.random.randint(k_tgt, (B, S_TGT), 0, PERM_LEN)

    src_mask = jnp.zeros((S_SRC, S_SRC), jnp.float32)
    tgt_mask = jnp.where(jnp.tril(jnp.ones((S_TGT, S_TGT), dtype=bool)),
                         0.0, float("-inf")).astype(jnp.float32)

    params = init_params(0)
    fwd = jax.jit(transformer_forward)
    out = jax.block_until_ready(fwd(params, src, tgt, src_mask, tgt_mask))

    assert out.shape == (B, S_TGT, PERM_LEN)
    assert bool(jnp.all(jnp.isfinite(out)))
    print("KERNEL_OK")
</pallas_src>

<mosaic_0001>
module attributes {stable_mosaic.version = 11 : i64} {
  func.func @_transformer_kernel(%arg0: memref<16x4xf32, #tpu.memory_space<vmem>>, %arg1: memref<12x4xf32, #tpu.memory_space<vmem>>, %arg2: memref<8x8xf32, #tpu.memory_space<vmem>>, %arg3: memref<6x6xf32, #tpu.memory_space<vmem>>, %arg4: memref<6x4x12xf32, #tpu.memory_space<vmem>>, %arg5: memref<6x1x12xf32, #tpu.memory_space<vmem>>, %arg6: memref<6x4x4xf32, #tpu.memory_space<vmem>>, %arg7: memref<6x1x4xf32, #tpu.memory_space<vmem>>, %arg8: memref<6x1x4xf32, #tpu.memory_space<vmem>>, %arg9: memref<6x1x4xf32, #tpu.memory_space<vmem>>, %arg10: memref<6x4x2048xf32, #tpu.memory_space<vmem>>, %arg11: memref<6x1x2048xf32, #tpu.memory_space<vmem>>, %arg12: memref<6x2048x4xf32, #tpu.memory_space<vmem>>, %arg13: memref<6x1x4xf32, #tpu.memory_space<vmem>>, %arg14: memref<6x1x4xf32, #tpu.memory_space<vmem>>, %arg15: memref<6x1x4xf32, #tpu.memory_space<vmem>>, %arg16: memref<6x4x12xf32, #tpu.memory_space<vmem>>, %arg17: memref<6x1x12xf32, #tpu.memory_space<vmem>>, %arg18: memref<6x4x4xf32, #tpu.memory_space<vmem>>, %arg19: memref<6x1x4xf32, #tpu.memory_space<vmem>>, %arg20: memref<6x4x4xf32, #tpu.memory_space<vmem>>, %arg21: memref<6x1x4xf32, #tpu.memory_space<vmem>>, %arg22: memref<6x4x8xf32, #tpu.memory_space<vmem>>, %arg23: memref<6x1x8xf32, #tpu.memory_space<vmem>>, %arg24: memref<6x4x4xf32, #tpu.memory_space<vmem>>, %arg25: memref<6x1x4xf32, #tpu.memory_space<vmem>>, %arg26: memref<6x1x4xf32, #tpu.memory_space<vmem>>, %arg27: memref<6x1x4xf32, #tpu.memory_space<vmem>>, %arg28: memref<6x1x4xf32, #tpu.memory_space<vmem>>, %arg29: memref<6x1x4xf32, #tpu.memory_space<vmem>>, %arg30: memref<6x1x4xf32, #tpu.memory_space<vmem>>, %arg31: memref<6x1x4xf32, #tpu.memory_space<vmem>>, %arg32: memref<6x4x2048xf32, #tpu.memory_space<vmem>>, %arg33: memref<6x1x2048xf32, #tpu.memory_space<vmem>>, %arg34: memref<6x2048x4xf32, #tpu.memory_space<vmem>>, %arg35: memref<6x1x4xf32, #tpu.memory_space<vmem>>, %arg36: memref<1x4xf32, #tpu.memory_space<vmem>>, %arg37: memref<1x4xf32, #tpu.memory_space<vmem>>, %arg38: memref<1x4xf32, #tpu.memory_space<vmem>>, %arg39: memref<1x4xf32, #tpu.memory_space<vmem>>, %arg40: memref<4x128xf32, #tpu.memory_space<vmem>>, %arg41: memref<1x128xf32, #tpu.memory_space<vmem>>, %arg42: memref<12x128xf32, #tpu.memory_space<vmem>>) attributes {dimension_semantics = [], scalar_prefetch = 0 : i64, scratch_operands = 0 : i64, tpu.core_type = #tpu.core_type<tc>} {
    %c0 = arith.constant 0 : index
    %c0_0 = arith.constant 0 : index
    %0 = vector.load %arg0[%c0, %c0_0] : memref<16x4xf32, #tpu.memory_space<vmem>>, vector<16x4xf32>
    %c0_1 = arith.constant 0 : index
    %c0_2 = arith.constant 0 : index
    %1 = vector.load %arg1[%c0_1, %c0_2] : memref<12x4xf32, #tpu.memory_space<vmem>>, vector<12x4xf32>
    %c0_3 = arith.constant 0 : index
    %c0_4 = arith.constant 0 : index
    %2 = vector.load %arg2[%c0_3, %c0_4] : memref<8x8xf32, #tpu.memory_space<vmem>>, vector<8x8xf32>
    %c0_5 = arith.constant 0 : index
    %c0_6 = arith.constant 0 : index
    %3 = vector.load %arg3[%c0_5, %c0_6] : memref<6x6xf32, #tpu.memory_space<vmem>>, vector<6x6xf32>
    %c0_i32 = arith.constant 0 : i32
    %c6_i32 = arith.constant 6 : i32
    %4 = arith.addi %c0_i32, %c6_i32 : i32
    %c1_i32 = arith.constant 1 : i32
    %5 = scf.for %arg43 = %c0_i32 to %4 step %c1_i32 iter_args(%arg44 = %0) -> (vector<16x4xf32>)  : i32 {
      %62 = arith.index_cast %arg43 : i32 to index
      %c0_36 = arith.constant 0 : index
      %c0_37 = arith.constant 0 : index
      %63 = vector.load %arg4[%62, %c0_36, %c0_37] : memref<6x4x12xf32, #tpu.memory_space<vmem>>, vector<1x4x12xf32>
      %64 = vector.shape_cast %63 : vector<1x4x12xf32> to vector<4x12xf32>
      %cst_38 = arith.constant dense<0.000000e+00> : vector<16x12xf32>
      %65 = tpu.matmul %arg44, %64, %cst_38 {dimension_numbers = #tpu.dot_dimension_numbers<[1], [0], [0], [1], [0, 0, 1, 1], [], []>} : vector<16x4xf32>, vector<4x12xf32>, vector<16x12xf32> -> vector<16x12xf32>
      %66 = arith.index_cast %arg43 : i32 to index
      %c0_39 = arith.constant 0 : index
      %c0_40 = arith.constant 0 : index
      %67 = vector.load %arg5[%66, %c0_39, %c0_40] : memref<6x1x12xf32, #tpu.memory_space<vmem>>, vector<1x1x12xf32>
      %68 = vector.shape_cast %67 : vector<1x1x12xf32> to vector<1x12xf32>
      %69 = vector.broadcast %68 : vector<1x12xf32> to vector<16x12xf32>
      %70 = arith.addf %65, %69 : vector<16x12xf32>
      %71 = vector.extract_strided_slice %70 {offsets = [0, 0], sizes = [16, 4], strides = [1, 1]} : vector<16x12xf32> to vector<16x4xf32>
      %72 = vector.extract_strided_slice %70 {offsets = [0, 4], sizes = [16, 4], strides = [1, 1]} : vector<16x12xf32> to vector<16x4xf32>
      %73 = vector.extract_strided_slice %70 {offsets = [0, 8], sizes = [16, 4], strides = [1, 1]} : vector<16x12xf32> to vector<16x4xf32>
      %74 = arith.index_cast %arg43 : i32 to index
      %c0_41 = arith.constant 0 : index
      %c0_42 = arith.constant 0 : index
      %75 = vector.load %arg6[%74, %c0_41, %c0_42] : memref<6x4x4xf32, #tpu.memory_space<vmem>>, vector<1x4x4xf32>
      %76 = vector.shape_cast %75 : vector<1x4x4xf32> to vector<4x4xf32>
      %77 = arith.index_cast %arg43 : i32 to index
      %c0_43 = arith.constant 0 : index
      %c0_44 = arith.constant 0 : index
      %78 = vector.load %arg7[%77, %c0_43, %c0_44] : memref<6x1x4xf32, #tpu.memory_space<vmem>>, vector<1x1x4xf32>
      %79 = vector.shape_cast %78 : vector<1x1x4xf32> to vector<1x4xf32>
      %80 = vector.extract_strided_slice %71 {offsets = [0, 0], sizes = [8, 4], strides = [1, 1]} : vector<16x4xf32> to vector<8x4xf32>
      %81 = vector.extract_strided_slice %72 {offsets = [0, 0], sizes = [8, 4], strides = [1, 1]} : vector<16x4xf32> to vector<8x4xf32>
      %82 = vector.extract_strided_slice %73 {offsets = [0, 0], sizes = [8, 4], strides = [1, 1]} : vector<16x4xf32> to vector<8x4xf32>
      %83 = vector.extract_strided_slice %80 {offsets = [0, 0], sizes = [8, 1], strides = [1, 1]} : vector<8x4xf32> to vector<8x1xf32>
      %cst_45 = arith.constant 1.000000e+00 : f32
      %84 = vector.broadcast %cst_45 : f32 to vector<8x1xf32>
      %85 = arith.mulf %83, %84 : vector<8x1xf32>
      %86 = vector.extract_strided_slice %81 {offsets = [0, 0], sizes = [8, 1], strides = [1, 1]} : vector<8x4xf32> to vector<8x1xf32>
      %87 = vector.extract_strided_slice %82 {offsets = [0, 0], sizes = [8, 1], strides = [1, 1]} : vector<8x4xf32> to vector<8x1xf32>
      "tpu.trace_start"() <{level = 10 : i32, message = "qd,kd->qk"}> : () -> ()
      %cst_46 = arith.constant dense<0.000000e+00> : vector<8x8xf32>
      %88 = tpu.matmul %85, %86, %cst_46 {dimension_numbers = #tpu.dot_dimension_numbers<[1], [1], [0], [0], [0, 0, 1, 0], [], []>} : vector<8x1xf32>, vector<8x1xf32>, vector<8x8xf32> -> vector<8x8xf32>
      "tpu.trace_stop"() : () -> ()
      %89 = arith.addf %88, %2 : vector<8x8xf32>
      %cst_47 = arith.constant dense<0xFF800000> : vector<8xf32>
      %90 = vector.multi_reduction <maximumf>, %89, %cst_47 [1] : vector<8x8xf32> to vector<8xf32>
      %91 = vector.shape_cast %90 : vector<8xf32> to vector<8x1xf32>
      %92 = vector.broadcast %91 : vector<8x1xf32> to vector<8x8xf32>
      %93 = arith.subf %89, %92 : vector<8x8xf32>
      %94 = math.exp %93 : vector<8x8xf32>
      %cst_48 = arith.constant dense<0.000000e+00> : vector<8xf32>
      %95 = vector.multi_reduction <add>, %94, %cst_48 [1] : vector<8x8xf32> to vector<8xf32>
      %96 = vector.shape_cast %95 : vector<8xf32> to vector<8x1xf32>
      %97 = vector.broadcast %96 : vector<8x1xf32> to vector<8x8xf32>
      %98 = arith.divf %94, %97 : vector<8x8xf32>
      %cst_49 = arith.constant dense<0.000000e+00> : vector<8x1xf32>
      %99 = tpu.matmul %98, %87, %cst_49 {dimension_numbers = #tpu.dot_dimension_numbers<[1], [0], [0], [1], [0, 0, 1, 1], [], []>} : vector<8x8xf32>, vector<8x1xf32>, vector<8x1xf32> -> vector<8x1xf32>
      %100 = vector.extract_strided_slice %76 {offsets = [0, 0], sizes = [1, 4], strides = [1, 1]} : vector<4x4xf32> to vector<1x4xf32>
      %101 = vector.broadcast %99 : vector<8x1xf32> to vector<8x4xf32>
      %102 = vector.broadcast %100 : vector<1x4xf32> to vector<8x4xf32>
      %103 = arith.mulf %101, %102 : vector<8x4xf32>
      %104 = vector.extract_strided_slice %80 {offsets = [0, 1], sizes = [8, 1], strides = [1, 1]} : vector<8x4xf32> to vector<8x1xf32>
      %cst_50 = arith.constant 1.000000e+00 : f32
      %105 = vector.broadcast %cst_50 : f32 to vector<8x1xf32>
      %106 = arith.mulf %104, %105 : vector<8x1xf32>
      %107 = vector.extract_strided_slice %81 {offsets = [0, 1], sizes = [8, 1], strides = [1, 1]} : vector<8x4xf32> to vector<8x1xf32>
      %108 = vector.extract_strided_slice %82 {offsets = [0, 1], sizes = [8, 1], strides = [1, 1]} : vector<8x4xf32> to vector<8x1xf32>
      "tpu.trace_start"() <{level = 10 : i32, message = "qd,kd->qk"}> : () -> ()
      %cst_51 = arith.constant dense<0.000000e+00> : vector<8x8xf32>
      %109 = tpu.matmul %106, %107, %cst_51 {dimension_numbers = #tpu.dot_dimension_numbers<[1], [1], [0], [0], [0, 0, 1, 0], [], []>} : vector<8x1xf32>, vector<8x1xf32>, vector<8x8xf32> -> vector<8x8xf32>
      "tpu.trace_stop"() : () -> ()
      %110 = arith.addf %109, %2 : vector<8x8xf32>
      %cst_52 = arith.constant dense<0xFF800000> : vector<8xf32>
      %111 = vector.multi_reduction <maximumf>, %110, %cst_52 [1] : vector<8x8xf32> to vector<8xf32>
      %112 = vector.shape_cast %111 : vector<8xf32> to vector<8x1xf32>
      %113 = vector.broadcast %112 : vector<8x1xf32> to vector<8x8xf32>
      %114 = arith.subf %110, %113 : vector<8x8xf32>
      %115 = math.exp %114 : vector<8x8xf32>
      %cst_53 = arith.constant dense<0.000000e+00> : vector<8xf32>
      %116 = vector.multi_reduction <add>, %115, %cst_53 [1] : vector<8x8xf32> to vector<8xf32>
      %117 = vector.shape_cast %116 : vector<8xf32> to vector<8x1xf32>
      %118 = vector.broadcast %117 : vector<8x1xf32> to vector<8x8xf32>
      %119 = arith.divf %115, %118 : vector<8x8xf32>
      %cst_54 = arith.constant dense<0.000000e+00> : vector<8x1xf32>
      %120 = tpu.matmul %119, %108, %cst_54 {dimension_numbers = #tpu.dot_dimension_numbers<[1], [0], [0], [1], [0, 0, 1, 1], [], []>} : vector<8x8xf32>, vector<8x1xf32>, vector<8x1xf32> -> vector<8x1xf32>
      %121 = vector.extract_strided_slice %76 {offsets = [1, 0], sizes = [1, 4], strides = [1, 1]} : vector<4x4xf32> to vector<1x4xf32>
      %122 = vector.broadcast %120 : vector<8x1xf32> to vector<8x4xf32>
      %123 = vector.broadcast %121 : vector<1x4xf32> to vector<8x4xf32>
      %124 = arith.mulf %122, %123 : vector<8x4xf32>
      %125 = arith.addf %103, %124 : vector<8x4xf32>
      %126 = vector.extract_strided_slice %80 {offsets = [0, 2], sizes = [8, 1], strides = [1, 1]} : vector<8x4xf32> to vector<8x1xf32>
      %cst_55 = arith.constant 1.000000e+00 : f32
      %127 = vector.broadcast %cst_55 : f32 to vector<8x1xf32>
      %128 = arith.mulf %126, %127 : vector<8x1xf32>
      %129 = vector.extract_strided_slice %81 {offsets = [0, 2], sizes = [8, 1], strides = [1, 1]} : vector<8x4xf32> to vector<8x1xf32>
      %130 = vector.extract_strided_slice %82 {offsets = [0, 2], sizes = [8, 1], strides = [1, 1]} : vector<8x4xf32> to vector<8x1xf32>
      "tpu.trace_start"() <{level = 10 : i32, message = "qd,kd->qk"}> : () -> ()
      %cst_56 = arith.constant dense<0.000000e+00> : vector<8x8xf32>
      %131 = tpu.matmul %128, %129, %cst_56 {dimension_numbers = #tpu.dot_dimension_numbers<[1], [1], [0], [0], [0, 0, 1, 0], [], []>} : vector<8x1xf32>, vector<8x1xf32>, vector<8x8xf32> -> vector<8x8xf32>
      "tpu.trace_stop"() : () -> ()
      %132 = arith.addf %131, %2 : vector<8x8xf32>
      %cst_57 = arith.constant dense<0xFF800000> : vector<8xf32>
      %133 = vector.multi_reduction <maximumf>, %132, %cst_57 [1] : vector<8x8xf32> to vector<8xf32>
      %134 = vector.shape_cast %133 : vector<8xf32> to vector<8x1xf32>
      %135 = vector.broadcast %134 : vector<8x1xf32> to vector<8x8xf32>
      %136 = arith.subf %132, %135 : vector<8x8xf32>
      %137 = math.exp %136 : vector<8x8xf32>
      %cst_58 = arith.constant dense<0.000000e+00> : vector<8xf32>
      %138 = vector.multi_reduction <add>, %137, %cst_58 [1] : vector<8x8xf32> to vector<8xf32>
      %139 = vector.shape_cast %138 : vector<8xf32> to vector<8x1xf32>
      %140 = vector.broadcast %139 : vector<8x1xf32> to vector<8x8xf32>
      %141 = arith.divf %137, %140 : vector<8x8xf32>
      %cst_59 = arith.constant dense<0.000000e+00> : vector<8x1xf32>
      %142 = tpu.matmul %141, %130, %cst_59 {dimension_numbers = #tpu.dot_dimension_numbers<[1], [0], [0], [1], [0, 0, 1, 1], [], []>} : vector<8x8xf32>, vector<8x1xf32>, vector<8x1xf32> -> vector<8x1xf32>
      %143 = vector.extract_strided_slice %76 {offsets = [2, 0], sizes = [1, 4], strides = [1, 1]} : vector<4x4xf32> to vector<1x4xf32>
      %144 = vector.broadcast %142 : vector<8x1xf32> to vector<8x4xf32>
      %145 = vector.broadcast %143 : vector<1x4xf32> to vector<8x4xf32>
      %146 = arith.mulf %144, %145 : vector<8x4xf32>
      %147 = arith.addf %125, %146 : vector<8x4xf32>
      %148 = vector.extract_strided_slice %80 {offsets = [0, 3], sizes = [8, 1], strides = [1, 1]} : vector<8x4xf32> to vector<8x1xf32>
      %cst_60 = arith.constant 1.000000e+00 : f32
      %149 = vector.broadcast %cst_60 : f32 to vector<8x1xf32>
      %150 = arith.mulf %148, %149 : vector<8x1xf32>
      %151 = vector.extract_strided_slice %81 {offsets = [0, 3], sizes = [8, 1], strides = [1, 1]} : vector<8x4xf32> to vector<8x1xf32>
      %152 = vector.extract_strided_slice %82 {offsets = [0, 3], sizes = [8, 1], strides = [1, 1]} : vector<8x4xf32> to vector<8x1xf32>
      "tpu.trace_start"() <{level = 10 : i32, message = "qd,kd->qk"}> : () -> ()
      %cst_61 = arith.constant dense<0.000000e+00> : vector<8x8xf32>
      %153 = tpu.matmul %150, %151, %cst_61 {dimension_numbers = #tpu.dot_dimension_numbers<[1], [1], [0], [0], [0, 0, 1, 0], [], []>} : vector<8x1xf32>, vector<8x1xf32>, vector<8x8xf32> -> vector<8x8xf32>
      "tpu.trace_stop"() : () -> ()
      %154 = arith.addf %153, %2 : vector<8x8xf32>
      %cst_62 = arith.constant dense<0xFF800000> : vector<8xf32>
      %155 = vector.multi_reduction <maximumf>, %154, %cst_62 [1] : vector<8x8xf32> to vector<8xf32>
      %156 = vector.shape_cast %155 : vector<8xf32> to vector<8x1xf32>
      %157 = vector.broadcast %156 : vector<8x1xf32> to vector<8x8xf32>
      %158 = arith.subf %154, %157 : vector<8x8xf32>
      %159 = math.exp %158 : vector<8x8xf32>
      %cst_63 = arith.constant dense<0.000000e+00> : vector<8xf32>
      %160 = vector.multi_reduction <add>, %159, %cst_63 [1] : vector<8x8xf32> to vector<8xf32>
      %161 = vector.shape_cast %160 : vector<8xf32> to vector<8x1xf32>
      %162 = vector.broadcast %161 : vector<8x1xf32> to vector<8x8xf32>
      %163 = arith.divf %159, %162 : vector<8x8xf32>
      %cst_64 = arith.constant dense<0.000000e+00> : vector<8x1xf32>
      %164 = tpu.matmul %163, %152, %cst_64 {dimension_numbers = #tpu.dot_dimension_numbers<[1], [0], [0], [1], [0, 0, 1, 1], [], []>} : vector<8x8xf32>, vector<8x1xf32>, vector<8x1xf32> -> vector<8x1xf32>
      %165 = vector.extract_strided_slice %76 {offsets = [3, 0], sizes = [1, 4], strides = [1, 1]} : vector<4x4xf32> to vector<1x4xf32>
      %166 = vector.broadcast %164 : vector<8x1xf32> to vector<8x4xf32>
      %167 = vector.broadcast %165 : vector<1x4xf32> to vector<8x4xf32>
      %168 = arith.mulf %166, %167 : vector<8x4xf32>
      %169 = arith.addf %147, %168 : vector<8x4xf32>
      %170 = vector.extract_strided_slice %71 {offsets = [8, 0], sizes = [8, 4], strides = [1, 1]} : vector<16x4xf32> to vector<8x4xf32>
      %171 = vector.extract_strided_slice %72 {offsets = [8, 0], sizes = [8, 4], strides = [1, 1]} : vector<16x4xf32> to vector<8x4xf32>
      %172 = vector.extract_strided_slice %73 {offsets = [8, 0], sizes = [8, 4], strides = [1, 1]} : vector<16x4xf32> to vector<8x4xf32>
      %173 = vector.extract_strided_slice %170 {offsets = [0, 0], sizes = [8, 1], strides = [1, 1]} : vector<8x4xf32> to vector<8x1xf32>
      %cst_65 = arith.constant 1.000000e+00 : f32
      %174 = vector.broadcast %cst_65 : f32 to vector<8x1xf32>
      %175 = arith.mulf %173, %174 : vector<8x1xf32>
      %176 = vector.extract_strided_slice %171 {offsets = [0, 0], sizes = [8, 1], strides = [1, 1]} : vector<8x4xf32> to vector<8x1xf32>
      %177 = vector.extract_strided_slice %172 {offsets = [0, 0], sizes = [8, 1], strides = [1, 1]} : vector<8x4xf32> to vector<8x1xf32>
      "tpu.trace_start"() <{level = 10 : i32, message = "qd,kd->qk"}> : () -> ()
      %cst_66 = arith.constant dense<0.000000e+00> : vector<8x8xf32>
      %178 = tpu.matmul %175, %176, %cst_66 {dimension_numbers = #tpu.dot_dimension_numbers<[1], [1], [0], [0], [0, 0, 1, 0], [], []>} : vector<8x1xf32>, vector<8x1xf32>, vector<8x8xf32> -> vector<8x8xf32>
      "tpu.trace_stop"() : () -> ()
      %179 = arith.addf %178, %2 : vector<8x8xf32>
      %cst_67 = arith.constant dense<0xFF800000> : vector<8xf32>
      %180 = vector.multi_reduction <maximumf>, %179, %cst_67 [1] : vector<8x8xf32> to vector<8xf32>
      %181 = vector.shape_cast %180 : vector<8xf32> to vector<8x1xf32>
      %182 = vector.broadcast %181 : vector<8x1xf32> to vector<8x8xf32>
      %183 = arith.subf %179, %182 : vector<8x8xf32>
      %184 = math.exp %183 : vector<8x8xf32>
      %cst_68 = arith.constant dense<0.000000e+00> : vector<8xf32>
      %185 = vector.multi_reduction <add>, %184, %cst_68 [1] : vector<8x8xf32> to vector<8xf32>
      %186 = vector.shape_cast %185 : vector<8xf32> to vector<8x1xf32>
      %187 = vector.broadcast %186 : vector<8x1xf32> to vector<8x8xf32>
      %188 = arith.divf %184, %187 : vector<8x8xf32>
      %cst_69 = arith.constant dense<0.000000e+00> : vector<8x1xf32>
      %189 = tpu.matmul %188, %177, %cst_69 {dimension_numbers = #tpu.dot_dimension_numbers<[1], [0], [0], [1], [0, 0, 1, 1], [], []>} : vector<8x8xf32>, vector<8x1xf32>, vector<8x1xf32> -> vector<8x1xf32>
      %190 = vector.extract_strided_slice %76 {offsets = [0, 0], sizes = [1, 4], strides = [1, 1]} : vector<4x4xf32> to vector<1x4xf32>
      %191 = vector.broadcast %189 : vector<8x1xf32> to vector<8x4xf32>
      %192 = vector.broadcast %190 : vector<1x4xf32> to vector<8x4xf32>
      %193 = arith.mulf %191, %192 : vector<8x4xf32>
      %194 = vector.extract_strided_slice %170 {offsets = [0, 1], sizes = [8, 1], strides = [1, 1]} : vector<8x4xf32> to vector<8x1xf32>
      %cst_70 = arith.constant 1.000000e+00 : f32
      %195 = vector.broadcast %cst_70 : f32 to vector<8x1xf32>
      %196 = arith.mulf %194, %195 : vector<8x1xf32>
      %197 = vector.extract_strided_slice %171 {offsets = [0, 1], sizes = [8, 1], strides = [1, 1]} : vector<8x4xf32> to vector<8x1xf32>
      %198 = vector.extract_strided_slice %172 {offsets = [0, 1], sizes = [8, 1], strides = [1, 1]} : vector<8x4xf32> to vector<8x1xf32>
      "tpu.trace_start"() <{level = 10 : i32, message = "qd,kd->qk"}> : () -> ()
      %cst_71 = arith.constant dense<0.000000e+00> : vector<8x8xf32>
      %199 = tpu.matmul %196, %197, %cst_71 {dimension_numbers = #tpu.dot_dimension_numbers<[1], [1], [0], [0], [0, 0, 1, 0], [], []>} : vector<8x1xf32>, vector<8x1xf32>, vector<8x8xf32> -> vector<8x8xf32>
      "tpu.trace_stop"() : () -> ()
      %200 = arith.addf %199, %2 : vector<8x8xf32>
      %cst_72 = arith.constant dense<0xFF800000> : vector<8xf32>
      %201 = vector.multi_reduction <maximumf>, %200, %cst_72 [1] : vector<8x8xf32> to vector<8xf32>
      %202 = vector.shape_cast %201 : vector<8xf32> to vector<8x1xf32>
      %203 = vector.broadcast %202 : vector<8x1xf32> to vector<8x8xf32>
      %204 = arith.subf %200, %203 : vector<8x8xf32>
      %205 = math.exp %204 : vector<8x8xf32>
      %cst_73 = arith.constant dense<0.000000e+00> : vector<8xf32>
      %206 = vector.multi_reduction <add>, %205, %cst_73 [1] : vector<8x8xf32> to vector<8xf32>
      %207 = vector.shape_cast %206 : vector<8xf32> to vector<8x1xf32>
      %208 = vector.broadcast %207 : vector<8x1xf32> to vector<8x8xf32>
      %209 = arith.divf %205, %208 : vector<8x8xf32>
      %cst_74 = arith.constant dense<0.000000e+00> : vector<8x1xf32>
      %210 = tpu.matmul %209, %198, %cst_74 {dimension_numbers = #tpu.dot_dimension_numbers<[1], [0], [0], [1], [0, 0, 1, 1], [], []>} : vector<8x8xf32>, vector<8x1xf32>, vector<8x1xf32> -> vector<8x1xf32>
      %211 = vector.extract_strided_slice %76 {offsets = [1, 0], sizes = [1, 4], strides = [1, 1]} : vector<4x4xf32> to vector<1x4xf32>
      %212 = vector.broadcast %210 : vector<8x1xf32> to vector<8x4xf32>
      %213 = vector.broadcast %211 : vector<1x4xf32> to vector<8x4xf32>
      %214 = arith.mulf %212, %213 : vector<8x4xf32>
      %215 = arith.addf %193, %214 : vector<8x4xf32>
      %216 = vector.extract_strided_slice %170 {offsets = [0, 2], sizes = [8, 1], strides = [1, 1]} : vector<8x4xf32> to vector<8x1xf32>
      %cst_75 = arith.constant 1.000000e+00 : f32
      %217 = vector.broadcast %cst_75 : f32 to vector<8x1xf32>
      %218 = arith.mulf %216, %217 : vector<8x1xf32>
      %219 = vector.extract_strided_slice %171 {offsets = [0, 2], sizes = [8, 1], strides = [1, 1]} : vector<8x4xf32> to vector<8x1xf32>
      %220 = vector.extract_strided_slice %172 {offsets = [0, 2], sizes = [8, 1], strides = [1, 1]} : vector<8x4xf32> to vector<8x1xf32>
      "tpu.trace_start"() <{level = 10 : i32, message = "qd,kd->qk"}> : () -> ()
      %cst_76 = arith.constant dense<0.000000e+00> : vector<8x8xf32>
      %221 = tpu.matmul %218, %219, %cst_76 {dimension_numbers = #tpu.dot_dimension_numbers<[1], [1], [0], [0], [0, 0, 1, 0], [], []>} : vector<8x1xf32>, vector<8x1xf32>, vector<8x8xf32> -> vector<8x8xf32>
      "tpu.trace_stop"() : () -> ()
      %222 = arith.addf %221, %2 : vector<8x8xf32>
      %cst_77 = arith.constant dense<0xFF800000> : vector<8xf32>
      %223 = vector.multi_reduction <maximumf>, %222, %cst_77 [1] : vector<8x8xf32> to vector<8xf32>
      %224 = vector.shape_cast %223 : vector<8xf32> to vector<8x1xf32>
      %225 = vector.broadcast %224 : vector<8x1xf32> to vector<8x8xf32>
      %226 = arith.subf %222, %225 : vector<8x8xf32>
      %227 = math.exp %226 : vector<8x8xf32>
      %cst_78 = arith.constant dense<0.000000e+00> : vector<8xf32>
      %228 = vector.multi_reduction <add>, %227, %cst_78 [1] : vector<8x8xf32> to vector<8xf32>
      %229 = vector.shape_cast %228 : vector<8xf32> to vector<8x1xf32>
      %230 = vector.broadcast %229 : vector<8x1xf32> to vector<8x8xf32>
      %231 = arith.divf %227, %230 : vector<8x8xf32>
      %cst_79 = arith.constant dense<0.000000e+00> : vector<8x1xf32>
      %232 = tpu.matmul %231, %220, %cst_79 {dimension_numbers = #tpu.dot_dimension_numbers<[1], [0], [0], [1], [0, 0, 1, 1], [], []>} : vector<8x8xf32>, vector<8x1xf32>, vector<8x1xf32> -> vector<8x1xf32>
      %233 = vector.extract_strided_slice %76 {offsets = [2, 0], sizes = [1, 4], strides = [1, 1]} : vector<4x4xf32> to vector<1x4xf32>
      %234 = vector.broadcast %232 : vector<8x1xf32> to vector<8x4xf32>
      %235 = vector.broadcast %233 : vector<1x4xf32> to vector<8x4xf32>
      %236 = arith.mulf %234, %235 : vector<8x4xf32>
      %237 = arith.addf %215, %236 : vector<8x4xf32>
      %238 = vector.extract_strided_slice %170 {offsets = [0, 3], sizes = [8, 1], strides = [1, 1]} : vector<8x4xf32> to vector<8x1xf32>
      %cst_80 = arith.constant 1.000000e+00 : f32
      %239 = vector.broadcast %cst_80 : f32 to vector<8x1xf32>
      %240 = arith.mulf %238, %239 : vector<8x1xf32>
      %241 = vector.extract_strided_slice %171 {offsets = [0, 3], sizes = [8, 1], strides = [1, 1]} : vector<8x4xf32> to vector<8x1xf32>
      %242 = vector.extract_strided_slice %172 {offsets = [0, 3], sizes = [8, 1], strides = [1, 1]} : vector<8x4xf32> to vector<8x1xf32>
      "tpu.trace_start"() <{level = 10 : i32, message = "qd,kd->qk"}> : () -> ()
      %cst_81 = arith.constant dense<0.000000e+00> : vector<8x8xf32>
      %243 = tpu.matmul %240, %241, %cst_81 {dimension_numbers = #tpu.dot_dimension_numbers<[1], [1], [0], [0], [0, 0, 1, 0], [], []>} : vector<8x1xf32>, vector<8x1xf32>, vector<8x8xf32> -> vector<8x8xf32>
      "tpu.trace_stop"() : () -> ()
      %244 = arith.addf %243, %2 : vector<8x8xf32>
      %cst_82 = arith.constant dense<0xFF800000> : vector<8xf32>
      %245 = vector.multi_reduction <maximumf>, %244, %cst_82 [1] : vector<8x8xf32> to vector<8xf32>
      %246 = vector.shape_cast %245 : vector<8xf32> to vector<8x1xf32>
      %247 = vector.broadcast %246 : vector<8x1xf32> to vector<8x8xf32>
      %248 = arith.subf %244, %247 : vector<8x8xf32>
      %249 = math.exp %248 : vector<8x8xf32>
      %cst_83 = arith.constant dense<0.000000e+00> : vector<8xf32>
      %250 = vector.multi_reduction <add>, %249, %cst_83 [1] : vector<8x8xf32> to vector<8xf32>
      %251 = vector.shape_cast %250 : vector<8xf32> to vector<8x1xf32>
      %252 = vector.broadcast %251 : vector<8x1xf32> to vector<8x8xf32>
      %253 = arith.divf %249, %252 : vector<8x8xf32>
      %cst_84 = arith.constant dense<0.000000e+00> : vector<8x1xf32>
      %254 = tpu.matmul %253, %242, %cst_84 {dimension_numbers = #tpu.dot_dimension_numbers<[1], [0], [0], [1], [0, 0, 1, 1], [], []>} : vector<8x8xf32>, vector<8x1xf32>, vector<8x1xf32> -> vector<8x1xf32>
      %255 = vector.extract_strided_slice %76 {offsets = [3, 0], sizes = [1, 4], strides = [1, 1]} : vector<4x4xf32> to vector<1x4xf32>
      %256 = vector.broadcast %254 : vector<8x1xf32> to vector<8x4xf32>
      %257 = vector.broadcast %255 : vector<1x4xf32> to vector<8x4xf32>
      %258 = arith.mulf %256, %257 : vector<8x4xf32>
      %259 = arith.addf %237, %258 : vector<8x4xf32>
      %260 = tpu.concatenate %169, %259 in 0 : vector<8x4xf32>, vector<8x4xf32> -> vector<16x4xf32>
      %261 = vector.broadcast %79 : vector<1x4xf32> to vector<16x4xf32>
      %262 = arith.addf %260, %261 : vector<16x4xf32>
      %263 = arith.addf %arg44, %262 : vector<16x4xf32>
      %264 = arith.index_cast %arg43 : i32 to index
      %c0_85 = arith.constant 0 : index
      %c0_86 = arith.constant 0 : index
      %265 = vector.load %arg8[%264, %c0_85, %c0_86] : memref<6x1x4xf32, #tpu.memory_space<vmem>>, vector<1x1x4xf32>
      %266 = vector.shape_cast %265 : vector<1x1x4xf32> to vector<1x4xf32>
      %267 = arith.index_cast %arg43 : i32 to index
      %c0_87 = arith.constant 0 : index
      %c0_88 = arith.constant 0 : index
      %268 = vector.load %arg9[%267, %c0_87, %c0_88] : memref<6x1x4xf32, #tpu.memory_space<vmem>>, vector<1x1x4xf32>
      %269 = vector.shape_cast %268 : vector<1x1x4xf32> to vector<1x4xf32>
      %cst_89 = arith.constant dense<0.000000e+00> : vector<16xf32>
      %270 = vector.multi_reduction <add>, %263, %cst_89 [1] : vector<16x4xf32> to vector<16xf32>
      %271 = vector.shape_cast %270 : vector<16xf32> to vector<16x1xf32>
      %cst_90 = arith.constant 4.000000e+00 : f32
      %272 = vector.broadcast %cst_90 : f32 to vector<16x1xf32>
      %273 = arith.divf %271, %272 : vector<16x1xf32>
      %274 = vector.broadcast %273 : vector<16x1xf32> to vector<16x4xf32>
      %275 = arith.subf %263, %274 : vector<16x4xf32>
      %276 = arith.mulf %275, %275 : vector<16x4xf32>
      %cst_91 = arith.constant dense<0.000000e+00> : vector<16xf32>
      %277 = vector.multi_reduction <add>, %276, %cst_91 [1] : vector<16x4xf32> to vector<16xf32>
      %278 = vector.shape_cast %277 : vector<16xf32> to vector<16x1xf32>
      %cst_92 = arith.constant 4.000000e+00 : f32
      %279 = vector.broadcast %cst_92 : f32 to vector<16x1xf32>
      %280 = arith.divf %278, %279 : vector<16x1xf32>
      %281 = vector.broadcast %273 : vector<16x1xf32> to vector<16x4xf32>
      %282 = arith.subf %263, %281 : vector<16x4xf32>
      %cst_93 = arith.constant 9.99999974E-6 : f32
      %283 = vector.broadcast %cst_93 : f32 to vector<16x1xf32>
      %284 = arith.addf %280, %283 : vector<16x1xf32>
      %285 = math.rsqrt %284 : vector<16x1xf32>
      %286 = vector.broadcast %285 : vector<16x1xf32> to vector<16x4xf32>
      %287 = arith.mulf %282, %286 : vector<16x4xf32>
      %288 = vector.broadcast %266 : vector<1x4xf32> to vector<16x4xf32>
      %289 = arith.mulf %287, %288 : vector<16x4xf32>
      %290 = vector.broadcast %269 : vector<1x4xf32> to vector<16x4xf32>
      %291 = arith.addf %289, %290 : vector<16x4xf32>
      %292 = arith.index_cast %arg43 : i32 to index
      %c0_94 = arith.constant 0 : index
      %c0_95 = arith.constant 0 : index
      %293 = vector.load %arg10[%292, %c0_94, %c0_95] : memref<6x4x2048xf32, #tpu.memory_space<vmem>>, vector<1x4x2048xf32>
      %294 = vector.shape_cast %293 : vector<1x4x2048xf32> to vector<4x2048xf32>
      %295 = arith.index_cast %arg43 : i32 to index
      %c0_96 = arith.constant 0 : index
      %c0_97 = arith.constant 0 : index
      %296 = vector.load %arg11[%295, %c0_96, %c0_97] : memref<6x1x2048xf32, #tpu.memory_space<vmem>>, vector<1x1x2048xf32>
      %297 = vector.shape_cast %296 : vector<1x1x2048xf32> to vector<1x2048xf32>
      %298 = arith.index_cast %arg43 : i32 to index
      %c0_98 = arith.constant 0 : index
      %c0_99 = arith.constant 0 : index
      %299 = vector.load %arg12[%298, %c0_98, %c0_99] : memref<6x2048x4xf32, #tpu.memory_space<vmem>>, vector<1x2048x4xf32>
      %300 = vector.shape_cast %299 : vector<1x2048x4xf32> to vector<2048x4xf32>
      %301 = arith.index_cast %arg43 : i32 to index
      %c0_100 = arith.constant 0 : index
      %c0_101 = arith.constant 0 : index
      %302 = vector.load %arg13[%301, %c0_100, %c0_101] : memref<6x1x4xf32, #tpu.memory_space<vmem>>, vector<1x1x4xf32>
      %303 = vector.shape_cast %302 : vector<1x1x4xf32> to vector<1x4xf32>
      %cst_102 = arith.constant dense<0.000000e+00> : vector<16x2048xf32>
      %304 = tpu.matmul %291, %294, %cst_102 {dimension_numbers = #tpu.dot_dimension_numbers<[1], [0], [0], [1], [0, 0, 1, 1], [], []>} : vector<16x4xf32>, vector<4x2048xf32>, vector<16x2048xf32> -> vector<16x2048xf32>
      %305 = vector.broadcast %297 : vector<1x2048xf32> to vector<16x2048xf32>
      %306 = arith.addf %304, %305 : vector<16x2048xf32>
      %cst_103 = arith.constant 0.000000e+00 : f32
      %307 = vector.broadcast %cst_103 : f32 to vector<16x2048xf32>
      %308 = arith.maximumf %306, %307 : vector<16x2048xf32>
      %cst_104 = arith.constant dense<0.000000e+00> : vector<16x4xf32>
      %309 = tpu.matmul %308, %300, %cst_104 {dimension_numbers = #tpu.dot_dimension_numbers<[1], [0], [0], [1], [0, 0, 1, 1], [], []>} : vector<16x2048xf32>, vector<2048x4xf32>, vector<16x4xf32> -> vector<16x4xf32>
      %310 = vector.broadcast %303 : vector<1x4xf32> to vector<16x4xf32>
      %311 = arith.addf %309, %310 : vector<16x4xf32>
      %312 = arith.addf %291, %311 : vector<16x4xf32>
      %313 = arith.index_cast %arg43 : i32 to index
      %c0_105 = arith.constant 0 : index
      %c0_106 = arith.constant 0 : index
      %314 = vector.load %arg14[%313, %c0_105, %c0_106] : memref<6x1x4xf32, #tpu.memory_space<vmem>>, vector<1x1x4xf32>
      %315 = vector.shape_cast %314 : vector<1x1x4xf32> to vector<1x4xf32>
      %316 = arith.index_cast %arg43 : i32 to index
      %c0_107 = arith.constant 0 : index
      %c0_108 = arith.constant 0 : index
      %317 = vector.load %arg15[%316, %c0_107, %c0_108] : memref<6x1x4xf32, #tpu.memory_space<vmem>>, vector<1x1x4xf32>
      %318 = vector.shape_cast %317 : vector<1x1x4xf32> to vector<1x4xf32>
      %cst_109 = arith.constant dense<0.000000e+00> : vector<16xf32>
      %319 = vector.multi_reduction <add>, %312, %cst_109 [1] : vector<16x4xf32> to vector<16xf32>
      %320 = vector.shape_cast %319 : vector<16xf32> to vector<16x1xf32>
      %cst_110 = arith.constant 4.000000e+00 : f32
      %321 = vector.broadcast %cst_110 : f32 to vector<16x1xf32>
      %322 = arith.divf %320, %321 : vector<16x1xf32>
      %323 = vector.broadcast %322 : vector<16x1xf32> to vector<16x4xf32>
      %324 = arith.subf %312, %323 : vector<16x4xf32>
      %325 = arith.mulf %324, %324 : vector<16x4xf32>
      %cst_111 = arith.constant dense<0.000000e+00> : vector<16xf32>
      %326 = vector.multi_reduction <add>, %325, %cst_111 [1] : vector<16x4xf32> to vector<16xf32>
      %327 = vector.shape_cast %326 : vector<16xf32> to vector<16x1xf32>
      %cst_112 = arith.constant 4.000000e+00 : f32
      %328 = vector.broadcast %cst_112 : f32 to vector<16x1xf32>
      %329 = arith.divf %327, %328 : vector<16x1xf32>
      %330 = vector.broadcast %322 : vector<16x1xf32> to vector<16x4xf32>
      %331 = arith.subf %312, %330 : vector<16x4xf32>
      %cst_113 = arith.constant 9.99999974E-6 : f32
      %332 = vector.broadcast %cst_113 : f32 to vector<16x1xf32>
      %333 = arith.addf %329, %332 : vector<16x1xf32>
      %334 = math.rsqrt %333 : vector<16x1xf32>
      %335 = vector.broadcast %334 : vector<16x1xf32> to vector<16x4xf32>
      %336 = arith.mulf %331, %335 : vector<16x4xf32>
      %337 = vector.broadcast %315 : vector<1x4xf32> to vector<16x4xf32>
      %338 = arith.mulf %336, %337 : vector<16x4xf32>
      %339 = vector.broadcast %318 : vector<1x4xf32> to vector<16x4xf32>
      %340 = arith.addf %338, %339 : vector<16x4xf32>
      scf.yield %340 : vector<16x4xf32>
    }
    %c6_i32_7 = arith.constant 6 : i32
    %c0_8 = arith.constant 0 : index
    %c0_9 = arith.constant 0 : index
    %6 = vector.load %arg36[%c0_8, %c0_9] : memref<1x4xf32, #tpu.memory_space<vmem>>, vector<1x4xf32>
    %c0_10 = arith.constant 0 : index
    %c0_11 = arith.constant 0 : index
    %7 = vector.load %arg37[%c0_10, %c0_11] : memref<1x4xf32, #tpu.memory_space<vmem>>, vector<1x4xf32>
    %cst = arith.constant dense<0.000000e+00> : vector<16xf32>
    %8 = vector.multi_reduction <add>, %5, %cst [1] : vector<16x4xf32> to vector<16xf32>
    %9 = vector.shape_cast %8 : vector<16xf32> to vector<16x1xf32>
    %cst_12 = arith.constant 4.000000e+00 : f32
    %10 = vector.broadcast %cst_12 : f32 to vector<16x1xf32>
    %11 = arith.divf %9, %10 : vector<16x1xf32>
    %12 = vector.broadcast %11 : vector<16x1xf32> to vector<16x4xf32>
    %13 = arith.subf %5, %12 : vector<16x4xf32>
    %14 = arith.mulf %13, %13 : vector<16x4xf32>
    %cst_13 = arith.constant dense<0.000000e+00> : vector<16xf32>
    %15 = vector.multi_reduction <add>, %14, %cst_13 [1] : vector<16x4xf32> to vector<16xf32>
    %16 = vector.shape_cast %15 : vector<16xf32> to vector<16x1xf32>
    %cst_14 = arith.constant 4.000000e+00 : f32
    %17 = vector.broadcast %cst_14 : f32 to vector<16x1xf32>
    %18 = arith.divf %16, %17 : vector<16x1xf32>
    %19 = vector.broadcast %11 : vector<16x1xf32> to vector<16x4xf32>
    %20 = arith.subf %5, %19 : vector<16x4xf32>
    %cst_15 = arith.constant 9.99999974E-6 : f32
    %21 = vector.broadcast %cst_15 : f32 to vector<16x1xf32>
    %22 = arith.addf %18, %21 : vector<16x1xf32>
    %23 = math.rsqrt %22 : vector<16x1xf32>
    %24 = vector.broadcast %23 : vector<16x1xf32> to vector<16x4xf32>
    %25 = arith.mulf %20, %24 : vector<16x4xf32>
    %26 = vector.broadcast %6 : vector<1x4xf32> to vector<16x4xf32>
    %27 = arith.mulf %25, %26 : vector<16x4xf32>
    %28 = vector.broadcast %7 : vector<1x4xf32> to vector<16x4xf32>
    %29 = arith.addf %27, %28 : vector<16x4xf32>
    %c0_i32_16 = arith.constant 0 : i32
    %c6_i32_17 = arith.constant 6 : i32
    %30 = arith.addi %c0_i32_16, %c6_i32_17 : i32
    %c1_i32_18 = arith.constant 1 : i32
    %31 = scf.for %arg43 = %c0_i32_16 to %30 step %c1_i32_18 iter_args(%arg44 = %1) -> (vector<12x4xf32>)  : i32 {
      %62 = arith.index_cast %arg43 : i32 to index
      %c0_36 = arith.constant 0 : index
      %c0_37 = arith.constant 0 : index
      %63 = vector.load %arg16[%62, %c0_36, %c0_37] : memref<6x4x12xf32, #tpu.memory_space<vmem>>, vector<1x4x12xf32>
      %64 = vector.shape_cast %63 : vector<1x4x12xf32> to vector<4x12xf32>
      %cst_38 = arith.constant dense<0.000000e+00> : vector<12x12xf32>
      %65 = tpu.matmul %arg44, %64, %cst_38 {dimension_numbers = #tpu.dot_dimension_numbers<[1], [0], [0], [1], [0, 0, 1, 1], [], []>} : vector<12x4xf32>, vector<4x12xf32>, vector<12x12xf32> -> vector<12x12xf32>
      %66 = arith.index_cast %arg43 : i32 to index
      %c0_39 = arith.constant 0 : index
      %c0_40 = arith.constant 0 : index
      %67 = vector.load %arg17[%66, %c0_39, %c0_40] : memref<6x1x12xf32, #tpu.memory_space<vmem>>, vector<1x1x12xf32>
      %68 = vector.shape_cast %67 : vector<1x1x12xf32> to vector<1x12xf32>
      %69 = vector.broadcast %68 : vector<1x12xf32> to vector<12x12xf32>
      %70 = arith.addf %65, %69 : vector<12x12xf32>
      %71 = vector.extract_strided_slice %70 {offsets = [0, 0], sizes = [12, 4], strides = [1, 1]} : vector<12x12xf32> to vector<12x4xf32>
      %72 = vector.extract_strided_slice %70 {offsets = [0, 4], sizes = [12, 4], strides = [1, 1]} : vector<12x12xf32> to vector<12x4xf32>
      %73 = vector.extract_strided_slice %70 {offsets = [0, 8], sizes = [12, 4], strides = [1, 1]} : vector<12x12xf32> to vector<12x4xf32>
      %74 = arith.index_cast %arg43 : i32 to index
      %c0_41 = arith.constant 0 : index
      %c0_42 = arith.constant 0 : index
      %75 = vector.load %arg18[%74, %c0_41, %c0_42] : memref<6x4x4xf32, #tpu.memory_space<vmem>>, vector<1x4x4xf32>
      %76 = vector.shape_cast %75 : vector<1x4x4xf32> to vector<4x4xf32>
      %77 = arith.index_cast %arg43 : i32 to index
      %c0_43 = arith.constant 0 : index
      %c0_44 = arith.constant 0 : index
      %78 = vector.load %arg19[%77, %c0_43, %c0_44] : memref<6x1x4xf32, #tpu.memory_space<vmem>>, vector<1x1x4xf32>
      %79 = vector.shape_cast %78 : vector<1x1x4xf32> to vector<1x4xf32>
      %80 = vector.extract_strided_slice %71 {offsets = [0, 0], sizes = [6, 4], strides = [1, 1]} : vector<12x4xf32> to vector<6x4xf32>
      %81 = vector.extract_strided_slice %72 {offsets = [0, 0], sizes = [6, 4], strides = [1, 1]} : vector<12x4xf32> to vector<6x4xf32>
      %82 = vector.extract_strided_slice %73 {offsets = [0, 0], sizes = [6, 4], strides = [1, 1]} : vector<12x4xf32> to vector<6x4xf32>
      %83 = vector.extract_strided_slice %80 {offsets = [0, 0], sizes = [6, 1], strides = [1, 1]} : vector<6x4xf32> to vector<6x1xf32>
      %cst_45 = arith.constant 1.000000e+00 : f32
      %84 = vector.broadcast %cst_45 : f32 to vector<6x1xf32>
      %85 = arith.mulf %83, %84 : vector<6x1xf32>
      %86 = vector.extract_strided_slice %81 {offsets = [0, 0], sizes = [6, 1], strides = [1, 1]} : vector<6x4xf32> to vector<6x1xf32>
      %87 = vector.extract_strided_slice %82 {offsets = [0, 0], sizes = [6, 1], strides = [1, 1]} : vector<6x4xf32> to vector<6x1xf32>
      "tpu.trace_start"() <{level = 10 : i32, message = "qd,kd->qk"}> : () -> ()
      %cst_46 = arith.constant dense<0.000000e+00> : vector<6x6xf32>
      %88 = tpu.matmul %85, %86, %cst_46 {dimension_numbers = #tpu.dot_dimension_numbers<[1], [1], [0], [0], [0, 0, 1, 0], [], []>} : vector<6x1xf32>, vector<6x1xf32>, vector<6x6xf32> -> vector<6x6xf32>
      "tpu.trace_stop"() : () -> ()
      %89 = arith.addf %88, %3 : vector<6x6xf32>
      %cst_47 = arith.constant dense<0xFF800000> : vector<6xf32>
      %90 = vector.multi_reduction <maximumf>, %89, %cst_47 [1] : vector<6x6xf32> to vector<6xf32>
      %91 = vector.shape_cast %90 : vector<6xf32> to vector<6x1xf32>
      %92 = vector.broadcast %91 : vector<6x1xf32> to vector<6x6xf32>
      %93 = arith.subf %89, %92 : vector<6x6xf32>
      %94 = math.exp %93 : vector<6x6xf32>
      %cst_48 = arith.constant dense<0.000000e+00> : vector<6xf32>
      %95 = vector.multi_reduction <add>, %94, %cst_48 [1] : vector<6x6xf32> to vector<6xf32>
      %96 = vector.shape_cast %95 : vector<6xf32> to vector<6x1xf32>
      %97 = vector.broadcast %96 : vector<6x1xf32> to vector<6x6xf32>
      %98 = arith.divf %94, %97 : vector<6x6xf32>
      %cst_49 = arith.constant dense<0.000000e+00> : vector<6x1xf32>
      %99 = tpu.matmul %98, %87, %cst_49 {dimension_numbers = #tpu.dot_dimension_numbers<[1], [0], [0], [1], [0, 0, 1, 1], [], []>} : vector<6x6xf32>, vector<6x1xf32>, vector<6x1xf32> -> vector<6x1xf32>
      %100 = vector.extract_strided_slice %76 {offsets = [0, 0], sizes = [1, 4], strides = [1, 1]} : vector<4x4xf32> to vector<1x4xf32>
      %101 = vector.broadcast %99 : vector<6x1xf32> to vector<6x4xf32>
      %102 = vector.broadcast %100 : vector<1x4xf32> to vector<6x4xf32>
      %103 = arith.mulf %101, %102 : vector<6x4xf32>
      %104 = vector.extract_strided_slice %80 {offsets = [0, 1], sizes = [6, 1], strides = [1, 1]} : vector<6x4xf32> to vector<6x1xf32>
      %cst_50 = arith.constant 1.000000e+00 : f32
      %105 = vector.broadcast %cst_50 : f32 to vector<6x1xf32>
      %106 = arith.mulf %104, %105 : vector<6x1xf32>
      %107 = vector.extract_strided_slice %81 {offsets = [0, 1], sizes = [6, 1], strides = [1, 1]} : vector<6x4xf32> to vector<6x1xf32>
      %108 = vector.extract_strided_slice %82 {offsets = [0, 1], sizes = [6, 1], strides = [1, 1]} : vector<6x4xf32> to vector<6x1xf32>
      "tpu.trace_start"() <{level = 10 : i32, message = "qd,kd->qk"}> : () -> ()
      %cst_51 = arith.constant dense<0.000000e+00> : vector<6x6xf32>
      %109 = tpu.matmul %106, %107, %cst_51 {dimension_numbers = #tpu.dot_dimension_numbers<[1], [1], [0], [0], [0, 0, 1, 0], [], []>} : vector<6x1xf32>, vector<6x1xf32>, vector<6x6xf32> -> vector<6x6xf32>
      "tpu.trace_stop"() : () -> ()
      %110 = arith.addf %109, %3 : vector<6x6xf32>
      %cst_52 = arith.constant dense<0xFF800000> : vector<6xf32>
      %111 = vector.multi_reduction <maximumf>, %110, %cst_52 [1] : vector<6x6xf32> to vector<6xf32>
      %112 = vector.shape_cast %111 : vector<6xf32> to vector<6x1xf32>
      %113 = vector.broadcast %112 : vector<6x1xf32> to vector<6x6xf32>
      %114 = arith.subf %110, %113 : vector<6x6xf32>
      %115 = math.exp %114 : vector<6x6xf32>
      %cst_53 = arith.constant dense<0.000000e+00> : vector<6xf32>
      %116 = vector.multi_reduction <add>, %115, %cst_53 [1] : vector<6x6xf32> to vector<6xf32>
      %117 = vector.shape_cast %116 : vector<6xf32> to vector<6x1xf32>
      %118 = vector.broadcast %117 : vector<6x1xf32> to vector<6x6xf32>
      %119 = arith.divf %115, %118 : vector<6x6xf32>
      %cst_54 = arith.constant dense<0.000000e+00> : vector<6x1xf32>
      %120 = tpu.matmul %119, %108, %cst_54 {dimension_numbers = #tpu.dot_dimension_numbers<[1], [0], [0], [1], [0, 0, 1, 1], [], []>} : vector<6x6xf32>, vector<6x1xf32>, vector<6x1xf32> -> vector<6x1xf32>
      %121 = vector.extract_strided_slice %76 {offsets = [1, 0], sizes = [1, 4], strides = [1, 1]} : vector<4x4xf32> to vector<1x4xf32>
      %122 = vector.broadcast %120 : vector<6x1xf32> to vector<6x4xf32>
      %123 = vector.broadcast %121 : vector<1x4xf32> to vector<6x4xf32>
      %124 = arith.mulf %122, %123 : vector<6x4xf32>
      %125 = arith.addf %103, %124 : vector<6x4xf32>
      %126 = vector.extract_strided_slice %80 {offsets = [0, 2], sizes = [6, 1], strides = [1, 1]} : vector<6x4xf32> to vector<6x1xf32>
      %cst_55 = arith.constant 1.000000e+00 : f32
      %127 = vector.broadcast %cst_55 : f32 to vector<6x1xf32>
      %128 = arith.mulf %126, %127 : vector<6x1xf32>
      %129 = vector.extract_strided_slice %81 {offsets = [0, 2], sizes = [6, 1], strides = [1, 1]} : vector<6x4xf32> to vector<6x1xf32>
      %130 = vector.extract_strided_slice %82 {offsets = [0, 2], sizes = [6, 1], strides = [1, 1]} : vector<6x4xf32> to vector<6x1xf32>
      "tpu.trace_start"() <{level = 10 : i32, message = "qd,kd->qk"}> : () -> ()
      %cst_56 = arith.constant dense<0.000000e+00> : vector<6x6xf32>
      %131 = tpu.matmul %128, %129, %cst_56 {dimension_numbers = #tpu.dot_dimension_numbers<[1], [1], [0], [0], [0, 0, 1, 0], [], []>} : vector<6x1xf32>, vector<6x1xf32>, vector<6x6xf32> -> vector<6x6xf32>
      "tpu.trace_stop"() : () -> ()
      %132 = arith.addf %131, %3 : vector<6x6xf32>
      %cst_57 = arith.constant dense<0xFF800000> : vector<6xf32>
      %133 = vector.multi_reduction <maximumf>, %132, %cst_57 [1] : vector<6x6xf32> to vector<6xf32>
      %134 = vector.shape_cast %133 : vector<6xf32> to vector<6x1xf32>
      %135 = vector.broadcast %134 : vector<6x1xf32> to vector<6x6xf32>
      %136 = arith.subf %132, %135 : vector<6x6xf32>
      %137 = math.exp %136 : vector<6x6xf32>
      %cst_58 = arith.constant dense<0.000000e+00> : vector<6xf32>
      %138 = vector.multi_reduction <add>, %137, %cst_58 [1] : vector<6x6xf32> to vector<6xf32>
      %139 = vector.shape_cast %138 : vector<6xf32> to vector<6x1xf32>
      %140 = vector.broadcast %139 : vector<6x1xf32> to vector<6x6xf32>
      %141 = arith.divf %137, %140 : vector<6x6xf32>
      %cst_59 = arith.constant dense<0.000000e+00> : vector<6x1xf32>
      %142 = tpu.matmul %141, %130, %cst_59 {dimension_numbers = #tpu.dot_dimension_numbers<[1], [0], [0], [1], [0, 0, 1, 1], [], []>} : vector<6x6xf32>, vector<6x1xf32>, vector<6x1xf32> -> vector<6x1xf32>
      %143 = vector.extract_strided_slice %76 {offsets = [2, 0], sizes = [1, 4], strides = [1, 1]} : vector<4x4xf32> to vector<1x4xf32>
      %144 = vector.broadcast %142 : vector<6x1xf32> to vector<6x4xf32>
      %145 = vector.broadcast %143 : vector<1x4xf32> to vector<6x4xf32>
      %146 = arith.mulf %144, %145 : vector<6x4xf32>
      %147 = arith.addf %125, %146 : vector<6x4xf32>
      %148 = vector.extract_strided_slice %80 {offsets = [0, 3], sizes = [6, 1], strides = [1, 1]} : vector<6x4xf32> to vector<6x1xf32>
      %cst_60 = arith.constant 1.000000e+00 : f32
      %149 = vector.broadcast %cst_60 : f32 to vector<6x1xf32>
      %150 = arith.mulf %148, %149 : vector<6x1xf32>
      %151 = vector.extract_strided_slice %81 {offsets = [0, 3], sizes = [6, 1], strides = [1, 1]} : vector<6x4xf32> to vector<6x1xf32>
      %152 = vector.extract_strided_slice %82 {offsets = [0, 3], sizes = [6, 1], strides = [1, 1]} : vector<6x4xf32> to vector<6x1xf32>
      "tpu.trace_start"() <{level = 10 : i32, message = "qd,kd->qk"}> : () -> ()
      %cst_61 = arith.constant dense<0.000000e+00> : vector<6x6xf32>
      %153 = tpu.matmul %150, %151, %cst_61 {dimension_numbers = #tpu.dot_dimension_numbers<[1], [1], [0], [0], [0, 0, 1, 0], [], []>} : vector<6x1xf32>, vector<6x1xf32>, vector<6x6xf32> -> vector<6x6xf32>
      "tpu.trace_stop"() : () -> ()
      %154 = arith.addf %153, %3 : vector<6x6xf32>
      %cst_62 = arith.constant dense<0xFF800000> : vector<6xf32>
      %155 = vector.multi_reduction <maximumf>, %154, %cst_62 [1] : vector<6x6xf32> to vector<6xf32>
      %156 = vector.shape_cast %155 : vector<6xf32> to vector<6x1xf32>
      %157 = vector.broadcast %156 : vector<6x1xf32> to vector<6x6xf32>
      %158 = arith.subf %154, %157 : vector<6x6xf32>
      %159 = math.exp %158 : vector<6x6xf32>
      %cst_63 = arith.constant dense<0.000000e+00> : vector<6xf32>
      %160 = vector.multi_reduction <add>, %159, %cst_63 [1] : vector<6x6xf32> to vector<6xf32>
      %161 = vector.shape_cast %160 : vector<6xf32> to vector<6x1xf32>
      %162 = vector.broadcast %161 : vector<6x1xf32> to vector<6x6xf32>
      %163 = arith.divf %159, %162 : vector<6x6xf32>
      %cst_64 = arith.constant dense<0.000000e+00> : vector<6x1xf32>
      %164 = tpu.matmul %163, %152, %cst_64 {dimension_numbers = #tpu.dot_dimension_numbers<[1], [0], [0], [1], [0, 0, 1, 1], [], []>} : vector<6x6xf32>, vector<6x1xf32>, vector<6x1xf32> -> vector<6x1xf32>
      %165 = vector.extract_strided_slice %76 {offsets = [3, 0], sizes = [1, 4], strides = [1, 1]} : vector<4x4xf32> to vector<1x4xf32>
      %166 = vector.broadcast %164 : vector<6x1xf32> to vector<6x4xf32>
      %167 = vector.broadcast %165 : vector<1x4xf32> to vector<6x4xf32>
      %168 = arith.mulf %166, %167 : vector<6x4xf32>
      %169 = arith.addf %147, %168 : vector<6x4xf32>
      %170 = vector.extract_strided_slice %71 {offsets = [6, 0], sizes = [6, 4], strides = [1, 1]} : vector<12x4xf32> to vector<6x4xf32>
      %171 = vector.extract_strided_slice %72 {offsets = [6, 0], sizes = [6, 4], strides = [1, 1]} : vector<12x4xf32> to vector<6x4xf32>
      %172 = vector.extract_strided_slice %73 {offsets = [6, 0], sizes = [6, 4], strides = [1, 1]} : vector<12x4xf32> to vector<6x4xf32>
      %173 = vector.extract_strided_slice %170 {offsets = [0, 0], sizes = [6, 1], strides = [1, 1]} : vector<6x4xf32> to vector<6x1xf32>
      %cst_65 = arith.constant 1.000000e+00 : f32
      %174 = vector.broadcast %cst_65 : f32 to vector<6x1xf32>
      %175 = arith.mulf %173, %174 : vector<6x1xf32>
      %176 = vector.extract_strided_slice %171 {offsets = [0, 0], sizes = [6, 1], strides = [1, 1]} : vector<6x4xf32> to vector<6x1xf32>
      %177 = vector.extract_strided_slice %172 {offsets = [0, 0], sizes = [6, 1], strides = [1, 1]} : vector<6x4xf32> to vector<6x1xf32>
      "tpu.trace_start"() <{level = 10 : i32, message = "qd,kd->qk"}> : () -> ()
      %cst_66 = arith.constant dense<0.000000e+00> : vector<6x6xf32>
      %178 = tpu.matmul %175, %176, %cst_66 {dimension_numbers = #tpu.dot_dimension_numbers<[1], [1], [0], [0], [0, 0, 1, 0], [], []>} : vector<6x1xf32>, vector<6x1xf32>, vector<6x6xf32> -> vector<6x6xf32>
      "tpu.trace_stop"() : () -> ()
      %179 = arith.addf %178, %3 : vector<6x6xf32>
      %cst_67 = arith.constant dense<0xFF800000> : vector<6xf32>
      %180 = vector.multi_reduction <maximumf>, %179, %cst_67 [1] : vector<6x6xf32> to vector<6xf32>
      %181 = vector.shape_cast %180 : vector<6xf32> to vector<6x1xf32>
      %182 = vector.broadcast %181 : vector<6x1xf32> to vector<6x6xf32>
      %183 = arith.subf %179, %182 : vector<6x6xf32>
      %184 = math.exp %183 : vector<6x6xf32>
      %cst_68 = arith.constant dense<0.000000e+00> : vector<6xf32>
      %185 = vector.multi_reduction <add>, %184, %cst_68 [1] : vector<6x6xf32> to vector<6xf32>
      %186 = vector.shape_cast %185 : vector<6xf32> to vector<6x1xf32>
      %187 = vector.broadcast %186 : vector<6x1xf32> to vector<6x6xf32>
      %188 = arith.divf %184, %187 : vector<6x6xf32>
      %cst_69 = arith.constant dense<0.000000e+00> : vector<6x1xf32>
      %189 = tpu.matmul %188, %177, %cst_69 {dimension_numbers = #tpu.dot_dimension_numbers<[1], [0], [0], [1], [0, 0, 1, 1], [], []>} : vector<6x6xf32>, vector<6x1xf32>, vector<6x1xf32> -> vector<6x1xf32>
      %190 = vector.extract_strided_slice %76 {offsets = [0, 0], sizes = [1, 4], strides = [1, 1]} : vector<4x4xf32> to vector<1x4xf32>
      %191 = vector.broadcast %189 : vector<6x1xf32> to vector<6x4xf32>
      %192 = vector.broadcast %190 : vector<1x4xf32> to vector<6x4xf32>
      %193 = arith.mulf %191, %192 : vector<6x4xf32>
      %194 = vector.extract_strided_slice %170 {offsets = [0, 1], sizes = [6, 1], strides = [1, 1]} : vector<6x4xf32> to vector<6x1xf32>
      %cst_70 = arith.constant 1.000000e+00 : f32
      %195 = vector.broadcast %cst_70 : f32 to vector<6x1xf32>
      %196 = arith.mulf %194, %195 : vector<6x1xf32>
      %197 = vector.extract_strided_slice %171 {offsets = [0, 1], sizes = [6, 1], strides = [1, 1]} : vector<6x4xf32> to vector<6x1xf32>
      %198 = vector.extract_strided_slice %172 {offsets = [0, 1], sizes = [6, 1], strides = [1, 1]} : vector<6x4xf32> to vector<6x1xf32>
      "tpu.trace_start"() <{level = 10 : i32, message = "qd,kd->qk"}> : () -> ()
      %cst_71 = arith.constant dense<0.000000e+00> : vector<6x6xf32>
      %199 = tpu.matmul %196, %197, %cst_71 {dimension_numbers = #tpu.dot_dimension_numbers<[1], [1], [0], [0], [0, 0, 1, 0], [], []>} : vector<6x1xf32>, vector<6x1xf32>, vector<6x6xf32> -> vector<6x6xf32>
      "tpu.trace_stop"() : () -> ()
      %200 = arith.addf %199, %3 : vector<6x6xf32>
      %cst_72 = arith.constant dense<0xFF800000> : vector<6xf32>
      %201 = vector.multi_reduction <maximumf>, %200, %cst_72 [1] : vector<6x6xf32> to vector<6xf32>
      %202 = vector.shape_cast %201 : vector<6xf32> to vector<6x1xf32>
      %203 = vector.broadcast %202 : vector<6x1xf32> to vector<6x6xf32>
      %204 = arith.subf %200, %203 : vector<6x6xf32>
      %205 = math.exp %204 : vector<6x6xf32>
      %cst_73 = arith.constant dense<0.000000e+00> : vector<6xf32>
      %206 = vector.multi_reduction <add>, %205, %cst_73 [1] : vector<6x6xf32> to vector<6xf32>
      %207 = vector.shape_cast %206 : vector<6xf32> to vector<6x1xf32>
      %208 = vector.broadcast %207 : vector<6x1xf32> to vector<6x6xf32>
      %209 = arith.divf %205, %208 : vector<6x6xf32>
      %cst_74 = arith.constant dense<0.000000e+00> : vector<6x1xf32>
      %210 = tpu.matmul %209, %198, %cst_74 {dimension_numbers = #tpu.dot_dimension_numbers<[1], [0], [0], [1], [0, 0, 1, 1], [], []>} : vector<6x6xf32>, vector<6x1xf32>, vector<6x1xf32> -> vector<6x1xf32>
      %211 = vector.extract_strided_slice %76 {offsets = [1, 0], sizes = [1, 4], strides = [1, 1]} : vector<4x4xf32> to vector<1x4xf32>
      %212 = vector.broadcast %210 : vector<6x1xf32> to vector<6x4xf32>
      %213 = vector.broadcast %211 : vector<1x4xf32> to vector<6x4xf32>
      %214 = arith.mulf %212, %213 : vector<6x4xf32>
      %215 = arith.addf %193, %214 : vector<6x4xf32>
      %216 = vector.extract_strided_slice %170 {offsets = [0, 2], sizes = [6, 1], strides = [1, 1]} : vector<6x4xf32> to vector<6x1xf32>
      %cst_75 = arith.constant 1.000000e+00 : f32
      %217 = vector.broadcast %cst_75 : f32 to vector<6x1xf32>
      %218 = arith.mulf %216, %217 : vector<6x1xf32>
      %219 = vector.extract_strided_slice %171 {offsets = [0, 2], sizes = [6, 1], strides = [1, 1]} : vector<6x4xf32> to vector<6x1xf32>
      %220 = vector.extract_strided_slice %172 {offsets = [0, 2], sizes = [6, 1], strides = [1, 1]} : vector<6x4xf32> to vector<6x1xf32>
      "tpu.trace_start"() <{level = 10 : i32, message = "qd,kd->qk"}> : () -> ()
      %cst_76 = arith.constant dense<0.000000e+00> : vector<6x6xf32>
      %221 = tpu.matmul %218, %219, %cst_76 {dimension_numbers = #tpu.dot_dimension_numbers<[1], [1], [0], [0], [0, 0, 1, 0], [], []>} : vector<6x1xf32>, vector<6x1xf32>, vector<6x6xf32> -> vector<6x6xf32>
      "tpu.trace_stop"() : () -> ()
      %222 = arith.addf %221, %3 : vector<6x6xf32>
      %cst_77 = arith.constant dense<0xFF800000> : vector<6xf32>
      %223 = vector.multi_reduction <maximumf>, %222, %cst_77 [1] : vector<6x6xf32> to vector<6xf32>
      %224 = vector.shape_cast %223 : vector<6xf32> to vector<6x1xf32>
      %225 = vector.broadcast %224 : vector<6x1xf32> to vector<6x6xf32>
      %226 = arith.subf %222, %225 : vector<6x6xf32>
      %227 = math.exp %226 : vector<6x6xf32>
      %cst_78 = arith.constant dense<0.000000e+00> : vector<6xf32>
      %228 = vector.multi_reduction <add>, %227, %cst_78 [1] : vector<6x6xf32> to vector<6xf32>
      %229 = vector.shape_cast %228 : vector<6xf32> to vector<6x1xf32>
      %230 = vector.broadcast %229 : vector<6x1xf32> to vector<6x6xf32>
      %231 = arith.divf %227, %230 : vector<6x6xf32>
      %cst_79 = arith.constant dense<0.000000e+00> : vector<6x1xf32>
      %232 = tpu.matmul %231, %220, %cst_79 {dimension_numbers = #tpu.dot_dimension_numbers<[1], [0], [0], [1], [0, 0, 1, 1], [], []>} : vector<6x6xf32>, vector<6x1xf32>, vector<6x1xf32> -> vector<6x1xf32>
      %233 = vector.extract_strided_slice %76 {offsets = [2, 0], sizes = [1, 4], strides = [1, 1]} : vector<4x4xf32> to vector<1x4xf32>
      %234 = vector.broadcast %232 : vector<6x1xf32> to vector<6x4xf32>
      %235 = vector.broadcast %233 : vector<1x4xf32> to vector<6x4xf32>
      %236 = arith.mulf %234, %235 : vector<6x4xf32>
      %237 = arith.addf %215, %236 : vector<6x4xf32>
      %238 = vector.extract_strided_slice %170 {offsets = [0, 3], sizes = [6, 1], strides = [1, 1]} : vector<6x4xf32> to vector<6x1xf32>
      %cst_80 = arith.constant 1.000000e+00 : f32
      %239 = vector.broadcast %cst_80 : f32 to vector<6x1xf32>
      %240 = arith.mulf %238, %239 : vector<6x1xf32>
      %241 = vector.extract_strided_slice %171 {offsets = [0, 3], sizes = [6, 1], strides = [1, 1]} : vector<6x4xf32> to vector<6x1xf32>
      %242 = vector.extract_strided_slice %172 {offsets = [0, 3], sizes = [6, 1], strides = [1, 1]} : vector<6x4xf32> to vector<6x1xf32>
      "tpu.trace_start"() <{level = 10 : i32, message = "qd,kd->qk"}> : () -> ()
      %cst_81 = arith.constant dense<0.000000e+00> : vector<6x6xf32>
      %243 = tpu.matmul %240, %241, %cst_81 {dimension_numbers = #tpu.dot_dimension_numbers<[1], [1], [0], [0], [0, 0, 1, 0], [], []>} : vector<6x1xf32>, vector<6x1xf32>, vector<6x6xf32> -> vector<6x6xf32>
      "tpu.trace_stop"() : () -> ()
      %244 = arith.addf %243, %3 : vector<6x6xf32>
      %cst_82 = arith.constant dense<0xFF800000> : vector<6xf32>
      %245 = vector.multi_reduction <maximumf>, %244, %cst_82 [1] : vector<6x6xf32> to vector<6xf32>
      %246 = vector.shape_cast %245 : vector<6xf32> to vector<6x1xf32>
      %247 = vector.broadcast %246 : vector<6x1xf32> to vector<6x6xf32>
      %248 = arith.subf %244, %247 : vector<6x6xf32>
      %249 = math.exp %248 : vector<6x6xf32>
      %cst_83 = arith.constant dense<0.000000e+00> : vector<6xf32>
      %250 = vector.multi_reduction <add>, %249, %cst_83 [1] : vector<6x6xf32> to vector<6xf32>
      %251 = vector.shape_cast %250 : vector<6xf32> to vector<6x1xf32>
      %252 = vector.broadcast %251 : vector<6x1xf32> to vector<6x6xf32>
      %253 = arith.divf %249, %252 : vector<6x6xf32>
      %cst_84 = arith.constant dense<0.000000e+00> : vector<6x1xf32>
      %254 = tpu.matmul %253, %242, %cst_84 {dimension_numbers = #tpu.dot_dimension_numbers<[1], [0], [0], [1], [0, 0, 1, 1], [], []>} : vector<6x6xf32>, vector<6x1xf32>, vector<6x1xf32> -> vector<6x1xf32>
      %255 = vector.extract_strided_slice %76 {offsets = [3, 0], sizes = [1, 4], strides = [1, 1]} : vector<4x4xf32> to vector<1x4xf32>
      %256 = vector.broadcast %254 : vector<6x1xf32> to vector<6x4xf32>
      %257 = vector.broadcast %255 : vector<1x4xf32> to vector<6x4xf32>
      %258 = arith.mulf %256, %257 : vector<6x4xf32>
      %259 = arith.addf %237, %258 : vector<6x4xf32>
      %260 = tpu.concatenate %169, %259 in 0 : vector<6x4xf32>, vector<6x4xf32> -> vector<12x4xf32>
      %261 = vector.broadcast %79 : vector<1x4xf32> to vector<12x4xf32>
      %262 = arith.addf %260, %261 : vector<12x4xf32>
      %263 = arith.addf %arg44, %262 : vector<12x4xf32>
      %264 = arith.index_cast %arg43 : i32 to index
      %c0_85 = arith.constant 0 : index
      %c0_86 = arith.constant 0 : index
      %265 = vector.load %arg26[%264, %c0_85, %c0_86] : memref<6x1x4xf32, #tpu.memory_space<vmem>>, vector<1x1x4xf32>
      %266 = vector.shape_cast %265 : vector<1x1x4xf32> to vector<1x4xf32>
      %267 = arith.index_cast %arg43 : i32 to index
      %c0_87 = arith.constant 0 : index
      %c0_88 = arith.constant 0 : index
      %268 = vector.load %arg27[%267, %c0_87, %c0_88] : memref<6x1x4xf32, #tpu.memory_space<vmem>>, vector<1x1x4xf32>
      %269 = vector.shape_cast %268 : vector<1x1x4xf32> to vector<1x4xf32>
      %cst_89 = arith.constant dense<0.000000e+00> : vector<12xf32>
      %270 = vector.multi_reduction <add>, %263, %cst_89 [1] : vector<12x4xf32> to vector<12xf32>
      %271 = vector.shape_cast %270 : vector<12xf32> to vector<12x1xf32>
      %cst_90 = arith.constant 4.000000e+00 : f32
      %272 = vector.broadcast %cst_90 : f32 to vector<12x1xf32>
      %273 = arith.divf %271, %272 : vector<12x1xf32>
      %274 = vector.broadcast %273 : vector<12x1xf32> to vector<12x4xf32>
      %275 = arith.subf %263, %274 : vector<12x4xf32>
      %276 = arith.mulf %275, %275 : vector<12x4xf32>
      %cst_91 = arith.constant dense<0.000000e+00> : vector<12xf32>
      %277 = vector.multi_reduction <add>, %276, %cst_91 [1] : vector<12x4xf32> to vector<12xf32>
      %278 = vector.shape_cast %277 : vector<12xf32> to vector<12x1xf32>
      %cst_92 = arith.constant 4.000000e+00 : f32
      %279 = vector.broadcast %cst_92 : f32 to vector<12x1xf32>
      %280 = arith.divf %278, %279 : vector<12x1xf32>
      %281 = vector.broadcast %273 : vector<12x1xf32> to vector<12x4xf32>
      %282 = arith.subf %263, %281 : vector<12x4xf32>
      %cst_93 = arith.constant 9.99999974E-6 : f32
      %283 = vector.broadcast %cst_93 : f32 to vector<12x1xf32>
      %284 = arith.addf %280, %283 : vector<12x1xf32>
      %285 = math.rsqrt %284 : vector<12x1xf32>
      %286 = vector.broadcast %285 : vector<12x1xf32> to vector<12x4xf32>
      %287 = arith.mulf %282, %286 : vector<12x4xf32>
      %288 = vector.broadcast %266 : vector<1x4xf32> to vector<12x4xf32>
      %289 = arith.mulf %287, %288 : vector<12x4xf32>
      %290 = vector.broadcast %269 : vector<1x4xf32> to vector<12x4xf32>
      %291 = arith.addf %289, %290 : vector<12x4xf32>
      %292 = arith.index_cast %arg43 : i32 to index
      %c0_94 = arith.constant 0 : index
      %c0_95 = arith.constant 0 : index
      %293 = vector.load %arg20[%292, %c0_94, %c0_95] : memref<6x4x4xf32, #tpu.memory_space<vmem>>, vector<1x4x4xf32>
      %294 = vector.shape_cast %293 : vector<1x4x4xf32> to vector<4x4xf32>
      %cst_96 = arith.constant dense<0.000000e+00> : vector<12x4xf32>
      %295 = tpu.matmul %291, %294, %cst_96 {dimension_numbers = #tpu.dot_dimension_numbers<[1], [0], [0], [1], [0, 0, 1, 1], [], []>} : vector<12x4xf32>, vector<4x4xf32>, vector<12x4xf32> -> vector<12x4xf32>
      %296 = arith.index_cast %arg43 : i32 to index
      %c0_97 = arith.constant 0 : index
      %c0_98 = arith.constant 0 : index
      %297 = vector.load %arg21[%296, %c0_97, %c0_98] : memref<6x1x4xf32, #tpu.memory_space<vmem>>, vector<1x1x4xf32>
      %298 = vector.shape_cast %297 : vector<1x1x4xf32> to vector<1x4xf32>
      %299 = vector.broadcast %298 : vector<1x4xf32> to vector<12x4xf32>
      %300 = arith.addf %295, %299 : vector<12x4xf32>
      %301 = arith.index_cast %arg43 : i32 to index
      %c0_99 = arith.constant 0 : index
      %c0_100 = arith.constant 0 : index
      %302 = vector.load %arg22[%301, %c0_99, %c0_100] : memref<6x4x8xf32, #tpu.memory_space<vmem>>, vector<1x4x8xf32>
      %303 = vector.shape_cast %302 : vector<1x4x8xf32> to vector<4x8xf32>
      %cst_101 = arith.constant dense<0.000000e+00> : vector<16x8xf32>
      %304 = tpu.matmul %29, %303, %cst_101 {dimension_numbers = #tpu.dot_dimension_numbers<[1], [0], [0], [1], [0, 0, 1, 1], [], []>} : vector<16x4xf32>, vector<4x8xf32>, vector<16x8xf32> -> vector<16x8xf32>
      %305 = arith.index_cast %arg43 : i32 to index
      %c0_102 = arith.constant 0 : index
      %c0_103 = arith.constant 0 : index
      %306 = vector.load %arg23[%305, %c0_102, %c0_103] : memref<6x1x8xf32, #tpu.memory_space<vmem>>, vector<1x1x8xf32>
      %307 = vector.shape_cast %306 : vector<1x1x8xf32> to vector<1x8xf32>
      %308 = vector.broadcast %307 : vector<1x8xf32> to vector<16x8xf32>
      %309 = arith.addf %304, %308 : vector<16x8xf32>
      %310 = vector.extract_strided_slice %309 {offsets = [0, 0], sizes = [16, 4], strides = [1, 1]} : vector<16x8xf32> to vector<16x4xf32>
      %311 = vector.extract_strided_slice %309 {offsets = [0, 4], sizes = [16, 4], strides = [1, 1]} : vector<16x8xf32> to vector<16x4xf32>
      %312 = arith.index_cast %arg43 : i32 to index
      %c0_104 = arith.constant 0 : index
      %c0_105 = arith.constant 0 : index
      %313 = vector.load %arg24[%312, %c0_104, %c0_105] : memref<6x4x4xf32, #tpu.memory_space<vmem>>, vector<1x4x4xf32>
      %314 = vector.shape_cast %313 : vector<1x4x4xf32> to vector<4x4xf32>
      %315 = arith.index_cast %arg43 : i32 to index
      %c0_106 = arith.constant 0 : index
      %c0_107 = arith.constant 0 : index
      %316 = vector.load %arg25[%315, %c0_106, %c0_107] : memref<6x1x4xf32, #tpu.memory_space<vmem>>, vector<1x1x4xf32>
      %317 = vector.shape_cast %316 : vector<1x1x4xf32> to vector<1x4xf32>
      %318 = vector.extract_strided_slice %300 {offsets = [0, 0], sizes = [6, 4], strides = [1, 1]} : vector<12x4xf32> to vector<6x4xf32>
      %319 = vector.extract_strided_slice %310 {offsets = [0, 0], sizes = [8, 4], strides = [1, 1]} : vector<16x4xf32> to vector<8x4xf32>
      %320 = vector.extract_strided_slice %311 {offsets = [0, 0], sizes = [8, 4], strides = [1, 1]} : vector<16x4xf32> to vector<8x4xf32>
      %321 = vector.extract_strided_slice %318 {offsets = [0, 0], sizes = [6, 1], strides = [1, 1]} : vector<6x4xf32> to vector<6x1xf32>
      %cst_108 = arith.constant 1.000000e+00 : f32
      %322 = vector.broadcast %cst_108 : f32 to vector<6x1xf32>
      %323 = arith.mulf %321, %322 : vector<6x1xf32>
      %324 = vector.extract_strided_slice %319 {offsets = [0, 0], sizes = [8, 1], strides = [1, 1]} : vector<8x4xf32> to vector<8x1xf32>
      %325 = vector.extract_strided_slice %320 {offsets = [0, 0], sizes = [8, 1], strides = [1, 1]} : vector<8x4xf32> to vector<8x1xf32>
      "tpu.trace_start"() <{level = 10 : i32, message = "qd,kd->qk"}> : () -> ()
      %cst_109 = arith.constant dense<0.000000e+00> : vector<6x8xf32>
      %326 = tpu.matmul %323, %324, %cst_109 {dimension_numbers = #tpu.dot_dimension_numbers<[1], [1], [0], [0], [0, 0, 1, 0], [], []>} : vector<6x1xf32>, vector<8x1xf32>, vector<6x8xf32> -> vector<6x8xf32>
      "tpu.trace_stop"() : () -> ()
      %cst_110 = arith.constant dense<0xFF800000> : vector<6xf32>
      %327 = vector.multi_reduction <maximumf>, %326, %cst_110 [1] : vector<6x8xf32> to vector<6xf32>
      %328 = vector.shape_cast %327 : vector<6xf32> to vector<6x1xf32>
      %329 = vector.broadcast %328 : vector<6x1xf32> to vector<6x8xf32>
      %330 = arith.subf %326, %329 : vector<6x8xf32>
      %331 = math.exp %330 : vector<6x8xf32>
      %cst_111 = arith.constant dense<0.000000e+00> : vector<6xf32>
      %332 = vector.multi_reduction <add>, %331, %cst_111 [1] : vector<6x8xf32> to vector<6xf32>
      %333 = vector.shape_cast %332 : vector<6xf32> to vector<6x1xf32>
      %334 = vector.broadcast %333 : vector<6x1xf32> to vector<6x8xf32>
      %335 = arith.divf %331, %334 : vector<6x8xf32>
      %cst_112 = arith.constant dense<0.000000e+00> : vector<6x1xf32>
      %336 = tpu.matmul %335, %325, %cst_112 {dimension_numbers = #tpu.dot_dimension_numbers<[1], [0], [0], [1], [0, 0, 1, 1], [], []>} : vector<6x8xf32>, vector<8x1xf32>, vector<6x1xf32> -> vector<6x1xf32>
      %337 = vector.extract_strided_slice %314 {offsets = [0, 0], sizes = [1, 4], strides = [1, 1]} : vector<4x4xf32> to vector<1x4xf32>
      %338 = vector.broadcast %336 : vector<6x1xf32> to vector<6x4xf32>
      %339 = vector.broadcast %337 : vector<1x4xf32> to vector<6x4xf32>
      %340 = arith.mulf %338, %339 : vector<6x4xf32>
      %341 = vector.extract_strided_slice %318 {offsets = [0, 1], sizes = [6, 1], strides = [1, 1]} : vector<6x4xf32> to vector<6x1xf32>
      %cst_113 = arith.constant 1.000000e+00 : f32
      %342 = vector.broadcast %cst_113 : f32 to vector<6x1xf32>
      %343 = arith.mulf %341, %342 : vector<6x1xf32>
      %344 = vector.extract_strided_slice %319 {offsets = [0, 1], sizes = [8, 1], strides = [1, 1]} : vector<8x4xf32> to vector<8x1xf32>
      %345 = vector.extract_strided_slice %320 {offsets = [0, 1], sizes = [8, 1], strides = [1, 1]} : vector<8x4xf32> to vector<8x1xf32>
      "tpu.trace_start"() <{level = 10 : i32, message = "qd,kd->qk"}> : () -> ()
      %cst_114 = arith.constant dense<0.000000e+00> : vector<6x8xf32>
      %346 = tpu.matmul %343, %344, %cst_114 {dimension_numbers = #tpu.dot_dimension_numbers<[1], [1], [0], [0], [0, 0, 1, 0], [], []>} : vector<6x1xf32>, vector<8x1xf32>, vector<6x8xf32> -> vector<6x8xf32>
      "tpu.trace_stop"() : () -> ()
      %cst_115 = arith.constant dense<0xFF800000> : vector<6xf32>
      %347 = vector.multi_reduction <maximumf>, %346, %cst_115 [1] : vector<6x8xf32> to vector<6xf32>
      %348 = vector.shape_cast %347 : vector<6xf32> to vector<6x1xf32>
      %349 = vector.broadcast %348 : vector<6x1xf32> to vector<6x8xf32>
      %350 = arith.subf %346, %349 : vector<6x8xf32>
      %351 = math.exp %350 : vector<6x8xf32>
      %cst_116 = arith.constant dense<0.000000e+00> : vector<6xf32>
      %352 = vector.multi_reduction <add>, %351, %cst_116 [1] : vector<6x8xf32> to vector<6xf32>
      %353 = vector.shape_cast %352 : vector<6xf32> to vector<6x1xf32>
      %354 = vector.broadcast %353 : vector<6x1xf32> to vector<6x8xf32>
      %355 = arith.divf %351, %354 : vector<6x8xf32>
      %cst_117 = arith.constant dense<0.000000e+00> : vector<6x1xf32>
      %356 = tpu.matmul %355, %345, %cst_117 {dimension_numbers = #tpu.dot_dimension_numbers<[1], [0], [0], [1], [0, 0, 1, 1], [], []>} : vector<6x8xf32>, vector<8x1xf32>, vector<6x1xf32> -> vector<6x1xf32>
      %357 = vector.extract_strided_slice %314 {offsets = [1, 0], sizes = [1, 4], strides = [1, 1]} : vector<4x4xf32> to vector<1x4xf32>
      %358 = vector.broadcast %356 : vector<6x1xf32> to vector<6x4xf32>
      %359 = vector.broadcast %357 : vector<1x4xf32> to vector<6x4xf32>
      %360 = arith.mulf %358, %359 : vector<6x4xf32>
      %361 = arith.addf %340, %360 : vector<6x4xf32>
      %362 = vector.extract_strided_slice %318 {offsets = [0, 2], sizes = [6, 1], strides = [1, 1]} : vector<6x4xf32> to vector<6x1xf32>
      %cst_118 = arith.constant 1.000000e+00 : f32
      %363 = vector.broadcast %cst_118 : f32 to vector<6x1xf32>
      %364 = arith.mulf %362, %363 : vector<6x1xf32>
      %365 = vector.extract_strided_slice %319 {offsets = [0, 2], sizes = [8, 1], strides = [1, 1]} : vector<8x4xf32> to vector<8x1xf32>
      %366 = vector.extract_strided_slice %320 {offsets = [0, 2], sizes = [8, 1], strides = [1, 1]} : vector<8x4xf32> to vector<8x1xf32>
      "tpu.trace_start"() <{level = 10 : i32, message = "qd,kd->qk"}> : () -> ()
      %cst_119 = arith.constant dense<0.000000e+00> : vector<6x8xf32>
      %367 = tpu.matmul %364, %365, %cst_119 {dimension_numbers = #tpu.dot_dimension_numbers<[1], [1], [0], [0], [0, 0, 1, 0], [], []>} : vector<6x1xf32>, vector<8x1xf32>, vector<6x8xf32> -> vector<6x8xf32>
      "tpu.trace_stop"() : () -> ()
      %cst_120 = arith.constant dense<0xFF800000> : vector<6xf32>
      %368 = vector.multi_reduction <maximumf>, %367, %cst_120 [1] : vector<6x8xf32> to vector<6xf32>
      %369 = vector.shape_cast %368 : vector<6xf32> to vector<6x1xf32>
      %370 = vector.broadcast %369 : vector<6x1xf32> to vector<6x8xf32>
      %371 = arith.subf %367, %370 : vector<6x8xf32>
      %372 = math.exp %371 : vector<6x8xf32>
      %cst_121 = arith.constant dense<0.000000e+00> : vector<6xf32>
      %373 = vector.multi_reduction <add>, %372, %cst_121 [1] : vector<6x8xf32> to vector<6xf32>
      %374 = vector.shape_cast %373 : vector<6xf32> to vector<6x1xf32>
      %375 = vector.broadcast %374 : vector<6x1xf32> to vector<6x8xf32>
      %376 = arith.divf %372, %375 : vector<6x8xf32>
      %cst_122 = arith.constant dense<0.000000e+00> : vector<6x1xf32>
      %377 = tpu.matmul %376, %366, %cst_122 {dimension_numbers = #tpu.dot_dimension_numbers<[1], [0], [0], [1], [0, 0, 1, 1], [], []>} : vector<6x8xf32>, vector<8x1xf32>, vector<6x1xf32> -> vector<6x1xf32>
      %378 = vector.extract_strided_slice %314 {offsets = [2, 0], sizes = [1, 4], strides = [1, 1]} : vector<4x4xf32> to vector<1x4xf32>
      %379 = vector.broadcast %377 : vector<6x1xf32> to vector<6x4xf32>
      %380 = vector.broadcast %378 : vector<1x4xf32> to vector<6x4xf32>
      %381 = arith.mulf %379, %380 : vector<6x4xf32>
      %382 = arith.addf %361, %381 : vector<6x4xf32>
      %383 = vector.extract_strided_slice %318 {offsets = [0, 3], sizes = [6, 1], strides = [1, 1]} : vector<6x4xf32> to vector<6x1xf32>
      %cst_123 = arith.constant 1.000000e+00 : f32
      %384 = vector.broadcast %cst_123 : f32 to vector<6x1xf32>
      %385 = arith.mulf %383, %384 : vector<6x1xf32>
      %386 = vector.extract_strided_slice %319 {offsets = [0, 3], sizes = [8, 1], strides = [1, 1]} : vector<8x4xf32> to vector<8x1xf32>
      %387 = vector.extract_strided_slice %320 {offsets = [0, 3], sizes = [8, 1], strides = [1, 1]} : vector<8x4xf32> to vector<8x1xf32>
      "tpu.trace_start"() <{level = 10 : i32, message = "qd,kd->qk"}> : () -> ()
      %cst_124 = arith.constant dense<0.000000e+00> : vector<6x8xf32>
      %388 = tpu.matmul %385, %386, %cst_124 {dimension_numbers = #tpu.dot_dimension_numbers<[1], [1], [0], [0], [0, 0, 1, 0], [], []>} : vector<6x1xf32>, vector<8x1xf32>, vector<6x8xf32> -> vector<6x8xf32>
      "tpu.trace_stop"() : () -> ()
      %cst_125 = arith.constant dense<0xFF800000> : vector<6xf32>
      %389 = vector.multi_reduction <maximumf>, %388, %cst_125 [1] : vector<6x8xf32> to vector<6xf32>
      %390 = vector.shape_cast %389 : vector<6xf32> to vector<6x1xf32>
      %391 = vector.broadcast %390 : vector<6x1xf32> to vector<6x8xf32>
      %392 = arith.subf %388, %391 : vector<6x8xf32>
      %393 = math.exp %392 : vector<6x8xf32>
      %cst_126 = arith.constant dense<0.000000e+00> : vector<6xf32>
      %394 = vector.multi_reduction <add>, %393, %cst_126 [1] : vector<6x8xf32> to vector<6xf32>
      %395 = vector.shape_cast %394 : vector<6xf32> to vector<6x1xf32>
      %396 = vector.broadcast %395 : vector<6x1xf32> to vector<6x8xf32>
      %397 = arith.divf %393, %396 : vector<6x8xf32>
      %cst_127 = arith.constant dense<0.000000e+00> : vector<6x1xf32>
      %398 = tpu.matmul %397, %387, %cst_127 {dimension_numbers = #tpu.dot_dimension_numbers<[1], [0], [0], [1], [0, 0, 1, 1], [], []>} : vector<6x8xf32>, vector<8x1xf32>, vector<6x1xf32> -> vector<6x1xf32>
      %399 = vector.extract_strided_slice %314 {offsets = [3, 0], sizes = [1, 4], strides = [1, 1]} : vector<4x4xf32> to vector<1x4xf32>
      %400 = vector.broadcast %398 : vector<6x1xf32> to vector<6x4xf32>
      %401 = vector.broadcast %399 : vector<1x4xf32> to vector<6x4xf32>
      %402 = arith.mulf %400, %401 : vector<6x4xf32>
      %403 = arith.addf %382, %402 : vector<6x4xf32>
      %404 = vector.extract_strided_slice %300 {offsets = [6, 0], sizes = [6, 4], strides = [1, 1]} : vector<12x4xf32> to vector<6x4xf32>
      %405 = vector.extract_strided_slice %310 {offsets = [8, 0], sizes = [8, 4], strides = [1, 1]} : vector<16x4xf32> to vector<8x4xf32>
      %406 = vector.extract_strided_slice %311 {offsets = [8, 0], sizes = [8, 4], strides = [1, 1]} : vector<16x4xf32> to vector<8x4xf32>
      %407 = vector.extract_strided_slice %404 {offsets = [0, 0], sizes = [6, 1], strides = [1, 1]} : vector<6x4xf32> to vector<6x1xf32>
      %cst_128 = arith.constant 1.000000e+00 : f32
      %408 = vector.broadcast %cst_128 : f32 to vector<6x1xf32>
      %409 = arith.mulf %407, %408 : vector<6x1xf32>
      %410 = vector.extract_strided_slice %405 {offsets = [0, 0], sizes = [8, 1], strides = [1, 1]} : vector<8x4xf32> to vector<8x1xf32>
      %411 = vector.extract_strided_slice %406 {offsets = [0, 0], sizes = [8, 1], strides = [1, 1]} : vector<8x4xf32> to vector<8x1xf32>
      "tpu.trace_start"() <{level = 10 : i32, message = "qd,kd->qk"}> : () -> ()
      %cst_129 = arith.constant dense<0.000000e+00> : vector<6x8xf32>
      %412 = tpu.matmul %409, %410, %cst_129 {dimension_numbers = #tpu.dot_dimension_numbers<[1], [1], [0], [0], [0, 0, 1, 0], [], []>} : vector<6x1xf32>, vector<8x1xf32>, vector<6x8xf32> -> vector<6x8xf32>
      "tpu.trace_stop"() : () -> ()
      %cst_130 = arith.constant dense<0xFF800000> : vector<6xf32>
      %413 = vector.multi_reduction <maximumf>, %412, %cst_130 [1] : vector<6x8xf32> to vector<6xf32>
      %414 = vector.shape_cast %413 : vector<6xf32> to vector<6x1xf32>
      %415 = vector.broadcast %414 : vector<6x1xf32> to vector<6x8xf32>
      %416 = arith.subf %412, %415 : vector<6x8xf32>
      %417 = math.exp %416 : vector<6x8xf32>
      %cst_131 = arith.constant dense<0.000000e+00> : vector<6xf32>
      %418 = vector.multi_reduction <add>, %417, %cst_131 [1] : vector<6x8xf32> to vector<6xf32>
      %419 = vector.shape_cast %418 : vector<6xf32> to vector<6x1xf32>
      %420 = vector.broadcast %419 : vector<6x1xf32> to vector<6x8xf32>
      %421 = arith.divf %417, %420 : vector<6x8xf32>
      %cst_132 = arith.constant dense<0.000000e+00> : vector<6x1xf32>
      %422 = tpu.matmul %421, %411, %cst_132 {dimension_numbers = #tpu.dot_dimension_numbers<[1], [0], [0], [1], [0, 0, 1, 1], [], []>} : vector<6x8xf32>, vector<8x1xf32>, vector<6x1xf32> -> vector<6x1xf32>
      %423 = vector.extract_strided_slice %314 {offsets = [0, 0], sizes = [1, 4], strides = [1, 1]} : vector<4x4xf32> to vector<1x4xf32>
      %424 = vector.broadcast %422 : vector<6x1xf32> to vector<6x4xf32>
      %425 = vector.broadcast %423 : vector<1x4xf32> to vector<6x4xf32>
      %426 = arith.mulf %424, %425 : vector<6x4xf32>
      %427 = vector.extract_strided_slice %404 {offsets = [0, 1], sizes = [6, 1], strides = [1, 1]} : vector<6x4xf32> to vector<6x1xf32>
      %cst_133 = arith.constant 1.000000e+00 : f32
      %428 = vector.broadcast %cst_133 : f32 to vector<6x1xf32>
      %429 = arith.mulf %427, %428 : vector<6x1xf32>
      %430 = vector.extract_strided_slice %405 {offsets = [0, 1], sizes = [8, 1], strides = [1, 1]} : vector<8x4xf32> to vector<8x1xf32>
      %431 = vector.extract_strided_slice %406 {offsets = [0, 1], sizes = [8, 1], strides = [1, 1]} : vector<8x4xf32> to vector<8x1xf32>
      "tpu.trace_start"() <{level = 10 : i32, message = "qd,kd->qk"}> : () -> ()
      %cst_134 = arith.constant dense<0.000000e+00> : vector<6x8xf32>
      %432 = tpu.matmul %429, %430, %cst_134 {dimension_numbers = #tpu.dot_dimension_numbers<[1], [1], [0], [0], [0, 0, 1, 0], [], []>} : vector<6x1xf32>, vector<8x1xf32>, vector<6x8xf32> -> vector<6x8xf32>
      "tpu.trace_stop"() : () -> ()
      %cst_135 = arith.constant dense<0xFF800000> : vector<6xf32>
      %433 = vector.multi_reduction <maximumf>, %432, %cst_135 [1] : vector<6x8xf32> to vector<6xf32>
      %434 = vector.shape_cast %433 : vector<6xf32> to vector<6x1xf32>
      %435 = vector.broadcast %434 : vector<6x1xf32> to vector<6x8xf32>
      %436 = arith.subf %432, %435 : vector<6x8xf32>
      %437 = math.exp %436 : vector<6x8xf32>
      %cst_136 = arith.constant dense<0.000000e+00> : vector<6xf32>
      %438 = vector.multi_reduction <add>, %437, %cst_136 [1] : vector<6x8xf32> to vector<6xf32>
      %439 = vector.shape_cast %438 : vector<6xf32> to vector<6x1xf32>
      %440 = vector.broadcast %439 : vector<6x1xf32> to vector<6x8xf32>
      %441 = arith.divf %437, %440 : vector<6x8xf32>
      %cst_137 = arith.constant dense<0.000000e+00> : vector<6x1xf32>
      %442 = tpu.matmul %441, %431, %cst_137 {dimension_numbers = #tpu.dot_dimension_numbers<[1], [0], [0], [1], [0, 0, 1, 1], [], []>} : vector<6x8xf32>, vector<8x1xf32>, vector<6x1xf32> -> vector<6x1xf32>
      %443 = vector.extract_strided_slice %314 {offsets = [1, 0], sizes = [1, 4], strides = [1, 1]} : vector<4x4xf32> to vector<1x4xf32>
      %444 = vector.broadcast %442 : vector<6x1xf32> to vector<6x4xf32>
      %445 = vector.broadcast %443 : vector<1x4xf32> to vector<6x4xf32>
      %446 = arith.mulf %444, %445 : vector<6x4xf32>
      %447 = arith.addf %426, %446 : vector<6x4xf32>
      %448 = vector.extract_strided_slice %404 {offsets = [0, 2], sizes = [6, 1], strides = [1, 1]} : vector<6x4xf32> to vector<6x1xf32>
      %cst_138 = arith.constant 1.000000e+00 : f32
      %449 = vector.broadcast %cst_138 : f32 to vector<6x1xf32>
      %450 = arith.mulf %448, %449 : vector<6x1xf32>
      %451 = vector.extract_strided_slice %405 {offsets = [0, 2], sizes = [8, 1], strides = [1, 1]} : vector<8x4xf32> to vector<8x1xf32>
      %452 = vector.extract_strided_slice %406 {offsets = [0, 2], sizes = [8, 1], strides = [1, 1]} : vector<8x4xf32> to vector<8x1xf32>
      "tpu.trace_start"() <{level = 10 : i32, message = "qd,kd->qk"}> : () -> ()
      %cst_139 = arith.constant dense<0.000000e+00> : vector<6x8xf32>
      %453 = tpu.matmul %450, %451, %cst_139 {dimension_numbers = #tpu.dot_dimension_numbers<[1], [1], [0], [0], [0, 0, 1, 0], [], []>} : vector<6x1xf32>, vector<8x1xf32>, vector<6x8xf32> -> vector<6x8xf32>
      "tpu.trace_stop"() : () -> ()
      %cst_140 = arith.constant dense<0xFF800000> : vector<6xf32>
      %454 = vector.multi_reduction <maximumf>, %453, %cst_140 [1] : vector<6x8xf32> to vector<6xf32>
      %455 = vector.shape_cast %454 : vector<6xf32> to vector<6x1xf32>
      %456 = vector.broadcast %455 : vector<6x1xf32> to vector<6x8xf32>
      %457 = arith.subf %453, %456 : vector<6x8xf32>
      %458 = math.exp %457 : vector<6x8xf32>
      %cst_141 = arith.constant dense<0.000000e+00> : vector<6xf32>
      %459 = vector.multi_reduction <add>, %458, %cst_141 [1] : vector<6x8xf32> to vector<6xf32>
      %460 = vector.shape_cast %459 : vector<6xf32> to vector<6x1xf32>
      %461 = vector.broadcast %460 : vector<6x1xf32> to vector<6x8xf32>
      %462 = arith.divf %458, %461 : vector<6x8xf32>
      %cst_142 = arith.constant dense<0.000000e+00> : vector<6x1xf32>
      %463 = tpu.matmul %462, %452, %cst_142 {dimension_numbers = #tpu.dot_dimension_numbers<[1], [0], [0], [1], [0, 0, 1, 1], [], []>} : vector<6x8xf32>, vector<8x1xf32>, vector<6x1xf32> -> vector<6x1xf32>
      %464 = vector.extract_strided_slice %314 {offsets = [2, 0], sizes = [1, 4], strides = [1, 1]} : vector<4x4xf32> to vector<1x4xf32>
      %465 = vector.broadcast %463 : vector<6x1xf32> to vector<6x4xf32>
      %466 = vector.broadcast %464 : vector<1x4xf32> to vector<6x4xf32>
      %467 = arith.mulf %465, %466 : vector<6x4xf32>
      %468 = arith.addf %447, %467 : vector<6x4xf32>
      %469 = vector.extract_strided_slice %404 {offsets = [0, 3], sizes = [6, 1], strides = [1, 1]} : vector<6x4xf32> to vector<6x1xf32>
      %cst_143 = arith.constant 1.000000e+00 : f32
      %470 = vector.broadcast %cst_143 : f32 to vector<6x1xf32>
      %471 = arith.mulf %469, %470 : vector<6x1xf32>
      %472 = vector.extract_strided_slice %405 {offsets = [0, 3], sizes = [8, 1], strides = [1, 1]} : vector<8x4xf32> to vector<8x1xf32>
      %473 = vector.extract_strided_slice %406 {offsets = [0, 3], sizes = [8, 1], strides = [1, 1]} : vector<8x4xf32> to vector<8x1xf32>
      "tpu.trace_start"() <{level = 10 : i32, message = "qd,kd->qk"}> : () -> ()
      %cst_144 = arith.constant dense<0.000000e+00> : vector<6x8xf32>
      %474 = tpu.matmul %471, %472, %cst_144 {dimension_numbers = #tpu.dot_dimension_numbers<[1], [1], [0], [0], [0, 0, 1, 0], [], []>} : vector<6x1xf32>, vector<8x1xf32>, vector<6x8xf32> -> vector<6x8xf32>
      "tpu.trace_stop"() : () -> ()
      %cst_145 = arith.constant dense<0xFF800000> : vector<6xf32>
      %475 = vector.multi_reduction <maximumf>, %474, %cst_145 [1] : vector<6x8xf32> to vector<6xf32>
      %476 = vector.shape_cast %475 : vector<6xf32> to vector<6x1xf32>
      %477 = vector.broadcast %476 : vector<6x1xf32> to vector<6x8xf32>
      %478 = arith.subf %474, %477 : vector<6x8xf32>
      %479 = math.exp %478 : vector<6x8xf32>
      %cst_146 = arith.constant dense<0.000000e+00> : vector<6xf32>
      %480 = vector.multi_reduction <add>, %479, %cst_146 [1] : vector<6x8xf32> to vector<6xf32>
      %481 = vector.shape_cast %480 : vector<6xf32> to vector<6x1xf32>
      %482 = vector.broadcast %481 : vector<6x1xf32> to vector<6x8xf32>
      %483 = arith.divf %479, %482 : vector<6x8xf32>
      %cst_147 = arith.constant dense<0.000000e+00> : vector<6x1xf32>
      %484 = tpu.matmul %483, %473, %cst_147 {dimension_numbers = #tpu.dot_dimension_numbers<[1], [0], [0], [1], [0, 0, 1, 1], [], []>} : vector<6x8xf32>, vector<8x1xf32>, vector<6x1xf32> -> vector<6x1xf32>
      %485 = vector.extract_strided_slice %314 {offsets = [3, 0], sizes = [1, 4], strides = [1, 1]} : vector<4x4xf32> to vector<1x4xf32>
      %486 = vector.broadcast %484 : vector<6x1xf32> to vector<6x4xf32>
      %487 = vector.broadcast %485 : vector<1x4xf32> to vector<6x4xf32>
      %488 = arith.mulf %486, %487 : vector<6x4xf32>
      %489 = arith.addf %468, %488 : vector<6x4xf32>
      %490 = tpu.concatenate %403, %489 in 0 : vector<6x4xf32>, vector<6x4xf32> -> vector<12x4xf32>
      %491 = vector.broadcast %317 : vector<1x4xf32> to vector<12x4xf32>
      %492 = arith.addf %490, %491 : vector<12x4xf32>
      %493 = arith.addf %291, %492 : vector<12x4xf32>
      %494 = arith.index_cast %arg43 : i32 to index
      %c0_148 = arith.constant 0 : index
      %c0_149 = arith.constant 0 : index
      %495 = vector.load %arg28[%494, %c0_148, %c0_149] : memref<6x1x4xf32, #tpu.memory_space<vmem>>, vector<1x1x4xf32>
      %496 = vector.shape_cast %495 : vector<1x1x4xf32> to vector<1x4xf32>
      %497 = arith.index_cast %arg43 : i32 to index
      %c0_150 = arith.constant 0 : index
      %c0_151 = arith.constant 0 : index
      %498 = vector.load %arg29[%497, %c0_150, %c0_151] : memref<6x1x4xf32, #tpu.memory_space<vmem>>, vector<1x1x4xf32>
      %499 = vector.shape_cast %498 : vector<1x1x4xf32> to vector<1x4xf32>
      %cst_152 = arith.constant dense<0.000000e+00> : vector<12xf32>
      %500 = vector.multi_reduction <add>, %493, %cst_152 [1] : vector<12x4xf32> to vector<12xf32>
      %501 = vector.shape_cast %500 : vector<12xf32> to vector<12x1xf32>
      %cst_153 = arith.constant 4.000000e+00 : f32
      %502 = vector.broadcast %cst_153 : f32 to vector<12x1xf32>
      %503 = arith.divf %501, %502 : vector<12x1xf32>
      %504 = vector.broadcast %503 : vector<12x1xf32> to vector<12x4xf32>
      %505 = arith.subf %493, %504 : vector<12x4xf32>
      %506 = arith.mulf %505, %505 : vector<12x4xf32>
      %cst_154 = arith.constant dense<0.000000e+00> : vector<12xf32>
      %507 = vector.multi_reduction <add>, %506, %cst_154 [1] : vector<12x4xf32> to vector<12xf32>
      %508 = vector.shape_cast %507 : vector<12xf32> to vector<12x1xf32>
      %cst_155 = arith.constant 4.000000e+00 : f32
      %509 = vector.broadcast %cst_155 : f32 to vector<12x1xf32>
      %510 = arith.divf %508, %509 : vector<12x1xf32>
      %511 = vector.broadcast %503 : vector<12x1xf32> to vector<12x4xf32>
      %512 = arith.subf %493, %511 : vector<12x4xf32>
      %cst_156 = arith.constant 9.99999974E-6 : f32
      %513 = vector.broadcast %cst_156 : f32 to vector<12x1xf32>
      %514 = arith.addf %510, %513 : vector<12x1xf32>
      %515 = math.rsqrt %514 : vector<12x1xf32>
      %516 = vector.broadcast %515 : vector<12x1xf32> to vector<12x4xf32>
      %517 = arith.mulf %512, %516 : vector<12x4xf32>
      %518 = vector.broadcast %496 : vector<1x4xf32> to vector<12x4xf32>
      %519 = arith.mulf %517, %518 : vector<12x4xf32>
      %520 = vector.broadcast %499 : vector<1x4xf32> to vector<12x4xf32>
      %521 = arith.addf %519, %520 : vector<12x4xf32>
      %522 = arith.index_cast %arg43 : i32 to index
      %c0_157 = arith.constant 0 : index
      %c0_158 = arith.constant 0 : index
      %523 = vector.load %arg32[%522, %c0_157, %c0_158] : memref<6x4x2048xf32, #tpu.memory_space<vmem>>, vector<1x4x2048xf32>
      %524 = vector.shape_cast %523 : vector<1x4x2048xf32> to vector<4x2048xf32>
      %525 = arith.index_cast %arg43 : i32 to index
      %c0_159 = arith.constant 0 : index
      %c0_160 = arith.constant 0 : index
      %526 = vector.load %arg33[%525, %c0_159, %c0_160] : memref<6x1x2048xf32, #tpu.memory_space<vmem>>, vector<1x1x2048xf32>
      %527 = vector.shape_cast %526 : vector<1x1x2048xf32> to vector<1x2048xf32>
      %528 = arith.index_cast %arg43 : i32 to index
      %c0_161 = arith.constant 0 : index
      %c0_162 = arith.constant 0 : index
      %529 = vector.load %arg34[%528, %c0_161, %c0_162] : memref<6x2048x4xf32, #tpu.memory_space<vmem>>, vector<1x2048x4xf32>
      %530 = vector.shape_cast %529 : vector<1x2048x4xf32> to vector<2048x4xf32>
      %531 = arith.index_cast %arg43 : i32 to index
      %c0_163 = arith.constant 0 : index
      %c0_164 = arith.constant 0 : index
      %532 = vector.load %arg35[%531, %c0_163, %c0_164] : memref<6x1x4xf32, #tpu.memory_space<vmem>>, vector<1x1x4xf32>
      %533 = vector.shape_cast %532 : vector<1x1x4xf32> to vector<1x4xf32>
      %cst_165 = arith.constant dense<0.000000e+00> : vector<12x2048xf32>
      %534 = tpu.matmul %521, %524, %cst_165 {dimension_numbers = #tpu.dot_dimension_numbers<[1], [0], [0], [1], [0, 0, 1, 1], [], []>} : vector<12x4xf32>, vector<4x2048xf32>, vector<12x2048xf32> -> vector<12x2048xf32>
      %535 = vector.broadcast %527 : vector<1x2048xf32> to vector<12x2048xf32>
      %536 = arith.addf %534, %535 : vector<12x2048xf32>
      %cst_166 = arith.constant 0.000000e+00 : f32
      %537 = vector.broadcast %cst_166 : f32 to vector<12x2048xf32>
      %538 = arith.maximumf %536, %537 : vector<12x2048xf32>
      %cst_167 = arith.constant dense<0.000000e+00> : vector<12x4xf32>
      %539 = tpu.matmul %538, %530, %cst_167 {dimension_numbers = #tpu.dot_dimension_numbers<[1], [0], [0], [1], [0, 0, 1, 1], [], []>} : vector<12x2048xf32>, vector<2048x4xf32>, vector<12x4xf32> -> vector<12x4xf32>
      %540 = vector.broadcast %533 : vector<1x4xf32> to vector<12x4xf32>
      %541 = arith.addf %539, %540 : vector<12x4xf32>
      %542 = arith.addf %521, %541 : vector<12x4xf32>
      %543 = arith.index_cast %arg43 : i32 to index
      %c0_168 = arith.constant 0 : index
      %c0_169 = arith.constant 0 : index
      %544 = vector.load %arg30[%543, %c0_168, %c0_169] : memref<6x1x4xf32, #tpu.memory_space<vmem>>, vector<1x1x4xf32>
      %545 = vector.shape_cast %544 : vector<1x1x4xf32> to vector<1x4xf32>
      %546 = arith.index_cast %arg43 : i32 to index
      %c0_170 = arith.constant 0 : index
      %c0_171 = arith.constant 0 : index
      %547 = vector.load %arg31[%546, %c0_170, %c0_171] : memref<6x1x4xf32, #tpu.memory_space<vmem>>, vector<1x1x4xf32>
      %548 = vector.shape_cast %547 : vector<1x1x4xf32> to vector<1x4xf32>
      %cst_172 = arith.constant dense<0.000000e+00> : vector<12xf32>
      %549 = vector.multi_reduction <add>, %542, %cst_172 [1] : vector<12x4xf32> to vector<12xf32>
      %550 = vector.shape_cast %549 : vector<12xf32> to vector<12x1xf32>
      %cst_173 = arith.constant 4.000000e+00 : f32
      %551 = vector.broadcast %cst_173 : f32 to vector<12x1xf32>
      %552 = arith.divf %550, %551 : vector<12x1xf32>
      %553 = vector.broadcast %552 : vector<12x1xf32> to vector<12x4xf32>
      %554 = arith.subf %542, %553 : vector<12x4xf32>
      %555 = arith.mulf %554, %554 : vector<12x4xf32>
      %cst_174 = arith.constant dense<0.000000e+00> : vector<12xf32>
      %556 = vector.multi_reduction <add>, %555, %cst_174 [1] : vector<12x4xf32> to vector<12xf32>
      %557 = vector.shape_cast %556 : vector<12xf32> to vector<12x1xf32>
      %cst_175 = arith.constant 4.000000e+00 : f32
      %558 = vector.broadcast %cst_175 : f32 to vector<12x1xf32>
      %559 = arith.divf %557, %558 : vector<12x1xf32>
      %560 = vector.broadcast %552 : vector<12x1xf32> to vector<12x4xf32>
      %561 = arith.subf %542, %560 : vector<12x4xf32>
      %cst_176 = arith.constant 9.99999974E-6 : f32
      %562 = vector.broadcast %cst_176 : f32 to vector<12x1xf32>
      %563 = arith.addf %559, %562 : vector<12x1xf32>
      %564 = math.rsqrt %563 : vector<12x1xf32>
      %565 = vector.broadcast %564 : vector<12x1xf32> to vector<12x4xf32>
      %566 = arith.mulf %561, %565 : vector<12x4xf32>
      %567 = vector.broadcast %545 : vector<1x4xf32> to vector<12x4xf32>
      %568 = arith.mulf %566, %567 : vector<12x4xf32>
      %569 = vector.broadcast %548 : vector<1x4xf32> to vector<12x4xf32>
      %570 = arith.addf %568, %569 : vector<12x4xf32>
      scf.yield %570 : vector<12x4xf32>
    }
    %c6_i32_19 = arith.constant 6 : i32
    %c0_20 = arith.constant 0 : index
    %c0_21 = arith.constant 0 : index
    %32 = vector.load %arg38[%c0_20, %c0_21] : memref<1x4xf32, #tpu.memory_space<vmem>>, vector<1x4xf32>
    %c0_22 = arith.constant 0 : index
    %c0_23 = arith.constant 0 : index
    %33 = vector.load %arg39[%c0_22, %c0_23] : memref<1x4xf32, #tpu.memory_space<vmem>>, vector<1x4xf32>
    %cst_24 = arith.constant dense<0.000000e+00> : vector<12xf32>
    %34 = vector.multi_reduction <add>, %31, %cst_24 [1] : vector<12x4xf32> to vector<12xf32>
    %35 = vector.shape_cast %34 : vector<12xf32> to vector<12x1xf32>
    %cst_25 = arith.constant 4.000000e+00 : f32
    %36 = vector.broadcast %cst_25 : f32 to vector<12x1xf32>
    %37 = arith.divf %35, %36 : vector<12x1xf32>
    %38 = vector.broadcast %37 : vector<12x1xf32> to vector<12x4xf32>
    %39 = arith.subf %31, %38 : vector<12x4xf32>
    %40 = arith.mulf %39, %39 : vector<12x4xf32>
    %cst_26 = arith.constant dense<0.000000e+00> : vector<12xf32>
    %41 = vector.multi_reduction <add>, %40, %cst_26 [1] : vector<12x4xf32> to vector<12xf32>
    %42 = vector.shape_cast %41 : vector<12xf32> to vector<12x1xf32>
    %cst_27 = arith.constant 4.000000e+00 : f32
    %43 = vector.broadcast %cst_27 : f32 to vector<12x1xf32>
    %44 = arith.divf %42, %43 : vector<12x1xf32>
    %45 = vector.broadcast %37 : vector<12x1xf32> to vector<12x4xf32>
    %46 = arith.subf %31, %45 : vector<12x4xf32>
    %cst_28 = arith.constant 9.99999974E-6 : f32
    %47 = vector.broadcast %cst_28 : f32 to vector<12x1xf32>
    %48 = arith.addf %44, %47 : vector<12x1xf32>
    %49 = math.rsqrt %48 : vector<12x1xf32>
    %50 = vector.broadcast %49 : vector<12x1xf32> to vector<12x4xf32>
    %51 = arith.mulf %46, %50 : vector<12x4xf32>
    %52 = vector.broadcast %32 : vector<1x4xf32> to vector<12x4xf32>
    %53 = arith.mulf %51, %52 : vector<12x4xf32>
    %54 = vector.broadcast %33 : vector<1x4xf32> to vector<12x4xf32>
    %55 = arith.addf %53, %54 : vector<12x4xf32>
    %c0_29 = arith.constant 0 : index
    %c0_30 = arith.constant 0 : index
    %56 = vector.load %arg40[%c0_29, %c0_30] : memref<4x128xf32, #tpu.memory_space<vmem>>, vector<4x128xf32>
    %cst_31 = arith.constant dense<0.000000e+00> : vector<12x128xf32>
    %57 = tpu.matmul %55, %56, %cst_31 {dimension_numbers = #tpu.dot_dimension_numbers<[1], [0], [0], [1], [0, 0, 1, 1], [], []>} : vector<12x4xf32>, vector<4x128xf32>, vector<12x128xf32> -> vector<12x128xf32>
    %c0_32 = arith.constant 0 : index
    %c0_33 = arith.constant 0 : index
    %58 = vector.load %arg41[%c0_32, %c0_33] : memref<1x128xf32, #tpu.memory_space<vmem>>, vector<1x128xf32>
    %59 = vector.broadcast %58 : vector<1x128xf32> to vector<12x128xf32>
    %60 = arith.addf %57, %59 : vector<12x128xf32>
    %c0_34 = arith.constant 0 : index
    %c0_35 = arith.constant 0 : index
    %61 = vector.load %arg42[%c0_34, %c0_35] : memref<12x128xf32, #tpu.memory_space<vmem>>, vector<12x128xf32>
    tpu.vector_store %arg42[%c0_34, %c0_35], %60 {strides = array<i32>} : memref<12x128xf32, #tpu.memory_space<vmem>>, vector<12x128xf32>,
    return
  }
}

</mosaic_0001>

<bundles_post_ra>
// kernel: transformer_forward.1
= control target key start
LH: loop header
LB: loop body
LE: loop exit
PB: predicated region body
PF: predicated region fallthrough
CT: control target
= control target key end

     0   :  { %s10674_s6 = smov 1   ;;  %s10675_s10 = smov 2   ;;  %s12647_s0 = inlined_call_operand.smem [shape: u32[43], index: -1, kind: input, shape index: {}] }
   0x1   :  { %s1_s5 = sld [smem:[%s12647_s0]]   ;;  %s10676_s14 = smov 3  }
   0x2   :  { %s8633_s9 = sld [smem:[%s12647_s0 + %s10674_s6]]   ;;  %s10677_s18 = smov 4  }
   0x3   :  { %s8634_s13 = sld [smem:[%s12647_s0 + %s10675_s10]]   ;;  %s10678_s22 = smov 5  }
   0x4   :  { %s8635_s17 = sld [smem:[%s12647_s0 + %s10676_s14]]   ;;  %s10679_s26 = smov 6  }
   0x5   :  { %s10764_s21 = sld [smem:[%s12647_s0 + %s10677_s18]]   ;;  %s10680_s30 = smov 7  }
   0x6   :  { %s10769_s25 = sld [smem:[%s12647_s0 + %s10678_s22]]   ;;  %s10681_s4 = smov 8  }
   0x7   :  { %s10774_s29 = sld [smem:[%s12647_s0 + %s10679_s26]]   ;;  %v10781_v0 = vld [vmem:[%s1_s5] sm:$0xff]   ;;  %v10783_v1 = vld [vmem:[%s1_s5 + $0x8] sm:$0xff]   ;;  %s10682_s10 = smov 9  }
   0x8   :  { %s10779_s3 = sld [smem:[%s12647_s0 + %s10680_s30]]   ;;  %v10785_v2 = vld [vmem:[%s8633_s9] sm:$0xff]   ;;  %v10792_v3 = vld [vmem:[%s8633_s9 + $0x8] sm:$0xf]   ;;  %s10683_s5 = smov 10  }
   0x9   :  { %s10790_s8 = sld [smem:[%s12647_s0 + %s10681_s4]]   ;;  %v10794_v4 = vld [vmem:[%s8634_s13] sm:$0xff]  ;;  %s10684_s19 = smov 11  }
   0xa   :  { %s10799_s14 = sld [smem:[%s12647_s0 + %s10682_s10]]   ;;  %v10801_v5 = vld [vmem:[%s8635_s17] sm:$0x3f]  ;;  %s10685_s22 = smov 12  }
   0xb   :  { %12649 = vst [vmem:[#allocation2_spill] sm:$0xff] %v10801_v5  ;;  %s10806_s18 = sld [smem:[%s12647_s0 + %s10683_s5]]   ;;  %s10686_s17 = smov 13  }
   0xc   :  { %s10811_s13 = sld [smem:[%s12647_s0 + %s10684_s19]]   ;;  %s10687_s1 = smov 14  }
   0xd   :  { %s10816_s26 = sld [smem:[%s12647_s0 + %s10685_s22]]   ;;  %s10688_s7 = smov 15  }
   0xe   :  { %s10821_s30 = sld [smem:[%s12647_s0 + %s10686_s17]]   ;;  %s10689_s5 = smov 16  }
   0xf   :  { %s10826_s6 = sld [smem:[%s12647_s0 + %s10687_s1]]   ;;  %s10690_s20 = smov 17  }
  0x10   :  { %s10831_s12 = sld [smem:[%s12647_s0 + %s10688_s7]]   ;;  %s10691_s24 = smov 18  }
  0x11   :  { %s10836_s19 = sld [smem:[%s12647_s0 + %s10689_s5]]   ;;  %s10692_s1 = smov 19  }
  0x12   :  { %s10841_s23 = sld [smem:[%s12647_s0 + %s10690_s20]]   ;;  %s10693_s10 = smov 20  }
  0x13   :  { %s10846_s28 = sld [smem:[%s12647_s0 + %s10691_s24]]   ;;  %s10694_s16 = smov 21  }
  0x14   :  { %s10851_s7 = sld [smem:[%s12647_s0 + %s10692_s1]]   ;;  %s10695_s24 = smov 22  }
  0x15   :  { %s10856_s15 = sld [smem:[%s12647_s0 + %s10693_s10]]   ;;  %s10696_s1 = smov 23  }
  0x16   :  { %s10861_s22 = sld [smem:[%s12647_s0 + %s10694_s16]]   ;;  %s10697_s10 = smov 24  }
  0x17   :  { %12650 = sst [smem:[#allocation3_spill]] %s10836_s19  ;;  %s10698_s16 = smov 25  }
  0x18   :  { %12651 = sst [smem:[#allocation4_spill]] %s10841_s23 }
  0x19   :  { %12652 = sst [smem:[#allocation5_spill]] %s10846_s28 }
  0x1a   :  { %12653 = sst [smem:[#allocation6_spill]] %s10851_s7 }
  0x1b   :  { %12654 = sst [smem:[#allocation7_spill]] %s10856_s15 }
  0x1c   :  { %12655 = sst [smem:[#allocation8_spill]] %s10861_s22 }
  0x1d   :  { %s10866_s28 = sld [smem:[%s12647_s0 + %s10695_s24]]   ;;  %s10699_s24 = smov 26  }
  0x1e   :  { %s10871_s7 = sld [smem:[%s12647_s0 + %s10696_s1]]   ;;  %s10700_s1 = smov 27  }
  0x1f   :  { %s10876_s15 = sld [smem:[%s12647_s0 + %s10697_s10]]   ;;  %s10701_s10 = smov 28  }
  0x20   :  { %s10881_s22 = sld [smem:[%s12647_s0 + %s10698_s16]]   ;;  %s10702_s16 = smov 29  }
  0x23   :  { %12656 = sst [smem:[#allocation9_spill]] %s10866_s28 }
  0x24   :  { %12657 = sst [smem:[#allocation10_spill]] %s10871_s7 }
  0x25   :  { %12658 = sst [smem:[#allocation11_spill]] %s10876_s15 }
  0x26   :  { %12659 = sst [smem:[#allocation12_spill]] %s10881_s22 }
  0x27   :  { %s10886_s28 = sld [smem:[%s12647_s0 + %s10699_s24]]   ;;  %s10703_s24 = smov 30  }
  0x28   :  { %s10891_s7 = sld [smem:[%s12647_s0 + %s10700_s1]]   ;;  %s10704_s1 = smov 31  }
  0x29   :  { %s10896_s15 = sld [smem:[%s12647_s0 + %s10701_s10]]   ;;  %s10705_s10 = smov 32  }
  0x2a   :  { %s10901_s22 = sld [smem:[%s12647_s0 + %s10702_s16]]   ;;  %s10706_s16 = smov 33  }
  0x2d   :  { %12660 = sst [smem:[#allocation13_spill]] %s10886_s28 }
  0x2e   :  { %12661 = sst [smem:[#allocation14_spill]] %s10891_s7 }
  0x2f   :  { %12662 = sst [smem:[#allocation15_spill]] %s10896_s15 }
  0x30   :  { %12663 = sst [smem:[#allocation16_spill]] %s10901_s22 }
  0x31   :  { %s10906_s28 = sld [smem:[%s12647_s0 + %s10703_s24]]   ;;  %s10707_s24 = smov 34  }
  0x32   :  { %s10911_s7 = sld [smem:[%s12647_s0 + %s10704_s1]]   ;;  %s10708_s1 = smov 35  }
  0x33   :  { %s10916_s15 = sld [smem:[%s12647_s0 + %s10705_s10]]   ;;  %s10709_s10 = smov 36  }
  0x34   :  { %s10921_s22 = sld [smem:[%s12647_s0 + %s10706_s16]]   ;;  %s10710_s16 = smov 37  }
  0x37   :  { %12664 = sst [smem:[#allocation17_spill]] %s10906_s28 }
  0x38   :  { %12665 = sst [smem:[#allocation18_spill]] %s10911_s7 }
  0x39   :  { %12666 = sst [smem:[#allocation19_spill]] %s10916_s15 }
  0x3a   :  { %12667 = sst [smem:[#allocation20_spill]] %s10921_s22 }
  0x3b   :  { %s10926_s28 = sld [smem:[%s12647_s0 + %s10707_s24]]   ;;  %s10711_s24 = smov 38  }
  0x3c   :  { %s10931_s7 = sld [smem:[%s12647_s0 + %s10708_s1]]   ;;  %s10712_s1 = smov 39  }
  0x3d   :  { %s10936_s15 = sld [smem:[%s12647_s0 + %s10709_s10]]   ;;  %s10713_s10 = smov 40  }
  0x3e   :  { %s10941_s22 = sld [smem:[%s12647_s0 + %s10710_s16]]   ;;  %s10714_s16 = smov 41  }
  0x3f   :  { %s10956_s23 = sld [smem:[%s12647_s0 + %s10713_s10]]  }
  0x40   :  { %s10961_s19 = sld [smem:[%s12647_s0 + %s10714_s16]]  }
  0x41   :  { %12668 = sst [smem:[#allocation21_spill]] %s10926_s28 }
  0x42   :  { %12669 = sst [smem:[#allocation22_spill]] %s10931_s7 }
  0x43   :  { %s10946_s28 = sld [smem:[%s12647_s0 + %s10711_s24]]   ;;  %s10715_s24 = smov 42  }
  0x44   :  { %s10951_s7 = sld [smem:[%s12647_s0 + %s10712_s1]]   ;;  %s10974_s1 = smov 0  }
  0x49   :  { %12670 = sst [smem:[#allocation23_spill]] %s10946_s28 }
  0x4a   :  { %s10966_s28 = sld [smem:[%s12647_s0 + %s10715_s24]]  }
  0x4b LB: > { %vm199_vm0 = vcmask 31744   ;;  %s8675_s0 = sshll.u32 %s10660_s1, 2  ;;  %vm206_vm1 = vcmask 1043456   ;;  %v10716_v7 = vmov 0.0   ;;  %vm10717_vm2 = vmmov 0   ;;  %s191_s4 = scalar_lea.vmem %s10769_s25, %s10660_s1  ;;  %s10660_s1 = sphi %s10974_s1, %s185_s1   ;;  %v10656_v0 = vphi %v10781_v0, %v12672_v0   ;;  %v10652_v1 = vphi %v10783_v1, %v12671_v1  }
  0x4c   : > { %9589 = vmatprep.mubr.msk.f32.mxu0 %vm199_vm0, %v10656_v0  ;;  %s189_s2 = scalar_lea.vmem %s10764_s21, %s8675_s0  ;;  %9592 = vmatprep.subr.mxu1 %v10716_v7  ;;  %v8676_v8 = vld [vmem:[%s191_s4] ss:$0 sm:$0xff]  ;;  %s10718_s10 = smov 127   ;;  %vm292_vm3 = vcmask 7168   ;;  %vm367_vm4 = vcmask 64512  }
  0x4d   : > { %v190_v6 = vld [vmem:[%s189_s2] sm:$0xf]  ;;  %9594 = vmatprep.mubr.msk.f32.mxu1 %vm10717_vm2, %v10716_v7  ;;  %s10719_s11 = smov 124   ;;  %s10720_s5 = smov 122  }
  0x4e   : > { %9587 = vmatprep.subr.msk.mxu0 %vm206_vm1, %v190_v6  ;;  %s10721_s16 = smov 123   ;;  %s10722_s20 = smov 121  }
  0x4f   : > { %9588 = vmatpush3.msk.msra.mxu0 %vm206_vm1, %v190_v6  ;;  %s10723_s9 = smov 126   ;;  %s10724_s24 = smov 125  }
  0x50   : > { %9590 = vmatmul.mubr.msk.f32.vlgmr.msra.gmra.mrb[0].mxu0 %vm199_vm0, %v10652_v1  ;;  %9597 = vmatprep.subr.mxu0 %v10716_v7  ;;  %s10725_s17 = smov 120   ;;  %s10726_s27 = smov 119  }
  0x51   : > { %9599 = vmatprep.mubr.msk.f32.mxu0 %vm10717_vm2, %v10716_v7  ;;  %s10727_s2 = smov 117   ;;  %s10728_s4 = smov 118  }
 0x123   : > { %v9591_v9 = vpop.f32.mrb[0].mxu0 }
 0x124   : > { %v276_v10 = vpop.f32.mrb[1].mxu0  ;;  %v11011_v12 = vadd.f32 %v9591_v9, %v8676_v8 }
 0x125   : > { %v11003_v11 = vadd.f32 %v8676_v8, %v276_v10 }
 0x127   : > { %465 = vrot.lane.b32.xlu1 %v11003_v11, %s10718_s10  ;;  %290 = vrot.lane.b32.xlu0 %v11003_v11, %s10719_s11 }
 0x12b   : > { %643 = vrot.lane.b32.xlu1 %v11003_v11, %s10720_s5  ;;  %467 = vrot.lane.b32.xlu0 %v11003_v11, %s10721_s16 }
 0x12f   : > { %819 = vrot.lane.b32.xlu1 %v11003_v11, %s10722_s20  ;;  %641 = vrot.lane.b32.xlu0 %v11003_v11, %s10723_s9 }
 0x133   : > { %994 = vrot.lane.b32.xlu1 %v11011_v12, %s10719_s11  ;;  %817 = vrot.lane.b32.xlu0 %v11003_v11, %s10724_s24  ;;  %s8866_s11 = sshll.u32 %s10660_s1, 6 }
 0x137   : > { %1163 = vrot.lane.b32.xlu1 %v11011_v12, %s10718_s10  ;;  %1165 = vrot.lane.b32.xlu0 %v11011_v12, %s10721_s16  ;;  %s285_s10 = scalar_lea.vmem %s10774_s29, %s8675_s0  ;;  %s287_s0 = scalar_lea.vmem %s10779_s3, %s10660_s1 }
 0x138   : > { %s1689_s16 = scalar_lea.vmem %s10790_s8, %s10660_s1 }
 0x13b   : > { %1335 = vrot.lane.b32.xlu1 %v11011_v12, %s10723_s9  ;;  %1337 = vrot.lane.b32.xlu0 %v11011_v12, %s10720_s5  ;;  %s11190_s5 = scalar_lea.vmem %s10806_s18, %s8866_s11  ;;  %s8709_s9 = sshll.u32 %s10660_s1, 11 }
 0x13f   : > { %1507 = vrot.lane.b32.xlu1 %v11011_v12, %s10724_s24  ;;  %1509 = vrot.lane.b32.xlu0 %v11011_v12, %s10722_s20  ;;  %s1691_s20 = scalar_lea.vmem %s10799_s14, %s10660_s1  ;;  %s11236_s24 = scalar_lea.vmem %s10816_s26, %s8709_s9 }
 0x199   : > { %v466_v13 = vpop.permute.xlu1 %465  ;;  %v291_v14 = vpop.permute.xlu0 %290 }
 0x19a   : > { %9593 = vmatpush3.xpose.msk.msra.mxu1 %vm292_vm3, %v291_v14 }
 0x19b   : > { %9602 = vmatprep.subr.mxu1 %v10716_v7 }
 0x19d   : > { %v644_v15 = vpop.permute.xlu1 %643  ;;  %9595 = vmatmul.mubr.msk.f32.vlgmr.msra.gmra.mrb[0].mxu1 %vm292_vm3, %v11003_v11  ;;  %v468_v16 = vpop.permute.xlu0 %467 }
 0x19e   : > { %9603 = vmatpush3.xpose.msk.msra.mxu1 %vm292_vm3, %v468_v16  ;;  %9604 = vmatprep.mubr.msk.f32.mxu1 %vm10717_vm2, %v10716_v7 }
 0x19f   : > { %9612 = vmatprep.subr.mxu1 %v10716_v7 }
 0x1a1   : > { %v820_v17 = vpop.permute.xlu1 %819  ;;  %9605 = vmatmul.mubr.msk.f32.vlgmr.msra.gmra.mrb[2].mxu1 %vm292_vm3, %v466_v13  ;;  %v642_v18 = vpop.permute.xlu0 %641 }
 0x1a2   : > { %9613 = vmatpush3.xpose.msk.msra.mxu1 %vm292_vm3, %v644_v15  ;;  %9614 = vmatprep.mubr.msk.f32.mxu1 %vm10717_vm2, %v10716_v7 }
 0x1a3   : > { %9622 = vmatprep.subr.mxu1 %v10716_v7 }
 0x1a5   : > { %9615 = vmatmul.mubr.msk.f32.vlgmr.msra.gmra.mrb[4].mxu1 %vm292_vm3, %v642_v18  ;;  %v818_v19 = vpop.permute.xlu0 %817  ;;  %v995_v20 = vpop.permute.xlu1 %994 }
 0x1a6   : > { %9623 = vmatpush3.xpose.msk.msra.mxu1 %vm292_vm3, %v820_v17  ;;  %9624 = vmatprep.mubr.msk.f32.mxu1 %vm10717_vm2, %v10716_v7 }
 0x1a7   : > { %9632 = vmatprep.subr.mxu1 %v10716_v7 }
 0x1a9   : > { %9625 = vmatmul.mubr.msk.f32.vlgmr.msra.gmra.mrb[6].mxu1 %vm292_vm3, %v818_v19  ;;  %v1166_v21 = vpop.permute.xlu0 %1165  ;;  %v1164_v22 = vpop.permute.xlu1 %1163 }
 0x1aa   : > { %9633 = vmatpush3.xpose.msk.msra.mxu1 %vm292_vm3, %v995_v20  ;;  %9634 = vmatprep.mubr.msk.f32.mxu1 %vm10717_vm2, %v10716_v7 }
 0x1ab   : > { %9642 = vmatprep.subr.mxu1 %v10716_v7 }
 0x1ad   : > { %9635 = vmatmul.mubr.msk.f32.vlgmr.msra.gmra.mrb[8].mxu1 %vm292_vm3, %v11011_v12  ;;  %v1338_v23 = vpop.permute.xlu0 %1337  ;;  %v1336_v24 = vpop.permute.xlu1 %1335 }
 0x1ae   : > { %9643 = vmatpush3.xpose.msk.msra.mxu1 %vm292_vm3, %v1166_v21  ;;  %9644 = vmatprep.mubr.msk.f32.mxu1 %vm10717_vm2, %v10716_v7 }
 0x1af   : > { %9652 = vmatprep.subr.mxu1 %v10716_v7 }
 0x1b1   : > { %9645 = vmatmul.mubr.msk.f32.vlgmr.msra.gmra.mrb[10].mxu1 %vm292_vm3, %v1164_v22  ;;  %v1510_v25 = vpop.permute.xlu0 %1509  ;;  %v1508_v26 = vpop.permute.xlu1 %1507 }
 0x1b2   : > { %9653 = vmatpush3.xpose.msk.msra.mxu1 %vm292_vm3, %v1338_v23  ;;  %9654 = vmatprep.mubr.msk.f32.mxu1 %vm10717_vm2, %v10716_v7 }
 0x1b3   : > { %9662 = vmatprep.subr.mxu1 %v10716_v7 }
 0x1b5   : > { %9655 = vmatmul.mubr.msk.f32.vlgmr.msra.gmra.mrb[12].mxu1 %vm292_vm3, %v1336_v24 }
 0x1b6   : > { %9663 = vmatpush3.xpose.msk.msra.mxu1 %vm292_vm3, %v1510_v25  ;;  %9664 = vmatprep.mubr.msk.f32.mxu1 %vm10717_vm2, %v10716_v7 }
 0x1b9   : > { %9665 = vmatmul.mubr.msk.f32.vlgmr.msra.gmra.mrb[14].mxu1 %vm292_vm3, %v1508_v26 }
 0x1ba   : > { %2210 = vmatprep.mubr.f32.mxu1 %v10716_v7 }
 0x270   : > { %v363_v27 = vpop.f32.mrb[0].mxu1 }
 0x271   : > { %v364_v28 = vadd.f32 %v363_v27, %v10794_v4  ;;  %v9596_v29 = vpop.f32.mrb[1].mxu1 }
 0x273   : > { %v368_v30 = vsel %vm367_vm4, %v364_v28, -inf }
 0x274   : > { %369 = vmax.xlane.f32.xlu0 %v368_v30  ;;  %v539_v31 = vpop.f32.mrb[2].mxu1 }
 0x275   : > { %v540_v32 = vadd.f32 %v539_v31, %v10794_v4  ;;  %v9606_v33 = vpop.f32.mrb[3].mxu1 }
 0x277   : > { %v543_v34 = vsel %vm367_vm4, %v540_v32, -inf }
 0x278   : > { %544 = vmax.xlane.f32.xlu1 %v543_v34  ;;  %v715_v35 = vpop.f32.mrb[4].mxu1 }
 0x279   : > { %v716_v36 = vadd.f32 %v715_v35, %v10794_v4  ;;  %v9616_v37 = vpop.f32.mrb[5].mxu1 }
 0x27b   : > { %v719_v38 = vsel %vm367_vm4, %v716_v36, -inf }
 0x27c   : > { %720 = vmax.xlane.f32.xlu0 %v719_v38  ;;  %v891_v39 = vpop.f32.mrb[6].mxu1 }
 0x27d   : > { %v892_v40 = vadd.f32 %v891_v39, %v10794_v4  ;;  %v9626_v41 = vpop.f32.mrb[7].mxu1 }
 0x27f   : > { %v895_v42 = vsel %vm367_vm4, %v892_v40, -inf }
 0x280   : > { %896 = vmax.xlane.f32.xlu0 %v895_v42  ;;  %v1066_v43 = vpop.f32.mrb[8].mxu1 }
 0x281   : > { %v1067_v44 = vadd.f32 %v1066_v43, %v10794_v4  ;;  %v9636_v45 = vpop.f32.mrb[9].mxu1 }
 0x283   : > { %v1070_v46 = vsel %vm367_vm4, %v1067_v44, -inf }
 0x284   : > { %1071 = vmax.xlane.f32.xlu1 %v1070_v46  ;;  %v1237_v47 = vpop.f32.mrb[10].mxu1 }
 0x285   : > { %v1238_v48 = vadd.f32 %v1237_v47, %v10794_v4  ;;  %v9646_v49 = vpop.f32.mrb[11].mxu1 }
 0x287   : > { %v1241_v50 = vsel %vm367_vm4, %v1238_v48, -inf }
 0x288   : > { %1242 = vmax.xlane.f32.xlu0 %v1241_v50  ;;  %v1409_v51 = vpop.f32.mrb[12].mxu1 }
 0x289   : > { %v1410_v52 = vadd.f32 %v1409_v51, %v10794_v4  ;;  %v9656_v53 = vpop.f32.mrb[13].mxu1 }
 0x28b   : > { %v1413_v54 = vsel %vm367_vm4, %v1410_v52, -inf }
 0x28c   : > { %1414 = vmax.xlane.f32.xlu1 %v1413_v54  ;;  %v1581_v55 = vpop.f32.mrb[14].mxu1 }
 0x28d   : > { %v1582_v56 = vadd.f32 %v1581_v55, %v10794_v4  ;;  %v9666_v57 = vpop.f32.mrb[15].mxu1 }
 0x28f   : > { %v1585_v58 = vsel %vm367_vm4, %v1582_v56, -inf }
 0x290   : > { %1586 = vmax.xlane.f32.xlu0 %v1585_v58 }
 0x29d   : > { %379 = vrot.lane.b32.xlu1 %v11003_v11, %s10725_s17 }
 0x2a6   : > { %554 = vrot.lane.b32.xlu0 %v11003_v11, %s10726_s27 }
 0x301   : > { %v370_v59 = vpop.xlane.xlu0 %369 }
 0x302   : > { %v371_v60 = vsub.f32 %v364_v28, %v370_v59 }
 0x304   : > { %v372_v61 = vmul.f32 1.442695, %v371_v60 }
 0x305   : > { %v545_v62 = vpop.xlane.xlu1 %544 }
 0x306   : > { %10492 = vpow2.f32 %v372_v61  ;;  %v546_v63 = vsub.f32 %v540_v32, %v545_v62 }
 0x308   : > { %v547_v6 = vmul.f32 1.442695, %v546_v63 }
 0x309   : > { %v721_v8 = vpop.xlane.xlu0 %720 }
 0x30a   : > { %10494 = vpow2.f32 %v547_v6  ;;  %v722_v9 = vsub.f32 %v716_v36, %v721_v8 }
 0x30c   : > { %v723_v10 = vmul.f32 1.442695, %v722_v9 }
 0x30d   : > { %v897_v22 = vpop.xlane.xlu0 %896 }
 0x30e   : > { %10496 = vpow2.f32 %v723_v10  ;;  %v898_v23 = vsub.f32 %v892_v40, %v897_v22 }
 0x310   : > { %v11081_v13 = vpop.eup %10492  ;;  %v899_v26 = vmul.f32 1.442695, %v898_v23 }
 0x311   : > { %v374_v14 = vsel %vm367_vm4, %v11081_v13, 0.0  ;;  %v1072_v16 = vpop.xlane.xlu1 %1071 }
 0x312   : > { %375 = vadd.xlane.f32.xlu1 %v374_v14  ;;  %v1073_v25 = vsub.f32 %v1067_v44, %v1072_v16  ;;  %10498 = vpow2.f32 %v899_v26  ;;  %v10729_v44 = vmov 0  }
 0x313   : > { %10482 = vset.pattern.permute.xlu1 %v10729_v44  ;;  %10483 = vset.pattern.permute.xlu0 %v10729_v44 }
 0x314   : > { %v11085_v15 = vpop.eup %10494  ;;  %v1074_v28 = vmul.f32 1.442695, %v1073_v25 }
 0x315   : > { %v549_v17 = vsel %vm367_vm4, %v11085_v15, 0.0  ;;  %v1243_v24 = vpop.xlane.xlu0 %1242 }
 0x316   : > { %550 = vadd.xlane.f32.xlu0 %v549_v17  ;;  %v1244_v27 = vsub.f32 %v1238_v48, %v1243_v24  ;;  %10500 = vpow2.f32 %v1074_v28 }
 0x318   : > { %v11089_v18 = vpop.eup %10496  ;;  %v1245_v29 = vmul.f32 1.442695, %v1244_v27 }
 0x319   : > { %v1415_v19 = vpop.xlane.xlu1 %1414  ;;  %v725_v20 = vsel %vm367_vm4, %v11089_v18, 0.0 }
 0x31a   : > { %726 = vadd.xlane.f32.xlu1 %v725_v20  ;;  %v1416_v30 = vsub.f32 %v1410_v52, %v1415_v19  ;;  %10502 = vpow2.f32 %v1245_v29 }
 0x31c   : > { %v1417_v32 = vmul.f32 1.442695, %v1416_v30  ;;  %v10499_v35 = vpop.eup %10498 }
 0x31d   : > { %v380_v21 = vpop.permute.xlu1 %379  ;;  %v1587_v31 = vpop.xlane.xlu0 %1586  ;;  %v901_v36 = vsel %vm367_vm4, %v10499_v35, 0.0 }
 0x31e   : > { %9598 = vmatpush3.msra.mxu0 %v380_v21  ;;  %v1588_v33 = vsub.f32 %v1582_v56, %v1587_v31  ;;  %10504 = vpow2.f32 %v1417_v32 }
 0x31f   : > { %9607 = vmatprep.subr.mxu0 %v10716_v7 }
 0x320   : > { %v1589_v34 = vmul.f32 1.442695, %v1588_v33 }
 0x321   : > { %v555_v45 = vpop.permute.xlu0 %554 }
 0x322   : > { %10506 = vpow2.f32 %v1589_v34 }
 0x32b   : > { %906 = vrot.lane.b32.xlu1 %v11003_v11, %s10727_s2 }
 0x32c   : > { %730 = vrot.lane.b32.xlu0 %v11003_v11, %s10728_s4  ;;  %v11098_v11 = vpop.eup %10500 }
 0x32d   : > { %v11101_v37 = vpop.eup %10502  ;;  %v1076_v38 = vsel %vm367_vm4, %v11098_v11, 0.0 }
 0x32e   : > { %v1247_v39 = vsel %vm367_vm4, %v11101_v37, 0.0  ;;  %v11107_v40 = vpop.eup %10504 }
 0x32f   : > { %v1419_v41 = vsel %vm367_vm4, %v11107_v40, 0.0  ;;  %v11111_v42 = vpop.eup %10506 }
 0x330   : > { %v1591_v43 = vsel %vm367_vm4, %v11111_v42, 0.0 }
 0x34b   : > { %902 = vadd.xlane.f32.xlu0 %v901_v36 }
 0x34f   : > { %1077 = vadd.xlane.f32.xlu0 %v1076_v38  ;;  %1248 = vadd.xlane.f32.xlu1 %v1247_v39 }
 0x353   : > { %1420 = vadd.xlane.f32.xlu0 %v1419_v41  ;;  %v286_v41 = vld [vmem:[%s285_s10] sm:$0xf]  ;;  %s3404_s10 = scalar_lea.vmem %s10831_s12, %s10660_s1 }
 0x357   : > { %1592 = vadd.xlane.f32.xlu0 %v1591_v43 }
 0x360   : > { %1252 = vrot.lane.b32.xlu1 %v11011_v12, %s10726_s27 }
 0x364   : > { %1424 = vrot.lane.b32.xlu1 %v11011_v12, %s10728_s4  ;;  %s3402_s4 = scalar_lea.vmem %s10826_s6, %s10660_s1 }
 0x368   : > { %1596 = vrot.lane.b32.xlu1 %v11011_v12, %s10727_s2  ;;  %s2008_s2 = scalar_lea.vmem %s10821_s30, %s10660_s1 }
 0x36d   : > { %1081 = vrot.lane.b32.xlu0 %v11011_v12, %s10725_s17  ;;  %s8707_s17 = sshll.u32 %s10660_s1, 4  ;;  %s185_s1 = sadd.s32 1, %s10660_s1  }
 0x36e   : > { %s11344_s27 = scalar_lea.vmem %s10811_s13, %s8707_s17  ;;  %p182_p0 = scmp.ge.s32.totalorder %s185_s1, 6  }
 0x36f   :  { %s11728_s21 = smov (%p182_p0), 0  }
 0x39f   : > { %v376_v46 = vpop.xlane.xlu1 %375 }
 0x3a0   : > { %10508 = vrcp.f32 %v376_v46 }
 0x3a3   : > { %v551_v47 = vpop.xlane.xlu0 %550 }
 0x3a4   : > { %10510 = vrcp.f32 %v551_v47 }
 0x3a7   : > { %v727_v48 = vpop.xlane.xlu1 %726  ;;  %v731_v52 = vpop.permute.xlu0 %730 }
 0x3a8   : > { %10512 = vrcp.f32 %v727_v48 }
 0x3aa   : > { %v10509_v49 = vpop.eup %10508 }
 0x3ab   : > { %v378_v50 = vmul.f32 %v10509_v49, %v11081_v13  ;;  %v907_v55 = vpop.permute.xlu1 %906 }
 0x3ad   : > { %9600 = vmatmul.mubr.msk.f32.vlgmr.msra.gmra.mrb[2].mxu0 %vm367_vm4, %v378_v50 }
 0x3ae   : > { %v10511_v51 = vpop.eup %10510  ;;  %9608 = vmatpush3.msra.mxu0 %v555_v45  ;;  %9609 = vmatprep.mubr.msk.f32.mxu0 %vm10717_vm2, %v10716_v7 }
 0x3af   : > { %v553_v12 = vmul.f32 %v10511_v51, %v11085_v15  ;;  %9617 = vmatprep.subr.mxu0 %v10716_v7 }
 0x3b1   : > { %9610 = vmatmul.mubr.msk.f32.vlgmr.msra.gmra.mrb[4].mxu0 %vm367_vm4, %v553_v12 }
 0x3b2   : > { %v10513_v53 = vpop.eup %10512  ;;  %9618 = vmatpush3.msra.mxu0 %v731_v52  ;;  %9619 = vmatprep.mubr.msk.f32.mxu0 %vm10717_vm2, %v10716_v7 }
 0x3b3   : > { %v729_v54 = vmul.f32 %v10513_v53, %v11089_v18  ;;  %9627 = vmatprep.subr.mxu0 %v10716_v7 }
 0x3b5   : > { %9620 = vmatmul.mubr.msk.f32.vlgmr.msra.gmra.mrb[6].mxu0 %vm367_vm4, %v729_v54 }
 0x3b6   : > { %9628 = vmatpush3.msra.mxu0 %v907_v55  ;;  %9629 = vmatprep.mubr.msk.f32.mxu0 %vm10717_vm2, %v10716_v7  ;;  %v8704_v55 = vld [vmem:[%s287_s0] ss:$0 sm:$0xff] }
 0x3b7   : > { %9637 = vmatprep.subr.mxu0 %v10716_v7 }
 0x3d8   : > { %v903_v56 = vpop.xlane.xlu0 %902 }
 0x3d9   : > { %10514 = vrcp.f32 %v903_v56 }
 0x3dc   : > { %v1078_v57 = vpop.xlane.xlu0 %1077  ;;  %v1249_v58 = vpop.xlane.xlu1 %1248 }
 0x3dd   : > { %10516 = vrcp.f32 %v1078_v57 }
 0x3de   : > { %10518 = vrcp.f32 %v1249_v58 }
 0x3e0   : > { %v1421_v59 = vpop.xlane.xlu0 %1420  ;;  %v1253_v63 = vpop.permute.xlu1 %1252 }
 0x3e1   : > { %10520 = vrcp.f32 %v1421_v59 }
 0x3e3   : > { %v10515_v60 = vpop.eup %10514 }
 0x3e4   : > { %v905_v61 = vmul.f32 %v10515_v60, %v10499_v35  ;;  %v1593_v62 = vpop.xlane.xlu0 %1592  ;;  %v1425_v14 = vpop.permute.xlu1 %1424 }
 0x3e5   : > { %10522 = vrcp.f32 %v1593_v62 }
 0x3e6   : > { %9630 = vmatmul.mubr.msk.f32.vlgmr.msra.gmra.mrb[8].mxu0 %vm367_vm4, %v905_v61 }
 0x3e7   : > { %9639 = vmatprep.mubr.msk.f32.mxu0 %vm10717_vm2, %v10716_v7  ;;  %v10517_v6 = vpop.eup %10516 }
 0x3e8   : > { %v1082_v8 = vpop.permute.xlu0 %1081  ;;  %v1080_v9 = vmul.f32 %v10517_v6, %v11098_v11  ;;  %v10519_v10 = vpop.eup %10518  ;;  %v460_v11 = vlaneseq }
 0x3e9   : > { %9638 = vmatpush3.msra.mxu0 %v1082_v8  ;;  %v1251_v13 = vmul.f32 %v10519_v10, %v11101_v37  ;;  %v1597_v18 = vpop.permute.xlu1 %1596 }
 0x3ea   : > { %9647 = vmatprep.subr.mxu0 %v10716_v7  ;;  %9640 = vmatmul.mubr.msk.f32.vlgmr.msra.gmra.mrb[10].mxu0 %vm367_vm4, %v1080_v9  ;;  %v11159_v36 = vshrl.u32 %v460_v11, 7 }
 0x3eb   : > { %9648 = vmatpush3.msra.mxu0 %v1253_v63  ;;  %9649 = vmatprep.mubr.msk.f32.mxu0 %vm10717_vm2, %v10716_v7  ;;  %v10521_v15 = vpop.eup %10520 }
 0x3ec   : > { %9657 = vmatprep.subr.mxu0 %v10716_v7  ;;  %v1423_v16 = vmul.f32 %v10521_v15, %v11107_v40  ;;  %v11165_v38 = vsub.s32 1, %v11159_v36  ;;  %v11168_v39 = vsub.s32 0, %v11159_v36  ;;  %v11171_v40 = vsub.s32 2, %v11159_v36 }
 0x3ed   : > { %v11177_v46 = vsub.s32 3, %v11159_v36 }
 0x3ee   : > { %9650 = vmatmul.mubr.msk.f32.vlgmr.msra.gmra.mrb[12].mxu0 %vm367_vm4, %v1251_v13  ;;  %v463_v44 = vrot.slane %v286_v41, %v11168_v39  ;;  %v814_v45 = vrot.slane %v286_v41, %v11171_v40 }
 0x3ef   : > { %9658 = vmatpush3.msra.mxu0 %v1425_v14  ;;  %9659 = vmatprep.mubr.msk.f32.mxu0 %vm10717_vm2, %v10716_v7  ;;  %v10523_v17 = vpop.eup %10522  ;;  %v990_v51 = vrot.slane %v286_v41, %v11177_v46 }
 0x3f0   : > { %9667 = vmatprep.subr.mxu0 %v10716_v7  ;;  %v1595_v19 = vmul.f32 %v10523_v17, %v11111_v42  ;;  %v638_v42 = vrot.slane %v286_v41, %v11165_v38 }
 0x3f2   : > { %9660 = vmatmul.mubr.msk.f32.vlgmr.msra.gmra.mrb[14].mxu0 %vm367_vm4, %v1423_v16 }
 0x3f3   : > { %9668 = vmatpush3.msra.mxu0 %v1597_v18  ;;  %9669 = vmatprep.mubr.msk.f32.mxu0 %vm10717_vm2, %v10716_v7 }
 0x3f6   : > { %9670 = vmatmul.mubr.msk.f32.vlgmr.msra.gmra.mrb[16].mxu0 %vm367_vm4, %v1595_v19 }
 0x3f7   : > { %2287 = vmatprep.mubr.f32.mxu0 %v10716_v7 }
 0x480   : > { %v451_v20 = vpop.f32.mrb[2].mxu0 }
 0x481   : > { %v9601_v21 = vpop.f32.mrb[3].mxu0  ;;  %457 = vperm.xlu1 %10482, %v451_v20  }
 0x484   : > { %v626_v22 = vpop.f32.mrb[4].mxu0 }
 0x485   : > { %632 = vperm.xlu1 %10482, %v626_v22   ;;  %v9611_v23 = vpop.f32.mrb[5].mxu0 }
 0x488   : > { %v802_v24 = vpop.f32.mrb[6].mxu0 }
 0x489   : > { %808 = vperm.xlu0 %10483, %v802_v24   ;;  %v9621_v25 = vpop.f32.mrb[7].mxu0 }
 0x4b9   : > { %v978_v26 = vpop.f32.mrb[8].mxu0 }
 0x4ba   : > { %984 = vperm.xlu1 %10482, %v978_v26   ;;  %v9631_v27 = vpop.f32.mrb[9].mxu0 }
 0x4bd   : > { %v1153_v28 = vpop.f32.mrb[10].mxu0 }
 0x4be   : > { %1159 = vperm.xlu1 %10482, %v1153_v28   ;;  %v9641_v29 = vpop.f32.mrb[11].mxu0  ;;  %v1740_v28 = vld [vmem:[%s11190_s5 + $0x8] sm:$0xff] }
 0x4c1   : > { %v1324_v30 = vpop.f32.mrb[12].mxu0 }
 0x4c2   : > { %1330 = vperm.xlu0 %10483, %v1324_v30   ;;  %v9651_v31 = vpop.f32.mrb[13].mxu0  ;;  %v2101_v30 = vcombine.high %v1740_v28, %v1740_v28 }
 0x4c3   : > { %v1741_v31 = vld [vmem:[%s11190_s5 + $0x10] sm:$0xff] }
 0x4c4   : > { %8714 = vmatprep.subr.msk.mxu0 %vm206_vm1, %v2101_v30  ;;  %v1805_v30 = vld [vmem:[%s11236_s24 + $0x1a8] sm:$0xff] }
 0x4c5   : > { %v1496_v32 = vpop.f32.mrb[14].mxu0  ;;  %8715 = vmatpush1.msk.msra.mxu0 %vm206_vm1, %v1740_v28  ;;  %v1773_v28 = vld [vmem:[%s11236_s24 + $0xa8] sm:$0xff] }
 0x4c6   : > { %1502 = vperm.xlu1 %10482, %v1496_v32   ;;  %v9661_v33 = vpop.f32.mrb[15].mxu0  ;;  %v1742_v32 = vld [vmem:[%s11190_s5 + $0x18] sm:$0xff] }
 0x4c7   : > { %v2102_v33 = vcombine.high %v1741_v31, %v1741_v31 }
 0x4c9   : > { %v1668_v34 = vpop.f32.mrb[16].mxu0 }
 0x4ca   : > { %1674 = vperm.xlu0 %10483, %v1668_v34   ;;  %v9671_v35 = vpop.f32.mrb[17].mxu0  ;;  %v2103_v34 = vcombine.high %v1742_v32, %v1742_v32 }
 0x4cc   : > { %8722 = vmatprep.subr.msk.mxu0 %vm206_vm1, %v2103_v34  ;;  %v1757_v34 = vld [vmem:[%s11236_s24 + $0x28] sm:$0xff] }
 0x500   : > { %v458_v37 = vpop.permute.xlu1 %457 }
 0x501   : > { %v464_v49 = vmul.f32 %v463_v44, %v458_v37 }
 0x504   : > { %v633_v43 = vpop.permute.xlu1 %632 }
 0x505   : > { %v639_v48 = vmul.f32 %v638_v42, %v633_v43 }
 0x507   : > { %v640_v12 = vadd.f32 %v639_v48, %v464_v49  ;;  %v1743_v49 = vld [vmem:[%s11190_s5 + $0x20] sm:$0xff] }
 0x508   : > { %v809_v47 = vpop.permute.xlu0 %808 }
 0x509   : > { %v815_v50 = vmul.f32 %v814_v45, %v809_v47 }
 0x50b   : > { %v816_v53 = vadd.f32 %v815_v50, %v640_v12  ;;  %v1744_v50 = vld [vmem:[%s11190_s5 + $0x28] sm:$0xff] }
 0x539   : > { %v985_v52 = vpop.permute.xlu1 %984 }
 0x53a   : > { %v991_v54 = vmul.f32 %v990_v51, %v985_v52  ;;  %v2104_v52 = vcombine.high %v1743_v49, %v1743_v49 }
 0x53c   : > { %v992_v56 = vadd.f32 %v991_v54, %v816_v53  ;;  %v2105_v53 = vcombine.high %v1744_v50, %v1744_v50 }
 0x53d   : > { %v1160_v59 = vpop.permute.xlu1 %1159 }
 0x53e   : > { %v1685_v57 = vadd.f32 %v8704_v55, %v992_v56  ;;  %v1162_v6 = vmul.f32 %v1160_v59, %v463_v44  ;;  %v8706_v44 = vld [vmem:[%s1691_s20] ss:$0 sm:$0xff]  ;;  %v1746_v59 = vld [vmem:[%s11190_s5 + $0x38] sm:$0xff] }
 0x540   : > { %v1687_v58 = vadd.f32 %v10656_v0, %v1685_v57 }
 0x541   : > { %v1331_v60 = vpop.permute.xlu0 %1330 }
 0x542   : > { %v1693_v61 = vsel %vm199_vm0, %v1687_v58, 0.0  ;;  %v1333_v62 = vmul.f32 %v1331_v60, %v638_v42  ;;  %v8705_v42 = vld [vmem:[%s1689_s16] ss:$0 sm:$0xff] }
 0x543   : > { %1694 = vadd.xlane.f32.xlu1 %v1693_v61  ;;  %v2107_v61 = vcombine.high %v1746_v59, %v1746_v59 }
 0x544   : > { %v1334_v9 = vadd.f32 %v1333_v62, %v1162_v6  ;;  %v1768_v62 = vld [vmem:[%s11236_s24 + $0x80] sm:$0xff] }
 0x545   : > { %v1503_v63 = vpop.permute.xlu1 %1502  ;;  %v1800_v6 = vld [vmem:[%s11236_s24 + $0x180] sm:$0xff] }
 0x546   : > { %v1505_v8 = vmul.f32 %v1503_v63, %v814_v45  ;;  %v1769_v63 = vld [vmem:[%s11236_s24 + $0x88] sm:$0xff] }
 0x548   : > { %v1506_v13 = vadd.f32 %v1505_v8, %v1334_v9  ;;  %v1801_v8 = vld [vmem:[%s11236_s24 + $0x188] sm:$0xff]  ;;  %v9852_v9 = vpack.c.bf16 %v1769_v63, %v1768_v62 }
 0x549   : > { %v1675_v10 = vpop.permute.xlu0 %1674  ;;  %v1761_v62 = vld [vmem:[%s11236_s24 + $0x48] sm:$0xff] }
 0x54a   : > { %v1677_v14 = vmul.f32 %v1675_v10, %v990_v51  ;;  %v9884_v10 = vpack.c.bf16 %v1801_v8, %v1800_v6  ;;  %v1792_v8 = vld [vmem:[%s11236_s24 + $0x140] sm:$0xff] }
 0x54c   : > { %v1678_v15 = vadd.f32 %v1677_v14, %v1506_v13  ;;  %v1752_v13 = vld [vmem:[%s11236_s24] sm:$0xff]  ;;  %v1753_v14 = vld [vmem:[%s11236_s24 + $0x8] sm:$0xff] }
 0x54e   : > { %v1686_v16 = vadd.f32 %v8704_v55, %v1678_v15  ;;  %v1784_v15 = vld [vmem:[%s11236_s24 + $0x100] sm:$0xff] }
 0x550   : > { %v1688_v17 = vadd.f32 %v10652_v1, %v1686_v16  ;;  %v1739_v1 = vld [vmem:[%s11190_s5] sm:$0xff]  ;;  %v1785_v16 = vld [vmem:[%s11236_s24 + $0x108] sm:$0xff] }
 0x551   : > { %v2100_v29 = vcombine.high %v1739_v1, %v1739_v1 }
 0x552   : > { %v1696_v0 = vsel %vm199_vm0, %v1688_v17, 0.0 }
 0x553   : > { %1697 = vadd.xlane.f32.xlu0 %v1696_v0  ;;  %8710 = vmatprep.subr.msk.mxu1 %vm206_vm1, %v2100_v29  ;;  %v1771_v0 = vld [vmem:[%s11236_s24 + $0x98] sm:$0xff]  ;;  %v1804_v29 = vld [vmem:[%s11236_s24 + $0x1a0] sm:$0xff] }
 0x554   : > { %8711 = vmatpush1.msk.msra.mxu1 %vm206_vm1, %v1739_v1  ;;  %v1772_v1 = vld [vmem:[%s11236_s24 + $0xa0] sm:$0xff] }
 0x555   : > { %8718 = vmatprep.subr.msk.mxu1 %vm206_vm1, %v2102_v33  ;;  %v1756_v33 = vld [vmem:[%s11236_s24 + $0x20] sm:$0xff] }
 0x5d0   : > { %v1695_v18 = vpop.xlane.xlu1 %1694 }
 0x5d1   : > { %v1700_v19 = vmul.f32 0.25, %v1695_v18  ;;  %v1802_v18 = vld [vmem:[%s11236_s24 + $0x190] sm:$0xff] }
 0x5d3   : > { %v1702_v20 = vsub.f32 %v1687_v58, %v1700_v19  ;;  %v1745_v58 = vld [vmem:[%s11190_s5 + $0x30] sm:$0xff]  ;;  %v1803_v19 = vld [vmem:[%s11236_s24 + $0x198] sm:$0xff] }
 0x5d4   : > { %v2106_v60 = vcombine.high %v1745_v58, %v1745_v58 }
 0x5d5   : > { %v1704_v21 = vmul.f32 %v1702_v20, %v1702_v20 }
 0x5d7   : > { %v1706_v22 = vsel %vm199_vm0, %v1704_v21, 0.0  ;;  %v9886_v21 = vpack.c.bf16 %v1785_v16, %v1784_v15  ;;  %v1811_v15 = vld [vmem:[%s11236_s24 + $0x1d8] sm:$0xff] }
 0x5d8   : > { %1707 = vadd.xlane.f32.xlu0 %v1706_v22  ;;  %v1754_v22 = vld [vmem:[%s11236_s24 + $0x10] sm:$0xff] }
 0x5e0   : > { %v1698_v23 = vpop.xlane.xlu0 %1697 }
 0x5e1   : > { %v1701_v24 = vmul.f32 0.25, %v1698_v23  ;;  %v1755_v23 = vld [vmem:[%s11236_s24 + $0x18] sm:$0xff] }
 0x5e3   : > { %v1703_v25 = vsub.f32 %v1688_v17, %v1701_v24  ;;  %v1770_v17 = vld [vmem:[%s11236_s24 + $0x90] sm:$0xff] }
 0x5e4   : > { %v9856_v24 = vpack.c.bf16 %v1771_v0, %v1770_v17  ;;  %v1762_v0 = vld [vmem:[%s11236_s24 + $0x50] sm:$0xff] }
 0x5e5   : > { %v1705_v26 = vmul.f32 %v1703_v25, %v1703_v25 }
 0x5e7   : > { %v1709_v27 = vsel %vm199_vm0, %v1705_v26, 0.0  ;;  %v1786_v26 = vld [vmem:[%s11236_s24 + $0x110] sm:$0xff] }
 0x5e8   : > { %1710 = vadd.xlane.f32.xlu1 %v1709_v27  ;;  %v1787_v27 = vld [vmem:[%s11236_s24 + $0x118] sm:$0xff] }
 0x665   : > { %v1708_v35 = vpop.xlane.xlu0 %1707 }
 0x666   : > { %v1712_v11 = vmul.f32 0.25, %v1708_v35  ;;  %v9860_v35 = vpack.c.bf16 %v1773_v28, %v1772_v1  ;;  %v1764_v28 = vld [vmem:[%s11236_s24 + $0x60] sm:$0xff] }
 0x668   : > { %v1714_v37 = vadd.f32 1e-05, %v1712_v11  ;;  %v9892_v11 = vpack.c.bf16 %v1805_v30, %v1804_v29 }
 0x66a   : > { %10524 = vrsqrt.f32 %v1714_v37  ;;  %v1788_v37 = vld [vmem:[%s11236_s24 + $0x120] sm:$0xff] }
 0x674   : > { %v10525_v41 = vpop.eup %10524 }
 0x675   : > { %v1718_v43 = vmul.f32 %v10525_v41, %v1702_v20  ;;  %v1711_v45 = vpop.xlane.xlu1 %1710  ;;  %v9854_v20 = vpack.c.bf16 %v1753_v14, %v1752_v13  ;;  %v1789_v41 = vld [vmem:[%s11236_s24 + $0x128] sm:$0xff]  ;;  %v1779_v13 = vld [vmem:[%s11236_s24 + $0xd8] sm:$0xff]  ;;  %v1810_v14 = vld [vmem:[%s11236_s24 + $0x1d0] sm:$0xff] }
 0x676   : > { %v1713_v48 = vmul.f32 0.25, %v1711_v45  ;;  %v9862_v45 = vpack.c.bf16 %v1757_v34, %v1756_v33  ;;  %v1797_v33 = vld [vmem:[%s11236_s24 + $0x168] sm:$0xff] }
 0x677   : > { %v1726_v47 = vmul.f32 %v8705_v42, %v1718_v43  ;;  %v1806_v43 = vld [vmem:[%s11236_s24 + $0x1b0] sm:$0xff] }
 0x678   : > { %v1715_v12 = vadd.f32 1e-05, %v1713_v48  ;;  %v1758_v48 = vld [vmem:[%s11236_s24 + $0x30] sm:$0xff] }
 0x679   : > { %v11208_v51 = vadd.f32 %v8706_v44, %v1726_v47  ;;  %v9894_v47 = vpack.c.bf16 %v1789_v41, %v1788_v37  ;;  %v1783_v37 = vld [vmem:[%s11236_s24 + $0xf8] sm:$0xff]  ;;  %v1814_v41 = vld [vmem:[%s11236_s24 + $0x1f0] sm:$0xff] }
 0x67a   : > { %10526 = vrsqrt.f32 %v1715_v12 }
 0x67b   : > { %8712 = vmatmul.mubr.msk.f32.vlgmr.msra.gmra.mrb[16].mxu1 %vm199_vm0, %v11208_v51  ;;  %8716 = vmatmul.mubr.msk.f32.vlgmr.msra.gmra.mrb[18].mxu0 %vm199_vm0, %v11208_v51 }
 0x67c   : > { %2216 = vmatprep.mubr.f32.mxu1 %v10716_v7  ;;  %2293 = vmatprep.mubr.f32.mxu0 %v10716_v7 }
 0x67d   : > { %8719 = vmatpush1.msk.msra.mxu1 %vm206_vm1, %v1741_v31  ;;  %8723 = vmatpush1.msk.msra.mxu0 %vm206_vm1, %v1742_v32  ;;  %v9858_v31 = vpack.c.bf16 %v1755_v23, %v1754_v22  ;;  %v9890_v32 = vpack.c.bf16 %v1787_v27, %v1786_v26  ;;  %v1795_v22 = vld [vmem:[%s11236_s24 + $0x158] sm:$0xff]  ;;  %v1780_v23 = vld [vmem:[%s11236_s24 + $0xe0] sm:$0xff]  ;;  %v1813_v26 = vld [vmem:[%s11236_s24 + $0x1e8] sm:$0xff] }
 0x67e   : > { %8726 = vmatprep.subr.msk.mxu1 %vm206_vm1, %v2104_v52  ;;  %8730 = vmatprep.subr.msk.mxu0 %vm206_vm1, %v2105_v53  ;;  %v1790_v52 = vld [vmem:[%s11236_s24 + $0x130] sm:$0xff]  ;;  %v1791_v53 = vld [vmem:[%s11236_s24 + $0x138] sm:$0xff] }
 0x684   : > { %v10527_v54 = vpop.eup %10526 }
 0x685   : > { %v1719_v55 = vmul.f32 %v10527_v54, %v1703_v25  ;;  %v9888_v25 = vpack.c.bf16 %v1803_v19, %v1802_v18  ;;  %v1776_v54 = vld [vmem:[%s11236_s24 + $0xc0] sm:$0xff]  ;;  %v1763_v18 = vld [vmem:[%s11236_s24 + $0x58] sm:$0xff] }
 0x686   : > { %v9874_v27 = vpack.c.bf16 %v1763_v18, %v1762_v0  ;;  %v1834_v0 = vld [vmem:[%s11236_s24 + $0x290] sm:$0xff] }
 0x687   : > { %v1727_v56 = vmul.f32 %v8705_v42, %v1719_v55  ;;  %v1774_v42 = vld [vmem:[%s11236_s24 + $0xb0] sm:$0xff]  ;;  %v1777_v55 = vld [vmem:[%s11236_s24 + $0xc8] sm:$0xff] }
 0x688   : > { %v9868_v63 = vpack.c.bf16 %v1777_v55, %v1776_v54  ;;  %v1865_v55 = vld [vmem:[%s11236_s24 + $0x388] sm:$0xff] }
 0x689   : > { %v11220_v57 = vadd.f32 %v8706_v44, %v1727_v56  ;;  %v1807_v44 = vld [vmem:[%s11236_s24 + $0x1b8] sm:$0xff]  ;;  %v1808_v56 = vld [vmem:[%s11236_s24 + $0x1c0] sm:$0xff] }
 0x68a   : > { %v9896_v12 = vpack.c.bf16 %v1807_v44, %v1806_v43  ;;  %v1766_v43 = vld [vmem:[%s11236_s24 + $0x70] sm:$0xff]  ;;  %v1767_v44 = vld [vmem:[%s11236_s24 + $0x78] sm:$0xff] }
 0x68b   : > { %8713 = vmatmul.mubr.msk.f32.gmra.mrb[18].mxu1 %vm199_vm0, %v11220_v57  ;;  %8717 = vmatmul.mubr.msk.f32.gmra.mrb[20].mxu0 %vm199_vm0, %v11220_v57 }
 0x68c   : > { %2364 = vmatprep.mubr.f32.mxu1 %v10716_v7  ;;  %2441 = vmatprep.mubr.f32.mxu0 %v10716_v7 }
 0x68f   : > { %8720 = vmatmul.mubr.msk.f32.vlgmr.msra.gmra.mrb[20].mxu1 %vm199_vm0, %v11208_v51  ;;  %8724 = vmatmul.mubr.msk.f32.vlgmr.msra.gmra.mrb[22].mxu0 %vm199_vm0, %v11208_v51 }
 0x690   : > { %2370 = vmatprep.mubr.f32.mxu1 %v10716_v7  ;;  %2447 = vmatprep.mubr.f32.mxu0 %v10716_v7 }
 0x691   : > { %8727 = vmatpush1.msk.msra.mxu1 %vm206_vm1, %v1743_v49  ;;  %8731 = vmatpush1.msk.msra.mxu0 %vm206_vm1, %v1744_v50  ;;  %v1759_v49 = vld [vmem:[%s11236_s24 + $0x38] sm:$0xff] }
 0x692   : > { %8734 = vmatprep.subr.msk.mxu1 %vm206_vm1, %v2106_v60  ;;  %8738 = vmatprep.subr.msk.mxu0 %vm206_vm1, %v2107_v61  ;;  %v9898_v60 = vpack.c.bf16 %v1791_v53, %v1790_v52  ;;  %v1760_v61 = vld [vmem:[%s11236_s24 + $0x40] sm:$0xff]  ;;  %v1833_v52 = vld [vmem:[%s11236_s24 + $0x288] sm:$0xff] }
 0x693   : > { %8721 = vmatmul.mubr.msk.f32.gmra.mrb[22].mxu1 %vm199_vm0, %v11220_v57  ;;  %8725 = vmatmul.mubr.msk.f32.gmra.mrb[24].mxu0 %vm199_vm0, %v11220_v57  ;;  %v9870_v16 = vpack.c.bf16 %v1761_v62, %v1760_v61  ;;  %v1864_v53 = vld [vmem:[%s11236_s24 + $0x380] sm:$0xff] }
 0x694   : > { %2518 = vmatprep.mubr.f32.mxu1 %v10716_v7  ;;  %2595 = vmatprep.mubr.f32.mxu0 %v10716_v7 }
 0x697   : > { %8728 = vmatmul.mubr.msk.f32.vlgmr.msra.gmra.mrb[24].mxu1 %vm199_vm0, %v11208_v51  ;;  %8732 = vmatmul.mubr.msk.f32.vlgmr.msra.gmra.mrb[26].mxu0 %vm199_vm0, %v11208_v51 }
 0x698   : > { %2524 = vmatprep.mubr.f32.mxu1 %v10716_v7  ;;  %2601 = vmatprep.mubr.f32.mxu0 %v10716_v7 }
 0x699   : > { %8735 = vmatpush1.msk.msra.mxu1 %vm206_vm1, %v1745_v58  ;;  %8739 = vmatpush1.msk.msra.mxu0 %vm206_vm1, %v1746_v59  ;;  %v1809_v58 = vld [vmem:[%s11236_s24 + $0x1c8] sm:$0xff]  ;;  %v9866_v59 = vpack.c.bf16 %v1759_v49, %v1758_v48  ;;  %v1798_v48 = vld [vmem:[%s11236_s24 + $0x170] sm:$0xff]  ;;  %v1799_v49 = vld [vmem:[%s11236_s24 + $0x178] sm:$0xff] }
 0x69a   : > { %9853 = vmatprep.subr.bf16.mxu1 %v9852_v9  ;;  %9885 = vmatprep.subr.bf16.mxu0 %v9884_v10  ;;  %v9900_v6 = vpack.c.bf16 %v1809_v58, %v1808_v56  ;;  %v1793_v9 = vld [vmem:[%s11236_s24 + $0x148] sm:$0xff]  ;;  %v1778_v10 = vld [vmem:[%s11236_s24 + $0xd0] sm:$0xff]  ;;  %v9948_v56 = vpack.c.bf16 %v1865_v55, %v1864_v53  ;;  %v11347_v58 = vld [vmem:[%s11344_s27] sm:$0xff] }
 0x69b   : > { %8729 = vmatmul.mubr.msk.f32.gmra.mrb[26].mxu1 %vm199_vm0, %v11220_v57  ;;  %8733 = vmatmul.mubr.msk.f32.gmra.mrb[28].mxu0 %vm199_vm0, %v11220_v57  ;;  %v9902_v17 = vpack.c.bf16 %v1793_v9, %v1792_v8  ;;  %v9872_v19 = vpack.c.bf16 %v1779_v13, %v1778_v10  ;;  %v11359_v61 = vrot.slane %v11347_v58, %v11165_v38  ;;  %v1816_v8 = vld [vmem:[%s11236_s24 + $0x200] sm:$0xff]  ;;  %v1817_v9 = vld [vmem:[%s11236_s24 + $0x208] sm:$0xff]  ;;  %v1822_v55 = vld [vmem:[%s11236_s24 + $0x230] sm:$0xff] }
 0x69c   : > { %2672 = vmatprep.mubr.f32.mxu1 %v10716_v7  ;;  %2749 = vmatprep.mubr.f32.mxu0 %v10716_v7  ;;  %v11363_v62 = vrot.slane %v11347_v58, %v11177_v46 }
 0x69f   : > { %8736 = vmatmul.mubr.msk.f32.vlgmr.msra.gmra.mrb[28].mxu1 %vm199_vm0, %v11208_v51  ;;  %8740 = vmatmul.mubr.msk.f32.vlgmr.msra.gmra.mrb[30].mxu0 %vm199_vm0, %v11208_v51 }
 0x6a0   : > { %2678 = vmatprep.mubr.f32.mxu1 %v10716_v7  ;;  %2755 = vmatprep.mubr.f32.mxu0 %v10716_v7  ;;  %v1775_v7 = vld [vmem:[%s11236_s24 + $0xb8] sm:$0xff] }
 0x6a1   : > { %9855 = vmatpush3.bf16.msra.mxu1 %v9854_v20  ;;  %9887 = vmatpush3.bf16.msra.mxu0 %v9886_v21  ;;  %v9864_v50 = vpack.c.bf16 %v1775_v7, %v1774_v42  ;;  %v9904_v20 = vpack.c.bf16 %v1811_v15, %v1810_v14  ;;  %v1794_v21 = vld [vmem:[%s11236_s24 + $0x150] sm:$0xff]  ;;  %v1815_v7 = vld [vmem:[%s11236_s24 + $0x1f8] sm:$0xff] }
 0x6a2   : > { %9857 = vmatprep.subr.bf16.mxu1 %v9856_v24  ;;  %9889 = vmatprep.subr.bf16.mxu0 %v9888_v25  ;;  %v1781_v24 = vld [vmem:[%s11236_s24 + $0xe8] sm:$0xff]  ;;  %v1812_v25 = vld [vmem:[%s11236_s24 + $0x1e0] sm:$0xff]  ;;  %v9906_v1 = vpack.c.bf16 %v1795_v22, %v1794_v21  ;;  %v1866_v21 = vld [vmem:[%s11236_s24 + $0x390] sm:$0xff] }
 0x6a3   : > { %8737 = vmatmul.mubr.msk.f32.gmra.mrb[30].mxu1 %vm199_vm0, %v11220_v57  ;;  %8741 = vmatmul.mubr.msk.f32.gmra.mrb[32].mxu0 %vm199_vm0, %v11220_v57  ;;  %v9876_v29 = vpack.c.bf16 %v1781_v24, %v1780_v23  ;;  %v9908_v30 = vpack.c.bf16 %v1813_v26, %v1812_v25  ;;  %v1867_v22 = vld [vmem:[%s11236_s24 + $0x398] sm:$0xff]  ;;  %v9918_v25 = vpack.c.bf16 %v1817_v9, %v1816_v8  ;;  %v1854_v8 = vld [vmem:[%s11236_s24 + $0x330] sm:$0xff] }
 0x6a4   : > { %v1855_v9 = vld [vmem:[%s11236_s24 + $0x338] sm:$0xff] }
 0x6a5   : > { %9859 = vmatpush3.bf16.msra.mxu1 %v9858_v31  ;;  %9891 = vmatpush3.bf16.msra.mxu0 %v9890_v32  ;;  %v1765_v31 = vld [vmem:[%s11236_s24 + $0x68] sm:$0xff]  ;;  %v1796_v32 = vld [vmem:[%s11236_s24 + $0x160] sm:$0xff] }
 0x6a6   : > { %9861 = vmatprep.subr.bf16.mxu1 %v9860_v35  ;;  %9893 = vmatprep.subr.bf16.mxu0 %v9892_v11  ;;  %v9878_v34 = vpack.c.bf16 %v1765_v31, %v1764_v28  ;;  %v9910_v35 = vpack.c.bf16 %v1797_v33, %v1796_v32  ;;  %v1782_v11 = vld [vmem:[%s11236_s24 + $0xf0] sm:$0xff]  ;;  %v9952_v31 = vpack.c.bf16 %v1867_v22, %v1866_v21  ;;  %v1851_v33 = vld [vmem:[%s11236_s24 + $0x318] sm:$0xff] }
 0x6a7   : > { %v9880_v42 = vpack.c.bf16 %v1783_v37, %v1782_v11  ;;  %v1850_v32 = vld [vmem:[%s11236_s24 + $0x310] sm:$0xff]  ;;  %v1868_v11 = vld [vmem:[%s11236_s24 + $0x3a0] sm:$0xff]  ;;  %v1869_v37 = vld [vmem:[%s11236_s24 + $0x3a8] sm:$0xff] }
 0x6a9   : > { %9863 = vmatpush3.bf16.msra.mxu1 %v9862_v45  ;;  %9895 = vmatpush3.bf16.msra.mxu0 %v9894_v47  ;;  %v9912_v45 = vpack.c.bf16 %v1815_v7, %v1814_v41  ;;  %v9882_v47 = vpack.c.bf16 %v1767_v44, %v1766_v43  ;;  %v1820_v7 = vld [vmem:[%s11236_s24 + $0x220] sm:$0xff]  ;;  %v1821_v43 = vld [vmem:[%s11236_s24 + $0x228] sm:$0xff] }
 0x6aa   : > { %9865 = vmatprep.subr.bf16.mxu1 %v9864_v50  ;;  %9897 = vmatprep.subr.bf16.mxu0 %v9896_v12  ;;  %v9914_v50 = vpack.c.bf16 %v1799_v49, %v1798_v48  ;;  %v1832_v12 = vld [vmem:[%s11236_s24 + $0x280] sm:$0xff]  ;;  %v1853_v48 = vld [vmem:[%s11236_s24 + $0x328] sm:$0xff]  ;;  %v1838_v49 = vld [vmem:[%s11236_s24 + $0x2b0] sm:$0xff]  ;;  %v9926_v53 = vpack.c.bf16 %v1821_v43, %v1820_v7 }
 0x6ab   : > { %v9916_v54 = vpack.c.bf16 %v1833_v52, %v1832_v12  ;;  %v1870_v12 = vld [vmem:[%s11236_s24 + $0x3b0] sm:$0xff]  ;;  %v1871_v52 = vld [vmem:[%s11236_s24 + $0x3b8] sm:$0xff] }
 0x6ac   : > { %v1827_v43 = vld [vmem:[%s11236_s24 + $0x258] sm:$0xff] }
 0x6ad   : > { %9867 = vmatpush3.bf16.msra.mxu1 %v9866_v59  ;;  %9899 = vmatpush3.bf16.msra.mxu0 %v9898_v60  ;;  %v11351_v59 = vrot.slane %v11347_v58, %v11168_v39  ;;  %v11355_v60 = vrot.slane %v11347_v58, %v11171_v40 }
 0x6ae   : > { %9869 = vmatprep.subr.bf16.mxu1 %v9868_v63  ;;  %9901 = vmatprep.subr.bf16.mxu0 %v9900_v6 }
 0x6b1   : > { %9871 = vmatpush3.bf16.msra.mxu1 %v9870_v16  ;;  %9903 = vmatpush3.bf16.msra.mxu0 %v9902_v17  ;;  %v1848_v16 = vld [vmem:[%s11236_s24 + $0x300] sm:$0xff]  ;;  %v1849_v17 = vld [vmem:[%s11236_s24 + $0x308] sm:$0xff] }
 0x6b2   : > { %9873 = vmatprep.subr.bf16.mxu1 %v9872_v19  ;;  %9905 = vmatprep.subr.bf16.mxu0 %v9904_v20  ;;  %v1835_v20 = vld [vmem:[%s11236_s24 + $0x298] sm:$0xff]  ;;  %v9950_v26 = vpack.c.bf16 %v1849_v17, %v1848_v16  ;;  %v11402_v16 = vsub.s32 5, %v11159_v36  ;;  %v11405_v17 = vsub.s32 7, %v11159_v36 }
 0x6b5   : > { %9875 = vmatpush3.bf16.msra.mxu1 %v9874_v27  ;;  %9907 = vmatpush3.bf16.msra.mxu0 %v9906_v1  ;;  %v1818_v27 = vld [vmem:[%s11236_s24 + $0x210] sm:$0xff]  ;;  %v1819_v1 = vld [vmem:[%s11236_s24 + $0x218] sm:$0xff] }
 0x6b6   : > { %9877 = vmatprep.subr.bf16.mxu1 %v9876_v29  ;;  %9909 = vmatprep.subr.bf16.mxu0 %v9908_v30  ;;  %v9920_v30 = vpack.c.bf16 %v1835_v20, %v1834_v0  ;;  %v9922_v41 = vpack.c.bf16 %v1819_v1, %v1818_v27 }
 0x6b9   : > { %9879 = vmatpush3.bf16.msra.mxu1 %v9878_v34  ;;  %9911 = vmatpush3.bf16.msra.mxu0 %v9910_v35  ;;  %v1836_v34 = vld [vmem:[%s11236_s24 + $0x2a0] sm:$0xff]  ;;  %v1837_v35 = vld [vmem:[%s11236_s24 + $0x2a8] sm:$0xff] }
 0x6ba   : > { %9881 = vmatprep.subr.bf16.mxu1 %v9880_v42  ;;  %9913 = vmatprep.subr.bf16.mxu0 %v9912_v45  ;;  %v9954_v42 = vpack.c.bf16 %v1851_v33, %v1850_v32  ;;  %v9924_v44 = vpack.c.bf16 %v1837_v35, %v1836_v34  ;;  %v9956_v45 = vpack.c.bf16 %v1869_v37, %v1868_v11  ;;  %v1874_v34 = vld [vmem:[%s11236_s24 + $0x3d0] sm:$0xff]  ;;  %v1875_v35 = vld [vmem:[%s11236_s24 + $0x3d8] sm:$0xff] }
 0x6bb   : > { %v11418_v33 = vrot.slane %v11347_v58, %v11402_v16  ;;  %v1826_v11 = vld [vmem:[%s11236_s24 + $0x250] sm:$0xff] }
 0x6bd   : > { %9883 = vmatpush3.bf16.msra.mxu1 %v9882_v47  ;;  %9915 = vmatpush3.bf16.msra.mxu0 %v9914_v50  ;;  %v1852_v47 = vld [vmem:[%s11236_s24 + $0x320] sm:$0xff]  ;;  %v1839_v50 = vld [vmem:[%s11236_s24 + $0x2b8] sm:$0xff] }
 0x6be   : > { %9917 = vmatprep.subr.bf16.mxu1 %v9916_v54  ;;  %9949 = vmatprep.subr.bf16.mxu0 %v9948_v56  ;;  %v9958_v54 = vpack.c.bf16 %v1853_v48, %v1852_v47  ;;  %v1823_v56 = vld [vmem:[%s11236_s24 + $0x238] sm:$0xff] }
 0x6bf   : > { %v9930_v0 = vpack.c.bf16 %v1823_v56, %v1822_v55  ;;  %v1845_v56 = vld [vmem:[%s11236_s24 + $0x2e8] sm:$0xff] }
 0x74e   : > { %v2212_v63 = vpop.f32.mrb[16].mxu1  ;;  %v2289_v6 = vpop.f32.mrb[18].mxu0 }
 0x74f   : > { %v2213_v10 = vadd.f32 %v2212_v63, %v11351_v59  ;;  %v2290_v13 = vadd.f32 %v2289_v6, %v11355_v60  ;;  %v2214_v14 = vpop.f32.mrb[17].mxu1  ;;  %v2291_v15 = vpop.f32.mrb[19].mxu0  ;;  %v9928_v63 = vpack.c.bf16 %v1839_v50, %v1838_v49  ;;  %v9960_v6 = vpack.c.bf16 %v1871_v52, %v1870_v12  ;;  %v1859_v52 = vld [vmem:[%s11236_s24 + $0x358] sm:$0xff] }
 0x750   : > { %v2215_v18 = vadd.f32 %v2214_v14, %v11359_v61  ;;  %v2292_v19 = vadd.f32 %v2291_v15, %v11363_v62  ;;  %v1872_v14 = vld [vmem:[%s11236_s24 + $0x3c0] sm:$0xff]  ;;  %v1873_v15 = vld [vmem:[%s11236_s24 + $0x3c8] sm:$0xff]  ;;  %v9968_v12 = vpack.c.bf16 %v1875_v35, %v1874_v34  ;;  %v1831_v35 = vld [vmem:[%s11236_s24 + $0x278] sm:$0xff] }
 0x751   : > { %v2762_v28 = vmax.f32 %v2213_v10, 0.0  ;;  %v2764_v29 = vmax.f32 %v2290_v13, 0.0  ;;  %v1840_v10 = vld [vmem:[%s11236_s24 + $0x2c0] sm:$0xff]  ;;  %v1841_v13 = vld [vmem:[%s11236_s24 + $0x2c8] sm:$0xff]  ;;  %v9964_v22 = vpack.c.bf16 %v1873_v15, %v1872_v14  ;;  %v9938_v15 = vpack.c.bf16 %v1827_v43, %v1826_v11  ;;  %v1862_v11 = vld [vmem:[%s11236_s24 + $0x370] sm:$0xff] }
 0x752   : > { %v2763_v23 = vmax.f32 %v2215_v18, 0.0  ;;  %v2765_v24 = vmax.f32 %v2292_v19, 0.0  ;;  %v9962_v18 = vpack.c.bf16 %v1855_v9, %v1854_v8  ;;  %v9932_v21 = vpack.c.bf16 %v1841_v13, %v1840_v10 }
 0x753   : > { %v11442_v8 = vsub.s32 4, %v11159_v36 }
 0x754   : > { %2864 = vmatprep.mubr.f32.mxu1 %v2763_v23  ;;  %2939 = vmatprep.mubr.f32.mxu0 %v2765_v24  ;;  %v1824_v23 = vld [vmem:[%s11236_s24 + $0x240] sm:$0xff]  ;;  %v1825_v24 = vld [vmem:[%s11236_s24 + $0x248] sm:$0xff] }
 0x755   : > { %2865 = vmatmul.mubr.f32.vlgmr.msra.gmra.mrb[32].mxu1 %v2762_v28  ;;  %2940 = vmatmul.mubr.f32.vlgmr.msra.gmra.mrb[34].mxu0 %v2764_v29  ;;  %v1856_v28 = vld [vmem:[%s11236_s24 + $0x340] sm:$0xff]  ;;  %v1857_v29 = vld [vmem:[%s11236_s24 + $0x348] sm:$0xff] }
 0x756   : > { %9919 = vmatpush3.bf16.msra.mxu1 %v9918_v25  ;;  %9951 = vmatpush3.bf16.msra.mxu0 %v9950_v26  ;;  %v9966_v7 = vpack.c.bf16 %v1857_v29, %v1856_v28  ;;  %v1878_v28 = vld [vmem:[%s11236_s24 + $0x3f0] sm:$0xff]  ;;  %v1879_v29 = vld [vmem:[%s11236_s24 + $0x3f8] sm:$0xff] }
 0x757   : > { %9921 = vmatprep.subr.bf16.mxu1 %v9920_v30  ;;  %9953 = vmatprep.subr.bf16.mxu0 %v9952_v31  ;;  %v1842_v30 = vld [vmem:[%s11236_s24 + $0x2d0] sm:$0xff] }
 0x75a   : > { %9923 = vmatpush3.bf16.msra.mxu1 %v9922_v41  ;;  %9955 = vmatpush3.bf16.msra.mxu0 %v9954_v42  ;;  %v9934_v42 = vpack.c.bf16 %v1825_v24, %v1824_v23 }
 0x75b   : > { %9925 = vmatprep.subr.bf16.mxu1 %v9924_v44  ;;  %9957 = vmatprep.subr.bf16.mxu0 %v9956_v45  ;;  %v1858_v44 = vld [vmem:[%s11236_s24 + $0x350] sm:$0xff] }
 0x75e   : > { %9927 = vmatpush3.bf16.msra.mxu1 %v9926_v53  ;;  %9959 = vmatpush3.bf16.msra.mxu0 %v9958_v54  ;;  %v2218_v19 = vpop.f32.mrb[18].mxu1  ;;  %v2295_v20 = vpop.f32.mrb[20].mxu0  ;;  %v1844_v53 = vld [vmem:[%s11236_s24 + $0x2e0] sm:$0xff] }
 0x75f   : > { %9929 = vmatprep.subr.bf16.mxu1 %v9928_v63  ;;  %9961 = vmatprep.subr.bf16.mxu0 %v9960_v6  ;;  %v2219_v25 = vadd.f32 %v2218_v19, %v11351_v59  ;;  %v2296_v26 = vadd.f32 %v2295_v20, %v11355_v60  ;;  %v2220_v27 = vpop.f32.mrb[19].mxu1  ;;  %v2297_v1 = vpop.f32.mrb[21].mxu0  ;;  %v11422_v59 = vrot.slane %v11347_v58, %v11405_v17  ;;  %v1843_v60 = vld [vmem:[%s11236_s24 + $0x2d8] sm:$0xff]  ;;  %v1876_v63 = vld [vmem:[%s11236_s24 + $0x3e0] sm:$0xff]  ;;  %v1877_v6 = vld [vmem:[%s11236_s24 + $0x3e8] sm:$0xff]  ;;  %v11451_v20 = vsub.s32 6, %v11159_v36 }
 0x760   : > { %v2221_v31 = vadd.f32 %v2220_v27, %v11359_v61  ;;  %v2298_v32 = vadd.f32 %v2297_v1, %v11363_v62  ;;  %v9936_v50 = vpack.c.bf16 %v1843_v60, %v1842_v30  ;;  %v1829_v19 = vld [vmem:[%s11236_s24 + $0x268] sm:$0xff]  ;;  %v9940_v23 = vpack.c.bf16 %v1845_v56, %v1844_v53  ;;  %v1846_v27 = vld [vmem:[%s11236_s24 + $0x2f0] sm:$0xff]  ;;  %v1847_v1 = vld [vmem:[%s11236_s24 + $0x2f8] sm:$0xff] }
 0x761   : > { %v2778_v45 = vmax.f32 %v2219_v25, 0.0  ;;  %v2780_v47 = vmax.f32 %v2296_v26, 0.0  ;;  %v9972_v24 = vpack.c.bf16 %v1877_v6, %v1876_v63  ;;  %v1860_v25 = vld [vmem:[%s11236_s24 + $0x360] sm:$0xff]  ;;  %v1861_v26 = vld [vmem:[%s11236_s24 + $0x368] sm:$0xff]  ;;  %v1830_v30 = vld [vmem:[%s11236_s24 + $0x270] sm:$0xff]  ;;  %v2031_v36 = vrot.slane %v11347_v58, %v11442_v8 }
 0x762   : > { %9931 = vmatpush3.bf16.msra.mxu1 %v9930_v0  ;;  %9963 = vmatpush3.bf16.msra.mxu0 %v9962_v18  ;;  %v2779_v37 = vmax.f32 %v2221_v31, 0.0  ;;  %v2781_v61 = vmax.f32 %v2298_v32, 0.0  ;;  %v11428_v62 = vpop.f32.mrb[20].mxu1  ;;  %v11430_v41 = vpop.f32.mrb[22].mxu0  ;;  %v9970_v0 = vpack.c.bf16 %v1859_v52, %v1858_v44  ;;  %v1828_v18 = vld [vmem:[%s11236_s24 + $0x260] sm:$0xff]  ;;  %v9974_v34 = vpack.c.bf16 %v1861_v26, %v1860_v25  ;;  %v11486_v53 = vld [vmem:[%s11236_s24 + $0x408] sm:$0xff] }
 0x763   : > { %9933 = vmatprep.subr.bf16.mxu1 %v9932_v21  ;;  %9965 = vmatprep.subr.bf16.mxu0 %v9964_v22  ;;  %v2368_v48 = vpop.f32.mrb[21].mxu1  ;;  %v2445_v49 = vpop.f32.mrb[23].mxu0  ;;  %v9942_v60 = vpack.c.bf16 %v1829_v19, %v1828_v18  ;;  %v9944_v43 = vpack.c.bf16 %v1847_v1, %v1846_v27  ;;  %v9976_v44 = vpack.c.bf16 %v1879_v29, %v1878_v28  ;;  %v1930_v25 = vld [vmem:[%s11236_s24 + $0x590] sm:$0xff]  ;;  %v1931_v26 = vld [vmem:[%s11236_s24 + $0x598] sm:$0xff] }
 0x764   : > { %v2369_v54 = vadd.f32 %v2368_v48, %v11418_v33  ;;  %v2446_v55 = vadd.f32 %v2445_v49, %v11422_v59  ;;  %2869 = vmatprep.mubr.f32.mxu1 %v2779_v37  ;;  %2944 = vmatprep.mubr.f32.mxu0 %v2781_v61  ;;  %v1863_v37 = vld [vmem:[%s11236_s24 + $0x378] sm:$0xff]  ;;  %v2039_v61 = vrot.slane %v11347_v58, %v11451_v20  ;;  %v1928_v48 = vld [vmem:[%s11236_s24 + $0x580] sm:$0xff]  ;;  %v1929_v49 = vld [vmem:[%s11236_s24 + $0x588] sm:$0xff] }
 0x765   : > { %2870 = vmatmul.mubr.f32.gmra.mrb[34].mxu1 %v2778_v45  ;;  %2945 = vmatmul.mubr.f32.gmra.mrb[36].mxu0 %v2780_v47  ;;  %v1896_v45 = vld [vmem:[%s11236_s24 + $0x480] sm:$0xff]  ;;  %v1897_v47 = vld [vmem:[%s11236_s24 + $0x488] sm:$0xff]  ;;  %v9978_v52 = vpack.c.bf16 %v1863_v37, %v1862_v11 }
 0x766   : > { %v2767_v9 = vmax.f32 %v2369_v54, 0.0  ;;  %v2769_v10 = vmax.f32 %v2446_v55, 0.0  ;;  %9935 = vmatpush3.bf16.msra.mxu1 %v9934_v42  ;;  %9967 = vmatpush3.bf16.msra.mxu0 %v9966_v7  ;;  %v11444_v13 = vpop.f32.mrb[22].mxu1  ;;  %v11446_v14 = vpop.f32.mrb[24].mxu0  ;;  %v11483_v58 = vld [vmem:[%s11236_s24 + $0x400] sm:$0xff]  ;;  %v2367_v54 = vadd.f32 %v11428_v62, %v2031_v36  ;;  %v2444_v62 = vadd.f32 %v11430_v41, %v2039_v61 }
 0x767   : > { %v2374_v21 = vpop.f32.mrb[23].mxu1  ;;  %v2451_v22 = vpop.f32.mrb[25].mxu0  ;;  %9937 = vmatprep.subr.bf16.mxu1 %v9936_v50  ;;  %9969 = vmatprep.subr.bf16.mxu0 %v9968_v12  ;;  %v11480_v50 = vld [vmem:[%s11344_s27 + $0x8] sm:$0xff]  ;;  %v9946_v12 = vpack.c.bf16 %v1831_v35, %v1830_v30  ;;  %v9980_v19 = vpack.c.bf16 %v1897_v47, %v1896_v45  ;;  %v9982_v29 = vpack.c.bf16 %v11486_v53, %v11483_v58  ;;  %v1882_v35 = vld [vmem:[%s11236_s24 + $0x410] sm:$0xff]  ;;  %v1883_v45 = vld [vmem:[%s11236_s24 + $0x418] sm:$0xff] }
 0x768   : > { %3014 = vmatprep.mubr.f32.mxu1 %v2767_v9  ;;  %3089 = vmatprep.mubr.f32.mxu0 %v2769_v10  ;;  %v2063_v63 = vrot.slane %v11480_v50, %v11442_v8  ;;  %v2071_v6 = vrot.slane %v11480_v50, %v11451_v20  ;;  %v1912_v9 = vld [vmem:[%s11236_s24 + $0x500] sm:$0xff]  ;;  %v1913_v10 = vld [vmem:[%s11236_s24 + $0x508] sm:$0xff]  ;;  %v2375_v27 = vadd.f32 %v2374_v21, %v11418_v33  ;;  %v2768_v11 = vmax.f32 %v2444_v62, 0.0  ;;  %v1914_v47 = vld [vmem:[%s11236_s24 + $0x510] sm:$0xff] }
 0x769   : > { %v2452_v1 = vadd.f32 %v2451_v22, %v11422_v59  ;;  %v11514_v28 = vrot.slane %v11480_v50, %v11165_v38  ;;  %v11518_v41 = vrot.slane %v11480_v50, %v11177_v46  ;;  %v10014_v30 = vpack.c.bf16 %v1913_v10, %v1912_v9  ;;  %v1901_v58 = vld [vmem:[%s11236_s24 + $0x4a8] sm:$0xff]  ;;  %v1932_v53 = vld [vmem:[%s11236_s24 + $0x5a0] sm:$0xff] }
 0x76a   : > { %9939 = vmatpush3.bf16.msra.mxu1 %v9938_v15  ;;  %9971 = vmatpush3.bf16.msra.mxu0 %v9970_v0  ;;  %v11462_v31 = vpop.f32.mrb[24].mxu1  ;;  %v11464_v32 = vpop.f32.mrb[26].mxu0  ;;  %v11500_v15 = vld [vmem:[%s11236_s24 + $0x490] sm:$0xff]  ;;  %v10016_v22 = vpack.c.bf16 %v1931_v26, %v1930_v25  ;;  %v2450_v37 = vadd.f32 %v11446_v14, %v2039_v61  ;;  %v1884_v26 = vld [vmem:[%s11236_s24 + $0x420] sm:$0xff] }
 0x76b   : > { %v11471_v42 = vpop.f32.mrb[25].mxu1  ;;  %v11473_v7 = vpop.f32.mrb[27].mxu0  ;;  %9941 = vmatprep.subr.bf16.mxu1 %v9940_v23  ;;  %9973 = vmatprep.subr.bf16.mxu0 %v9972_v24  ;;  %v10012_v23 = vpack.c.bf16 %v1929_v49, %v1928_v48  ;;  %v1899_v24 = vld [vmem:[%s11236_s24 + $0x498] sm:$0xff]  ;;  %v2783_v49 = vmax.f32 %v2375_v27, 0.0  ;;  %v1885_v27 = vld [vmem:[%s11236_s24 + $0x428] sm:$0xff] }
 0x76c   : > { %v9984_v21 = vpack.c.bf16 %v1899_v24, %v11500_v15  ;;  %v1915_v48 = vld [vmem:[%s11236_s24 + $0x518] sm:$0xff]  ;;  %v2523_v14 = vadd.f32 %v11471_v42, %v11514_v28  ;;  %v2600_v61 = vadd.f32 %v11473_v7, %v11518_v41  ;;  %v9986_v15 = vpack.c.bf16 %v1883_v45, %v1882_v35 }
 0x76d   : > { %v10018_v62 = vpack.c.bf16 %v1915_v48, %v1914_v47  ;;  %v2784_v42 = vmax.f32 %v2450_v37, 0.0  ;;  %v1935_v35 = vld [vmem:[%s11236_s24 + $0x5b8] sm:$0xff]  ;;  %v1918_v48 = vld [vmem:[%s11236_s24 + $0x530] sm:$0xff] }
 0x76e   : > { %9943 = vmatpush3.bf16.msra.mxu1 %v9942_v60  ;;  %9975 = vmatpush3.bf16.msra.mxu0 %v9974_v34  ;;  %v11489_v55 = vpop.f32.mrb[26].mxu1  ;;  %v11491_v56 = vpop.f32.mrb[28].mxu0  ;;  %v2766_v60 = vmax.f32 %v2367_v54, 0.0  ;;  %v2373_v34 = vadd.f32 %v11444_v13, %v2031_v36  ;;  %v1933_v54 = vld [vmem:[%s11236_s24 + $0x5a8] sm:$0xff]  ;;  %v1887_v37 = vld [vmem:[%s11236_s24 + $0x438] sm:$0xff] }
 0x76f   : > { %v11503_v0 = vpop.f32.mrb[27].mxu1  ;;  %v11505_v18 = vpop.f32.mrb[29].mxu0  ;;  %9945 = vmatprep.subr.bf16.mxu1 %v9944_v43  ;;  %9977 = vmatprep.subr.bf16.mxu0 %v9976_v44 }
 0x772   : > { %9947 = vmatpush3.bf16.msra.mxu1 %v9946_v12  ;;  %9979 = vmatpush3.bf16.msra.mxu0 %v9978_v52  ;;  %v2674_v33 = vpop.f32.mrb[28].mxu1  ;;  %v2751_v59 = vpop.f32.mrb[30].mxu0  ;;  %v2785_v12 = vmax.f32 %v2452_v1, 0.0  ;;  %v1900_v52 = vld [vmem:[%s11236_s24 + $0x4a0] sm:$0xff]  ;;  %v2771_v1 = vmax.f32 %v2523_v14, 0.0  ;;  %v1905_v14 = vld [vmem:[%s11236_s24 + $0x4c8] sm:$0xff] }
 0x773   : > { %v11526_v43 = vadd.f32 %v2674_v33, %v2063_v63  ;;  %v11528_v44 = vadd.f32 %v2751_v59, %v2071_v6  ;;  %v11530_v13 = vpop.f32.mrb[29].mxu1  ;;  %v11532_v36 = vpop.f32.mrb[31].mxu0  ;;  %9981 = vmatprep.subr.bf16.mxu1 %v9980_v19  ;;  %10013 = vmatprep.subr.bf16.mxu0 %v10012_v23  ;;  %v2782_v19 = vmax.f32 %v2373_v34, 0.0  ;;  %v1902_v34 = vld [vmem:[%s11236_s24 + $0x4b0] sm:$0xff]  ;;  %v1903_v33 = vld [vmem:[%s11236_s24 + $0x4b8] sm:$0xff] }
 0x774   : > { %v1934_v59 = vld [vmem:[%s11236_s24 + $0x5b0] sm:$0xff]  ;;  %v9992_v45 = vpack.c.bf16 %v1903_v33, %v1902_v34 }
 0x775   : > { %3015 = vmatmul.mubr.f32.vlgmr.msra.gmra.mrb[36].mxu1 %v2766_v60  ;;  %3090 = vmatmul.mubr.f32.vlgmr.msra.gmra.mrb[38].mxu0 %v2768_v11  ;;  %v2773_v60 = vmax.f32 %v2600_v61, 0.0  ;;  %v1886_v11 = vld [vmem:[%s11236_s24 + $0x430] sm:$0xff]  ;;  %v10024_v47 = vpack.c.bf16 %v1935_v35, %v1934_v59  ;;  %v1936_v61 = vld [vmem:[%s11236_s24 + $0x5c0] sm:$0xff]  ;;  %v1923_v59 = vld [vmem:[%s11236_s24 + $0x558] sm:$0xff] }
 0x776   : > { %3019 = vmatprep.mubr.f32.mxu1 %v2783_v49  ;;  %3094 = vmatprep.mubr.f32.mxu0 %v2785_v12  ;;  %v2680_v9 = vpop.f32.mrb[30].mxu1  ;;  %v2757_v10 = vpop.f32.mrb[32].mxu0  ;;  %v1919_v49 = vld [vmem:[%s11236_s24 + $0x538] sm:$0xff]  ;;  %v1904_v12 = vld [vmem:[%s11236_s24 + $0x4c0] sm:$0xff]  ;;  %v1922_v33 = vld [vmem:[%s11236_s24 + $0x550] sm:$0xff] }
 0x777   : > { %9983 = vmatpush3.bf16.msra.mxu1 %v9982_v29  ;;  %10015 = vmatpush3.bf16.msra.mxu0 %v10014_v30  ;;  %v11545_v7 = vadd.f32 %v2680_v9, %v2063_v63  ;;  %v11547_v23 = vadd.f32 %v2757_v10, %v2071_v6  ;;  %v11549_v24 = vpop.f32.mrb[31].mxu1  ;;  %v11551_v25 = vpop.f32.mrb[33].mxu0  ;;  %v9988_v29 = vpack.c.bf16 %v1901_v58, %v1900_v52  ;;  %v1916_v63 = vld [vmem:[%s11236_s24 + $0x520] sm:$0xff]  ;;  %v1917_v6 = vld [vmem:[%s11236_s24 + $0x528] sm:$0xff] }
 0x778   : > { %9985 = vmatprep.subr.bf16.mxu1 %v9984_v21  ;;  %10017 = vmatprep.subr.bf16.mxu0 %v10016_v22  ;;  %v10020_v30 = vpack.c.bf16 %v1933_v54, %v1932_v53  ;;  %v9990_v21 = vpack.c.bf16 %v1885_v27, %v1884_v26  ;;  %v10022_v22 = vpack.c.bf16 %v1917_v6, %v1916_v63  ;;  %v1937_v52 = vld [vmem:[%s11236_s24 + $0x5c8] sm:$0xff]  ;;  %v1888_v54 = vld [vmem:[%s11236_s24 + $0x440] sm:$0xff]  ;;  %v1907_v26 = vld [vmem:[%s11236_s24 + $0x4d8] sm:$0xff] }
 0x779   : > { %3020 = vmatmul.mubr.f32.gmra.mrb[38].mxu1 %v2782_v19  ;;  %3095 = vmatmul.mubr.f32.gmra.mrb[40].mxu0 %v2784_v42  ;;  %v9994_v58 = vpack.c.bf16 %v1887_v37, %v1886_v11  ;;  %v10026_v53 = vpack.c.bf16 %v1919_v49, %v1918_v48  ;;  %v1889_v9 = vld [vmem:[%s11236_s24 + $0x448] sm:$0xff]  ;;  %v9996_v10 = vpack.c.bf16 %v1905_v14, %v1904_v12  ;;  %v1906_v42 = vld [vmem:[%s11236_s24 + $0x4d0] sm:$0xff]  ;;  %v1891_v63 = vld [vmem:[%s11236_s24 + $0x458] sm:$0xff] }
 0x77a   : > { %3164 = vmatprep.mubr.f32.mxu1 %v2771_v1  ;;  %3239 = vmatprep.mubr.f32.mxu0 %v2773_v60  ;;  %v1921_v19 = vld [vmem:[%s11236_s24 + $0x548] sm:$0xff]  ;;  %v1938_v27 = vld [vmem:[%s11236_s24 + $0x5d0] sm:$0xff]  ;;  %v1939_v1 = vld [vmem:[%s11236_s24 + $0x5d8] sm:$0xff]  ;;  %v9998_v60 = vpack.c.bf16 %v1889_v9, %v1888_v54  ;;  %v10000_v6 = vpack.c.bf16 %v1907_v26, %v1906_v42  ;;  %v2047_v9 = vrot.slane %v11480_v50, %v11168_v39 }
 0x77b   : > { %9987 = vmatpush3.bf16.msra.mxu1 %v9986_v15  ;;  %10019 = vmatpush3.bf16.msra.mxu0 %v10018_v62  ;;  %v10028_v15 = vpack.c.bf16 %v1937_v52, %v1936_v61  ;;  %v1920_v62 = vld [vmem:[%s11236_s24 + $0x540] sm:$0xff]  ;;  %v10032_v34 = vpack.c.bf16 %v1939_v1, %v1938_v27  ;;  %v1941_v11 = vld [vmem:[%s11236_s24 + $0x5e8] sm:$0xff]  ;;  %v1910_v52 = vld [vmem:[%s11236_s24 + $0x4f0] sm:$0xff]  ;;  %v2055_v26 = vrot.slane %v11480_v50, %v11171_v40 }
 0x77c   : > { %9989 = vmatprep.subr.bf16.mxu1 %v9988_v29  ;;  %10021 = vmatprep.subr.bf16.mxu0 %v10020_v30  ;;  %v10030_v29 = vpack.c.bf16 %v1921_v19, %v1920_v62  ;;  %v1890_v30 = vld [vmem:[%s11236_s24 + $0x450] sm:$0xff]  ;;  %v1908_v35 = vld [vmem:[%s11236_s24 + $0x4e0] sm:$0xff]  ;;  %v1893_v48 = vld [vmem:[%s11236_s24 + $0x468] sm:$0xff] }
 0x77d   : > { %v10002_v37 = vpack.c.bf16 %v1891_v63, %v1890_v30  ;;  %v1924_v14 = vld [vmem:[%s11236_s24 + $0x560] sm:$0xff]  ;;  %v1925_v61 = vld [vmem:[%s11236_s24 + $0x568] sm:$0xff]  ;;  %v1943_v54 = vld [vmem:[%s11236_s24 + $0x5f8] sm:$0xff] }
 0x77e   : > { %v1894_v62 = vld [vmem:[%s11236_s24 + $0x470] sm:$0xff]  ;;  %v1895_v19 = vld [vmem:[%s11236_s24 + $0x478] sm:$0xff]  ;;  %v1961_v30 = vld [vmem:[%s11236_s24 + $0x688] sm:$0xff] }
 0x77f   : > { %9991 = vmatpush3.bf16.msra.mxu1 %v9990_v21  ;;  %10023 = vmatpush3.bf16.msra.mxu0 %v10022_v22  ;;  %v1909_v21 = vld [vmem:[%s11236_s24 + $0x4e8] sm:$0xff]  ;;  %v1940_v22 = vld [vmem:[%s11236_s24 + $0x5e0] sm:$0xff]  ;;  %v1926_v42 = vld [vmem:[%s11236_s24 + $0x570] sm:$0xff] }
 0x780   : > { %9993 = vmatprep.subr.bf16.mxu1 %v9992_v45  ;;  %10025 = vmatprep.subr.bf16.mxu0 %v10024_v47  ;;  %v10034_v45 = vpack.c.bf16 %v1923_v59, %v1922_v33  ;;  %v1892_v47 = vld [vmem:[%s11236_s24 + $0x460] sm:$0xff]  ;;  %v10004_v49 = vpack.c.bf16 %v1909_v21, %v1908_v35  ;;  %v10036_v12 = vpack.c.bf16 %v1941_v11, %v1940_v22  ;;  %v1945_v33 = vld [vmem:[%s11236_s24 + $0x608] sm:$0xff] }
 0x781   : > { %v1992_v63 = vld [vmem:[%s11236_s24 + $0x780] sm:$0xff]  ;;  %v10010_v59 = vpack.c.bf16 %v1895_v19, %v1894_v62  ;;  %v1977_v11 = vld [vmem:[%s11236_s24 + $0x708] sm:$0xff] }
 0x782   : > { %v1976_v22 = vld [vmem:[%s11236_s24 + $0x700] sm:$0xff] }
 0x783   : > { %9995 = vmatpush3.bf16.msra.mxu1 %v9994_v58  ;;  %10027 = vmatpush3.bf16.msra.mxu0 %v10026_v53  ;;  %v1911_v58 = vld [vmem:[%s11236_s24 + $0x4f8] sm:$0xff]  ;;  %v1942_v53 = vld [vmem:[%s11236_s24 + $0x5f0] sm:$0xff] }
 0x784   : > { %9997 = vmatprep.subr.bf16.mxu1 %v9996_v10  ;;  %10029 = vmatprep.subr.bf16.mxu0 %v10028_v15  ;;  %v10006_v10 = vpack.c.bf16 %v1893_v48, %v1892_v47  ;;  %v10038_v15 = vpack.c.bf16 %v1925_v61, %v1924_v14  ;;  %v10008_v27 = vpack.c.bf16 %v1911_v58, %v1910_v52  ;;  %v1995_v14 = vld [vmem:[%s11236_s24 + $0x798] sm:$0xff] }
 0x785   : > { %v10040_v1 = vpack.c.bf16 %v1943_v54, %v1942_v53  ;;  %v2598_v47 = vadd.f32 %v11464_v32, %v2055_v26  ;;  %v2529_v61 = vadd.f32 %v11503_v0, %v11514_v28  ;;  %v2606_v52 = vadd.f32 %v11505_v18, %v11518_v41 }
 0x786   : > { %v11621_v58 = vrot.slane %v11480_v50, %v11402_v16  ;;  %v10078_v53 = vpack.c.bf16 %v1977_v11, %v1976_v22  ;;  %v2527_v41 = vadd.f32 %v11489_v55, %v2047_v9  ;;  %v1964_v55 = vld [vmem:[%s11236_s24 + $0x6a0] sm:$0xff]  ;;  %v1981_v22 = vld [vmem:[%s11236_s24 + $0x728] sm:$0xff]  ;;  %v1966_v11 = vld [vmem:[%s11236_s24 + $0x6b0] sm:$0xff] }
 0x787   : > { %9999 = vmatpush3.bf16.msra.mxu1 %v9998_v60  ;;  %10031 = vmatpush3.bf16.msra.mxu0 %v10030_v29  ;;  %v1927_v60 = vld [vmem:[%s11236_s24 + $0x578] sm:$0xff]  ;;  %v1960_v29 = vld [vmem:[%s11236_s24 + $0x680] sm:$0xff]  ;;  %v2772_v18 = vmax.f32 %v2598_v47, 0.0  ;;  %v2787_v62 = vmax.f32 %v2529_v61, 0.0  ;;  %v2789_v19 = vmax.f32 %v2606_v52, 0.0 }
 0x788   : > { %10001 = vmatprep.subr.bf16.mxu1 %v10000_v6  ;;  %10033 = vmatprep.subr.bf16.mxu0 %v10032_v34  ;;  %v1993_v6 = vld [vmem:[%s11236_s24 + $0x788] sm:$0xff]  ;;  %v1944_v34 = vld [vmem:[%s11236_s24 + $0x600] sm:$0xff]  ;;  %v10042_v35 = vpack.c.bf16 %v1927_v60, %v1926_v42  ;;  %v10044_v21 = vpack.c.bf16 %v1961_v30, %v1960_v29  ;;  %v2677_v42 = vadd.f32 %v11530_v13, %v11621_v58  ;;  %v1979_v60 = vld [vmem:[%s11236_s24 + $0x718] sm:$0xff]  ;;  %v2786_v29 = vmax.f32 %v2527_v41, 0.0 }
 0x789   : > { %v10076_v48 = vpack.c.bf16 %v1993_v6, %v1992_v63  ;;  %v10046_v32 = vpack.c.bf16 %v1945_v33, %v1944_v34  ;;  %v1948_v63 = vld [vmem:[%s11236_s24 + $0x620] sm:$0xff]  ;;  %v1949_v6 = vld [vmem:[%s11236_s24 + $0x628] sm:$0xff]  ;;  %v1999_v47 = vld [vmem:[%s11236_s24 + $0x7b8] sm:$0xff] }
 0x78a   : > { %v2775_v34 = vmax.f32 %v2677_v42, 0.0  ;;  %v1984_v42 = vld [vmem:[%s11236_s24 + $0x740] sm:$0xff] }
 0x78b   : > { %10003 = vmatpush3.bf16.msra.mxu1 %v10002_v37  ;;  %10035 = vmatpush3.bf16.msra.mxu0 %v10034_v45  ;;  %v1962_v37 = vld [vmem:[%s11236_s24 + $0x690] sm:$0xff]  ;;  %v2521_v45 = vadd.f32 %v11462_v31, %v2047_v9  ;;  %v11625_v31 = vrot.slane %v11480_v50, %v11405_v17  ;;  %v1996_v9 = vld [vmem:[%s11236_s24 + $0x7a0] sm:$0xff] }
 0x78c   : > { %10005 = vmatprep.subr.bf16.mxu1 %v10004_v49  ;;  %10037 = vmatprep.subr.bf16.mxu0 %v10036_v12  ;;  %v1963_v49 = vld [vmem:[%s11236_s24 + $0x698] sm:$0xff]  ;;  %v1994_v12 = vld [vmem:[%s11236_s24 + $0x790] sm:$0xff] }
 0x78d   : > { %v10048_v0 = vpack.c.bf16 %v1963_v49, %v1962_v37  ;;  %v10080_v28 = vpack.c.bf16 %v1995_v14, %v1994_v12  ;;  %v2770_v54 = vmax.f32 %v2521_v45, 0.0  ;;  %v1946_v50 = vld [vmem:[%s11236_s24 + $0x610] sm:$0xff]  ;;  %v1967_v37 = vld [vmem:[%s11236_s24 + $0x6b8] sm:$0xff] }
 0x78e   : > { %v1998_v45 = vld [vmem:[%s11236_s24 + $0x7b0] sm:$0xff]  ;;  %v1951_v14 = vld [vmem:[%s11236_s24 + $0x638] sm:$0xff]  ;;  %v10056_v61 = vpack.c.bf16 %v1967_v37, %v1966_v11  ;;  %v1956_v11 = vld [vmem:[%s11236_s24 + $0x660] sm:$0xff] }
 0x78f   : > { %10007 = vmatpush3.bf16.msra.mxu1 %v10006_v10  ;;  %10039 = vmatpush3.bf16.msra.mxu0 %v10038_v15  ;;  %v2604_v10 = vadd.f32 %v11491_v56, %v2055_v26  ;;  %v1947_v15 = vld [vmem:[%s11236_s24 + $0x618] sm:$0xff]  ;;  %v1965_v56 = vld [vmem:[%s11236_s24 + $0x6a8] sm:$0xff]  ;;  %v1950_v12 = vld [vmem:[%s11236_s24 + $0x630] sm:$0xff]  ;;  %v10088_v52 = vpack.c.bf16 %v1999_v47, %v1998_v45 }
 0x790   : > { %10009 = vmatprep.subr.bf16.mxu1 %v10008_v27  ;;  %10041 = vmatprep.subr.bf16.mxu0 %v10040_v1  ;;  %v2754_v27 = vadd.f32 %v11532_v36, %v11625_v31  ;;  %v1978_v1 = vld [vmem:[%s11236_s24 + $0x710] sm:$0xff]  ;;  %v1997_v26 = vld [vmem:[%s11236_s24 + $0x7a8] sm:$0xff]  ;;  %v10050_v36 = vpack.c.bf16 %v1947_v15, %v1946_v50  ;;  %v10058_v41 = vpack.c.bf16 %v1951_v14, %v1950_v12  ;;  %v1952_v50 = vld [vmem:[%s11236_s24 + $0x640] sm:$0xff] }
 0x791   : > { %v2788_v13 = vmax.f32 %v2604_v10, 0.0  ;;  %v10082_v30 = vpack.c.bf16 %v1979_v60, %v1978_v1  ;;  %v1953_v15 = vld [vmem:[%s11236_s24 + $0x648] sm:$0xff]  ;;  %v1970_v1 = vld [vmem:[%s11236_s24 + $0x6d0] sm:$0xff]  ;;  %v1971_v60 = vld [vmem:[%s11236_s24 + $0x6d8] sm:$0xff] }
 0x792   : > { %v2777_v33 = vmax.f32 %v2754_v27, 0.0  ;;  %v1985_v27 = vld [vmem:[%s11236_s24 + $0x748] sm:$0xff]  ;;  %v1974_v12 = vld [vmem:[%s11236_s24 + $0x6f0] sm:$0xff]  ;;  %v1975_v14 = vld [vmem:[%s11236_s24 + $0x6f8] sm:$0xff] }
 0x793   : > { %10011 = vmatpush3.bf16.msra.mxu1 %v10010_v59  ;;  %10043 = vmatpush3.bf16.msra.mxu0 %v10042_v35  ;;  %v10052_v59 = vpack.c.bf16 %v1965_v56, %v1964_v55  ;;  %v10084_v35 = vpack.c.bf16 %v1997_v26, %v1996_v9  ;;  %v2002_v55 = vld [vmem:[%s11236_s24 + $0x7d0] sm:$0xff]  ;;  %v2003_v56 = vld [vmem:[%s11236_s24 + $0x7d8] sm:$0xff]  ;;  %v10062_v9 = vpack.c.bf16 %v1953_v15, %v1952_v50  ;;  %v1957_v37 = vld [vmem:[%s11236_s24 + $0x668] sm:$0xff] }
 0x794   : > { %10045 = vmatprep.subr.bf16.mxu1 %v10044_v21  ;;  %10077 = vmatprep.subr.bf16.mxu0 %v10076_v48  ;;  %v1980_v21 = vld [vmem:[%s11236_s24 + $0x720] sm:$0xff]  ;;  %v10054_v48 = vpack.c.bf16 %v1949_v6, %v1948_v63  ;;  %v10094_v26 = vpack.c.bf16 %v1985_v27, %v1984_v42  ;;  %v1986_v63 = vld [vmem:[%s11236_s24 + $0x750] sm:$0xff]  ;;  %v1987_v6 = vld [vmem:[%s11236_s24 + $0x758] sm:$0xff]  ;;  %v2774_v42 = vmax.f32 %v11526_v43, 0.0  ;;  %v2776_v27 = vmax.f32 %v11528_v44, 0.0 }
 0x795   : > { %v10086_v49 = vpack.c.bf16 %v1981_v22, %v1980_v21  ;;  %v10098_v22 = vpack.c.bf16 %v1987_v6, %v1986_v63 }
 0x796   : > { %3165 = vmatmul.mubr.f32.vlgmr.msra.gmra.mrb[40].mxu1 %v2770_v54  ;;  %3240 = vmatmul.mubr.f32.vlgmr.msra.gmra.mrb[42].mxu0 %v2772_v18  ;;  %v2000_v54 = vld [vmem:[%s11236_s24 + $0x7c0] sm:$0xff]  ;;  %v2001_v18 = vld [vmem:[%s11236_s24 + $0x7c8] sm:$0xff] }
 0x797   : > { %3169 = vmatprep.mubr.f32.mxu1 %v2787_v62  ;;  %3244 = vmatprep.mubr.f32.mxu0 %v2789_v19  ;;  %v10092_v19 = vpack.c.bf16 %v2001_v18, %v2000_v54  ;;  %v1959_v18 = vld [vmem:[%s11236_s24 + $0x678] sm:$0xff] }
 0x798   : > { %10047 = vmatpush3.bf16.msra.mxu1 %v10046_v32  ;;  %10079 = vmatpush3.bf16.msra.mxu0 %v10078_v53  ;;  %v1982_v32 = vld [vmem:[%s11236_s24 + $0x730] sm:$0xff]  ;;  %v1983_v53 = vld [vmem:[%s11236_s24 + $0x738] sm:$0xff] }
 0x799   : > { %10049 = vmatprep.subr.bf16.mxu1 %v10048_v0  ;;  %10081 = vmatprep.subr.bf16.mxu0 %v10080_v28  ;;  %v1968_v0 = vld [vmem:[%s11236_s24 + $0x6c0] sm:$0xff]  ;;  %v1969_v28 = vld [vmem:[%s11236_s24 + $0x6c8] sm:$0xff]  ;;  %v10090_v10 = vpack.c.bf16 %v1983_v53, %v1982_v32  ;;  %v10070_v32 = vpack.c.bf16 %v1957_v37, %v1956_v11 }
 0x79a   : > { %3170 = vmatmul.mubr.f32.gmra.mrb[42].mxu1 %v2786_v29  ;;  %3245 = vmatmul.mubr.f32.gmra.mrb[44].mxu0 %v2788_v13  ;;  %v10060_v62 = vpack.c.bf16 %v1969_v28, %v1968_v0  ;;  %v1954_v29 = vld [vmem:[%s11236_s24 + $0x650] sm:$0xff]  ;;  %v1955_v13 = vld [vmem:[%s11236_s24 + $0x658] sm:$0xff]  ;;  %v10072_v28 = vpack.c.bf16 %v1975_v14, %v1974_v12 }
 0x79b   : > { %3314 = vmatprep.mubr.f32.mxu1 %v2775_v34  ;;  %3389 = vmatprep.mubr.f32.mxu0 %v2777_v33  ;;  %v1972_v34 = vld [vmem:[%s11236_s24 + $0x6e0] sm:$0xff]  ;;  %v1973_v33 = vld [vmem:[%s11236_s24 + $0x6e8] sm:$0xff]  ;;  %v10066_v21 = vpack.c.bf16 %v1955_v13, %v1954_v29  ;;  %v1958_v0 = vld [vmem:[%s11236_s24 + $0x670] sm:$0xff] }
 0x79c   : > { %10051 = vmatpush3.bf16.msra.mxu1 %v10050_v36  ;;  %10083 = vmatpush3.bf16.msra.mxu0 %v10082_v30  ;;  %v10064_v36 = vpack.c.bf16 %v1971_v60, %v1970_v1  ;;  %v10096_v30 = vpack.c.bf16 %v2003_v56, %v2002_v55  ;;  %v10068_v45 = vpack.c.bf16 %v1973_v33, %v1972_v34  ;;  %v2790_v55 = vmax.f32 %v11545_v7, 0.0 }
 0x79d   : > { %10053 = vmatprep.subr.bf16.mxu1 %v10052_v59  ;;  %10085 = vmatprep.subr.bf16.mxu0 %v10084_v35  ;;  %v2004_v59 = vld [vmem:[%s11236_s24 + $0x7e0] sm:$0xff]  ;;  %v2005_v35 = vld [vmem:[%s11236_s24 + $0x7e8] sm:$0xff]  ;;  %v10074_v50 = vpack.c.bf16 %v1959_v18, %v1958_v0 }
 0x79e   : > { %v10100_v47 = vpack.c.bf16 %v2005_v35, %v2004_v59 }
 0x7a0   : > { %10055 = vmatpush3.bf16.msra.mxu1 %v10054_v48  ;;  %10087 = vmatpush3.bf16.msra.mxu0 %v10086_v49  ;;  %v1988_v48 = vld [vmem:[%s11236_s24 + $0x760] sm:$0xff]  ;;  %v1989_v49 = vld [vmem:[%s11236_s24 + $0x768] sm:$0xff] }
 0x7a1   : > { %10057 = vmatprep.subr.bf16.mxu1 %v10056_v61  ;;  %10089 = vmatprep.subr.bf16.mxu0 %v10088_v52  ;;  %v2006_v61 = vld [vmem:[%s11236_s24 + $0x7f0] sm:$0xff]  ;;  %v2007_v52 = vld [vmem:[%s11236_s24 + $0x7f8] sm:$0xff]  ;;  %v10102_v53 = vpack.c.bf16 %v1989_v49, %v1988_v48 }
 0x7a2   : > { %v10104_v54 = vpack.c.bf16 %v2007_v52, %v2006_v61 }
 0x7a4   : > { %10059 = vmatpush3.bf16.msra.mxu1 %v10058_v41  ;;  %10091 = vmatpush3.bf16.msra.mxu0 %v10090_v10  ;;  %v1990_v41 = vld [vmem:[%s11236_s24 + $0x770] sm:$0xff]  ;;  %v1991_v10 = vld [vmem:[%s11236_s24 + $0x778] sm:$0xff] }
 0x7a5   : > { %10061 = vmatprep.subr.bf16.mxu1 %v10060_v62  ;;  %10093 = vmatprep.subr.bf16.mxu0 %v10092_v19  ;;  %v10106_v15 = vpack.c.bf16 %v1991_v10, %v1990_v41  ;;  %v2683_v62 = vadd.f32 %v11549_v24, %v11621_v58  ;;  %v2760_v19 = vadd.f32 %v11551_v25, %v11625_v31  ;;  %v2792_v24 = vmax.f32 %v11547_v23, 0.0  ;;  %v8742_v31 = vld [vmem:[%s2008_s2] ss:$0 sm:$0xff] }
 0x7a7   : > { %v2791_v1 = vmax.f32 %v2683_v62, 0.0  ;;  %v2793_v60 = vmax.f32 %v2760_v19, 0.0 }
 0x7a8   : > { %10063 = vmatpush3.bf16.msra.mxu1 %v10062_v9  ;;  %10095 = vmatpush3.bf16.msra.mxu0 %v10094_v26 }
 0x7a9   : > { %10065 = vmatprep.subr.bf16.mxu1 %v10064_v36  ;;  %10097 = vmatprep.subr.bf16.mxu0 %v10096_v30 }
 0x7ac   : > { %10067 = vmatpush3.bf16.msra.mxu1 %v10066_v21  ;;  %10099 = vmatpush3.bf16.msra.mxu0 %v10098_v22 }
 0x7ad   : > { %10069 = vmatprep.subr.bf16.mxu1 %v10068_v45  ;;  %10101 = vmatprep.subr.bf16.mxu0 %v10100_v47 }
 0x7b0   : > { %10071 = vmatpush3.bf16.msra.mxu1 %v10070_v32  ;;  %10103 = vmatpush3.bf16.msra.mxu0 %v10102_v53 }
 0x7b1   : > { %10073 = vmatprep.subr.bf16.mxu1 %v10072_v28  ;;  %10105 = vmatprep.subr.bf16.mxu0 %v10104_v54 }
 0x7b4   : > { %10075 = vmatpush3.bf16.msra.mxu1 %v10074_v50  ;;  %10107 = vmatpush3.bf16.msra.mxu0 %v10106_v15 }
 0x7b7   : > { %3315 = vmatmul.mubr.f32.vlgmr.msra.gmra.mrb[44].mxu1 %v2774_v42  ;;  %3390 = vmatmul.mubr.f32.vlgmr.msra.gmra.mrb[46].mxu0 %v2776_v27 }
 0x7b8   : > { %3319 = vmatprep.mubr.f32.mxu1 %v2791_v1  ;;  %3394 = vmatprep.mubr.f32.mxu0 %v2793_v60 }
 0x7bb   : > { %3320 = vmatmul.mubr.f32.gmra.mrb[46].mxu1 %v2790_v55  ;;  %3395 = vmatmul.mubr.f32.gmra.mrb[48].mxu0 %v2792_v24 }
 0x828   : > { %v8935_v25 = vpop.f32.mrb[32].mxu1  ;;  %v8973_v58 = vpop.f32.mrb[34].mxu0 }
 0x829   : > { %v8936_v56 = vpop.f32.mrb[33].mxu1  ;;  %v8974_v43 = vpop.f32.mrb[35].mxu0 }
 0x82a   : > { %v8937_v9 = vadd.f32 %v8936_v56, %v8935_v25  ;;  %v8975_v44 = vadd.f32 %v8974_v43, %v8973_v58 }
 0x82c   : > { %v2867_v26 = vadd.f32 %v8937_v9, %v8742_v31 }
 0x82e   : > { %v2942_v29 = vadd.f32 %v8975_v44, %v2867_v26 }
 0x838   : > { %v8938_v13 = vpop.f32.mrb[34].mxu1  ;;  %v8976_v36 = vpop.f32.mrb[36].mxu0 }
 0x839   : > { %v8939_v30 = vpop.f32.mrb[35].mxu1  ;;  %v8977_v63 = vpop.f32.mrb[37].mxu0 }
 0x83a   : > { %v8940_v6 = vadd.f32 %v8939_v30, %v8938_v13  ;;  %v8978_v7 = vadd.f32 %v8977_v63, %v8976_v36 }
 0x83c   : > { %v2872_v34 = vadd.f32 %v8940_v6, %v8742_v31 }
 0x83e   : > { %v2947_v23 = vadd.f32 %v8978_v7, %v2872_v34 }
 0x848   : > { %v9011_v33 = vpop.f32.mrb[36].mxu1  ;;  %v9049_v59 = vpop.f32.mrb[38].mxu0 }
 0x849   : > { %v9012_v35 = vpop.f32.mrb[37].mxu1  ;;  %v9050_v21 = vpop.f32.mrb[39].mxu0 }
 0x84a   : > { %v9013_v22 = vadd.f32 %v9012_v35, %v9011_v33  ;;  %v9051_v11 = vadd.f32 %v9050_v21, %v9049_v59 }
 0x84c   : > { %v3017_v37 = vadd.f32 %v9013_v22, %v2942_v29  ;;  %v9014_v45 = vpop.f32.mrb[38].mxu1  ;;  %v9052_v47 = vpop.f32.mrb[40].mxu0 }
 0x84d   : > { %v9015_v48 = vpop.f32.mrb[39].mxu1  ;;  %v9053_v49 = vpop.f32.mrb[41].mxu0 }
 0x84e   : > { %v3092_v12 = vadd.f32 %v9051_v11, %v3017_v37  ;;  %v9016_v14 = vadd.f32 %v9015_v48, %v9014_v45  ;;  %v9054_v61 = vadd.f32 %v9053_v49, %v9052_v47 }
 0x850   : > { %v3022_v52 = vadd.f32 %v9016_v14, %v2947_v23 }
 0x852   : > { %v3097_v32 = vadd.f32 %v9054_v61, %v3022_v52 }
 0x869   : > { %v9087_v53 = vpop.f32.mrb[40].mxu1  ;;  %v9125_v0 = vpop.f32.mrb[42].mxu0 }
 0x86a   : > { %v9088_v28 = vpop.f32.mrb[41].mxu1  ;;  %v9126_v54 = vpop.f32.mrb[43].mxu0 }
 0x86b   : > { %v9089_v18 = vadd.f32 %v9088_v28, %v9087_v53  ;;  %v9127_v41 = vadd.f32 %v9126_v54, %v9125_v0  ;;  %v8743_v0 = vld [vmem:[%s3402_s4] ss:$0 sm:$0xff] }
 0x86c   : > { %v8744_v54 = vld [vmem:[%s3404_s10] ss:$0 sm:$0xff] }
 0x86d   : > { %v3167_v10 = vadd.f32 %v9089_v18, %v3092_v12  ;;  %v9090_v50 = vpop.f32.mrb[42].mxu1  ;;  %v9128_v15 = vpop.f32.mrb[44].mxu0 }
 0x86e   : > { %v9091_v62 = vpop.f32.mrb[43].mxu1  ;;  %v9129_v19 = vpop.f32.mrb[45].mxu0 }
 0x86f   : > { %v3242_v42 = vadd.f32 %v9127_v41, %v3167_v10  ;;  %v9092_v27 = vadd.f32 %v9091_v62, %v9090_v50  ;;  %v9130_v1 = vadd.f32 %v9129_v19, %v9128_v15 }
 0x871   : > { %v3172_v60 = vadd.f32 %v9092_v27, %v3097_v32 }
 0x873   : > { %v3247_v55 = vadd.f32 %v9130_v1, %v3172_v60 }
 0x88a   : > { %v9163_v24 = vpop.f32.mrb[44].mxu1  ;;  %v9201_v25 = vpop.f32.mrb[46].mxu0 }
 0x88b   : > { %v9164_v58 = vpop.f32.mrb[45].mxu1  ;;  %v9202_v31 = vpop.f32.mrb[47].mxu0 }
 0x88c   : > { %v9165_v56 = vadd.f32 %v9164_v58, %v9163_v24  ;;  %v9203_v43 = vadd.f32 %v9202_v31, %v9201_v25 }
 0x88e   : > { %v3317_v9 = vadd.f32 %v9165_v56, %v3242_v42  ;;  %v9166_v44 = vpop.f32.mrb[46].mxu1  ;;  %v9204_v26 = vpop.f32.mrb[48].mxu0 }
 0x88f   : > { %v9167_v29 = vpop.f32.mrb[47].mxu1  ;;  %v9205_v13 = vpop.f32.mrb[49].mxu0 }
 0x890   : > { %v3392_v36 = vadd.f32 %v9203_v43, %v3317_v9  ;;  %v9168_v30 = vadd.f32 %v9167_v29, %v9166_v44  ;;  %v9206_v63 = vadd.f32 %v9205_v13, %v9204_v26 }
 0x892   : > { %v3322_v6 = vadd.f32 %v9168_v30, %v3247_v55  ;;  %v3400_v7 = vadd.f32 %v3392_v36, %v11208_v51  ;;  %v8745_v30 = vld [vmem:[%s10936_s15] ss:$0 sm:$0xff] (%p182_p0) }
 0x894   : > { %v3397_v34 = vadd.f32 %v9206_v63, %v3322_v6  ;;  %v3406_v23 = vsel %vm199_vm0, %v3400_v7, 0.0  ;;  %v8746_v6 = vld [vmem:[%s10941_s22] ss:$0 sm:$0xff] (%p182_p0) }
 0x895   : > { %3407 = vadd.xlane.f32.xlu0 %v3406_v23 }
 0x896   : > { %v3401_v33 = vadd.f32 %v3397_v34, %v11220_v57 }
 0x898   : > { %v3409_v59 = vsel %vm199_vm0, %v3401_v33, 0.0 }
 0x899   : > { %3410 = vadd.xlane.f32.xlu1 %v3409_v59 }
 0x922   : > { %v3408_v35 = vpop.xlane.xlu0 %3407 }
 0x923   : > { %v3412_v21 = vmul.f32 0.25, %v3408_v35 }
 0x925   : > { %v3414_v22 = vsub.f32 %v3400_v7, %v3412_v21 }
 0x926   : > { %v3411_v11 = vpop.xlane.xlu1 %3410 }
 0x927   : > { %v3413_v37 = vmul.f32 0.25, %v3411_v11  ;;  %v3416_v45 = vmul.f32 %v3414_v22, %v3414_v22 }
 0x929   : > { %v3415_v51 = vsub.f32 %v3401_v33, %v3413_v37  ;;  %v3418_v47 = vsel %vm199_vm0, %v3416_v45, 0.0 }
 0x92a   : > { %3419 = vadd.xlane.f32.xlu0 %v3418_v47 }
 0x92b   : > { %v3417_v48 = vmul.f32 %v3415_v51, %v3415_v51 }
 0x92d   : > { %v3421_v57 = vsel %vm199_vm0, %v3417_v48, 0.0 }
 0x92e   : > { %3422 = vadd.xlane.f32.xlu1 %v3421_v57 }
 0x9b7   : > { %v3420_v49 = vpop.xlane.xlu0 %3419 }
 0x9b8   : > { %v3424_v12 = vmul.f32 0.25, %v3420_v49 }
 0x9ba   : > { %v3426_v14 = vadd.f32 1e-05, %v3424_v12 }
 0x9bb   : > { %v3423_v61 = vpop.xlane.xlu1 %3422 }
 0x9bc   : > { %10528 = vrsqrt.f32 %v3426_v14  ;;  %v3425_v52 = vmul.f32 0.25, %v3423_v61 }
 0x9be   : > { %v3427_v32 = vadd.f32 1e-05, %v3425_v52 }
 0x9c0   : > { %10530 = vrsqrt.f32 %v3427_v32 }
 0x9c6   : > { %v10529_v53 = vpop.eup %10528 }
 0x9c7   : > { %v3430_v28 = vmul.f32 %v10529_v53, %v3414_v22 }
 0x9c9   : > { %v3438_v18 = vmul.f32 %v8743_v0, %v3430_v28 }
 0x9ca   : > { %v10531_v41 = vpop.eup %10530 }
 0x9cb   : > { %v3446_v10 = vadd.f32 %v8744_v54, %v3438_v18   ;;  %v3431_v50 = vmul.f32 %v10531_v41, %v3415_v51  ;;  %184 = sbr.rel (!%p182_p0) target bundleno = 75 (0x4b), region = 276 }
 0x9cd   : > { %v3439_v15 = vmul.f32 %v8743_v0, %v3431_v50  ;;  %v12672_v0 = vmov %v3446_v10  ;;  %v3451_v19 = vsel (%p182_p0), %vm199_vm0, %v3446_v10, 0.0 }
 0x9ce   :  { %3452 = vadd.xlane.f32.xlu0 (%p182_p0), %v3451_v19 }
 0x9cf   : > { %v3447_v62 = vadd.f32 %v8744_v54, %v3439_v15  }
 0x9d1   : > { %v12671_v1 = vmov %v3447_v62  ;;  %v3454_v42 = vsel (%p182_p0), %vm199_vm0, %v3447_v62, 0.0 }
 0x9d2   :  { %3455 = vadd.xlane.f32.xlu0 %v3454_v42 }
 0xa5b   :  { %v3453_v27 = vpop.xlane.xlu0 %3452 }
 0xa5c   :  { %v3458_v60 = vmul.f32 0.25, %v3453_v27 }
 0xa5e   :  { %v3460_v55 = vsub.f32 %v3446_v10, %v3458_v60 }
 0xa5f   :  { %v3456_v24 = vpop.xlane.xlu0 %3455 }
 0xa60   :  { %v3459_v25 = vmul.f32 0.25, %v3456_v24  ;;  %v3462_v58 = vmul.f32 %v3460_v55, %v3460_v55 }
 0xa62   :  { %v3461_v31 = vsub.f32 %v3447_v62, %v3459_v25  ;;  %v3464_v56 = vsel %vm199_vm0, %v3462_v58, 0.0 }
 0xa63   :  { %3465 = vadd.xlane.f32.xlu1 %v3464_v56 }
 0xa64   :  { %v3463_v43 = vmul.f32 %v3461_v31, %v3461_v31 }
 0xa66   :  { %v3467_v4 = vsel %vm199_vm0, %v3463_v43, 0.0 }
 0xa67   :  { %3468 = vadd.xlane.f32.xlu1 %v3467_v4 }
 0xaf0   :  { %v3466_v1 = vpop.xlane.xlu1 %3465 }
 0xaf1   :  { %v3470_v9 = vmul.f32 0.25, %v3466_v1 }
 0xaf3   :  { %v3472_v44 = vadd.f32 1e-05, %v3470_v9 }
 0xaf4   :  { %v3469_v26 = vpop.xlane.xlu1 %3468 }
 0xaf5   :  { %10532 = vrsqrt.f32 %v3472_v44  ;;  %v3471_v29 = vmul.f32 0.25, %v3469_v26 }
 0xaf7   :  { %v3473_v13 = vadd.f32 1e-05, %v3471_v29 }
 0xaf9   :  { %10534 = vrsqrt.f32 %v3473_v13 }
 0xaff   :  { %v10533_v36 = vpop.eup %10532 }
 0xb00   :  { %v3476_v63 = vmul.f32 %v10533_v36, %v3460_v55 }
 0xb02   :  { %v3484_v7 = vmul.f32 %v8745_v30, %v3476_v63 }
 0xb03   :  { %v10535_v34 = vpop.eup %10534 }
 0xb04   :  { %v11718_v23 = vadd.f32 %v8746_v6, %v3484_v7  ;;  %v3477_v33 = vmul.f32 %v10535_v34, %v3461_v31 }
 0xb06   :  { %12673 = vst [vmem:[#allocation24_spill] sm:$0xff] %v11718_v23  ;;  %v3485_v59 = vmul.f32 %v8745_v30, %v3477_v33 }
 0xb08   :  { %v11720_v35 = vadd.f32 %v8746_v6, %v3485_v59 }
 0xb09 LB: > { %v12674_v5 = vld [vmem:[#allocation2_spill] sm:$0xff]  ;;  %s12675_s25 = sld [smem:[#allocation3_spill]]  ;;  %s12676_s29 = sld [smem:[#allocation4_spill]]  ;;  %9674 = vmatprep.mubr.msk.f32.mxu0 %vm199_vm0, %v10668_v2  ;;  %v10730_v22 = vmov 0.0   ;;  %vm10731_vm5 = vmmov 0   ;;  %vm4313_vm6 = vcmask 1041408   ;;  %v10664_v3 = vphi %v10792_v3, %v12696_v3   ;;  %s10672_s21 = sphi %s11728_s21, %s3499_s21   ;;  %v10668_v2 = vphi %v10785_v2, %v12697_v2  }
 0xb0a   : > { %s11740_s3 = sshll.u32 %s10672_s21, 2  ;;  %9677 = vmatprep.subr.mxu1 %v10730_v22  ;;  %9679 = vmatprep.mubr.msk.f32.mxu1 %vm10731_vm5, %v10730_v22  ;;  %s10732_s18 = smov 127   ;;  %vm3698_vm7 = vcmask 1045504   ;;  %vm3680_vm8 = vcmask 46080   ;;  %vm3694_vm9 = vcmask 48128   ;;  %vm5027_vm10 = vcmask 27648  }
 0xb0b   : > { %s10733_s13 = smov 124   ;;  %s10734_s26 = smov 122   ;;  %vm5335_vm11 = vcmask 62464  }
 0xb0c   : > { %s10735_s30 = smov 123   ;;  %s10736_s6 = smov 121  }
 0xb0d   : > { %s10737_s12 = smov 126   ;;  %s10738_s15 = smov 125   ;;  %v12677_v23 = vld [vmem:[#allocation24_spill] sm:$0xff] }
 0xb0e   : > { %s10739_s22 = smov 120   ;;  %s10740_s1 = smov 119  }
 0xb0f   : > { %s3503_s8 = scalar_lea.vmem %s12675_s25, %s11740_s3  ;;  %s3505_s14 = scalar_lea.vmem %s12676_s29, %s10672_s21 }
 0xb10   : > { %v3504_v21 = vld [vmem:[%s3503_s8] sm:$0xf]  ;;  %s10741_s0 = smov 117   ;;  %s10742_s11 = smov 118  }
 0xb11   : > { %9672 = vmatprep.subr.msk.mxu0 %vm206_vm1, %v3504_v21  ;;  %v8748_v11 = vld [vmem:[%s3505_s14] ss:$0 sm:$0xff]  ;;  %s12678_s5 = sld [smem:[#allocation5_spill]]  ;;  %s12679_s20 = sld [smem:[#allocation6_spill]] }
 0xb12   : > { %9673 = vmatpush3.msk.msra.mxu0 %vm206_vm1, %v3504_v21  ;;  %s12680_s24 = sld [smem:[#allocation9_spill]]  ;;  %s12681_s17 = sld [smem:[#allocation7_spill]] }
 0xb13   : > { %9675 = vmatmul.mubr.msk.f32.vlgmr.msra.gmra.mrb[0].mxu0 %vm199_vm0, %v10664_v3  ;;  %9682 = vmatprep.subr.mxu0 %v10730_v22  ;;  %s12682_s4 = sld [smem:[#allocation13_spill]]  ;;  %s12683_s10 = sld [smem:[#allocation14_spill]] }
 0xb14   : > { %9684 = vmatprep.mubr.msk.f32.mxu0 %vm10731_vm5, %v10730_v22  ;;  %s12684_s25 = sld [smem:[#allocation10_spill]]  ;;  %s12685_s14 = sld [smem:[#allocation8_spill]] }
 0xb17   : > { %s3598_s16 = scalar_lea.vmem %s12678_s5, %s11740_s3  ;;  %s3600_s9 = scalar_lea.vmem %s12679_s20, %s10672_s21 }
 0xb18   : > { %s5161_s27 = scalar_lea.vmem %s12680_s24, %s11740_s3  ;;  %s5067_s2 = scalar_lea.vmem %s12681_s17, %s11740_s3 }
 0xb19   : > { %s5020_s29 = scalar_lea.vmem %s12682_s4, %s10672_s21  ;;  %s5022_s8 = scalar_lea.vmem %s12683_s10, %s10672_s21 }
 0xb1a   : > { %s8824_s20 = sshll.u32 %s10672_s21, 11  ;;  %s12692_s24 = sld [smem:[#allocation20_spill]] }
 0xb1b   : > { %s8822_s17 = sshll.u32 %s10672_s21, 4  ;;  %s12694_s10 = sld [smem:[#allocation17_spill]] }
 0xbe6   : > { %v9676_v37 = vpop.f32.mrb[0].mxu0 }
 0xbe7   : > { %v3589_v45 = vpop.f32.mrb[1].mxu0  ;;  %v3595_v47 = vadd.f32 %v9676_v37, %v8748_v11 }
 0xbe8   : > { %v11758_v51 = vadd.f32 %v8748_v11, %v3589_v45 }
 0xbe9   : > { %v4315_v48 = vrot.slane %v3595_v47, 6 }
 0xbea   : > { %3781 = vrot.lane.b32.xlu1 %v11758_v51, %s10732_s18  ;;  %3603 = vrot.lane.b32.xlu0 %v11758_v51, %s10733_s13  ;;  %v4314_v57 = vrot.slane %v11758_v51, 6 }
 0xbec   : > { %v11774_v49 = vsel %vm4313_vm6, %v4314_v57, %v4315_v48 }
 0xbee   : > { %3960 = vrot.lane.b32.xlu1 %v11758_v51, %s10734_s26  ;;  %3783 = vrot.lane.b32.xlu0 %v11758_v51, %s10735_s30 }
 0xbf2   : > { %4137 = vrot.lane.b32.xlu1 %v11758_v51, %s10736_s6  ;;  %3958 = vrot.lane.b32.xlu0 %v11758_v51, %s10737_s12 }
 0xbf6   : > { %4135 = vrot.lane.b32.xlu0 %v11758_v51, %s10738_s15  ;;  %4317 = vrot.lane.b32.xlu1 %v11774_v49, %s10733_s13 }
 0xbfa   : > { %4489 = vrot.lane.b32.xlu0 %v11774_v49, %s10735_s30  ;;  %4487 = vrot.lane.b32.xlu1 %v11774_v49, %s10732_s18 }
 0xbfe   : > { %4662 = vrot.lane.b32.xlu0 %v11774_v49, %s10734_s26  ;;  %4660 = vrot.lane.b32.xlu1 %v11774_v49, %s10737_s12 }
 0xc02   : > { %4835 = vrot.lane.b32.xlu0 %v11774_v49, %s10736_s6  ;;  %4833 = vrot.lane.b32.xlu1 %v11774_v49, %s10738_s15 }
 0xc06   : > { %3692 = vrot.lane.b32.xlu0 %v11758_v51, %s10739_s22  ;;  %3870 = vrot.lane.b32.xlu1 %v11758_v51, %s10740_s1 }
 0xc5c   : > { %v3782_v12 = vpop.permute.xlu1 %3781  ;;  %v3604_v14 = vpop.permute.xlu0 %3603 }
 0xc5d   : > { %9678 = vmatpush3.xpose.msk.msra.mxu1 %vm292_vm3, %v3604_v14 }
 0xc5e   : > { %9687 = vmatprep.subr.mxu1 %v10730_v22 }
 0xc60   : > { %v3961_v61 = vpop.permute.xlu1 %3960  ;;  %9680 = vmatmul.mubr.msk.f32.vlgmr.msra.gmra.mrb[0].mxu1 %vm292_vm3, %v11758_v51  ;;  %v3784_v52 = vpop.permute.xlu0 %3783 }
 0xc61   : > { %9688 = vmatpush3.xpose.msk.msra.mxu1 %vm292_vm3, %v3784_v52  ;;  %9689 = vmatprep.mubr.msk.f32.mxu1 %vm10731_vm5, %v10730_v22 }
 0xc62   : > { %9697 = vmatprep.subr.mxu1 %v10730_v22 }
 0xc64   : > { %v4138_v32 = vpop.permute.xlu1 %4137  ;;  %9690 = vmatmul.mubr.msk.f32.vlgmr.msra.gmra.mrb[2].mxu1 %vm292_vm3, %v3782_v12  ;;  %v3959_v53 = vpop.permute.xlu0 %3958 }
 0xc65   : > { %9698 = vmatpush3.xpose.msk.msra.mxu1 %vm292_vm3, %v3961_v61  ;;  %9699 = vmatprep.mubr.msk.f32.mxu1 %vm10731_vm5, %v10730_v22 }
 0xc66   : > { %9707 = vmatprep.subr.mxu1 %v10730_v22 }
 0xc68   : > { %9700 = vmatmul.mubr.msk.f32.vlgmr.msra.gmra.mrb[4].mxu1 %vm292_vm3, %v3959_v53  ;;  %v4136_v0 = vpop.permute.xlu0 %4135  ;;  %v4318_v28 = vpop.permute.xlu1 %4317 }
 0xc69   : > { %9708 = vmatpush3.xpose.msk.msra.mxu1 %vm292_vm3, %v4138_v32  ;;  %9709 = vmatprep.mubr.msk.f32.mxu1 %vm10731_vm5, %v10730_v22 }
 0xc6a   : > { %9717 = vmatprep.subr.mxu1 %v10730_v22 }
 0xc6c   : > { %9710 = vmatmul.mubr.msk.f32.vlgmr.msra.gmra.mrb[6].mxu1 %vm292_vm3, %v4136_v0  ;;  %v4490_v54 = vpop.permute.xlu0 %4489  ;;  %v4488_v18 = vpop.permute.xlu1 %4487 }
 0xc6d   : > { %9718 = vmatpush3.xpose.msk.msra.mxu1 %vm292_vm3, %v4318_v28  ;;  %9719 = vmatprep.mubr.msk.f32.mxu1 %vm10731_vm5, %v10730_v22 }
 0xc6e   : > { %9727 = vmatprep.subr.mxu1 %v10730_v22 }
 0xc70   : > { %v4663_v41 = vpop.permute.xlu0 %4662  ;;  %9720 = vmatmul.mubr.msk.f32.vlgmr.msra.gmra.mrb[8].mxu1 %vm292_vm3, %v11774_v49  ;;  %v4661_v50 = vpop.permute.xlu1 %4660 }
 0xc71   : > { %9728 = vmatpush3.xpose.msk.msra.mxu1 %vm292_vm3, %v4490_v54  ;;  %9729 = vmatprep.mubr.msk.f32.mxu1 %vm10731_vm5, %v10730_v22 }
 0xc72   : > { %9737 = vmatprep.subr.mxu1 %v10730_v22 }
 0xc74   : > { %v4836_v10 = vpop.permute.xlu0 %4835  ;;  %9730 = vmatmul.mubr.msk.f32.vlgmr.msra.gmra.mrb[10].mxu1 %vm292_vm3, %v4488_v18  ;;  %v4834_v62 = vpop.permute.xlu1 %4833 }
 0xc75   : > { %9738 = vmatpush3.xpose.msk.msra.mxu1 %vm292_vm3, %v4663_v41  ;;  %9739 = vmatprep.mubr.msk.f32.mxu1 %vm10731_vm5, %v10730_v22 }
 0xc76   : > { %9747 = vmatprep.subr.mxu1 %v10730_v22 }
 0xc78   : > { %v3693_v15 = vpop.permute.xlu0 %3692  ;;  %9740 = vmatmul.mubr.msk.f32.vlgmr.msra.gmra.mrb[12].mxu1 %vm292_vm3, %v4661_v50  ;;  %v11857_v57 = vpop.permute.xlu1 %3870 }
 0xc79   : > { %9683 = vmatpush3.msk.msra.mxu0 %vm3698_vm7, %v3693_v15  ;;  %9748 = vmatpush3.xpose.msk.msra.mxu1 %vm292_vm3, %v4836_v10 }
 0xc7a   : > { %9749 = vmatprep.mubr.msk.f32.mxu1 %vm10731_vm5, %v10730_v22  ;;  %9692 = vmatprep.subr.mxu0 %v10730_v22 }
 0xc7c   : > { %9750 = vmatmul.mubr.msk.f32.vlgmr.msra.gmra.mrb[14].mxu1 %vm292_vm3, %v4834_v62 }
 0xd33   : > { %v3676_v19 = vpop.f32.mrb[0].mxu1 }
 0xd34   : > { %v3677_v42 = vadd.f32 %v3676_v19, %v12674_v5  ;;  %v9681_v27 = vpop.f32.mrb[1].mxu1 }
 0xd36   : > { %v3681_v60 = vsel %vm3680_vm8, %v3677_v42, -inf }
 0xd37   : > { %v3855_v55 = vpop.f32.mrb[2].mxu1  ;;  %3682 = vmax.xlane.f32.xlu0 %v3681_v60 }
 0xd38   : > { %v3856_v24 = vadd.f32 %v3855_v55, %v12674_v5  ;;  %v9691_v25 = vpop.f32.mrb[3].mxu1 }
 0xd3a   : > { %v3859_v58 = vsel %vm3680_vm8, %v3856_v24, -inf }
 0xd3b   : > { %v4032_v31 = vpop.f32.mrb[4].mxu1  ;;  %3860 = vmax.xlane.f32.xlu1 %v3859_v58 }
 0xd3c   : > { %v4033_v56 = vadd.f32 %v4032_v31, %v12674_v5  ;;  %v9701_v43 = vpop.f32.mrb[5].mxu1 }
 0xd3e   : > { %v4036_v4 = vsel %vm3680_vm8, %v4033_v56, -inf }
 0xd3f   : > { %v4209_v1 = vpop.f32.mrb[6].mxu1  ;;  %4037 = vmax.xlane.f32.xlu0 %v4036_v4 }
 0xd40   : > { %v4210_v9 = vadd.f32 %v4209_v1, %v12674_v5  ;;  %v9711_v44 = vpop.f32.mrb[7].mxu1 }
 0xd42   : > { %v4213_v26 = vsel %vm3680_vm8, %v4210_v9, -inf }
 0xd43   : > { %4214 = vmax.xlane.f32.xlu0 %v4213_v26  ;;  %v4389_v29 = vpop.f32.mrb[8].mxu1 }
 0xd44   : > { %v4390_v13 = vadd.f32 %v4389_v29, %v12674_v5  ;;  %v9721_v36 = vpop.f32.mrb[9].mxu1 }
 0xd46   : > { %v4393_v30 = vsel %vm3680_vm8, %v4390_v13, -inf }
 0xd47   : > { %4394 = vmax.xlane.f32.xlu1 %v4393_v30  ;;  %v4561_v63 = vpop.f32.mrb[10].mxu1 }
 0xd48   : > { %v4562_v6 = vadd.f32 %v4561_v63, %v12674_v5  ;;  %v9731_v7 = vpop.f32.mrb[11].mxu1 }
 0xd4a   : > { %v4565_v34 = vsel %vm3680_vm8, %v4562_v6, -inf }
 0xd4b   : > { %4566 = vmax.xlane.f32.xlu0 %v4565_v34  ;;  %v4734_v33 = vpop.f32.mrb[12].mxu1 }
 0xd4c   : > { %v4735_v59 = vadd.f32 %v4734_v33, %v12674_v5  ;;  %v9741_v21 = vpop.f32.mrb[13].mxu1  ;;  %v10743_v33 = vmov 0  }
 0xd4d   : > { %10536 = vset.pattern.permute.xlu1 %v10743_v33  ;;  %10537 = vset.pattern.permute.xlu0 %v10743_v33  ;;  %v3599_v33 = vld [vmem:[%s3598_s16] sm:$0xf]  ;;  %s12691_s16 = sld [smem:[#allocation21_spill]] }
 0xd4e   : > { %v4738_v11 = vsel %vm3680_vm8, %v4735_v59, -inf }
 0xd4f   : > { %4739 = vmax.xlane.f32.xlu1 %v4738_v11  ;;  %v4907_v37 = vpop.f32.mrb[14].mxu1 }
 0xd50   : > { %v4908_v45 = vadd.f32 %v4907_v37, %v12674_v5  ;;  %v9751_v47 = vpop.f32.mrb[15].mxu1 }
 0xd52   : > { %v4911_v48 = vsel %vm3680_vm8, %v4908_v45, -inf }
 0xd53   : > { %4912 = vmax.xlane.f32.xlu0 %v4911_v48 }
 0xd60   : > { %4224 = vrot.lane.b32.xlu1 %v11758_v51, %s10741_s0 }
 0xd69   : > { %4047 = vrot.lane.b32.xlu0 %v11758_v51, %s10742_s11 }
 0xdc4   : > { %v3683_v12 = vpop.xlane.xlu0 %3682 }
 0xdc5   : > { %v3684_v14 = vsub.f32 %v3677_v42, %v3683_v12 }
 0xdc7   : > { %v3685_v61 = vmul.f32 1.442695, %v3684_v14 }
 0xdc8   : > { %v3861_v52 = vpop.xlane.xlu1 %3860 }
 0xdc9   : > { %10546 = vpow2.f32 %v3685_v61  ;;  %v3862_v32 = vsub.f32 %v3856_v24, %v3861_v52 }
 0xdcb   : > { %v3863_v53 = vmul.f32 1.442695, %v3862_v32 }
 0xdcc   : > { %v4038_v0 = vpop.xlane.xlu0 %4037 }
 0xdcd   : > { %10548 = vpow2.f32 %v3863_v53  ;;  %v4039_v28 = vsub.f32 %v4033_v56, %v4038_v0 }
 0xdcf   : > { %v4040_v54 = vmul.f32 1.442695, %v4039_v28 }
 0xdd0   : > { %v4215_v18 = vpop.xlane.xlu0 %4214 }
 0xdd1   : > { %10550 = vpow2.f32 %v4040_v54  ;;  %v4216_v41 = vsub.f32 %v4210_v9, %v4215_v18 }
 0xdd3   : > { %v10547_v10 = vpop.eup %10546  ;;  %v4217_v50 = vmul.f32 1.442695, %v4216_v41 }
 0xdd4   : > { %v3687_v51 = vsel %vm3680_vm8, %v10547_v10, 0.0  ;;  %v4395_v55 = vpop.xlane.xlu1 %4394 }
 0xdd5   : > { %10552 = vpow2.f32 %v4217_v50  ;;  %3688 = vadd.xlane.f32.xlu1 %v3687_v51  ;;  %v4396_v24 = vsub.f32 %v4390_v13, %v4395_v55 }
 0xdd7   : > { %v10549_v15 = vpop.eup %10548  ;;  %v4397_v56 = vmul.f32 1.442695, %v4396_v24 }
 0xdd8   : > { %v3865_v62 = vsel %vm3680_vm8, %v10549_v15, 0.0  ;;  %v4567_v25 = vpop.xlane.xlu0 %4566 }
 0xdd9   : > { %3866 = vadd.xlane.f32.xlu0 %v3865_v62  ;;  %v4568_v31 = vsub.f32 %v4562_v6, %v4567_v25  ;;  %10554 = vpow2.f32 %v4397_v56 }
 0xddb   : > { %v11861_v19 = vpop.eup %10550  ;;  %v4569_v1 = vmul.f32 1.442695, %v4568_v31 }
 0xddc   : > { %v4042_v42 = vsel %vm3680_vm8, %v11861_v19, 0.0  ;;  %v4740_v58 = vpop.xlane.xlu1 %4739 }
 0xddd   : > { %4043 = vadd.xlane.f32.xlu1 %v4042_v42  ;;  %v4741_v43 = vsub.f32 %v4735_v59, %v4740_v58  ;;  %10556 = vpow2.f32 %v4569_v1 }
 0xddf   : > { %v11865_v27 = vpop.eup %10552  ;;  %v4742_v9 = vmul.f32 1.442695, %v4741_v43 }
 0xde0   : > { %v4219_v60 = vsel %vm3680_vm8, %v11865_v27, 0.0  ;;  %v4913_v4 = vpop.xlane.xlu0 %4912  ;;  %v4225_v59 = vpop.permute.xlu1 %4224 }
 0xde1   : > { %4220 = vadd.xlane.f32.xlu0 %v4219_v60  ;;  %v4914_v44 = vsub.f32 %v4908_v45, %v4913_v4  ;;  %10558 = vpow2.f32 %v4742_v9 }
 0xde3   : > { %v4915_v26 = vmul.f32 1.442695, %v4914_v44  ;;  %v11873_v29 = vpop.eup %10554 }
 0xde4   : > { %v4399_v13 = vsel %vm3680_vm8, %v11873_v29, 0.0  ;;  %v4048_v21 = vpop.permute.xlu0 %4047 }
 0xde5   : > { %10560 = vpow2.f32 %v4915_v26 }
 0xde7   : > { %v11875_v36 = vpop.eup %10556 }
 0xde8   : > { %v4571_v63 = vsel %vm3680_vm8, %v11875_v36, 0.0 }
 0xdeb   : > { %v11879_v30 = vpop.eup %10558 }
 0xdec   : > { %v4744_v6 = vsel %vm3680_vm8, %v11879_v30, 0.0 }
 0xdee   : > { %4576 = vrot.lane.b32.xlu1 %v11774_v49, %s10740_s1  ;;  %s5069_s1 = scalar_lea.vmem %s12685_s14, %s10672_s21 }
 0xdef   : > { %v11885_v7 = vpop.eup %10560 }
 0xdf0   : > { %v4917_v34 = vsel %vm3680_vm8, %v11885_v7, 0.0 }
 0xdf7   : > { %4404 = vrot.lane.b32.xlu0 %v11774_v49, %s10739_s22  ;;  %s5163_s22 = scalar_lea.vmem %s12684_s25, %s10672_s21  ;;  %s12695_s25 = sld [smem:[#allocation18_spill]] }
 0xe12   : > { %4400 = vadd.xlane.f32.xlu1 %v4399_v13 }
 0xe16   : > { %4572 = vadd.xlane.f32.xlu0 %v4571_v63  ;;  %4745 = vadd.xlane.f32.xlu1 %v4744_v6 }
 0xe1a   : > { %4918 = vadd.xlane.f32.xlu1 %v4917_v34 }
 0xe2b   : > { %4922 = vrot.lane.b32.xlu1 %v11774_v49, %s10741_s0  ;;  %s12690_s0 = sld [smem:[#allocation16_spill]] }
 0xe2c   : > { %4749 = vrot.lane.b32.xlu0 %v11774_v49, %s10742_s11 }
 0xe31   : > { %s6666_s5 = scalar_lea.vmem %s12690_s0, %s10672_s21 }
 0xe62   : > { %v3689_v11 = vpop.xlane.xlu1 %3688 }
 0xe63   : > { %10562 = vrcp.f32 %v3689_v11  ;;  %v3955_v11 = vrot.slane %v3599_v33, %v11165_v38 }
 0xe66   : > { %v3867_v37 = vpop.xlane.xlu0 %3866 }
 0xe67   : > { %10564 = vrcp.f32 %v3867_v37  ;;  %v3779_v37 = vrot.slane %v3599_v33, %v11168_v39 }
 0xe6a   : > { %v4044_v45 = vpop.xlane.xlu1 %4043 }
 0xe6b   : > { %10566 = vrcp.f32 %v4044_v45  ;;  %v4132_v45 = vrot.slane %v3599_v33, %v11171_v40 }
 0xe6d   : > { %v10563_v47 = vpop.eup %10562 }
 0xe6e   : > { %v3691_v48 = vmul.f32 %v10563_v47, %v10547_v10  ;;  %v4221_v12 = vpop.xlane.xlu0 %4220  ;;  %v4577_v0 = vpop.permute.xlu1 %4576 }
 0xe6f   : > { %10568 = vrcp.f32 %v4221_v12 }
 0xe70   : > { %9685 = vmatmul.mubr.msk.f32.vlgmr.msra.gmra.mrb[2].mxu0 %vm3694_vm9, %v3691_v48 }
 0xe71   : > { %v10565_v14 = vpop.eup %10564  ;;  %9693 = vmatpush3.msk.msra.mxu0 %vm3698_vm7, %v11857_v57  ;;  %9694 = vmatprep.mubr.msk.f32.mxu0 %vm10731_vm5, %v10730_v22 }
 0xe72   : > { %v3869_v49 = vmul.f32 %v10565_v14, %v10549_v15  ;;  %9702 = vmatprep.subr.mxu0 %v10730_v22  ;;  %v4405_v53 = vpop.permute.xlu0 %4404 }
 0xe74   : > { %9695 = vmatmul.mubr.msk.f32.vlgmr.msra.gmra.mrb[4].mxu0 %vm3694_vm9, %v3869_v49  ;;  %v4309_v49 = vrot.slane %v3599_v33, %v11177_v46  ;;  %v8785_v33 = vld [vmem:[%s5020_s29] ss:$0 sm:$0xff]  ;;  %s8376_s29 = scalar_lea.vmem %s12694_s10, %s10672_s21 }
 0xe75   : > { %v10567_v61 = vpop.eup %10566  ;;  %9703 = vmatpush3.msk.msra.mxu0 %vm3698_vm7, %v4048_v21  ;;  %9704 = vmatprep.mubr.msk.f32.mxu0 %vm10731_vm5, %v10730_v22 }
 0xe76   : > { %v4046_v52 = vmul.f32 %v10567_v61, %v11861_v19  ;;  %9712 = vmatprep.subr.mxu0 %v10730_v22 }
 0xe78   : > { %9705 = vmatmul.mubr.msk.f32.vlgmr.msra.gmra.mrb[6].mxu0 %vm3694_vm9, %v4046_v52 }
 0xe79   : > { %v10569_v57 = vpop.eup %10568  ;;  %9713 = vmatpush3.msk.msra.mxu0 %vm3698_vm7, %v4225_v59  ;;  %9714 = vmatprep.mubr.msk.f32.mxu0 %vm10731_vm5, %v10730_v22 }
 0xe7a   : > { %v4223_v32 = vmul.f32 %v10569_v57, %v11865_v27  ;;  %9722 = vmatprep.subr.mxu0 %v10730_v22 }
 0xe7c   : > { %9715 = vmatmul.mubr.msk.f32.vlgmr.msra.gmra.mrb[8].mxu0 %vm3694_vm9, %v4223_v32 }
 0xe7d   : > { %9723 = vmatpush3.msk.msra.mxu0 %vm3698_vm7, %v4405_v53  ;;  %9724 = vmatprep.mubr.msk.f32.mxu0 %vm10731_vm5, %v10730_v22 }
 0xe7e   : > { %9732 = vmatprep.subr.mxu0 %v10730_v22 }
 0xe9f   : > { %v4401_v28 = vpop.xlane.xlu1 %4400 }
 0xea0   : > { %10570 = vrcp.f32 %v4401_v28 }
 0xea3   : > { %v4573_v54 = vpop.xlane.xlu0 %4572  ;;  %v4746_v18 = vpop.xlane.xlu1 %4745 }
 0xea4   : > { %10572 = vrcp.f32 %v4573_v54 }
 0xea5   : > { %10574 = vrcp.f32 %v4746_v18 }
 0xea7   : > { %v4919_v41 = vpop.xlane.xlu1 %4918  ;;  %v4750_v19 = vpop.permute.xlu0 %4749 }
 0xea8   : > { %10576 = vrcp.f32 %v4919_v41 }
 0xeaa   : > { %v10571_v10 = vpop.eup %10570 }
 0xeab   : > { %v4403_v50 = vmul.f32 %v10571_v10, %v11873_v29  ;;  %v4923_v60 = vpop.permute.xlu1 %4922 }
 0xead   : > { %9725 = vmatmul.mubr.msk.f32.vlgmr.msra.gmra.mrb[10].mxu0 %vm3694_vm9, %v4403_v50 }
 0xeae   : > { %v10573_v51 = vpop.eup %10572  ;;  %9733 = vmatpush3.msk.msra.mxu0 %vm3698_vm7, %v4577_v0  ;;  %9734 = vmatprep.mubr.msk.f32.mxu0 %vm10731_vm5, %v10730_v22 }
 0xeaf   : > { %v4575_v15 = vmul.f32 %v10573_v51, %v11875_v36  ;;  %9742 = vmatprep.subr.mxu0 %v10730_v22  ;;  %v10575_v62 = vpop.eup %10574  ;;  %v8784_v51 = vld [vmem:[%s3600_s9] ss:$0 sm:$0xff]  ;;  %s12188_s9 = scalar_lea.vmem %s12691_s16, %s8824_s20 }
 0xeb0   : > { %v4748_v42 = vmul.f32 %v10575_v62, %v11879_v30  ;;  %v6904_v5 = vld [vmem:[%s12188_s9 + $0x590] sm:$0xff] }
 0xeb1   : > { %9735 = vmatmul.mubr.msk.f32.vlgmr.msra.gmra.mrb[12].mxu0 %vm3694_vm9, %v4575_v15 }
 0xeb2   : > { %9743 = vmatpush3.msk.msra.mxu0 %vm3698_vm7, %v4750_v19  ;;  %9744 = vmatprep.mubr.msk.f32.mxu0 %vm10731_vm5, %v10730_v22  ;;  %v10577_v27 = vpop.eup %10576 }
 0xeb3   : > { %9752 = vmatprep.subr.mxu0 %v10730_v22  ;;  %v4921_v55 = vmul.f32 %v10577_v27, %v11885_v7 }
 0xeb5   : > { %9745 = vmatmul.mubr.msk.f32.vlgmr.msra.gmra.mrb[14].mxu0 %vm3694_vm9, %v4748_v42 }
 0xeb6   : > { %9753 = vmatpush3.msk.msra.mxu0 %vm3698_vm7, %v4923_v60  ;;  %9754 = vmatprep.mubr.msk.f32.mxu0 %vm10731_vm5, %v10730_v22 }
 0xeb9   : > { %9755 = vmatmul.mubr.msk.f32.vlgmr.msra.gmra.mrb[16].mxu0 %vm3694_vm9, %v4921_v55 }
 0xeba   : > { %9764 = vmatprep.mubr.msk.f32.mxu0 %vm199_vm0, %v12677_v23  ;;  %v6905_v23 = vld [vmem:[%s12188_s9 + $0x598] sm:$0xff] }
 0xf43   : > { %v3767_v24 = vpop.f32.mrb[2].mxu0 }
 0xf44   : > { %3773 = vperm.xlu1 %10536, %v3767_v24   ;;  %v9686_v25 = vpop.f32.mrb[3].mxu0 }
 0xf47   : > { %v3943_v58 = vpop.f32.mrb[4].mxu0 }
 0xf48   : > { %3949 = vperm.xlu0 %10537, %v3943_v58   ;;  %v9696_v31 = vpop.f32.mrb[5].mxu0 }
 0xf4b   : > { %v4120_v56 = vpop.f32.mrb[6].mxu0 }
 0xf4c   : > { %v9706_v43 = vpop.f32.mrb[7].mxu0 }
 0xf4f   : > { %v4297_v4 = vpop.f32.mrb[8].mxu0 }
 0xf50   : > { %v9716_v1 = vpop.f32.mrb[9].mxu0 }
 0xf80   : > { %v4477_v9 = vpop.f32.mrb[10].mxu0 }
 0xf81   : > { %4483 = vperm.xlu0 %10537, %v4477_v9   ;;  %v9726_v44 = vpop.f32.mrb[11].mxu0 }
 0xf84   : > { %v4649_v26 = vpop.f32.mrb[12].mxu0 }
 0xf85   : > { %4126 = vperm.xlu0 %10537, %v4120_v56   ;;  %4655 = vperm.xlu1 %10536, %v4649_v26   ;;  %v9736_v29 = vpop.f32.mrb[13].mxu0  ;;  %v5162_v26 = vld [vmem:[%s5161_s27] sm:$0xf]  ;;  %s12296_s27 = scalar_lea.vmem %s12692_s24, %s8822_s17 }
 0xf86   : > { %v5068_v29 = vld [vmem:[%s5067_s2] sm:$0xf]  ;;  %9762 = vmatprep.subr.msk.mxu0 %vm206_vm1, %v5162_v26  ;;  %s12693_s2 = sld [smem:[#allocation22_spill]] }
 0xf87   : > { %9757 = vmatprep.subr.msk.mxu1 %vm206_vm1, %v5068_v29  ;;  %9763 = vmatpush3.msk.msra.mxu0 %vm206_vm1, %v5162_v26 }
 0xf88   : > { %v4822_v36 = vpop.f32.mrb[14].mxu0  ;;  %9758 = vmatpush3.msk.msra.mxu1 %vm206_vm1, %v5068_v29  ;;  %9765 = vmatmul.mubr.msk.f32.vlgmr.msra.gmra.mrb[18].mxu0 %vm199_vm0, %v11720_v35 }
 0xf89   : > { %4303 = vperm.xlu0 %10537, %v4297_v4   ;;  %4828 = vperm.xlu1 %10536, %v4822_v36   ;;  %v9746_v13 = vpop.f32.mrb[15].mxu0 }
 0xf8a   : > { %9767 = vmatprep.subr.mxu1 %v10730_v22  ;;  %9772 = vmatprep.subr.mxu0 %v10730_v22 }
 0xf8b   : > { %9774 = vmatprep.mubr.msk.f32.mxu0 %vm10731_vm5, %v10730_v22 }
 0xf8c   : > { %v4995_v30 = vpop.f32.mrb[16].mxu0  ;;  %s6982_s4 = scalar_lea.vmem %s12693_s2, %s10672_s21 }
 0xf8d   : > { %5001 = vperm.xlu1 %10536, %v4995_v30   ;;  %v9756_v63 = vpop.f32.mrb[17].mxu0 }
 0xfc3   : > { %v3774_v7 = vpop.permute.xlu1 %3773 }
 0xfc4   : > { %v3780_v57 = vmul.f32 %v3779_v37, %v3774_v7 }
 0xfc7   : > { %v3950_v6 = vpop.permute.xlu0 %3949 }
 0xfc8   : > { %v3956_v12 = vmul.f32 %v3955_v11, %v3950_v6 }
 0xfca   : > { %v3957_v28 = vadd.f32 %v3956_v12, %v3780_v57 }
0x1000   : > { %v4484_v34 = vpop.permute.xlu0 %4483 }
0x1001   : > { %v4486_v14 = vmul.f32 %v4484_v34, %v3779_v37  ;;  %v8786_v37 = vld [vmem:[%s5022_s8] ss:$0 sm:$0xff]  ;;  %s8378_s8 = scalar_lea.vmem %s12695_s25, %s10672_s21 }
0x1004   : > { %v4127_v59 = vpop.permute.xlu0 %4126  ;;  %v4656_v21 = vpop.permute.xlu1 %4655 }
0x1005   : > { %v4658_v47 = vmul.f32 %v4656_v21, %v3955_v11  ;;  %v4133_v32 = vmul.f32 %v4132_v45, %v4127_v59 }
0x1007   : > { %v4659_v53 = vadd.f32 %v4658_v47, %v4486_v14  ;;  %v4134_v10 = vadd.f32 %v4133_v32, %v3957_v28  ;;  %v8791_v14 = vld [vmem:[%s5163_s22] ss:$0 sm:$0xff] }
0x1008   : > { %v4829_v48 = vpop.permute.xlu1 %4828  ;;  %v4304_v52 = vpop.permute.xlu0 %4303  ;;  %v8787_v32 = vld [vmem:[%s5069_s1] ss:$0 sm:$0xff] }
0x1009   : > { %v4831_v61 = vmul.f32 %v4829_v48, %v4132_v45  ;;  %v4310_v54 = vmul.f32 %v4309_v49, %v4304_v52 }
0x100b   : > { %v4832_v18 = vadd.f32 %v4831_v61, %v4659_v53  ;;  %v4311_v15 = vadd.f32 %v4310_v54, %v4134_v10 }
0x100c   : > { %v5002_v0 = vpop.permute.xlu1 %5001 }
0x100d   : > { %v5004_v41 = vmul.f32 %v5002_v0, %v4309_v49 }
0x100f   : > { %v5005_v50 = vadd.f32 %v5004_v41, %v4832_v18 }
0x1011   : > { %v5007_v62 = vrot.slane %v5005_v50, 2 }
0x1013   : > { %v5017_v19 = vadd.f32 %v8784_v51, %v5007_v62  ;;  %v5009_v42 = vsel %vm3698_vm7, %v4311_v15, %v5007_v62 }
0x1014   : > { %v5016_v27 = vadd.f32 %v8784_v51, %v5009_v42 }
0x1015   : > { %v5019_v60 = vadd.f32 %v10664_v3, %v5017_v19 }
0x1016   : > { %v5018_v55 = vadd.f32 %v10668_v2, %v5016_v27 }
0x1017   : > { %v5028_v24 = vsel %vm5027_vm10, %v5019_v60, 0.0 }
0x1018   : > { %5029 = vadd.xlane.f32.xlu0 %v5028_v24  ;;  %v5024_v25 = vsel %vm199_vm0, %v5018_v55, 0.0 }
0x1019   : > { %5025 = vadd.xlane.f32.xlu1 %v5024_v25 }
0x105b   : > { %v9766_v49 = vpop.f32.mrb[18].mxu0 }
0x105c   : > { %v11982_v61 = vadd.f32 %v9766_v49, %v8791_v14  ;;  %v5246_v52 = vpop.f32.mrb[19].mxu0 }
0x105d   : > { %v11984_v57 = vadd.f32 %v8791_v14, %v5246_v52 }
0x10a5   : > { %v5030_v58 = vpop.xlane.xlu0 %5029 }
0x10a6   : > { %v5032_v31 = vmul.f32 0.25, %v5030_v58  ;;  %v5026_v56 = vpop.xlane.xlu1 %5025 }
0x10a7   : > { %v5031_v43 = vmul.f32 0.25, %v5026_v56 }
0x10a8   : > { %v5034_v4 = vsub.f32 %v5019_v60, %v5032_v31 }
0x10a9   : > { %v5033_v1 = vsub.f32 %v5018_v55, %v5031_v43 }
0x10aa   : > { %v5036_v9 = vmul.f32 %v5034_v4, %v5034_v4 }
0x10ab   : > { %v5035_v3 = vmul.f32 %v5033_v1, %v5033_v1 }
0x10ac   : > { %v5040_v2 = vsel %vm5027_vm10, %v5036_v9, 0.0 }
0x10ad   : > { %5041 = vadd.xlane.f32.xlu1 %v5040_v2  ;;  %v5037_v44 = vsel %vm199_vm0, %v5035_v3, 0.0 }
0x10ae   : > { %5038 = vadd.xlane.f32.xlu0 %v5037_v44 }
0x10c4   : > { %5436 = vrot.lane.b32.xlu0 %v11984_v57, %s10732_s18 }
0x113a   : > { %v5042_v36 = vpop.xlane.xlu1 %5041 }
0x113b   : > { %v5044_v13 = vmul.f32 0.25, %v5042_v36  ;;  %v5039_v30 = vpop.xlane.xlu0 %5038 }
0x113c   : > { %v5043_v63 = vmul.f32 0.25, %v5039_v30 }
0x113d   : > { %v5046_v6 = vadd.f32 1e-05, %v5044_v13 }
0x113e   : > { %v5045_v7 = vadd.f32 1e-05, %v5043_v63 }
0x113f   : > { %10578 = vrsqrt.f32 %v5046_v6  ;;  %v5437_v41 = vpop.permute.xlu0 %5436 }
0x1140   : > { %10580 = vrsqrt.f32 %v5045_v7 }
0x1149   : > { %v10579_v34 = vpop.eup %10578 }
0x114a   : > { %v10581_v59 = vpop.eup %10580  ;;  %v5050_v21 = vmul.f32 %v10579_v34, %v5034_v4 }
0x114b   : > { %v5049_v11 = vmul.f32 %v10581_v59, %v5033_v1 }
0x114c   : > { %v5058_v45 = vmul.f32 %v8785_v33, %v5050_v21 }
0x114d   : > { %v5057_v47 = vmul.f32 %v8785_v33, %v5049_v11 }
0x114e   : > { %v11972_v12 = vadd.f32 %v8786_v37, %v5058_v45 }
0x114f   : > { %v11970_v48 = vadd.f32 %v8786_v37, %v5057_v47 }
0x1151   : > { %9759 = vmatprep.mubr.msk.f32.mxu1 %vm199_vm0, %v11970_v48 }
0x1152   : > { %9760 = vmatmul.mubr.msk.f32.vlgmr.msra.gmra.mrb[16].mxu1 %vm199_vm0, %v11972_v12 }
0x1153   : > { %9769 = vmatprep.mubr.msk.f32.mxu1 %vm10731_vm5, %v10730_v22  ;;  %9768 = vmatpush3.xpose.msk.msra.mxu1 %vm292_vm3, %v11984_v57 }
0x1154   : > { %9777 = vmatprep.subr.mxu1 %v10730_v22 }
0x1225   : > { %v9761_v53 = vpop.f32.mrb[16].mxu1 }
0x1226   : > { %v5158_v0 = vadd.f32 %v9761_v53, %v8787_v32  ;;  %v5152_v28 = vpop.f32.mrb[17].mxu1 }
0x1227   : > { %v5153_v54 = vadd.f32 %v8787_v32, %v5152_v28 }
0x1228   : > { %v5964_v18 = vrot.slane %v5158_v0, 6 }
0x1229   : > { %5610 = vrot.lane.b32.xlu0 %v5153_v54, %s10737_s12  ;;  %5434 = vrot.lane.b32.xlu1 %v5153_v54, %s10732_s18  ;;  %v5963_v10 = vrot.slane %v5153_v54, 6 }
0x122a   : > { %9770 = vmatmul.mubr.msk.f32.vlgmr.msra.gmra.mrb[18].mxu1 %vm292_vm3, %v5153_v54 }
0x122b   : > { %v5965_v50 = vsel %vm4313_vm6, %v5963_v10, %v5964_v18  ;;  %9778 = vmatpush3.xpose.msk.msra.mxu1 %vm292_vm3, %v5437_v41  ;;  %9779 = vmatprep.mubr.msk.f32.mxu1 %vm10731_vm5, %v10730_v22 }
0x122c   : > { %9787 = vmatprep.subr.mxu1 %v10730_v22 }
0x122d   : > { %5786 = vrot.lane.b32.xlu0 %v5153_v54, %s10738_s15  ;;  %5612 = vrot.lane.b32.xlu1 %v11984_v57, %s10737_s12 }
0x1231   : > { %5788 = vrot.lane.b32.xlu1 %v11984_v57, %s10738_s15  ;;  %6134 = vrot.lane.b32.xlu0 %v5965_v50, %s10732_s18 }
0x1235   : > { %6136 = vrot.lane.b32.xlu1 %v11982_v61, %s10732_s18  ;;  %6306 = vrot.lane.b32.xlu0 %v5965_v50, %s10737_s12  ;;  %s12686_s18 = sld [smem:[#allocation11_spill]] }
0x1239   : > { %6308 = vrot.lane.b32.xlu1 %v11982_v61, %s10737_s12  ;;  %6478 = vrot.lane.b32.xlu0 %v5965_v50, %s10738_s15 }
0x123d   : > { %6480 = vrot.lane.b32.xlu1 %v11982_v61, %s10738_s15  ;;  %s12689_s15 = sld [smem:[#allocation15_spill]] }
0x1241   : > { %5347 = vrot.lane.b32.xlu1 %v11984_v57, %s10733_s13 }
0x1243   : > { %s6664_s11 = scalar_lea.vmem %s12689_s15, %s10672_s21 }
0x129b   : > { %v5435_v51 = vpop.permute.xlu1 %5434  ;;  %v5611_v15 = vpop.permute.xlu0 %5610 }
0x129c   : > { %9780 = vmatmul.mubr.msk.f32.vlgmr.msra.gmra.mrb[20].mxu1 %vm292_vm3, %v5435_v51 }
0x129d   : > { %9789 = vmatprep.mubr.msk.f32.mxu1 %vm10731_vm5, %v10730_v22 }
0x129f   : > { %v5613_v62 = vpop.permute.xlu1 %5612  ;;  %v5787_v42 = vpop.permute.xlu0 %5786 }
0x12a0   : > { %9788 = vmatpush3.xpose.msk.msra.mxu1 %vm292_vm3, %v5613_v62 }
0x12a1   : > { %9797 = vmatprep.subr.mxu1 %v10730_v22 }
0x12a3   : > { %v5789_v19 = vpop.permute.xlu1 %5788  ;;  %9790 = vmatmul.mubr.msk.f32.vlgmr.msra.gmra.mrb[22].mxu1 %vm292_vm3, %v5611_v15  ;;  %v6135_v60 = vpop.permute.xlu0 %6134 }
0x12a4   : > { %9798 = vmatpush3.xpose.msk.msra.mxu1 %vm292_vm3, %v5789_v19  ;;  %9799 = vmatprep.mubr.msk.f32.mxu1 %vm10731_vm5, %v10730_v22 }
0x12a5   : > { %9807 = vmatprep.subr.mxu1 %v10730_v22 }
0x12a7   : > { %v6137_v27 = vpop.permute.xlu1 %6136  ;;  %9800 = vmatmul.mubr.msk.f32.vlgmr.msra.gmra.mrb[24].mxu1 %vm292_vm3, %v5787_v42  ;;  %v6307_v25 = vpop.permute.xlu0 %6306 }
0x12a8   : > { %9808 = vmatpush3.xpose.msk.msra.mxu1 %vm292_vm3, %v11982_v61  ;;  %9809 = vmatprep.mubr.msk.f32.mxu1 %vm10731_vm5, %v10730_v22 }
0x12a9   : > { %9817 = vmatprep.subr.mxu1 %v10730_v22 }
0x12ab   : > { %v6309_v55 = vpop.permute.xlu1 %6308  ;;  %9810 = vmatmul.mubr.msk.f32.vlgmr.msra.gmra.mrb[26].mxu1 %vm292_vm3, %v5965_v50  ;;  %v6479_v31 = vpop.permute.xlu0 %6478 }
0x12ac   : > { %9818 = vmatpush3.xpose.msk.msra.mxu1 %vm292_vm3, %v6137_v27  ;;  %9819 = vmatprep.mubr.msk.f32.mxu1 %vm10731_vm5, %v10730_v22 }
0x12ad   : > { %9827 = vmatprep.subr.mxu1 %v10730_v22 }
0x12af   : > { %v6481_v24 = vpop.permute.xlu1 %6480  ;;  %9820 = vmatmul.mubr.msk.f32.vlgmr.msra.gmra.mrb[28].mxu1 %vm292_vm3, %v6135_v60 }
0x12b0   : > { %9828 = vmatpush3.xpose.msk.msra.mxu1 %vm292_vm3, %v6309_v55  ;;  %9829 = vmatprep.mubr.msk.f32.mxu1 %vm10731_vm5, %v10730_v22 }
0x12b1   : > { %9837 = vmatprep.subr.mxu1 %v10730_v22 }
0x12b3   : > { %v5348_v58 = vpop.permute.xlu1 %5347  ;;  %9830 = vmatmul.mubr.msk.f32.vlgmr.msra.gmra.mrb[30].mxu1 %vm292_vm3, %v6307_v25 }
0x12b4   : > { %9773 = vmatpush3.msra.mxu0 %v5348_v58  ;;  %9838 = vmatpush3.xpose.msk.msra.mxu1 %vm292_vm3, %v6481_v24 }
0x12b5   : > { %9839 = vmatprep.mubr.msk.f32.mxu1 %vm10731_vm5, %v10730_v22  ;;  %9782 = vmatprep.subr.mxu0 %v10730_v22 }
0x12b7   : > { %9840 = vmatmul.mubr.msk.f32.vlgmr.msra.gmra.mrb[32].mxu1 %vm292_vm3, %v6479_v31 }
0x12b8   : > { %7184 = vmatprep.mubr.f32.mxu1 %v10730_v22 }
0x12fd   : > { %v5331_v56 = vpop.f32.mrb[18].mxu1 }
0x12fe   : > { %v9771_v43 = vpop.f32.mrb[19].mxu1  ;;  %v5336_v4 = vsel %vm5335_vm11, %v5331_v56, -inf }
0x12ff   : > { %5337 = vmax.xlane.f32.xlu1 %v5336_v4 }
0x136f   : > { %v5508_v1 = vpop.f32.mrb[20].mxu1 }
0x1370   : > { %v9781_v9 = vpop.f32.mrb[21].mxu1  ;;  %v5512_v3 = vsel %vm5335_vm11, %v5508_v1, -inf }
0x1371   : > { %5513 = vmax.xlane.f32.xlu0 %v5512_v3 }
0x1376   : > { %v5684_v2 = vpop.f32.mrb[22].mxu1 }
0x1377   : > { %v9791_v44 = vpop.f32.mrb[23].mxu1  ;;  %v5688_v26 = vsel %vm5335_vm11, %v5684_v2, -inf }
0x1378   : > { %5689 = vmax.xlane.f32.xlu0 %v5688_v26 }
0x137a   : > { %v5860_v29 = vpop.f32.mrb[24].mxu1 }
0x137b   : > { %v9801_v36 = vpop.f32.mrb[25].mxu1  ;;  %v5864_v13 = vsel %vm5335_vm11, %v5860_v29, -inf }
0x137c   : > { %5865 = vmax.xlane.f32.xlu1 %v5864_v13 }
0x137e   : > { %v6037_v30 = vpop.f32.mrb[26].mxu1 }
0x137f   : > { %v9811_v63 = vpop.f32.mrb[27].mxu1  ;;  %v6041_v6 = vsel %vm5335_vm11, %v6037_v30, -inf }
0x1380   : > { %6042 = vmax.xlane.f32.xlu0 %v6041_v6 }
0x1382   : > { %v6208_v7 = vpop.f32.mrb[28].mxu1 }
0x1383   : > { %v9821_v34 = vpop.f32.mrb[29].mxu1  ;;  %v6212_v33 = vsel %vm5335_vm11, %v6208_v7, -inf }
0x1384   : > { %6213 = vmax.xlane.f32.xlu1 %v6212_v33 }
0x1386   : > { %v6380_v59 = vpop.f32.mrb[30].mxu1 }
0x1387   : > { %v9831_v21 = vpop.f32.mrb[31].mxu1  ;;  %v6384_v11 = vsel %vm5335_vm11, %v6380_v59, -inf }
0x1388   : > { %6385 = vmax.xlane.f32.xlu0 %v6384_v11 }
0x138a   : > { %v6552_v37 = vpop.f32.mrb[32].mxu1 }
0x138b   : > { %v9841_v45 = vpop.f32.mrb[33].mxu1  ;;  %v6556_v52 = vsel %vm5335_vm11, %v6552_v37, -inf }
0x138c   : > { %v5338_v47 = vpop.xlane.xlu1 %5337 }
0x138d   : > { %v5339_v14 = vsub.f32 %v5331_v56, %v5338_v47 }
0x138f   : > { %v5340_v49 = vmul.f32 1.442695, %v5339_v14 }
0x1391   : > { %10582 = vpow2.f32 %v5340_v49 }
0x1395   : > { %5699 = vrot.lane.b32.xlu1 %v11984_v57, %s10734_s26 }
0x139b   : > { %v10583_v32 = vpop.eup %10582 }
0x139c   : > { %v5342_v53 = vsel %vm5335_vm11, %v10583_v32, 0.0 }
0x139e   : > { %5523 = vrot.lane.b32.xlu0 %v11984_v57, %s10735_s30 }
0x13b9   : > { %6557 = vmax.xlane.f32.xlu1 %v6556_v52 }
0x13bd   : > { %5343 = vadd.xlane.f32.xlu0 %v5342_v53 }
0x13ca   : > { %5875 = vrot.lane.b32.xlu1 %v11984_v57, %s10736_s6 }
0x13fe   : > { %v5514_v0 = vpop.xlane.xlu0 %5513 }
0x13ff   : > { %v5515_v28 = vsub.f32 %v5508_v1, %v5514_v0 }
0x1401   : > { %v5516_v54 = vmul.f32 1.442695, %v5515_v28 }
0x1403   : > { %10584 = vpow2.f32 %v5516_v54 }
0x1405   : > { %v5690_v18 = vpop.xlane.xlu0 %5689 }
0x1406   : > { %v5691_v41 = vsub.f32 %v5684_v2, %v5690_v18 }
0x1408   : > { %v5692_v10 = vmul.f32 1.442695, %v5691_v41 }
0x1409   : > { %v5866_v57 = vpop.xlane.xlu1 %5865 }
0x140a   : > { %10586 = vpow2.f32 %v5692_v10  ;;  %v5867_v19 = vsub.f32 %v5860_v29, %v5866_v57 }
0x140c   : > { %v5868_v27 = vmul.f32 1.442695, %v5867_v19 }
0x140d   : > { %v10585_v50 = vpop.eup %10584  ;;  %v6043_v60 = vpop.xlane.xlu0 %6042 }
0x140e   : > { %v5518_v51 = vsel %vm5335_vm11, %v10585_v50, 0.0  ;;  %v6044_v24 = vsub.f32 %v6037_v30, %v6043_v60  ;;  %10588 = vpow2.f32 %v5868_v27 }
0x140f   : > { %5519 = vadd.xlane.f32.xlu1 %v5518_v51 }
0x1410   : > { %v6045_v31 = vmul.f32 1.442695, %v6044_v24 }
0x1411   : > { %v6214_v42 = vpop.xlane.xlu1 %6213 }
0x1412   : > { %v6215_v55 = vsub.f32 %v6208_v7, %v6214_v42 }
0x1414   : > { %v12066_v15 = vpop.eup %10586  ;;  %v6216_v25 = vmul.f32 1.442695, %v6215_v55 }
0x1415   : > { %v5694_v62 = vsel %vm5335_vm11, %v12066_v15, 0.0  ;;  %v6386_v58 = vpop.xlane.xlu0 %6385  ;;  %v5700_v1 = vpop.permute.xlu1 %5699 }
0x1416   : > { %5695 = vadd.xlane.f32.xlu0 %v5694_v62  ;;  %v6387_v56 = vsub.f32 %v6380_v59, %v6386_v58  ;;  %10590 = vpow2.f32 %v6216_v25 }
0x1417   : > { %10592 = vpow2.f32 %v6045_v31 }
0x1418   : > { %v6388_v43 = vmul.f32 1.442695, %v6387_v56  ;;  %v10589_v4 = vpop.eup %10588 }
0x1419   : > { %v5870_v9 = vsel %vm5335_vm11, %v10589_v4, 0.0  ;;  %v5524_v2 = vpop.permute.xlu0 %5523 }
0x141a   : > { %10594 = vpow2.f32 %v6388_v43 }
0x1420   : > { %6052 = vrot.lane.b32.xlu1 %v11982_v61, %s10733_s13  ;;  %v12075_v3 = vpop.eup %10590  ;;  %s5255_s13 = scalar_lea.vmem %s12686_s18, %s11740_s3 }
0x1421   : > { %v10593_v26 = vpop.eup %10592  ;;  %v6218_v36 = vsel %vm5335_vm11, %v12075_v3, 0.0 }
0x1422   : > { %v6047_v63 = vsel %vm5335_vm11, %v10593_v26, 0.0 }
0x1424   : > { %v12080_v6 = vpop.eup %10594 }
0x1425   : > { %v6390_v7 = vsel %vm5335_vm11, %v12080_v6, 0.0 }
0x142c   : > { %6223 = vrot.lane.b32.xlu0 %v11982_v61, %s10735_s30  ;;  %s12688_s30 = sld [smem:[#allocation19_spill]] }
0x1444   : > { %5871 = vadd.xlane.f32.xlu1 %v5870_v9 }
0x1446   : > { %v6558_v44 = vpop.xlane.xlu1 %6557 }
0x1447   : > { %v6559_v29 = vsub.f32 %v6552_v37, %v6558_v44 }
0x1448   : > { %6219 = vadd.xlane.f32.xlu1 %v6218_v36 }
0x1449   : > { %v6560_v13 = vmul.f32 1.442695, %v6559_v29 }
0x144a   : > { %v5344_v30 = vpop.xlane.xlu0 %5343  ;;  %v5876_v11 = vpop.permute.xlu1 %5875 }
0x144b   : > { %10596 = vpow2.f32 %v6560_v13  ;;  %6048 = vadd.xlane.f32.xlu0 %v6047_v63 }
0x144c   : > { %10598 = vrcp.f32 %v5344_v30 }
0x144f   : > { %6391 = vadd.xlane.f32.xlu0 %v6390_v7 }
0x1455   : > { %v12084_v34 = vpop.eup %10596 }
0x1456   : > { %v10599_v33 = vpop.eup %10598  ;;  %v6562_v59 = vsel %vm5335_vm11, %v12084_v34, 0.0 }
0x1457   : > { %6563 = vadd.xlane.f32.xlu0 %v6562_v59  ;;  %v5346_v21 = vmul.f32 %v10599_v33, %v10583_v32 }
0x1459   : > { %9775 = vmatmul.mubr.msk.f32.vlgmr.msra.gmra.mrb[20].mxu0 %vm367_vm4, %v5346_v21  ;;  %6395 = vrot.lane.b32.xlu1 %v11982_v61, %s10734_s26  ;;  %s12687_s26 = sld [smem:[#allocation12_spill]] }
0x145a   : > { %9783 = vmatpush3.msra.mxu0 %v5524_v2  ;;  %9784 = vmatprep.mubr.msk.f32.mxu0 %vm10731_vm5, %v10730_v22 }
0x145b   : > { %9792 = vmatprep.subr.mxu0 %v10730_v22 }
0x145f   : > { %s5257_s3 = scalar_lea.vmem %s12687_s26, %s10672_s21 }
0x146d   : > { %6567 = vrot.lane.b32.xlu0 %v11982_v61, %s10736_s6  ;;  %s8867_s6 = sshll.u32 %s10672_s21, 6  ;;  %s3499_s21 = sadd.s32 1, %s10672_s21  }
0x146e   : > { %s12142_s12 = scalar_lea.vmem %s12688_s30, %s8867_s6  ;;  %p3496_p1 = scmp.ge.s32.totalorder %s3499_s21, 6  }
0x146f   :  { %s12698_s14 = sld [smem:[#allocation23_spill]] (%p3496_p1) }
0x149c   : > { %v5520_v37 = vpop.xlane.xlu1 %5519 }
0x149d   : > { %10600 = vrcp.f32 %v5520_v37 }
0x14a0   : > { %v6053_v61 = vpop.permute.xlu1 %6052 }
0x14a3   : > { %v5696_v45 = vpop.xlane.xlu0 %5695 }
0x14a4   : > { %10602 = vrcp.f32 %v5696_v45 }
0x14a7   : > { %v10601_v47 = vpop.eup %10600  ;;  %v6224_v53 = vpop.permute.xlu0 %6223 }
0x14a8   : > { %v5522_v14 = vmul.f32 %v10601_v47, %v10585_v50 }
0x14aa   : > { %9785 = vmatmul.mubr.msk.f32.vlgmr.msra.gmra.mrb[22].mxu0 %vm367_vm4, %v5522_v14 }
0x14ab   : > { %9793 = vmatpush3.msra.mxu0 %v5700_v1  ;;  %9794 = vmatprep.mubr.msk.f32.mxu0 %vm10731_vm5, %v10730_v22 }
0x14ac   : > { %9802 = vmatprep.subr.mxu0 %v10730_v22 }
0x14ae   : > { %v10603_v49 = vpop.eup %10602 }
0x14af   : > { %v5698_v52 = vmul.f32 %v10603_v49, %v12066_v15 }
0x14b1   : > { %9795 = vmatmul.mubr.msk.f32.vlgmr.msra.gmra.mrb[24].mxu0 %vm367_vm4, %v5698_v52 }
0x14b2   : > { %9803 = vmatpush3.msra.mxu0 %v5876_v11  ;;  %9804 = vmatprep.mubr.msk.f32.mxu0 %vm10731_vm5, %v10730_v22 }
0x14b3   : > { %9812 = vmatprep.subr.mxu0 %v10730_v22 }
0x14d1   : > { %v5872_v32 = vpop.xlane.xlu1 %5871 }
0x14d2   : > { %10604 = vrcp.f32 %v5872_v32 }
0x14d5   : > { %v6220_v0 = vpop.xlane.xlu1 %6219 }
0x14d8   : > { %v6049_v28 = vpop.xlane.xlu0 %6048 }
0x14d9   : > { %10606 = vrcp.f32 %v6049_v28  ;;  %v6396_v19 = vpop.permute.xlu1 %6395 }
0x14da   : > { %10608 = vrcp.f32 %v6220_v0 }
0x14dc   : > { %v10605_v54 = vpop.eup %10604  ;;  %v6392_v18 = vpop.xlane.xlu0 %6391 }
0x14dd   : > { %v5874_v41 = vmul.f32 %v10605_v54, %v10589_v4  ;;  %10610 = vrcp.f32 %v6392_v18 }
0x14df   : > { %9805 = vmatmul.mubr.msk.f32.vlgmr.msra.gmra.mrb[26].mxu0 %vm367_vm4, %v5874_v41 }
0x14e0   : > { %9813 = vmatpush3.msra.mxu0 %v6053_v61  ;;  %9814 = vmatprep.mubr.msk.f32.mxu0 %vm10731_vm5, %v10730_v22 }
0x14e1   : > { %9822 = vmatprep.subr.mxu0 %v10730_v22 }
0x14e3   : > { %v10607_v10 = vpop.eup %10606 }
0x14e4   : > { %v6564_v50 = vpop.xlane.xlu0 %6563  ;;  %v6051_v51 = vmul.f32 %v10607_v10, %v10593_v26  ;;  %v10609_v15 = vpop.eup %10608 }
0x14e5   : > { %10612 = vrcp.f32 %v6564_v50  ;;  %v6222_v62 = vmul.f32 %v10609_v15, %v12075_v3  ;;  %v8819_v15 = vld [vmem:[%s5257_s3] ss:$0 sm:$0xff] }
0x14e6   : > { %9815 = vmatmul.mubr.msk.f32.vlgmr.msra.gmra.mrb[28].mxu0 %vm367_vm4, %v6051_v51 }
0x14e7   : > { %9823 = vmatpush3.msra.mxu0 %v6224_v53  ;;  %9824 = vmatprep.mubr.msk.f32.mxu0 %vm10731_vm5, %v10730_v22  ;;  %v10611_v57 = vpop.eup %10610 }
0x14e8   : > { %9832 = vmatprep.subr.mxu0 %v10730_v22  ;;  %v6394_v42 = vmul.f32 %v10611_v57, %v12080_v6  ;;  %v6568_v27 = vpop.permute.xlu0 %6567  ;;  %v5256_v6 = vld [vmem:[%s5255_s13] sm:$0xf] }
0x14e9   : > { %v5607_v33 = vrot.slane %v5256_v6, %v11165_v38  ;;  %v5783_v59 = vrot.slane %v5256_v6, %v11171_v40  ;;  %v5432_v21 = vrot.slane %v5256_v6, %v11168_v39  ;;  %v5959_v52 = vrot.slane %v5256_v6, %v11177_v46 }
0x14ea   : > { %9825 = vmatmul.mubr.msk.f32.vlgmr.msra.gmra.mrb[30].mxu0 %vm367_vm4, %v6222_v62 }
0x14eb   : > { %9833 = vmatpush3.msra.mxu0 %v6396_v19  ;;  %9834 = vmatprep.mubr.msk.f32.mxu0 %vm10731_vm5, %v10730_v22 }
0x14ec   : > { %9842 = vmatprep.subr.mxu0 %v10730_v22 }
0x14ee   : > { %9835 = vmatmul.mubr.msk.f32.vlgmr.msra.gmra.mrb[32].mxu0 %vm367_vm4, %v6394_v42 }
0x14ef   : > { %v10613_v60 = vpop.eup %10612  ;;  %9843 = vmatpush3.msra.mxu0 %v6568_v27  ;;  %9844 = vmatprep.mubr.msk.f32.mxu0 %vm10731_vm5, %v10730_v22 }
0x14f0   : > { %v6566_v55 = vmul.f32 %v10613_v60, %v12084_v34 }
0x14f2   : > { %9845 = vmatmul.mubr.msk.f32.vlgmr.msra.gmra.mrb[34].mxu0 %vm367_vm4, %v6566_v55 }
0x14f3   : > { %7261 = vmatprep.mubr.f32.mxu0 %v10730_v22 }
0x152c   : > { %v5420_v24 = vpop.f32.mrb[20].mxu0 }
0x152d   : > { %v9776_v25 = vpop.f32.mrb[21].mxu0  ;;  %5426 = vperm.xlu1 %10536, %v5420_v24  }
0x157d   : > { %v5595_v58 = vpop.f32.mrb[22].mxu0 }
0x157e   : > { %5601 = vperm.xlu0 %10537, %v5595_v58   ;;  %v9786_v31 = vpop.f32.mrb[23].mxu0 }
0x1584   : > { %v5771_v56 = vpop.f32.mrb[24].mxu0 }
0x1585   : > { %v9796_v43 = vpop.f32.mrb[25].mxu0 }
0x15ac   : > { %v5427_v30 = vpop.permute.xlu1 %5426 }
0x15ad   : > { %v5433_v61 = vmul.f32 %v5432_v21, %v5427_v30 }
0x15b2   : > { %v5947_v4 = vpop.f32.mrb[26].mxu0 }
0x15b3   : > { %v9806_v1 = vpop.f32.mrb[27].mxu0 }
0x15b9   : > { %v6124_v9 = vpop.f32.mrb[28].mxu0 }
0x15ba   : > { %6130 = vperm.xlu1 %10536, %v6124_v9   ;;  %v9816_v3 = vpop.f32.mrb[29].mxu0 }
0x15bd   : > { %v6295_v2 = vpop.f32.mrb[30].mxu0 }
0x15be   : > { %6301 = vperm.xlu0 %10537, %v6295_v2   ;;  %v9826_v44 = vpop.f32.mrb[31].mxu0  ;;  %v6713_v2 = vld [vmem:[%s12142_s12] sm:$0xff] }
0x15bf   : > { %v6714_v44 = vld [vmem:[%s12142_s12 + $0x8] sm:$0xff] }
0x15c1   : > { %v6467_v26 = vpop.f32.mrb[32].mxu0 }
0x15c2   : > { %5777 = vperm.xlu0 %10537, %v5771_v56   ;;  %6473 = vperm.xlu1 %10536, %v6467_v26   ;;  %v9836_v29 = vpop.f32.mrb[33].mxu0  ;;  %v7074_v26 = vcombine.high %v6713_v2, %v6713_v2 }
0x15c3   : > { %v7075_v29 = vcombine.high %v6714_v44, %v6714_v44 }
0x15c4   : > { %8825 = vmatprep.subr.msk.mxu1 %vm206_vm1, %v7074_v26  ;;  %v6746_v26 = vld [vmem:[%s12188_s9 + $0xa0] sm:$0xff] }
0x15c5   : > { %v6639_v36 = vpop.f32.mrb[34].mxu0  ;;  %8829 = vmatprep.subr.msk.mxu0 %vm206_vm1, %v7075_v29  ;;  %8826 = vmatpush1.msk.msra.mxu1 %vm206_vm1, %v6713_v2  ;;  %v6760_v2 = vld [vmem:[%s12188_s9 + $0x110] sm:$0xff]  ;;  %v6747_v29 = vld [vmem:[%s12188_s9 + $0xa8] sm:$0xff] }
0x15c6   : > { %5953 = vperm.xlu0 %10537, %v5947_v4   ;;  %6645 = vperm.xlu1 %10536, %v6639_v36   ;;  %v9846_v13 = vpop.f32.mrb[35].mxu0  ;;  %v6715_v36 = vld [vmem:[%s12142_s12 + $0x10] sm:$0xff] }
0x15c7   : > { %8830 = vmatpush1.msk.msra.mxu0 %vm206_vm1, %v6714_v44  ;;  %v6716_v13 = vld [vmem:[%s12142_s12 + $0x18] sm:$0xff]  ;;  %v7076_v30 = vcombine.high %v6715_v36, %v6715_v36 }
0x15c8   : > { %v6761_v44 = vld [vmem:[%s12188_s9 + $0x118] sm:$0xff] }
0x15c9   : > { %8833 = vmatprep.subr.msk.mxu1 %vm206_vm1, %v7076_v30 }
0x15fd   : > { %v5602_v63 = vpop.permute.xlu0 %5601 }
0x15fe   : > { %v5608_v47 = vmul.f32 %v5607_v33, %v5602_v63  ;;  %v7077_v63 = vcombine.high %v6716_v13, %v6716_v13 }
0x1600   : > { %v5609_v54 = vadd.f32 %v5608_v47, %v5433_v61  ;;  %8837 = vmatprep.subr.msk.mxu0 %vm206_vm1, %v7077_v63  ;;  %v6717_v61 = vld [vmem:[%s12142_s12 + $0x20] sm:$0xff]  ;;  %v10146_v63 = vpack.c.bf16 %v6761_v44, %v6760_v2  ;;  %v6755_v2 = vld [vmem:[%s12188_s9 + $0xe8] sm:$0xff] }
0x1601   : > { %v6786_v44 = vld [vmem:[%s12188_s9 + $0x1e0] sm:$0xff] }
0x1639   : > { %v6131_v7 = vpop.permute.xlu1 %6130 }
0x163a   : > { %v6133_v14 = vmul.f32 %v6131_v7, %v5432_v21 }
0x163d   : > { %v6302_v34 = vpop.permute.xlu0 %6301 }
0x163e   : > { %v6304_v11 = vmul.f32 %v6302_v34, %v5607_v33 }
0x1640   : > { %v6305_v32 = vadd.f32 %v6304_v11, %v6133_v14 }
0x1641   : > { %v5778_v37 = vpop.permute.xlu0 %5777  ;;  %v6474_v45 = vpop.permute.xlu1 %6473 }
0x1642   : > { %v6476_v49 = vmul.f32 %v6474_v45, %v5783_v59  ;;  %v5784_v53 = vmul.f32 %v5783_v59, %v5778_v37  ;;  %v8820_v45 = vld [vmem:[%s6664_s11] ss:$0 sm:$0xff] }
0x1644   : > { %v6477_v18 = vadd.f32 %v6476_v49, %v6305_v32  ;;  %v5785_v50 = vadd.f32 %v5784_v53, %v5609_v54  ;;  %v8821_v49 = vld [vmem:[%s6666_s5] ss:$0 sm:$0xff]  ;;  %v6718_v32 = vld [vmem:[%s12142_s12 + $0x28] sm:$0xff] }
0x1645   : > { %v5954_v0 = vpop.permute.xlu0 %5953  ;;  %v6646_v28 = vpop.permute.xlu1 %6645  ;;  %v7079_v54 = vcombine.high %v6718_v32, %v6718_v32 }
0x1646   : > { %v5960_v41 = vmul.f32 %v5959_v52, %v5954_v0  ;;  %v6648_v10 = vmul.f32 %v6646_v28, %v5959_v52  ;;  %v7078_v28 = vcombine.high %v6717_v61, %v6717_v61 }
0x1648   : > { %v6649_v51 = vadd.f32 %v6648_v10, %v6477_v18  ;;  %v5961_v62 = vadd.f32 %v5960_v41, %v5785_v50  ;;  %v6719_v41 = vld [vmem:[%s12142_s12 + $0x30] sm:$0xff]  ;;  %v6720_v10 = vld [vmem:[%s12142_s12 + $0x38] sm:$0xff] }
0x1649   : > { %v7080_v50 = vcombine.high %v6719_v41, %v6719_v41 }
0x164a   : > { %v6651_v57 = vrot.slane %v6649_v51, 2  ;;  %v7081_v51 = vcombine.high %v6720_v10, %v6720_v10 }
0x164c   : > { %v6661_v19 = vadd.f32 %v8819_v15, %v6651_v57  ;;  %v6653_v42 = vsel %vm3698_vm7, %v5961_v62, %v6651_v57  ;;  %v6743_v62 = vld [vmem:[%s12188_s9 + $0x88] sm:$0xff]  ;;  %v6774_v57 = vld [vmem:[%s12188_s9 + $0x180] sm:$0xff] }
0x164d   : > { %v6660_v27 = vadd.f32 %v8819_v15, %v6653_v42  ;;  %v6742_v15 = vld [vmem:[%s12188_s9 + $0x80] sm:$0xff] }
0x164e   : > { %v6663_v60 = vadd.f32 %v6661_v19, %v11972_v12  ;;  %v6775_v19 = vld [vmem:[%s12188_s9 + $0x188] sm:$0xff]  ;;  %v10108_v42 = vpack.c.bf16 %v6743_v62, %v6742_v15  ;;  %v6734_v62 = vld [vmem:[%s12188_s9 + $0x40] sm:$0xff] }
0x164f   : > { %v6662_v55 = vadd.f32 %v6660_v27, %v11970_v48  ;;  %v10140_v27 = vpack.c.bf16 %v6775_v19, %v6774_v57  ;;  %v6735_v57 = vld [vmem:[%s12188_s9 + $0x48] sm:$0xff] }
0x1650   : > { %v6671_v24 = vsel %vm5027_vm10, %v6663_v60, 0.0 }
0x1651   : > { %6672 = vadd.xlane.f32.xlu0 %v6671_v24  ;;  %v6668_v25 = vsel %vm199_vm0, %v6662_v55, 0.0  ;;  %v6758_v24 = vld [vmem:[%s12188_s9 + $0x100] sm:$0xff] }
0x1652   : > { %6669 = vadd.xlane.f32.xlu1 %v6668_v25  ;;  %v6759_v25 = vld [vmem:[%s12188_s9 + $0x108] sm:$0xff] }
0x16de   : > { %v6673_v58 = vpop.xlane.xlu0 %6672 }
0x16df   : > { %v6675_v31 = vmul.f32 0.25, %v6673_v58  ;;  %v6670_v56 = vpop.xlane.xlu1 %6669  ;;  %v6744_v58 = vld [vmem:[%s12188_s9 + $0x90] sm:$0xff] }
0x16e0   : > { %v6674_v43 = vmul.f32 0.25, %v6670_v56  ;;  %v6776_v56 = vld [vmem:[%s12188_s9 + $0x190] sm:$0xff] }
0x16e1   : > { %v6677_v4 = vsub.f32 %v6663_v60, %v6675_v31  ;;  %v6726_v60 = vld [vmem:[%s12188_s9] sm:$0xff]  ;;  %v6745_v31 = vld [vmem:[%s12188_s9 + $0x98] sm:$0xff] }
0x16e2   : > { %v6676_v1 = vsub.f32 %v6662_v55, %v6674_v43  ;;  %v6727_v55 = vld [vmem:[%s12188_s9 + $0x8] sm:$0xff]  ;;  %v6777_v43 = vld [vmem:[%s12188_s9 + $0x198] sm:$0xff] }
0x16e3   : > { %v6679_v9 = vmul.f32 %v6677_v4, %v6677_v4 }
0x16e4   : > { %v6678_v3 = vmul.f32 %v6676_v1, %v6676_v1 }
0x16e5   : > { %v6683_v12 = vsel %vm5027_vm10, %v6679_v9, 0.0  ;;  %v6728_v9 = vld [vmem:[%s12188_s9 + $0x10] sm:$0xff] }
0x16e6   : > { %6684 = vadd.xlane.f32.xlu1 %v6683_v12  ;;  %v6680_v48 = vsel %vm199_vm0, %v6678_v3, 0.0  ;;  %v6729_v3 = vld [vmem:[%s12188_s9 + $0x18] sm:$0xff]  ;;  %v10112_v12 = vpack.c.bf16 %v6745_v31, %v6744_v58  ;;  %v10126_v31 = vpack.c.bf16 %v6735_v57, %v6734_v62 }
0x16e7   : > { %6681 = vadd.xlane.f32.xlu0 %v6680_v48  ;;  %v10144_v48 = vpack.c.bf16 %v6777_v43, %v6776_v56  ;;  %v10114_v30 = vpack.c.bf16 %v6729_v3, %v6728_v9  ;;  %v6785_v58 = vld [vmem:[%s12188_s9 + $0x1d8] sm:$0xff]  ;;  %v6736_v43 = vld [vmem:[%s12188_s9 + $0x50] sm:$0xff] }
0x16e8   : > { %v6768_v3 = vld [vmem:[%s12188_s9 + $0x150] sm:$0xff] }
0x1773   : > { %v6685_v6 = vpop.xlane.xlu1 %6684 }
0x1774   : > { %v6687_v7 = vmul.f32 0.25, %v6685_v6  ;;  %v6682_v34 = vpop.xlane.xlu0 %6681  ;;  %v6730_v6 = vld [vmem:[%s12188_s9 + $0x20] sm:$0xff] }
0x1775   : > { %v6686_v33 = vmul.f32 0.25, %v6682_v34  ;;  %v10116_v34 = vpack.c.bf16 %v6747_v29, %v6746_v26  ;;  %v6787_v26 = vld [vmem:[%s12188_s9 + $0x1e8] sm:$0xff] }
0x1776   : > { %v6689_v59 = vadd.f32 1e-05, %v6687_v7  ;;  %v6731_v7 = vld [vmem:[%s12188_s9 + $0x28] sm:$0xff] }
0x1777   : > { %v6688_v21 = vadd.f32 1e-05, %v6686_v33 }
0x1778   : > { %10614 = vrsqrt.f32 %v6689_v59  ;;  %v6762_v59 = vld [vmem:[%s12188_s9 + $0x120] sm:$0xff] }
0x1779   : > { %10616 = vrsqrt.f32 %v6688_v21  ;;  %v6763_v21 = vld [vmem:[%s12188_s9 + $0x128] sm:$0xff] }
0x1782   : > { %v10615_v11 = vpop.eup %10614 }
0x1783   : > { %v10617_v37 = vpop.eup %10616  ;;  %v6693_v47 = vmul.f32 %v10615_v11, %v6677_v4  ;;  %v10110_v4 = vpack.c.bf16 %v6727_v55, %v6726_v60  ;;  %v6748_v11 = vld [vmem:[%s12188_s9 + $0xb0] sm:$0xff]  ;;  %v6767_v60 = vld [vmem:[%s12188_s9 + $0x148] sm:$0xff] }
0x1784   : > { %v6692_v14 = vmul.f32 %v10617_v37, %v6676_v1  ;;  %v10142_v1 = vpack.c.bf16 %v6759_v25, %v6758_v24  ;;  %v6780_v37 = vld [vmem:[%s12188_s9 + $0x1b0] sm:$0xff]  ;;  %v6753_v24 = vld [vmem:[%s12188_s9 + $0xd8] sm:$0xff] }
0x1785   : > { %v6701_v53 = vmul.f32 %v8820_v45, %v6693_v47  ;;  %v10118_v47 = vpack.c.bf16 %v6731_v7, %v6730_v6  ;;  %v6752_v55 = vld [vmem:[%s12188_s9 + $0xd0] sm:$0xff]  ;;  %v6739_v6 = vld [vmem:[%s12188_s9 + $0x68] sm:$0xff]  ;;  %v6770_v7 = vld [vmem:[%s12188_s9 + $0x160] sm:$0xff] }
0x1786   : > { %v6700_v52 = vmul.f32 %v8820_v45, %v6692_v14  ;;  %v6781_v45 = vld [vmem:[%s12188_s9 + $0x1b8] sm:$0xff]  ;;  %v10150_v14 = vpack.c.bf16 %v6763_v21, %v6762_v59  ;;  %v6784_v25 = vld [vmem:[%s12188_s9 + $0x1d0] sm:$0xff] }
0x1787   : > { %v12168_v18 = vadd.f32 %v8821_v49, %v6701_v53  ;;  %v6764_v53 = vld [vmem:[%s12188_s9 + $0x130] sm:$0xff]  ;;  %v10160_v9 = vpack.c.bf16 %v6785_v58, %v6784_v25  ;;  %v6822_v25 = vld [vmem:[%s12188_s9 + $0x300] sm:$0xff]  ;;  %v6823_v58 = vld [vmem:[%s12188_s9 + $0x308] sm:$0xff] }
0x1788   : > { %v12160_v0 = vadd.f32 %v8821_v49, %v6700_v52  ;;  %v6732_v49 = vld [vmem:[%s12188_s9 + $0x30] sm:$0xff]  ;;  %v6733_v52 = vld [vmem:[%s12188_s9 + $0x38] sm:$0xff] }
0x1789   : > { %v6756_v21 = vld [vmem:[%s12188_s9 + $0xf0] sm:$0xff] }
0x178a   : > { %8827 = vmatmul.mubr.msk.f32.vlgmr.msra.gmra.mrb[34].mxu1 %vm199_vm0, %v12160_v0  ;;  %8831 = vmatmul.mubr.msk.f32.vlgmr.msra.gmra.mrb[36].mxu0 %vm199_vm0, %v12160_v0 }
0x178b   : > { %7190 = vmatprep.mubr.f32.mxu1 %v10730_v22  ;;  %7267 = vmatprep.mubr.f32.mxu0 %v10730_v22 }
0x178c   : > { %8834 = vmatpush1.msk.msra.mxu1 %vm206_vm1, %v6715_v36  ;;  %8838 = vmatpush1.msk.msra.mxu0 %vm206_vm1, %v6716_v13  ;;  %v6778_v36 = vld [vmem:[%s12188_s9 + $0x1a0] sm:$0xff]  ;;  %v6779_v13 = vld [vmem:[%s12188_s9 + $0x1a8] sm:$0xff] }
0x178d   : > { %8841 = vmatprep.subr.msk.mxu1 %vm206_vm1, %v7078_v28  ;;  %8845 = vmatprep.subr.msk.mxu0 %vm206_vm1, %v7079_v54  ;;  %v10148_v33 = vpack.c.bf16 %v6779_v13, %v6778_v36  ;;  %v6765_v28 = vld [vmem:[%s12188_s9 + $0x138] sm:$0xff]  ;;  %v6750_v54 = vld [vmem:[%s12188_s9 + $0xc0] sm:$0xff] }
0x178e   : > { %8828 = vmatmul.mubr.msk.f32.gmra.mrb[36].mxu1 %vm199_vm0, %v12168_v18  ;;  %8832 = vmatmul.mubr.msk.f32.gmra.mrb[38].mxu0 %vm199_vm0, %v12168_v18  ;;  %v10154_v15 = vpack.c.bf16 %v6765_v28, %v6764_v53  ;;  %v6738_v13 = vld [vmem:[%s12188_s9 + $0x60] sm:$0xff] }
0x178f   : > { %7338 = vmatprep.mubr.f32.mxu1 %v10730_v22  ;;  %7415 = vmatprep.mubr.f32.mxu0 %v10730_v22  ;;  %v6806_v28 = vld [vmem:[%s12188_s9 + $0x280] sm:$0xff] }
0x1792   : > { %8835 = vmatmul.mubr.msk.f32.vlgmr.msra.gmra.mrb[38].mxu1 %vm199_vm0, %v12160_v0  ;;  %8839 = vmatmul.mubr.msk.f32.vlgmr.msra.gmra.mrb[40].mxu0 %vm199_vm0, %v12160_v0 }
0x1793   : > { %7344 = vmatprep.mubr.f32.mxu1 %v10730_v22  ;;  %7421 = vmatprep.mubr.f32.mxu0 %v10730_v22 }
0x1794   : > { %8842 = vmatpush1.msk.msra.mxu1 %vm206_vm1, %v6717_v61  ;;  %8846 = vmatpush1.msk.msra.mxu0 %vm206_vm1, %v6718_v32  ;;  %v10152_v32 = vpack.c.bf16 %v6781_v45, %v6780_v37  ;;  %v6789_v45 = vld [vmem:[%s12188_s9 + $0x1f8] sm:$0xff] }
0x1795   : > { %8849 = vmatprep.subr.msk.mxu1 %vm206_vm1, %v7080_v50  ;;  %8853 = vmatprep.subr.msk.mxu0 %vm206_vm1, %v7081_v51  ;;  %v6783_v50 = vld [vmem:[%s12188_s9 + $0x1c8] sm:$0xff]  ;;  %v10122_v51 = vpack.c.bf16 %v6733_v52, %v6732_v49 }
0x1796   : > { %8836 = vmatmul.mubr.msk.f32.gmra.mrb[40].mxu1 %vm199_vm0, %v12168_v18  ;;  %8840 = vmatmul.mubr.msk.f32.gmra.mrb[42].mxu0 %vm199_vm0, %v12168_v18 }
0x1797   : > { %7492 = vmatprep.mubr.f32.mxu1 %v10730_v22  ;;  %7569 = vmatprep.mubr.f32.mxu0 %v10730_v22 }
0x179a   : > { %8843 = vmatmul.mubr.msk.f32.vlgmr.msra.gmra.mrb[42].mxu1 %vm199_vm0, %v12160_v0  ;;  %8847 = vmatmul.mubr.msk.f32.vlgmr.msra.gmra.mrb[44].mxu0 %vm199_vm0, %v12160_v0 }
0x179b   : > { %7498 = vmatprep.mubr.f32.mxu1 %v10730_v22  ;;  %7575 = vmatprep.mubr.f32.mxu0 %v10730_v22 }
0x179c   : > { %8850 = vmatpush1.msk.msra.mxu1 %vm206_vm1, %v6719_v41  ;;  %8854 = vmatpush1.msk.msra.mxu0 %vm206_vm1, %v6720_v10  ;;  %v6751_v41 = vld [vmem:[%s12188_s9 + $0xc8] sm:$0xff]  ;;  %v6782_v10 = vld [vmem:[%s12188_s9 + $0x1c0] sm:$0xff] }
0x179d   : > { %10109 = vmatprep.subr.bf16.mxu1 %v10108_v42  ;;  %10141 = vmatprep.subr.bf16.mxu0 %v10140_v27  ;;  %v10124_v19 = vpack.c.bf16 %v6751_v41, %v6750_v54  ;;  %v10156_v42 = vpack.c.bf16 %v6783_v50, %v6782_v10  ;;  %v6766_v27 = vld [vmem:[%s12188_s9 + $0x140] sm:$0xff]  ;;  %v6807_v54 = vld [vmem:[%s12188_s9 + $0x288] sm:$0xff] }
0x179e   : > { %8844 = vmatmul.mubr.msk.f32.gmra.mrb[44].mxu1 %vm199_vm0, %v12168_v18  ;;  %8848 = vmatmul.mubr.msk.f32.gmra.mrb[46].mxu0 %vm199_vm0, %v12168_v18  ;;  %v10158_v56 = vpack.c.bf16 %v6767_v60, %v6766_v27  ;;  %v6838_v41 = vld [vmem:[%s12188_s9 + $0x380] sm:$0xff]  ;;  %v10172_v10 = vpack.c.bf16 %v6807_v54, %v6806_v28  ;;  %v6839_v50 = vld [vmem:[%s12188_s9 + $0x388] sm:$0xff] }
0x179f   : > { %7646 = vmatprep.mubr.f32.mxu1 %v10730_v22  ;;  %7723 = vmatprep.mubr.f32.mxu0 %v10730_v22  ;;  %v6790_v27 = vld [vmem:[%s12188_s9 + $0x200] sm:$0xff]  ;;  %v6791_v60 = vld [vmem:[%s12188_s9 + $0x208] sm:$0xff] }
0x17a0   : > { %v6842_v28 = vld [vmem:[%s12188_s9 + $0x3a0] sm:$0xff]  ;;  %v6843_v54 = vld [vmem:[%s12188_s9 + $0x3a8] sm:$0xff] }
0x17a2   : > { %8851 = vmatmul.mubr.msk.f32.vlgmr.msra.gmra.mrb[46].mxu1 %vm199_vm0, %v12160_v0  ;;  %8855 = vmatmul.mubr.msk.f32.vlgmr.msra.gmra.mrb[48].mxu0 %vm199_vm0, %v12160_v0 }
0x17a3   : > { %7652 = vmatprep.mubr.f32.mxu1 %v10730_v22  ;;  %7729 = vmatprep.mubr.f32.mxu0 %v10730_v22  ;;  %v6749_v22 = vld [vmem:[%s12188_s9 + $0xb8] sm:$0xff] }
0x17a4   : > { %10111 = vmatpush3.bf16.msra.mxu1 %v10110_v4  ;;  %10143 = vmatpush3.bf16.msra.mxu0 %v10142_v1  ;;  %v10120_v61 = vpack.c.bf16 %v6749_v22, %v6748_v11  ;;  %v6737_v4 = vld [vmem:[%s12188_s9 + $0x58] sm:$0xff]  ;;  %v10128_v1 = vpack.c.bf16 %v6753_v24, %v6752_v55  ;;  %v6788_v22 = vld [vmem:[%s12188_s9 + $0x1f0] sm:$0xff] }
0x17a5   : > { %10113 = vmatprep.subr.bf16.mxu1 %v10112_v12  ;;  %10145 = vmatprep.subr.bf16.mxu0 %v10144_v48  ;;  %v6769_v12 = vld [vmem:[%s12188_s9 + $0x158] sm:$0xff]  ;;  %v6754_v48 = vld [vmem:[%s12188_s9 + $0xe0] sm:$0xff]  ;;  %v10130_v29 = vpack.c.bf16 %v6737_v4, %v6736_v43  ;;  %v10168_v49 = vpack.c.bf16 %v6789_v45, %v6788_v22 }
0x17a6   : > { %8852 = vmatmul.mubr.msk.f32.gmra.mrb[48].mxu1 %vm199_vm0, %v12168_v18  ;;  %8856 = vmatmul.mubr.msk.f32.gmra.mrb[50].mxu0 %vm199_vm0, %v12168_v18  ;;  %v10162_v36 = vpack.c.bf16 %v6769_v12, %v6768_v3  ;;  %v6757_v11 = vld [vmem:[%s12188_s9 + $0xf8] sm:$0xff]  ;;  %v6840_v3 = vld [vmem:[%s12188_s9 + $0x390] sm:$0xff] }
0x17a7   : > { %v10136_v37 = vpack.c.bf16 %v6757_v11, %v6756_v21  ;;  %v6841_v12 = vld [vmem:[%s12188_s9 + $0x398] sm:$0xff] }
0x17a8   : > { %10115 = vmatpush3.bf16.msra.mxu1 %v10114_v30  ;;  %10147 = vmatpush3.bf16.msra.mxu0 %v10146_v63  ;;  %v10132_v30 = vpack.c.bf16 %v6755_v2, %v6754_v48  ;;  %v10164_v63 = vpack.c.bf16 %v6787_v26, %v6786_v44  ;;  %v10174_v44 = vpack.c.bf16 %v6791_v60, %v6790_v27  ;;  %v6826_v27 = vld [vmem:[%s12188_s9 + $0x320] sm:$0xff] }
0x17a9   : > { %10117 = vmatprep.subr.bf16.mxu1 %v10116_v34  ;;  %10149 = vmatprep.subr.bf16.mxu0 %v10148_v33  ;;  %v6771_v34 = vld [vmem:[%s12188_s9 + $0x168] sm:$0xff]  ;;  %v10134_v33 = vpack.c.bf16 %v6739_v6, %v6738_v13  ;;  %v10206_v26 = vpack.c.bf16 %v6823_v58, %v6822_v25 }
0x17aa   : > { %v10166_v59 = vpack.c.bf16 %v6771_v34, %v6770_v7  ;;  %v10208_v34 = vpack.c.bf16 %v6841_v12, %v6840_v3  ;;  %v6844_v3 = vld [vmem:[%s12188_s9 + $0x3b0] sm:$0xff]  ;;  %v6845_v12 = vld [vmem:[%s12188_s9 + $0x3b8] sm:$0xff] }
0x17ac   : > { %10119 = vmatpush3.bf16.msra.mxu1 %v10118_v47  ;;  %10151 = vmatpush3.bf16.msra.mxu0 %v10150_v14  ;;  %v6740_v47 = vld [vmem:[%s12188_s9 + $0x70] sm:$0xff]  ;;  %v6741_v14 = vld [vmem:[%s12188_s9 + $0x78] sm:$0xff] }
0x17ad   : > { %10121 = vmatprep.subr.bf16.mxu1 %v10120_v61  ;;  %10153 = vmatprep.subr.bf16.mxu0 %v10152_v32  ;;  %v10138_v52 = vpack.c.bf16 %v6741_v14, %v6740_v47  ;;  %v6772_v61 = vld [vmem:[%s12188_s9 + $0x170] sm:$0xff]  ;;  %v6773_v32 = vld [vmem:[%s12188_s9 + $0x178] sm:$0xff] }
0x17ae   : > { %v10170_v53 = vpack.c.bf16 %v6773_v32, %v6772_v61  ;;  %v6825_v14 = vld [vmem:[%s12188_s9 + $0x318] sm:$0xff] }
0x17b0   : > { %10123 = vmatpush3.bf16.msra.mxu1 %v10122_v51  ;;  %10155 = vmatpush3.bf16.msra.mxu0 %v10154_v15  ;;  %v10204_v51 = vpack.c.bf16 %v6839_v50, %v6838_v41  ;;  %v12299_v15 = vld [vmem:[%s12296_s27] sm:$0xff] }
0x17b1   : > { %10125 = vmatprep.subr.bf16.mxu1 %v10124_v19  ;;  %10157 = vmatprep.subr.bf16.mxu0 %v10156_v42  ;;  %v6989_v62 = vrot.slane %v12299_v15, %v11168_v39  ;;  %v6997_v57 = vrot.slane %v12299_v15, %v11171_v40  ;;  %v6993_v19 = vrot.slane %v12299_v15, %v11165_v38  ;;  %v6794_v41 = vld [vmem:[%s12188_s9 + $0x220] sm:$0xff] }
0x17b2   : > { %v7001_v42 = vrot.slane %v12299_v15, %v11177_v46  ;;  %v12328_v32 = vrot.slane %v12299_v15, %v11405_v17 }
0x17b4   : > { %10127 = vmatpush3.bf16.msra.mxu1 %v10126_v31  ;;  %10159 = vmatpush3.bf16.msra.mxu0 %v10158_v56  ;;  %v6808_v31 = vld [vmem:[%s12188_s9 + $0x290] sm:$0xff] }
0x17b5   : > { %10129 = vmatprep.subr.bf16.mxu1 %v10128_v1  ;;  %10161 = vmatprep.subr.bf16.mxu0 %v10160_v9  ;;  %v6809_v9 = vld [vmem:[%s12188_s9 + $0x298] sm:$0xff] }
0x17b6   : > { %v10176_v7 = vpack.c.bf16 %v6809_v9, %v6808_v31  ;;  %v10212_v31 = vpack.c.bf16 %v6843_v54, %v6842_v28  ;;  %v6813_v9 = vld [vmem:[%s12188_s9 + $0x2b8] sm:$0xff] }
0x17b8   : > { %10131 = vmatpush3.bf16.msra.mxu1 %v10130_v29  ;;  %10163 = vmatpush3.bf16.msra.mxu0 %v10162_v36  ;;  %v12319_v29 = vrot.slane %v12299_v15, %v11402_v16  ;;  %v6792_v36 = vld [vmem:[%s12188_s9 + $0x210] sm:$0xff] }
0x17b9   : > { %10133 = vmatprep.subr.bf16.mxu1 %v10132_v30  ;;  %10165 = vmatprep.subr.bf16.mxu0 %v10164_v63 }
0x17bc   : > { %10135 = vmatpush3.bf16.msra.mxu1 %v10134_v33  ;;  %10167 = vmatpush3.bf16.msra.mxu0 %v10166_v59  ;;  %v6793_v33 = vld [vmem:[%s12188_s9 + $0x218] sm:$0xff]  ;;  %v6824_v59 = vld [vmem:[%s12188_s9 + $0x310] sm:$0xff] }
0x17bd   : > { %10137 = vmatprep.subr.bf16.mxu1 %v10136_v37  ;;  %10169 = vmatprep.subr.bf16.mxu0 %v10168_v49  ;;  %v6810_v49 = vld [vmem:[%s12188_s9 + $0x2a0] sm:$0xff] }
0x17c0   : > { %10139 = vmatpush3.bf16.msra.mxu1 %v10138_v52  ;;  %10171 = vmatpush3.bf16.msra.mxu0 %v10170_v53  ;;  %v6811_v53 = vld [vmem:[%s12188_s9 + $0x2a8] sm:$0xff] }
0x17c1   : > { %10173 = vmatprep.subr.bf16.mxu1 %v10172_v10  ;;  %10205 = vmatprep.subr.bf16.mxu0 %v10204_v51  ;;  %v10180_v58 = vpack.c.bf16 %v6811_v53, %v6810_v49  ;;  %v6799_v53 = vld [vmem:[%s12188_s9 + $0x248] sm:$0xff] }
0x185d   : > { %v7186_v55 = vpop.f32.mrb[34].mxu1  ;;  %v7263_v24 = vpop.f32.mrb[36].mxu0 }
0x185e   : > { %v7187_v56 = vadd.f32 %v7186_v55, %v6989_v62  ;;  %v7264_v43 = vadd.f32 %v7263_v24, %v6997_v57  ;;  %v7188_v4 = vpop.f32.mrb[35].mxu1  ;;  %v7265_v1 = vpop.f32.mrb[37].mxu0 }
0x185f   : > { %v7189_v48 = vadd.f32 %v7188_v4, %v6993_v19  ;;  %v7266_v2 = vadd.f32 %v7265_v1, %v7001_v42 }
0x1860   : > { %v7736_v21 = vmax.f32 %v7187_v56, 0.0  ;;  %v7738_v11 = vmax.f32 %v7264_v43, 0.0  ;;  %v6827_v56 = vld [vmem:[%s12188_s9 + $0x328] sm:$0xff]  ;;  %v6812_v43 = vld [vmem:[%s12188_s9 + $0x2b0] sm:$0xff] }
0x1861   : > { %v7737_v13 = vmax.f32 %v7189_v48, 0.0  ;;  %v7739_v30 = vmax.f32 %v7266_v2, 0.0  ;;  %v7192_v63 = vpop.f32.mrb[36].mxu1  ;;  %v7269_v6 = vpop.f32.mrb[38].mxu0 }
0x1862   : > { %v7193_v22 = vadd.f32 %v7192_v63, %v6989_v62  ;;  %v7270_v37 = vadd.f32 %v7269_v6, %v6997_v57  ;;  %v7194_v45 = vpop.f32.mrb[37].mxu1  ;;  %v7271_v47 = vpop.f32.mrb[39].mxu0  ;;  %v10178_v57 = vpack.c.bf16 %v6793_v33, %v6792_v36  ;;  %v6797_v63 = vld [vmem:[%s12188_s9 + $0x238] sm:$0xff]  ;;  %v10216_v33 = vpack.c.bf16 %v6845_v12, %v6844_v3  ;;  %v6832_v3 = vld [vmem:[%s12188_s9 + $0x350] sm:$0xff] }
0x1863   : > { %v7195_v52 = vadd.f32 %v7194_v45, %v6993_v19  ;;  %v7272_v61 = vadd.f32 %v7271_v47, %v7001_v42  ;;  %7838 = vmatprep.mubr.f32.mxu1 %v7737_v13  ;;  %7913 = vmatprep.mubr.f32.mxu0 %v7739_v30  ;;  %v10210_v19 = vpack.c.bf16 %v6825_v14, %v6824_v59  ;;  %v6795_v42 = vld [vmem:[%s12188_s9 + $0x228] sm:$0xff]  ;;  %v6796_v30 = vld [vmem:[%s12188_s9 + $0x230] sm:$0xff]  ;;  %v6833_v12 = vld [vmem:[%s12188_s9 + $0x358] sm:$0xff] }
0x1864   : > { %7839 = vmatmul.mubr.f32.vlgmr.msra.gmra.mrb[50].mxu1 %v7736_v21  ;;  %7914 = vmatmul.mubr.f32.vlgmr.msra.gmra.mrb[52].mxu0 %v7738_v11  ;;  %v7752_v60 = vmax.f32 %v7193_v22, 0.0  ;;  %v7754_v55 = vmax.f32 %v7270_v37, 0.0  ;;  %v10182_v36 = vpack.c.bf16 %v6795_v42, %v6794_v41  ;;  %v10214_v13 = vpack.c.bf16 %v6827_v56, %v6826_v27  ;;  %v6828_v59 = vld [vmem:[%s12188_s9 + $0x330] sm:$0xff]  ;;  %v6829_v21 = vld [vmem:[%s12188_s9 + $0x338] sm:$0xff]  ;;  %v6814_v11 = vld [vmem:[%s12188_s9 + $0x2c0] sm:$0xff] }
0x1865   : > { %v7753_v10 = vmax.f32 %v7195_v52, 0.0  ;;  %v7755_v50 = vmax.f32 %v7272_v61, 0.0  ;;  %10175 = vmatpush3.bf16.msra.mxu1 %v10174_v44  ;;  %10207 = vmatpush3.bf16.msra.mxu0 %v10206_v26  ;;  %v12334_v51 = vpop.f32.mrb[38].mxu1  ;;  %v12336_v62 = vpop.f32.mrb[40].mxu0  ;;  %v6815_v22 = vld [vmem:[%s12188_s9 + $0x2c8] sm:$0xff]  ;;  %v6846_v37 = vld [vmem:[%s12188_s9 + $0x3c0] sm:$0xff]  ;;  %v10186_v49 = vpack.c.bf16 %v6797_v63, %v6796_v30  ;;  %v10218_v52 = vpack.c.bf16 %v6829_v21, %v6828_v59 }
0x1866   : > { %v7342_v24 = vpop.f32.mrb[39].mxu1  ;;  %v7419_v25 = vpop.f32.mrb[41].mxu0  ;;  %10177 = vmatprep.subr.bf16.mxu1 %v10176_v7  ;;  %10209 = vmatprep.subr.bf16.mxu0 %v10208_v34  ;;  %v10184_v34 = vpack.c.bf16 %v6813_v9, %v6812_v43  ;;  %v6847_v45 = vld [vmem:[%s12188_s9 + $0x3c8] sm:$0xff]  ;;  %v6798_v61 = vld [vmem:[%s12188_s9 + $0x240] sm:$0xff]  ;;  %v10188_v41 = vpack.c.bf16 %v6815_v22, %v6814_v11  ;;  %v6817_v42 = vld [vmem:[%s12188_s9 + $0x2d8] sm:$0xff] }
0x1867   : > { %v7343_v4 = vadd.f32 %v7342_v24, %v12319_v29  ;;  %v7420_v1 = vadd.f32 %v7419_v25, %v12328_v32  ;;  %7843 = vmatprep.mubr.f32.mxu1 %v7753_v10  ;;  %7918 = vmatprep.mubr.f32.mxu0 %v7755_v50  ;;  %v10220_v10 = vpack.c.bf16 %v6847_v45, %v6846_v37  ;;  %v6830_v50 = vld [vmem:[%s12188_s9 + $0x340] sm:$0xff]  ;;  %v6848_v27 = vld [vmem:[%s12188_s9 + $0x3d0] sm:$0xff]  ;;  %v6801_v56 = vld [vmem:[%s12188_s9 + $0x258] sm:$0xff] }
0x1868   : > { %7844 = vmatmul.mubr.f32.gmra.mrb[52].mxu1 %v7752_v60  ;;  %7919 = vmatmul.mubr.f32.gmra.mrb[54].mxu0 %v7754_v55  ;;  %v6849_v60 = vld [vmem:[%s12188_s9 + $0x3d8] sm:$0xff]  ;;  %v10190_v25 = vpack.c.bf16 %v6799_v53, %v6798_v61  ;;  %v6802_v59 = vld [vmem:[%s12188_s9 + $0x260] sm:$0xff]  ;;  %v6803_v21 = vld [vmem:[%s12188_s9 + $0x268] sm:$0xff] }
0x1869   : > { %v7741_v48 = vmax.f32 %v7343_v4, 0.0  ;;  %v7743_v2 = vmax.f32 %v7420_v1, 0.0  ;;  %10179 = vmatpush3.bf16.msra.mxu1 %v10178_v57  ;;  %10211 = vmatpush3.bf16.msra.mxu0 %v10210_v19  ;;  %v12347_v44 = vpop.f32.mrb[40].mxu1  ;;  %v12349_v26 = vpop.f32.mrb[42].mxu0  ;;  %v6831_v57 = vld [vmem:[%s12188_s9 + $0x348] sm:$0xff]  ;;  %v6816_v19 = vld [vmem:[%s12188_s9 + $0x2d0] sm:$0xff]  ;;  %v10224_v9 = vpack.c.bf16 %v6849_v60, %v6848_v27 }
0x186a   : > { %v12353_v6 = vpop.f32.mrb[41].mxu1  ;;  %v12355_v7 = vpop.f32.mrb[43].mxu0  ;;  %10181 = vmatprep.subr.bf16.mxu1 %v10180_v58  ;;  %10213 = vmatprep.subr.bf16.mxu0 %v10212_v31  ;;  %v10222_v58 = vpack.c.bf16 %v6831_v57, %v6830_v50  ;;  %v6800_v31 = vld [vmem:[%s12188_s9 + $0x250] sm:$0xff]  ;;  %v10192_v1 = vpack.c.bf16 %v6817_v42, %v6816_v19  ;;  %v6821_v53 = vld [vmem:[%s12188_s9 + $0x2f8] sm:$0xff]  ;;  %v7005_v50 = vrot.slane %v12299_v15, %v11442_v8 }
0x186b   : > { %7988 = vmatprep.mubr.f32.mxu1 %v7741_v48  ;;  %8063 = vmatprep.mubr.f32.mxu0 %v7743_v2  ;;  %v6818_v48 = vld [vmem:[%s12188_s9 + $0x2e0] sm:$0xff]  ;;  %v6819_v2 = vld [vmem:[%s12188_s9 + $0x2e8] sm:$0xff]  ;;  %v6820_v61 = vld [vmem:[%s12188_s9 + $0x2f0] sm:$0xff]  ;;  %v10198_v42 = vpack.c.bf16 %v6803_v21, %v6802_v59 }
0x186c   : > { %v10196_v37 = vpack.c.bf16 %v6819_v2, %v6818_v48  ;;  %v6804_v60 = vld [vmem:[%s12188_s9 + $0x270] sm:$0xff]  ;;  %v6870_v48 = vld [vmem:[%s12188_s9 + $0x480] sm:$0xff]  ;;  %v6871_v2 = vld [vmem:[%s12188_s9 + $0x488] sm:$0xff] }
0x186d   : > { %10183 = vmatpush3.bf16.msra.mxu1 %v10182_v36  ;;  %10215 = vmatpush3.bf16.msra.mxu0 %v10214_v13  ;;  %v12363_v47 = vpop.f32.mrb[42].mxu1  ;;  %v12365_v14 = vpop.f32.mrb[44].mxu0  ;;  %v6850_v36 = vld [vmem:[%s12188_s9 + $0x3e0] sm:$0xff]  ;;  %v6851_v13 = vld [vmem:[%s12188_s9 + $0x3e8] sm:$0xff] }
0x186e   : > { %v12369_v28 = vpop.f32.mrb[43].mxu1  ;;  %v12371_v54 = vpop.f32.mrb[45].mxu0  ;;  %10185 = vmatprep.subr.bf16.mxu1 %v10184_v34  ;;  %10217 = vmatprep.subr.bf16.mxu0 %v10216_v33  ;;  %v10194_v34 = vpack.c.bf16 %v6801_v56, %v6800_v31  ;;  %v10226_v33 = vpack.c.bf16 %v6833_v12, %v6832_v3  ;;  %v10228_v45 = vpack.c.bf16 %v6851_v13, %v6850_v36  ;;  %v6837_v12 = vld [vmem:[%s12188_s9 + $0x378] sm:$0xff]  ;;  %v6902_v36 = vld [vmem:[%s12188_s9 + $0x580] sm:$0xff]  ;;  %v6903_v13 = vld [vmem:[%s12188_s9 + $0x588] sm:$0xff] }
0x186f   : > { %v7013_v31 = vrot.slane %v12299_v15, %v11451_v20  ;;  %v6854_v15 = vld [vmem:[%s12188_s9 + $0x400] sm:$0xff] }
0x1871   : > { %10187 = vmatpush3.bf16.msra.mxu1 %v10186_v49  ;;  %10219 = vmatpush3.bf16.msra.mxu0 %v10218_v52  ;;  %v12379_v55 = vpop.f32.mrb[44].mxu1  ;;  %v12381_v24 = vpop.f32.mrb[46].mxu0  ;;  %v6834_v49 = vld [vmem:[%s12188_s9 + $0x360] sm:$0xff]  ;;  %v6835_v52 = vld [vmem:[%s12188_s9 + $0x368] sm:$0xff] }
0x1872   : > { %v12385_v43 = vpop.f32.mrb[45].mxu1  ;;  %v12387_v4 = vpop.f32.mrb[47].mxu0  ;;  %10189 = vmatprep.subr.bf16.mxu1 %v10188_v41  ;;  %10221 = vmatprep.subr.bf16.mxu0 %v10220_v10  ;;  %v6852_v41 = vld [vmem:[%s12188_s9 + $0x3f0] sm:$0xff]  ;;  %v6853_v10 = vld [vmem:[%s12188_s9 + $0x3f8] sm:$0xff]  ;;  %v10230_v27 = vpack.c.bf16 %v6835_v52, %v6834_v49  ;;  %v6887_v49 = vld [vmem:[%s12188_s9 + $0x508] sm:$0xff] }
0x1873   : > { %v10232_v3 = vpack.c.bf16 %v6853_v10, %v6852_v41  ;;  %v6872_v52 = vld [vmem:[%s12188_s9 + $0x490] sm:$0xff]  ;;  %v10268_v41 = vpack.c.bf16 %v6903_v13, %v6902_v36  ;;  %v6873_v10 = vld [vmem:[%s12188_s9 + $0x498] sm:$0xff] }
0x1874   : > { %v6889_v13 = vld [vmem:[%s12188_s9 + $0x518] sm:$0xff] }
0x1875   : > { %10191 = vmatpush3.bf16.msra.mxu1 %v10190_v25  ;;  %10223 = vmatpush3.bf16.msra.mxu0 %v10222_v58  ;;  %v12395_v30 = vpop.f32.mrb[46].mxu1  ;;  %v12397_v63 = vpop.f32.mrb[48].mxu0  ;;  %v6805_v25 = vld [vmem:[%s12188_s9 + $0x278] sm:$0xff]  ;;  %v6836_v58 = vld [vmem:[%s12188_s9 + $0x370] sm:$0xff] }
0x1876   : > { %v12401_v11 = vpop.f32.mrb[47].mxu1  ;;  %v12403_v22 = vpop.f32.mrb[49].mxu0  ;;  %10193 = vmatprep.subr.bf16.mxu1 %v10192_v1  ;;  %10225 = vmatprep.subr.bf16.mxu0 %v10224_v9  ;;  %v10200_v9 = vpack.c.bf16 %v6821_v53, %v6820_v61  ;;  %v10202_v59 = vpack.c.bf16 %v6805_v25, %v6804_v60  ;;  %v10234_v21 = vpack.c.bf16 %v6837_v12, %v6836_v58  ;;  %v6857_v12 = vld [vmem:[%s12188_s9 + $0x418] sm:$0xff] }
0x1877   : > { %v7341_v61 = vadd.f32 %v12334_v51, %v7005_v50  ;;  %v7418_v53 = vadd.f32 %v12336_v62, %v7013_v31 }
0x1879   : > { %10195 = vmatpush3.bf16.msra.mxu1 %v10194_v34  ;;  %10227 = vmatpush3.bf16.msra.mxu0 %v10226_v33  ;;  %v12413_v57 = vpop.f32.mrb[48].mxu1  ;;  %v12415_v19 = vpop.f32.mrb[50].mxu0  ;;  %v12432_v34 = vld [vmem:[%s12296_s27 + $0x8] sm:$0xff]  ;;  %v7740_v58 = vmax.f32 %v7341_v61, 0.0  ;;  %v6890_v61 = vld [vmem:[%s12188_s9 + $0x520] sm:$0xff] }
0x187a   : > { %v12422_v56 = vpop.f32.mrb[49].mxu1  ;;  %v12424_v1 = vpop.f32.mrb[51].mxu0  ;;  %10197 = vmatprep.subr.bf16.mxu1 %v10196_v37  ;;  %10229 = vmatprep.subr.bf16.mxu0 %v10228_v45  ;;  %v6855_v33 = vld [vmem:[%s12188_s9 + $0x408] sm:$0xff]  ;;  %v10236_v37 = vpack.c.bf16 %v6871_v2, %v6870_v48  ;;  %v6886_v45 = vld [vmem:[%s12188_s9 + $0x500] sm:$0xff]  ;;  %v12450_v60 = vrot.slane %v12432_v34, %v11165_v38  ;;  %v12454_v51 = vrot.slane %v12432_v34, %v11177_v46 }
0x187b   : > { %v10238_v62 = vpack.c.bf16 %v6855_v33, %v6854_v15  ;;  %v10270_v25 = vpack.c.bf16 %v6887_v49, %v6886_v45 }
0x187c   : > { %v7497_v36 = vadd.f32 %v12369_v28, %v12450_v60 }
0x187d   : > { %10199 = vmatpush3.bf16.msra.mxu1 %v10198_v42  ;;  %10231 = vmatpush3.bf16.msra.mxu0 %v10230_v27  ;;  %v7349_v42 = vadd.f32 %v12353_v6, %v12319_v29  ;;  %v7426_v27 = vadd.f32 %v12355_v7, %v12328_v32  ;;  %v10240_v29 = vpack.c.bf16 %v6873_v10, %v6872_v52  ;;  %v7742_v32 = vmax.f32 %v7418_v53, 0.0  ;;  %v6891_v53 = vld [vmem:[%s12188_s9 + $0x528] sm:$0xff]  ;;  %v6877_v10 = vld [vmem:[%s12188_s9 + $0x4b8] sm:$0xff] }
0x187e   : > { %10201 = vmatprep.subr.bf16.mxu1 %v10200_v9  ;;  %10233 = vmatprep.subr.bf16.mxu0 %v10232_v3  ;;  %v10272_v6 = vpack.c.bf16 %v6905_v23, %v6904_v5  ;;  %v7347_v7 = vadd.f32 %v12347_v44, %v7005_v50  ;;  %v7424_v9 = vadd.f32 %v12349_v26, %v7013_v31  ;;  %v6856_v3 = vld [vmem:[%s12188_s9 + $0x410] sm:$0xff]  ;;  %v6874_v44 = vld [vmem:[%s12188_s9 + $0x4a0] sm:$0xff]  ;;  %v6875_v26 = vld [vmem:[%s12188_s9 + $0x4a8] sm:$0xff] }
0x187f   : > { %v7757_v48 = vmax.f32 %v7349_v42, 0.0  ;;  %v7759_v2 = vmax.f32 %v7426_v27, 0.0  ;;  %v7574_v5 = vadd.f32 %v12371_v54, %v12454_v51  ;;  %v6888_v23 = vld [vmem:[%s12188_s9 + $0x510] sm:$0xff]  ;;  %v6906_v50 = vld [vmem:[%s12188_s9 + $0x5a0] sm:$0xff]  ;;  %v6907_v31 = vld [vmem:[%s12188_s9 + $0x5a8] sm:$0xff]  ;;  %v10242_v54 = vpack.c.bf16 %v6857_v12, %v6856_v3 }
0x1880   : > { %v7756_v15 = vmax.f32 %v7347_v7, 0.0  ;;  %v7758_v28 = vmax.f32 %v7424_v9, 0.0  ;;  %v10274_v33 = vpack.c.bf16 %v6889_v13, %v6888_v23  ;;  %v10244_v49 = vpack.c.bf16 %v6875_v26, %v6874_v44  ;;  %v6908_v42 = vld [vmem:[%s12188_s9 + $0x5b0] sm:$0xff]  ;;  %v6909_v27 = vld [vmem:[%s12188_s9 + $0x5b8] sm:$0xff]  ;;  %v6878_v3 = vld [vmem:[%s12188_s9 + $0x4c0] sm:$0xff] }
0x1881   : > { %10203 = vmatpush3.bf16.msra.mxu1 %v10202_v59  ;;  %10235 = vmatpush3.bf16.msra.mxu0 %v10234_v21  ;;  %v6858_v59 = vld [vmem:[%s12188_s9 + $0x420] sm:$0xff]  ;;  %v6859_v21 = vld [vmem:[%s12188_s9 + $0x428] sm:$0xff]  ;;  %v7747_v45 = vmax.f32 %v7574_v5, 0.0  ;;  %v10276_v52 = vpack.c.bf16 %v6907_v31, %v6906_v50  ;;  %v6892_v7 = vld [vmem:[%s12188_s9 + $0x530] sm:$0xff] }
0x1882   : > { %10237 = vmatprep.subr.bf16.mxu1 %v10236_v37  ;;  %10269 = vmatprep.subr.bf16.mxu0 %v10268_v41  ;;  %v7745_v37 = vmax.f32 %v7497_v36, 0.0  ;;  %v6876_v41 = vld [vmem:[%s12188_s9 + $0x4b0] sm:$0xff]  ;;  %v6893_v9 = vld [vmem:[%s12188_s9 + $0x538] sm:$0xff]  ;;  %v6879_v12 = vld [vmem:[%s12188_s9 + $0x4c8] sm:$0xff] }
0x1883   : > { %v10282_v5 = vpack.c.bf16 %v6893_v9, %v6892_v7  ;;  %v6862_v23 = vld [vmem:[%s12188_s9 + $0x440] sm:$0xff]  ;;  %v6863_v13 = vld [vmem:[%s12188_s9 + $0x448] sm:$0xff]  ;;  %v10252_v44 = vpack.c.bf16 %v6879_v12, %v6878_v3  ;;  %v6884_v3 = vld [vmem:[%s12188_s9 + $0x4f0] sm:$0xff] }
0x1884   : > { %7989 = vmatmul.mubr.f32.vlgmr.msra.gmra.mrb[54].mxu1 %v7740_v58  ;;  %8064 = vmatmul.mubr.f32.vlgmr.msra.gmra.mrb[56].mxu0 %v7742_v32  ;;  %v10248_v58 = vpack.c.bf16 %v6877_v10, %v6876_v41  ;;  %v10280_v32 = vpack.c.bf16 %v6909_v27, %v6908_v42  ;;  %v6894_v50 = vld [vmem:[%s12188_s9 + $0x540] sm:$0xff]  ;;  %v6895_v31 = vld [vmem:[%s12188_s9 + $0x548] sm:$0xff]  ;;  %v6885_v12 = vld [vmem:[%s12188_s9 + $0x4f8] sm:$0xff] }
0x1885   : > { %7993 = vmatprep.mubr.f32.mxu1 %v7757_v48  ;;  %8068 = vmatprep.mubr.f32.mxu0 %v7759_v2  ;;  %v6910_v48 = vld [vmem:[%s12188_s9 + $0x5c0] sm:$0xff]  ;;  %v6911_v2 = vld [vmem:[%s12188_s9 + $0x5c8] sm:$0xff] }
0x1886   : > { %10239 = vmatpush3.bf16.msra.mxu1 %v10238_v62  ;;  %10271 = vmatpush3.bf16.msra.mxu0 %v10270_v25  ;;  %v10246_v62 = vpack.c.bf16 %v6859_v21, %v6858_v59  ;;  %v10278_v25 = vpack.c.bf16 %v6891_v53, %v6890_v61  ;;  %v10284_v26 = vpack.c.bf16 %v6911_v2, %v6910_v48  ;;  %v6896_v61 = vld [vmem:[%s12188_s9 + $0x550] sm:$0xff]  ;;  %v6897_v53 = vld [vmem:[%s12188_s9 + $0x558] sm:$0xff]  ;;  %v6882_v41 = vld [vmem:[%s12188_s9 + $0x4e0] sm:$0xff] }
0x1887   : > { %10241 = vmatprep.subr.bf16.mxu1 %v10240_v29  ;;  %10273 = vmatprep.subr.bf16.mxu0 %v10272_v6  ;;  %v6860_v29 = vld [vmem:[%s12188_s9 + $0x430] sm:$0xff]  ;;  %v6861_v6 = vld [vmem:[%s12188_s9 + $0x438] sm:$0xff]  ;;  %v10254_v59 = vpack.c.bf16 %v6863_v13, %v6862_v23  ;;  %v10286_v21 = vpack.c.bf16 %v6895_v31, %v6894_v50  ;;  %v6883_v10 = vld [vmem:[%s12188_s9 + $0x4e8] sm:$0xff]  ;;  %v7029_v50 = vrot.slane %v12432_v34, %v11171_v40 }
0x1888   : > { %7994 = vmatmul.mubr.f32.gmra.mrb[56].mxu1 %v7756_v15  ;;  %8069 = vmatmul.mubr.f32.gmra.mrb[58].mxu0 %v7758_v28  ;;  %v10250_v36 = vpack.c.bf16 %v6861_v6, %v6860_v29  ;;  %v6880_v15 = vld [vmem:[%s12188_s9 + $0x4d0] sm:$0xff]  ;;  %v6881_v28 = vld [vmem:[%s12188_s9 + $0x4d8] sm:$0xff]  ;;  %v6914_v42 = vld [vmem:[%s12188_s9 + $0x5e0] sm:$0xff]  ;;  %v10264_v31 = vpack.c.bf16 %v6885_v12, %v6884_v3 }
0x1889   : > { %8138 = vmatprep.mubr.f32.mxu1 %v7745_v37  ;;  %8213 = vmatprep.mubr.f32.mxu0 %v7747_v45  ;;  %v6864_v37 = vld [vmem:[%s12188_s9 + $0x450] sm:$0xff]  ;;  %v6865_v45 = vld [vmem:[%s12188_s9 + $0x458] sm:$0xff]  ;;  %v6915_v27 = vld [vmem:[%s12188_s9 + $0x5e8] sm:$0xff]  ;;  %v7578_v12 = vadd.f32 %v12381_v24, %v7029_v50 }
0x188a   : > { %10243 = vmatpush3.bf16.msra.mxu1 %v10242_v54  ;;  %10275 = vmatpush3.bf16.msra.mxu0 %v10274_v33  ;;  %v6912_v54 = vld [vmem:[%s12188_s9 + $0x5d0] sm:$0xff]  ;;  %v6913_v33 = vld [vmem:[%s12188_s9 + $0x5d8] sm:$0xff]  ;;  %v6866_v29 = vld [vmem:[%s12188_s9 + $0x460] sm:$0xff] }
0x188b   : > { %10245 = vmatprep.subr.bf16.mxu1 %v10244_v49  ;;  %10277 = vmatprep.subr.bf16.mxu0 %v10276_v52  ;;  %v10256_v49 = vpack.c.bf16 %v6881_v28, %v6880_v15  ;;  %v10288_v52 = vpack.c.bf16 %v6913_v33, %v6912_v54  ;;  %v6867_v6 = vld [vmem:[%s12188_s9 + $0x468] sm:$0xff]  ;;  %v6898_v7 = vld [vmem:[%s12188_s9 + $0x560] sm:$0xff]  ;;  %v6916_v48 = vld [vmem:[%s12188_s9 + $0x5f0] sm:$0xff] }
0x188c   : > { %v6899_v9 = vld [vmem:[%s12188_s9 + $0x568] sm:$0xff]  ;;  %v6917_v2 = vld [vmem:[%s12188_s9 + $0x5f8] sm:$0xff]  ;;  %v6868_v13 = vld [vmem:[%s12188_s9 + $0x470] sm:$0xff] }
0x188d   : > { %v10294_v23 = vpack.c.bf16 %v6899_v9, %v6898_v7  ;;  %v10296_v15 = vpack.c.bf16 %v6917_v2, %v6916_v48  ;;  %v6901_v28 = vld [vmem:[%s12188_s9 + $0x578] sm:$0xff]  ;;  %v6934_v54 = vld [vmem:[%s12188_s9 + $0x680] sm:$0xff]  ;;  %v6935_v33 = vld [vmem:[%s12188_s9 + $0x688] sm:$0xff]  ;;  %v12538_v7 = vrot.slane %v12432_v34, %v11402_v16 }
0x188e   : > { %10247 = vmatpush3.bf16.msra.mxu1 %v10246_v62  ;;  %10279 = vmatpush3.bf16.msra.mxu0 %v10278_v25  ;;  %v10258_v62 = vpack.c.bf16 %v6865_v45, %v6864_v37  ;;  %v10290_v25 = vpack.c.bf16 %v6897_v53, %v6896_v61  ;;  %v6918_v37 = vld [vmem:[%s12188_s9 + $0x600] sm:$0xff]  ;;  %v6919_v45 = vld [vmem:[%s12188_s9 + $0x608] sm:$0xff]  ;;  %v10300_v61 = vpack.c.bf16 %v6935_v33, %v6934_v54  ;;  %v6920_v48 = vld [vmem:[%s12188_s9 + $0x610] sm:$0xff] }
0x188f   : > { %10249 = vmatprep.subr.bf16.mxu1 %v10248_v58  ;;  %10281 = vmatprep.subr.bf16.mxu0 %v10280_v32  ;;  %v10260_v58 = vpack.c.bf16 %v6883_v10, %v6882_v41  ;;  %v10292_v32 = vpack.c.bf16 %v6915_v27, %v6914_v42  ;;  %v6950_v53 = vld [vmem:[%s12188_s9 + $0x700] sm:$0xff]  ;;  %v6951_v41 = vld [vmem:[%s12188_s9 + $0x708] sm:$0xff]  ;;  %v6936_v10 = vld [vmem:[%s12188_s9 + $0x690] sm:$0xff]  ;;  %v7572_v27 = vadd.f32 %v12365_v14, %v7029_v50 }
0x1890   : > { %v10302_v14 = vpack.c.bf16 %v6919_v45, %v6918_v37  ;;  %v10334_v9 = vpack.c.bf16 %v6951_v41, %v6950_v53  ;;  %v6921_v2 = vld [vmem:[%s12188_s9 + $0x618] sm:$0xff]  ;;  %v6939_v24 = vld [vmem:[%s12188_s9 + $0x6a8] sm:$0xff]  ;;  %v6922_v54 = vld [vmem:[%s12188_s9 + $0x620] sm:$0xff] }
0x1891   : > { %v6971_v50 = vld [vmem:[%s12188_s9 + $0x7a8] sm:$0xff]  ;;  %v6941_v53 = vld [vmem:[%s12188_s9 + $0x6b8] sm:$0xff]  ;;  %v6972_v41 = vld [vmem:[%s12188_s9 + $0x7b0] sm:$0xff] }
0x1892   : > { %10251 = vmatpush3.bf16.msra.mxu1 %v10250_v36  ;;  %10283 = vmatpush3.bf16.msra.mxu0 %v10282_v5  ;;  %v7021_v36 = vrot.slane %v12432_v34, %v11168_v39  ;;  %v10262_v5 = vpack.c.bf16 %v6867_v6, %v6866_v29  ;;  %v6968_v29 = vld [vmem:[%s12188_s9 + $0x790] sm:$0xff]  ;;  %v6969_v6 = vld [vmem:[%s12188_s9 + $0x798] sm:$0xff]  ;;  %v6923_v33 = vld [vmem:[%s12188_s9 + $0x628] sm:$0xff] }
0x1893   : > { %10253 = vmatprep.subr.bf16.mxu1 %v10252_v44  ;;  %10285 = vmatprep.subr.bf16.mxu0 %v10284_v26  ;;  %v6869_v44 = vld [vmem:[%s12188_s9 + $0x478] sm:$0xff]  ;;  %v6900_v26 = vld [vmem:[%s12188_s9 + $0x570] sm:$0xff]  ;;  %v8467_v39 = vld [vmem:[%s10956_s23] sm:$0xf] (%p3496_p1) }
0x1894   : > { %v7495_v42 = vadd.f32 %v12363_v47, %v7021_v36  ;;  %v12542_v47 = vrot.slane %v12432_v34, %v11405_v17 }
0x1896   : > { %10255 = vmatpush3.bf16.msra.mxu1 %v10254_v59  ;;  %10287 = vmatpush3.bf16.msra.mxu0 %v10286_v21  ;;  %v6966_v59 = vld [vmem:[%s12188_s9 + $0x780] sm:$0xff]  ;;  %v6967_v21 = vld [vmem:[%s12188_s9 + $0x788] sm:$0xff]  ;;  %v7744_v3 = vmax.f32 %v7495_v42, 0.0  ;;  %v10310_v42 = vpack.c.bf16 %v6923_v33, %v6922_v54 }
0x1897   : > { %10257 = vmatprep.subr.bf16.mxu1 %v10256_v49  ;;  %10289 = vmatprep.subr.bf16.mxu0 %v10288_v52  ;;  %v10266_v49 = vpack.c.bf16 %v6869_v44, %v6868_v13  ;;  %v10298_v52 = vpack.c.bf16 %v6901_v28, %v6900_v26  ;;  %v7651_v13 = vadd.f32 %v12401_v11, %v12538_v7  ;;  %v6952_v26 = vld [vmem:[%s12188_s9 + $0x710] sm:$0xff]  ;;  %v7762_v11 = vmax.f32 %v7578_v12, 0.0  ;;  %v6927_v12 = vld [vmem:[%s12188_s9 + $0x648] sm:$0xff]  ;;  %v6946_v54 = vld [vmem:[%s12188_s9 + $0x6e0] sm:$0xff] }
0x1898   : > { %v7728_v44 = vadd.f32 %v12403_v22, %v12542_v47  ;;  %v10306_v22 = vpack.c.bf16 %v6921_v2, %v6920_v48  ;;  %v6947_v33 = vld [vmem:[%s12188_s9 + $0x6e8] sm:$0xff] }
0x189a   : > { %10259 = vmatpush3.bf16.msra.mxu1 %v10258_v62  ;;  %10291 = vmatpush3.bf16.msra.mxu0 %v10290_v25  ;;  %v10332_v62 = vpack.c.bf16 %v6967_v21, %v6966_v59  ;;  %v6937_v25 = vld [vmem:[%s12188_s9 + $0x698] sm:$0xff]  ;;  %v7749_v59 = vmax.f32 %v7651_v13, 0.0  ;;  %v7751_v21 = vmax.f32 %v7728_v44, 0.0  ;;  %v6944_v13 = vld [vmem:[%s12188_s9 + $0x6d0] sm:$0xff] }
0x189b   : > { %10261 = vmatprep.subr.bf16.mxu1 %v10260_v58  ;;  %10293 = vmatprep.subr.bf16.mxu0 %v10292_v32  ;;  %v7503_v58 = vadd.f32 %v12385_v43, %v12450_v60  ;;  %v7580_v32 = vadd.f32 %v12387_v4, %v12454_v51  ;;  %v10304_v43 = vpack.c.bf16 %v6937_v25, %v6936_v10  ;;  %v7746_v4 = vmax.f32 %v7572_v27, 0.0  ;;  %v6973_v10 = vld [vmem:[%s12188_s9 + $0x7b8] sm:$0xff] }
0x189c   : > { %v10336_v60 = vpack.c.bf16 %v6969_v6, %v6968_v29  ;;  %v7501_v51 = vadd.f32 %v12379_v55, %v7021_v36  ;;  %v6938_v55 = vld [vmem:[%s12188_s9 + $0x6a0] sm:$0xff]  ;;  %v6925_v25 = vld [vmem:[%s12188_s9 + $0x638] sm:$0xff]  ;;  %v10344_v6 = vpack.c.bf16 %v6973_v10, %v6972_v41  ;;  %v6963_v10 = vld [vmem:[%s12188_s9 + $0x768] sm:$0xff] }
0x189d   : > { %v6970_v36 = vld [vmem:[%s12188_s9 + $0x7a0] sm:$0xff]  ;;  %v10308_v37 = vpack.c.bf16 %v6939_v24, %v6938_v55  ;;  %v6945_v44 = vld [vmem:[%s12188_s9 + $0x6d8] sm:$0xff] }
0x189e   : > { %10263 = vmatpush3.bf16.msra.mxu1 %v10262_v5  ;;  %10295 = vmatpush3.bf16.msra.mxu0 %v10294_v23  ;;  %v7761_v5 = vmax.f32 %v7503_v58, 0.0  ;;  %v7763_v23 = vmax.f32 %v7580_v32, 0.0  ;;  %v10340_v45 = vpack.c.bf16 %v6971_v50, %v6970_v36  ;;  %v6956_v58 = vld [vmem:[%s12188_s9 + $0x730] sm:$0xff]  ;;  %v6957_v32 = vld [vmem:[%s12188_s9 + $0x738] sm:$0xff]  ;;  %v6962_v41 = vld [vmem:[%s12188_s9 + $0x760] sm:$0xff] }
0x189f   : > { %10265 = vmatprep.subr.bf16.mxu1 %v10264_v31  ;;  %10297 = vmatprep.subr.bf16.mxu0 %v10296_v15  ;;  %v6953_v31 = vld [vmem:[%s12188_s9 + $0x718] sm:$0xff]  ;;  %v7760_v15 = vmax.f32 %v7501_v51, 0.0  ;;  %v6926_v51 = vld [vmem:[%s12188_s9 + $0x640] sm:$0xff]  ;;  %v6928_v36 = vld [vmem:[%s12188_s9 + $0x650] sm:$0xff] }
0x18a0   : > { %v10338_v28 = vpack.c.bf16 %v6953_v31, %v6952_v26  ;;  %v6976_v26 = vld [vmem:[%s12188_s9 + $0x7d0] sm:$0xff]  ;;  %v6977_v31 = vld [vmem:[%s12188_s9 + $0x7d8] sm:$0xff]  ;;  %v10318_v55 = vpack.c.bf16 %v6927_v12, %v6926_v51 }
0x18a1   : > { %v6929_v50 = vld [vmem:[%s12188_s9 + $0x658] sm:$0xff] }
0x18a2   : > { %10267 = vmatpush3.bf16.msra.mxu1 %v10266_v49  ;;  %10299 = vmatpush3.bf16.msra.mxu0 %v10298_v52  ;;  %v6954_v49 = vld [vmem:[%s12188_s9 + $0x720] sm:$0xff]  ;;  %v6955_v52 = vld [vmem:[%s12188_s9 + $0x728] sm:$0xff] }
0x18a3   : > { %10301 = vmatprep.subr.bf16.mxu1 %v10300_v61  ;;  %10333 = vmatprep.subr.bf16.mxu0 %v10332_v62  ;;  %v6940_v61 = vld [vmem:[%s12188_s9 + $0x6b0] sm:$0xff]  ;;  %v10342_v27 = vpack.c.bf16 %v6955_v52, %v6954_v49  ;;  %v6930_v49 = vld [vmem:[%s12188_s9 + $0x660] sm:$0xff]  ;;  %v6931_v52 = vld [vmem:[%s12188_s9 + $0x668] sm:$0xff] }
0x18a4   : > { %v6924_v62 = vld [vmem:[%s12188_s9 + $0x630] sm:$0xff]  ;;  %v10312_v29 = vpack.c.bf16 %v6941_v53, %v6940_v61  ;;  %v10324_v61 = vpack.c.bf16 %v6947_v33, %v6946_v54 }
0x18a5   : > { %8139 = vmatmul.mubr.f32.vlgmr.msra.gmra.mrb[58].mxu1 %v7744_v3  ;;  %8214 = vmatmul.mubr.f32.vlgmr.msra.gmra.mrb[60].mxu0 %v7746_v4  ;;  %v10314_v3 = vpack.c.bf16 %v6925_v25, %v6924_v62  ;;  %v10346_v4 = vpack.c.bf16 %v6957_v32, %v6956_v58  ;;  %v6980_v62 = vld [vmem:[%s12188_s9 + $0x7f0] sm:$0xff]  ;;  %v6981_v25 = vld [vmem:[%s12188_s9 + $0x7f8] sm:$0xff]  ;;  %v10358_v58 = vpack.c.bf16 %v6963_v10, %v6962_v41 }
0x18a6   : > { %8143 = vmatprep.mubr.f32.mxu1 %v7761_v5  ;;  %8218 = vmatprep.mubr.f32.mxu0 %v7763_v23  ;;  %v6958_v5 = vld [vmem:[%s12188_s9 + $0x740] sm:$0xff]  ;;  %v6959_v23 = vld [vmem:[%s12188_s9 + $0x748] sm:$0xff]  ;;  %v6932_v32 = vld [vmem:[%s12188_s9 + $0x670] sm:$0xff] }
0x18a7   : > { %10303 = vmatpush3.bf16.msra.mxu1 %v10302_v14  ;;  %10335 = vmatpush3.bf16.msra.mxu0 %v10334_v9  ;;  %v6942_v14 = vld [vmem:[%s12188_s9 + $0x6c0] sm:$0xff]  ;;  %v6943_v9 = vld [vmem:[%s12188_s9 + $0x6c8] sm:$0xff]  ;;  %v10350_v24 = vpack.c.bf16 %v6959_v23, %v6958_v5  ;;  %v7734_v5 = vadd.f32 %v12424_v1, %v12542_v47 }
0x18a8   : > { %10305 = vmatprep.subr.bf16.mxu1 %v10304_v43  ;;  %10337 = vmatprep.subr.bf16.mxu0 %v10336_v60  ;;  %v6974_v43 = vld [vmem:[%s12188_s9 + $0x7c0] sm:$0xff]  ;;  %v6975_v60 = vld [vmem:[%s12188_s9 + $0x7c8] sm:$0xff]  ;;  %v10316_v48 = vpack.c.bf16 %v6943_v9, %v6942_v14  ;;  %v7045_v14 = vrot.slane %v12432_v34, %v11451_v20 }
0x18a9   : > { %8144 = vmatmul.mubr.f32.gmra.mrb[60].mxu1 %v7760_v15  ;;  %8219 = vmatmul.mubr.f32.gmra.mrb[62].mxu0 %v7762_v11  ;;  %v10348_v2 = vpack.c.bf16 %v6975_v60, %v6974_v43  ;;  %v10320_v15 = vpack.c.bf16 %v6945_v44, %v6944_v13  ;;  %v10352_v11 = vpack.c.bf16 %v6977_v31, %v6976_v26  ;;  %v6933_v60 = vld [vmem:[%s12188_s9 + $0x678] sm:$0xff]  ;;  %v8857_v31 = vld [vmem:[%s6982_s4] ss:$0 sm:$0xff] }
0x18aa   : > { %8288 = vmatprep.mubr.f32.mxu1 %v7749_v59  ;;  %8363 = vmatprep.mubr.f32.mxu0 %v7751_v21  ;;  %v6978_v59 = vld [vmem:[%s12188_s9 + $0x7e0] sm:$0xff]  ;;  %v6979_v21 = vld [vmem:[%s12188_s9 + $0x7e8] sm:$0xff]  ;;  %v10360_v43 = vpack.c.bf16 %v6981_v25, %v6980_v62  ;;  %v10330_v51 = vpack.c.bf16 %v6933_v60, %v6932_v32 }
0x18ab   : > { %10307 = vmatpush3.bf16.msra.mxu1 %v10306_v22  ;;  %10339 = vmatpush3.bf16.msra.mxu0 %v10338_v28  ;;  %v6960_v22 = vld [vmem:[%s12188_s9 + $0x750] sm:$0xff]  ;;  %v6961_v28 = vld [vmem:[%s12188_s9 + $0x758] sm:$0xff]  ;;  %v10356_v53 = vpack.c.bf16 %v6979_v21, %v6978_v59 }
0x18ac   : > { %10309 = vmatprep.subr.bf16.mxu1 %v10308_v37  ;;  %10341 = vmatprep.subr.bf16.mxu0 %v10340_v45  ;;  %v10322_v37 = vpack.c.bf16 %v6929_v50, %v6928_v36  ;;  %v10354_v45 = vpack.c.bf16 %v6961_v28, %v6960_v22 }
0x18af   : > { %10311 = vmatpush3.bf16.msra.mxu1 %v10310_v42  ;;  %10343 = vmatpush3.bf16.msra.mxu0 %v10342_v27  ;;  %v6948_v42 = vld [vmem:[%s12188_s9 + $0x6f0] sm:$0xff]  ;;  %v6949_v27 = vld [vmem:[%s12188_s9 + $0x6f8] sm:$0xff] }
0x18b0   : > { %10313 = vmatprep.subr.bf16.mxu1 %v10312_v29  ;;  %10345 = vmatprep.subr.bf16.mxu0 %v10344_v6  ;;  %v7037_v29 = vrot.slane %v12432_v34, %v11442_v8  ;;  %v10326_v6 = vpack.c.bf16 %v6931_v52, %v6930_v49  ;;  %v10328_v9 = vpack.c.bf16 %v6949_v27, %v6948_v42 }
0x18b1   : > { %v7657_v34 = vadd.f32 %v12422_v56, %v12538_v7 }
0x18b2   : > { %v7655_v44 = vadd.f32 %v12413_v57, %v7037_v29 }
0x18b3   : > { %10315 = vmatpush3.bf16.msra.mxu1 %v10314_v3  ;;  %10347 = vmatpush3.bf16.msra.mxu0 %v10346_v4  ;;  %v6964_v3 = vld [vmem:[%s12188_s9 + $0x770] sm:$0xff]  ;;  %v6965_v4 = vld [vmem:[%s12188_s9 + $0x778] sm:$0xff]  ;;  %v7765_v26 = vmax.f32 %v7657_v34, 0.0 }
0x18b4   : > { %10317 = vmatprep.subr.bf16.mxu1 %v10316_v48  ;;  %10349 = vmatprep.subr.bf16.mxu0 %v10348_v2  ;;  %v10362_v12 = vpack.c.bf16 %v6965_v4, %v6964_v3  ;;  %v7649_v48 = vadd.f32 %v12395_v30, %v7037_v29  ;;  %v7726_v2 = vadd.f32 %v12397_v63, %v7045_v14  ;;  %v7767_v63 = vmax.f32 %v7734_v5, 0.0 }
0x18b5   : > { %v7732_v30 = vadd.f32 %v12415_v19, %v7045_v14  ;;  %v7764_v56 = vmax.f32 %v7655_v44, 0.0 }
0x18b6   : > { %v7748_v23 = vmax.f32 %v7649_v48, 0.0  ;;  %v7750_v13 = vmax.f32 %v7726_v2, 0.0 }
0x18b7   : > { %10319 = vmatpush3.bf16.msra.mxu1 %v10318_v55  ;;  %10351 = vmatpush3.bf16.msra.mxu0 %v10350_v24  ;;  %v7766_v7 = vmax.f32 %v7732_v30, 0.0 }
0x18b8   : > { %10321 = vmatprep.subr.bf16.mxu1 %v10320_v15  ;;  %10353 = vmatprep.subr.bf16.mxu0 %v10352_v11 }
0x18bb   : > { %10323 = vmatpush3.bf16.msra.mxu1 %v10322_v37  ;;  %10355 = vmatpush3.bf16.msra.mxu0 %v10354_v45 }
0x18bc   : > { %10325 = vmatprep.subr.bf16.mxu1 %v10324_v61  ;;  %10357 = vmatprep.subr.bf16.mxu0 %v10356_v53 }
0x18bf   : > { %10327 = vmatpush3.bf16.msra.mxu1 %v10326_v6  ;;  %10359 = vmatpush3.bf16.msra.mxu0 %v10358_v58 }
0x18c0   : > { %10329 = vmatprep.subr.bf16.mxu1 %v10328_v9  ;;  %10361 = vmatprep.subr.bf16.mxu0 %v10360_v43 }
0x18c3   : > { %10331 = vmatpush3.bf16.msra.mxu1 %v10330_v51  ;;  %10363 = vmatpush3.bf16.msra.mxu0 %v10362_v12 }
0x18c4   :  { %9847 = vmatprep.subr.msk.mxu0 (%p3496_p1), %vm206_vm1, %v8467_v39 }
0x18c6   : > { %8289 = vmatmul.mubr.f32.vlgmr.msra.gmra.mrb[62].mxu1 %v7748_v23  ;;  %8364 = vmatmul.mubr.f32.vlgmr.msra.gmra.mrb[64].mxu0 %v7750_v13 }
0x18c7   : > { %8293 = vmatprep.mubr.f32.mxu1 %v7765_v26  ;;  %8368 = vmatprep.mubr.f32.mxu0 %v7767_v63 }
0x18c8   :  { %9848 = vmatpush3.msk.msra.mxu0 (%p3496_p1), %vm206_vm1, %v8467_v39 }
0x18ca   : > { %8294 = vmatmul.mubr.f32.gmra.mrb[64].mxu1 %v7764_v56  ;;  %8369 = vmatmul.mubr.f32.gmra.mrb[66].mxu0 %v7766_v7 }
0x1937   : > { %v9312_v1 = vpop.f32.mrb[50].mxu1  ;;  %v9350_v47 = vpop.f32.mrb[52].mxu0 }
0x1938   : > { %v9313_v55 = vpop.f32.mrb[51].mxu1  ;;  %v9351_v24 = vpop.f32.mrb[53].mxu0 }
0x1939   : > { %v9314_v36 = vadd.f32 %v9313_v55, %v9312_v1  ;;  %v9352_v57 = vadd.f32 %v9351_v24, %v9350_v47 }
0x193b   : > { %v7841_v50 = vadd.f32 %v9314_v36, %v8857_v31  ;;  %v9315_v19 = vpop.f32.mrb[52].mxu1  ;;  %v9353_v15 = vpop.f32.mrb[54].mxu0 }
0x193c   : > { %v9316_v11 = vpop.f32.mrb[53].mxu1  ;;  %v9354_v22 = vpop.f32.mrb[55].mxu0 }
0x193d   : > { %v7916_v28 = vadd.f32 %v9352_v57, %v7841_v50  ;;  %v9317_v54 = vadd.f32 %v9316_v11, %v9315_v19  ;;  %v9355_v33 = vadd.f32 %v9354_v22, %v9353_v15 }
0x193f   : > { %v7846_v59 = vadd.f32 %v9317_v54, %v8857_v31 }
0x1941   : > { %v7921_v21 = vadd.f32 %v9355_v33, %v7846_v59 }
0x1957   : > { %v9388_v37 = vpop.f32.mrb[54].mxu1  ;;  %v9426_v45 = vpop.f32.mrb[56].mxu0 }
0x1958   : > { %v9389_v49 = vpop.f32.mrb[55].mxu1  ;;  %v9427_v52 = vpop.f32.mrb[57].mxu0 }
0x1959   : > { %v9390_v61 = vadd.f32 %v9389_v49, %v9388_v37  ;;  %v9428_v53 = vadd.f32 %v9427_v52, %v9426_v45 }
0x195b   : > { %v7991_v41 = vadd.f32 %v9390_v61, %v7916_v28  ;;  %v9391_v10 = vpop.f32.mrb[56].mxu1  ;;  %v9429_v42 = vpop.f32.mrb[58].mxu0 }
0x195c   : > { %v9392_v27 = vpop.f32.mrb[57].mxu1  ;;  %v9430_v62 = vpop.f32.mrb[59].mxu0 }
0x195d   : > { %v8066_v25 = vadd.f32 %v9428_v53, %v7991_v41  ;;  %v9393_v29 = vadd.f32 %v9392_v27, %v9391_v10  ;;  %v9431_v6 = vadd.f32 %v9430_v62, %v9429_v42 }
0x195f   : > { %v7996_v58 = vadd.f32 %v9393_v29, %v7921_v21 }
0x1961   : > { %v8071_v32 = vadd.f32 %v9431_v6, %v7996_v58  ;;  %v8858_v58 = vld [vmem:[%s8376_s29] ss:$0 sm:$0xff] }
0x1978   : > { %v9464_v14 = vpop.f32.mrb[58].mxu1  ;;  %v9502_v9 = vpop.f32.mrb[60].mxu0 }
0x1979   : > { %v9465_v43 = vpop.f32.mrb[59].mxu1  ;;  %v9503_v60 = vpop.f32.mrb[61].mxu0 }
0x197a   : > { %v9466_v3 = vadd.f32 %v9465_v43, %v9464_v14  ;;  %v9504_v4 = vadd.f32 %v9503_v60, %v9502_v9  ;;  %v8859_v14 = vld [vmem:[%s8378_s8] ss:$0 sm:$0xff] }
0x197c   : > { %v8141_v51 = vadd.f32 %v9466_v3, %v8066_v25  ;;  %v9467_v12 = vpop.f32.mrb[60].mxu1  ;;  %v9505_v48 = vpop.f32.mrb[62].mxu0 }
0x197d   : > { %v9468_v2 = vpop.f32.mrb[61].mxu1  ;;  %v9506_v34 = vpop.f32.mrb[63].mxu0 }
0x197e   : > { %v8216_v5 = vadd.f32 %v9504_v4, %v8141_v51  ;;  %v9469_v23 = vadd.f32 %v9468_v2, %v9467_v12  ;;  %v9507_v13 = vadd.f32 %v9506_v34, %v9505_v48 }
0x1980   : > { %v8146_v44 = vadd.f32 %v9469_v23, %v8071_v32 }
0x1982   : > { %v8221_v30 = vadd.f32 %v9507_v13, %v8146_v44 }
0x1999   : > { %v9540_v26 = vpop.f32.mrb[62].mxu1  ;;  %v9578_v63 = vpop.f32.mrb[64].mxu0 }
0x199a   : > { %v9541_v56 = vpop.f32.mrb[63].mxu1  ;;  %v9579_v7 = vpop.f32.mrb[65].mxu0 }
0x199b   : > { %v9542_v1 = vadd.f32 %v9541_v56, %v9540_v26  ;;  %v9580_v47 = vadd.f32 %v9579_v7, %v9578_v63  ;;  %v8860_v56 = vld [vmem:[%s12698_s14] ss:$0 sm:$0xff] (%p3496_p1) }
0x199d   : > { %v8291_v31 = vadd.f32 %v9542_v1, %v8216_v5  ;;  %v9543_v55 = vpop.f32.mrb[64].mxu1  ;;  %v9581_v24 = vpop.f32.mrb[66].mxu0  ;;  %v8861_v1 = vld [vmem:[%s10951_s7] ss:$0 sm:$0xff] (%p3496_p1) }
0x199e   : > { %v9544_v36 = vpop.f32.mrb[65].mxu1  ;;  %v9582_v57 = vpop.f32.mrb[67].mxu0 }
0x199f   : > { %v8366_v50 = vadd.f32 %v9580_v47, %v8291_v31  ;;  %v9545_v19 = vadd.f32 %v9544_v36, %v9543_v55  ;;  %v9583_v15 = vadd.f32 %v9582_v57, %v9581_v24 }
0x19a1   : > { %v8296_v11 = vadd.f32 %v9545_v19, %v8221_v30  ;;  %v8374_v22 = vadd.f32 %v8366_v50, %v12160_v0  ;;  %v8862_v50 = vld [vmem:[%s10961_s19] ss:$0 sm:$0xff] (%p3496_p1) }
0x19a3   : > { %v8371_v28 = vadd.f32 %v9583_v15, %v8296_v11  ;;  %v8380_v54 = vsel %vm199_vm0, %v8374_v22, 0.0 }
0x19a4   : > { %8381 = vadd.xlane.f32.xlu0 %v8380_v54 }
0x19a5   : > { %v8375_v33 = vadd.f32 %v8371_v28, %v12168_v18 }
0x19a7   : > { %v8383_v59 = vsel %vm5027_vm10, %v8375_v33, 0.0 }
0x19a8   : > { %8384 = vadd.xlane.f32.xlu1 %v8383_v59 }
0x1a31   : > { %v8382_v21 = vpop.xlane.xlu0 %8381 }
0x1a32   : > { %v8386_v37 = vmul.f32 0.25, %v8382_v21 }
0x1a34   : > { %v8388_v45 = vsub.f32 %v8374_v22, %v8386_v37 }
0x1a35   : > { %v8385_v49 = vpop.xlane.xlu1 %8384 }
0x1a36   : > { %v8387_v52 = vmul.f32 0.25, %v8385_v49  ;;  %v8390_v61 = vmul.f32 %v8388_v45, %v8388_v45 }
0x1a38   : > { %v8389_v0 = vsub.f32 %v8375_v33, %v8387_v52  ;;  %v8392_v53 = vsel %vm199_vm0, %v8390_v61, 0.0 }
0x1a39   : > { %8393 = vadd.xlane.f32.xlu0 %v8392_v53 }
0x1a3a   : > { %v8391_v41 = vmul.f32 %v8389_v0, %v8389_v0 }
0x1a3c   : > { %v8395_v18 = vsel %vm5027_vm10, %v8391_v41, 0.0 }
0x1a3d   : > { %8396 = vadd.xlane.f32.xlu1 %v8395_v18 }
0x1ac6   : > { %v8394_v10 = vpop.xlane.xlu0 %8393 }
0x1ac7   : > { %v8398_v42 = vmul.f32 0.25, %v8394_v10 }
0x1ac9   : > { %v8400_v27 = vadd.f32 1e-05, %v8398_v42 }
0x1aca   : > { %v8397_v62 = vpop.xlane.xlu1 %8396 }
0x1acb   : > { %10618 = vrsqrt.f32 %v8400_v27  ;;  %v8399_v25 = vmul.f32 0.25, %v8397_v62 }
0x1acd   : > { %v8401_v29 = vadd.f32 1e-05, %v8399_v25 }
0x1acf   : > { %10620 = vrsqrt.f32 %v8401_v29 }
0x1ad5   : > { %v10619_v6 = vpop.eup %10618 }
0x1ad6   : > { %v8404_v32 = vmul.f32 %v10619_v6, %v8388_v45 }
0x1ad8   : > { %v8412_v9 = vmul.f32 %v8858_v58, %v8404_v32 }
0x1ad9   : > { %v10621_v43 = vpop.eup %10620 }
0x1ada   : > { %v8420_v60 = vadd.f32 %v8859_v14, %v8412_v9   ;;  %v8405_v3 = vmul.f32 %v10621_v43, %v8389_v0  ;;  %3498 = sbr.rel (!%p3496_p1) target bundleno = 2825 (0xb09), region = 287 }
0x1adc   : > { %v8413_v4 = vmul.f32 %v8858_v58, %v8405_v3  ;;  %v12697_v2 = vmov %v8420_v60  ;;  %v8424_v12 = vsel (%p3496_p1), %vm199_vm0, %v8420_v60, 0.0 }
0x1add   :  { %8425 = vadd.xlane.f32.xlu0 (%p3496_p1), %v8424_v12 }
0x1ade   : > { %v8421_v51 = vadd.f32 %v8859_v14, %v8413_v4  }
0x1ae0   : > { %v12696_v3 = vmov %v8421_v51  ;;  %v8428_v48 = vsel (%p3496_p1), %vm5027_vm10, %v8421_v51, 0.0 }
0x1ae1   :  { %8429 = vadd.xlane.f32.xlu0 %v8428_v48 }
0x1b6a   :  { %v8426_v2 = vpop.xlane.xlu0 %8425 }
0x1b6b   :  { %v8431_v34 = vmul.f32 0.25, %v8426_v2 }
0x1b6d   :  { %v8433_v5 = vsub.f32 %v8420_v60, %v8431_v34 }
0x1b6e   :  { %v8430_v23 = vpop.xlane.xlu0 %8429 }
0x1b6f   :  { %v8432_v13 = vmul.f32 0.25, %v8430_v23  ;;  %v8435_v44 = vmul.f32 %v8433_v5, %v8433_v5 }
0x1b71   :  { %v8434_v30 = vsub.f32 %v8421_v51, %v8432_v13  ;;  %v8437_v26 = vsel %vm199_vm0, %v8435_v44, 0.0 }
0x1b72   :  { %8438 = vadd.xlane.f32.xlu1 %v8437_v26 }
0x1b73   :  { %v8436_v63 = vmul.f32 %v8434_v30, %v8434_v30 }
0x1b75   :  { %v8440_v38 = vsel %vm5027_vm10, %v8436_v63, 0.0 }
0x1b76   :  { %8441 = vadd.xlane.f32.xlu1 %v8440_v38 }
0x1bff   :  { %v8439_v40 = vpop.xlane.xlu1 %8438 }
0x1c00   :  { %v8443_v46 = vmul.f32 0.25, %v8439_v40 }
0x1c02   :  { %v8445_v16 = vadd.f32 1e-05, %v8443_v46 }
0x1c03   :  { %v8442_v17 = vpop.xlane.xlu1 %8441 }
0x1c04   :  { %10622 = vrsqrt.f32 %v8445_v16  ;;  %v8444_v8 = vmul.f32 0.25, %v8442_v17 }
0x1c06   :  { %v8446_v20 = vadd.f32 1e-05, %v8444_v8 }
0x1c08   :  { %10624 = vrsqrt.f32 %v8446_v20 }
0x1c0e   :  { %v10623_v35 = vpop.eup %10622 }
0x1c0f   :  { %v8449_v7 = vmul.f32 %v10623_v35, %v8433_v5 }
0x1c11   :  { %v8457_v47 = vmul.f32 %v8860_v56, %v8449_v7 }
0x1c12   :  { %v10625_v31 = vpop.eup %10624 }
0x1c13   :  { %v8450_v55 = vmul.f32 %v10625_v31, %v8434_v30  ;;  %v8465_v24 = vadd.f32 %v8861_v1, %v8457_v47 }
0x1c15   :  { %v8458_v36 = vmul.f32 %v8860_v56, %v8450_v55  ;;  %9849 = vmatprep.mubr.msk.f32.mxu0 %vm199_vm0, %v8465_v24 }
0x1c17   :  { %v8466_v57 = vadd.f32 %v8861_v1, %v8458_v36 }
0x1c19   :  { %9850 = vmatmul.mubr.msk.f32.vlgmr.msra.gmra.mrb[0].mxu0 %vm199_vm0, %v8466_v57 }
0x1cec   :  { %v9851_v19 = vpop.f32.mrb[0].mxu0 }
0x1ced   :  { %v8557_v15 = vadd.f32 %v9851_v19, %v8862_v50  ;;  %v8551_v11 = vpop.f32.mrb[1].mxu0 }
0x1cee   :  { %v8552_v22 = vadd.f32 %v8862_v50, %v8551_v11 }
0x1cef   :  { %8561 = vst [vmem:[%s10966_s28 + $0x8] sm:$0xf] %v8557_v15 }
0x1cf0   :  { %8560 = vst [vmem:[%s10966_s28] sm:$0xff] %v8552_v22 }

</bundles_post_ra>
